<compile_context>
chip_gen: v6e
topology: v6e:2x2x1
jax: 0.10.0
libtpu: 0.0.40
codegen_flags: <defaults>
</compile_context>

<pallas_src>
from itertools import combinations

import numpy as np
import jax
import jax.numpy as jnp
from jax.experimental import pallas as pl
from jax.experimental.pallas import tpu as pltpu

LANES = 128        # node axis and feature axis both fit in one vreg lane width
MAX_TILE_B = 256   # batch rows fed to the MXU per grid step (fills 256-wide MXU)


# ----------------------- hierarchy utilities (host-side glue) -----------------------

def get_dim(hierar):
    if len(hierar) > 1:
        return min(k for k in hierar if k > 0)
    return len(hierar[-1])


def get_height(hierarchy, node=-1, heights=None):
    if heights is None:
        heights = {}
    if node not in hierarchy:
        heights[node] = 0
    else:
        for c in hierarchy[node]:
            get_height(hierarchy, c, heights)
        heights[node] = max(heights[c] for c in hierarchy[node]) + 1
    return heights


# ------------------------------- Pallas kernel ---------------------------------------

def make_hci_kernel(num_levels):
    """Single-invocation kernel: evaluates all tree levels, state stays in vregs."""

    def kernel(x_ref, ab_ref, m_ref, w_ref, o_ref):
        v = x_ref[...]                                   # (TILE_B, 128) batched node state
        for h in range(num_levels):                      # static unroll (L is small)
            # Fused one-hot gather of both pair operands: one 256-lane MXU pass.
            # HIGHEST precision keeps the one-hot gather exact in f32.
            ab = jnp.dot(v, ab_ref[h],
                         precision=jax.lax.Precision.HIGHEST,
                         preferred_element_type=jnp.float32)         # (TILE_B, 256)
            a = ab[:, :LANES]
            b = ab[:, LANES:]
            m = m_ref[h]                                 # (2, 128): rows [2m-1, 1-m]
            m_min = m[0:1, :]                            # coeff on min(a, b)
            m_sum = m[1:2, :]                            # coeff on (a + b)
            mn = jnp.minimum(a, b)
            # m*min + (1-m)*max == (2m-1)*min + (1-m)*(a+b), coeffs precomputed on host
            feats = m_min * mn + m_sum * (a + b)
            # Scatter weighted features back into node lanes; accumulate form lets
            # v7x use in-place MRB accumulation on this serial dependency chain.
            v = v + jnp.dot(feats, w_ref[h],
                            precision=jax.lax.Precision.HIGHEST,
                            preferred_element_type=jnp.float32)
        o_ref[...] = v

    return kernel


# ------------------------------- wrapper ----------------------------------------------

class HCI2AddPallas:
    """JAX/Pallas re-implementation of neurhci HCI_2_add.forward."""

    def __init__(self, hierarchy, key):
        self.hierarchy = hierarchy
        self.dim = get_dim(hierarchy)
        self.n_nodes = self.dim + len(hierarchy)
        if self.n_nodes > LANES:
            raise ValueError(f"n_nodes={self.n_nodes} exceeds the {LANES}-lane node tile")
        heights = get_height(hierarchy)
        self.height_map = {}
        for k, v in heights.items():
            self.height_map.setdefault(v, []).append(k)
        self.height = max(self.height_map)

        # Deterministic per-aggregator weights: one nonnegative weight per feature
        #   [x_c]_c  +  [min(x_i,x_j)]_{i<j}  +  [max(x_i,x_j)]_{i<j}
        # normalized to sum to 1 (the effect of CI.normalize()).
        # TODO(synk): Choquet_2_add_ATTENTION source is not provided in the module;
        # this uses the standard normalized 2-additive Choquet parametrization.
        self.weights = {}
        for ag, children in hierarchy.items():
            c = len(children)
            n_feats = c + c * (c - 1)
            key, sub = jax.random.split(key)
            w = jax.random.uniform(sub, (n_feats,), jnp.float32, 0.05, 1.0)
            self.weights[ag] = np.asarray(w / jnp.sum(w), np.float32)

        self._build_level_tensors()
        self._kernel = make_hci_kernel(self.height)
        self._run = jax.jit(self._run_impl)   # trace/compile once per input shape

    def _node_index(self, node):
        return self.n_nodes - 1 if node == -1 else node

    def _node_features(self, children):
        feats = [(c, c, 1.0) for c in children]                           # singletons (min(x,x)=x)
        feats += [(ci, cj, 1.0) for ci, cj in combinations(children, 2)]  # min pairs
        feats += [(ci, cj, 0.0) for ci, cj in combinations(children, 2)]  # max pairs
        return feats

    def _build_level_tensors(self):
        L = self.height
        AB = np.zeros((L, LANES, 2 * LANES), np.float32)   # fused [A | B] gather matrices
        M = np.zeros((L, 2, LANES), np.float32)            # rows: [2m-1, 1-m] per level
        W = np.zeros((L, LANES, LANES), np.float32)        # feature -> node scatter weights
        for h in range(1, L + 1):
            n_level_feats = sum(
                len(self._node_features(self.hierarchy[ag])) for ag in self.height_map[h])
            if n_level_feats > LANES:
                raise ValueError(
                    f"level {h} has {n_level_feats} features; exceeds {LANES}-lane feature tile")
            slot = 0
            for ag in self.height_map[h]:
                children = self.hierarchy[ag]
                w = self.weights[ag]
                ag_idx = self._node_index(ag)
                feats = self._node_features(children)
                assert len(feats) == len(w)
                for k, (ci, cj, is_min) in enumerate(feats):
                    AB[h - 1, self._node_index(ci), slot] = 1.0
                    AB[h - 1, self._node_index(cj), LANES + slot] = 1.0
                    M[h - 1, 0, slot] = 2.0 * is_min - 1.0   # coeff on min(a,b)
                    M[h - 1, 1, slot] = 1.0 - is_min         # coeff on (a+b)
                    W[h - 1, slot, ag_idx] = w[k]
                    slot += 1
        self.AB, self.M, self.W = map(jnp.asarray, (AB, M, W))

    def _run_impl(self, xb):
        B = xb.shape[0]
        # Pad batch up to a multiple of 8 sublanes; tile at MAX_TILE_B rows per grid step.
        Bp = max(8, ((B + 7) // 8) * 8)
        if Bp > MAX_TILE_B:
            tile_b = MAX_TILE_B
            Bp = ((Bp + MAX_TILE_B - 1) // MAX_TILE_B) * MAX_TILE_B
        else:
            tile_b = Bp
        x_pad = jnp.zeros((Bp, LANES), jnp.float32).at[:B, : self.dim].set(xb)

        L = self.height
        const3 = lambda b: (0, 0, 0)   # same block every step -> stays VMEM-resident
        v = pl.pallas_call(
            self._kernel,
            out_shape=jax.ShapeDtypeStruct((Bp, LANES), jnp.float32),
            grid=(Bp // tile_b,),
            in_specs=[
                pl.BlockSpec((tile_b, LANES), lambda b: (b, 0)),
                pl.BlockSpec((L, LANES, 2 * LANES), const3),
                pl.BlockSpec((L, 2, LANES), const3),
                pl.BlockSpec((L, LANES, LANES), const3),
            ],
            out_specs=pl.BlockSpec((tile_b, LANES), lambda b: (b, 0)),
            compiler_params=pltpu.CompilerParams(
                dimension_semantics=("parallel",)),   # batch tiles shard across v7x's 2 TCs
        )(x_pad, self.AB, self.M, self.W)
        return v[:B, self.n_nodes - 1]

    def forward_batch(self, xb):
        """Evaluate a batch of independent inputs (any batch size) in one jitted call."""
        return self._run(jnp.asarray(xb, jnp.float32))

    def forward(self, x):
        # Mirrors the PyTorch module: single input -> root node value, shape (1,).
        return self.forward_batch(jnp.asarray(x, jnp.float32)[None, :])[0].reshape((1,))

    # Pure-numpy reference mirroring the sequential PyTorch forward.
    def reference(self, x):
        vals = np.zeros(self.n_nodes, np.float64)
        vals[: self.dim] = np.asarray(x, np.float64)
        for h in range(1, self.height + 1):
            for ag in self.height_map[h]:
                cv = [vals[self._node_index(c)] for c in self.hierarchy[ag]]
                feats = list(cv)
                feats += [min(a, b) for a, b in combinations(cv, 2)]
                feats += [max(a, b) for a, b in combinations(cv, 2)]
                vals[self._node_index(ag)] = float(
                    np.dot(self.weights[ag].astype(np.float64), feats))
        return np.array([vals[self.n_nodes - 1]])


if __name__ == "__main__":
    # 8 leaves, three intermediate aggregators, root -1 (height 2, 12 nodes).
    hierarchy = {8: [0, 1, 2], 9: [3, 4], 10: [5, 6, 7], -1: [8, 9, 10]}

    key = jax.random.PRNGKey(0)
    key, wkey, xkey = jax.random.split(key, 3)
    model = HCI2AddPallas(hierarchy, wkey)

    batch = 300                                             # > MAX_TILE_B: exercises the batch grid
    xb = jax.random.uniform(xkey, (batch, model.dim), jnp.float32)   # leaf utilities in [0,1)

    out_b = jax.block_until_ready(model.forward_batch(xb))
    xb_np = np.asarray(xb)
    ref_b = np.stack([model.reference(xb_np[i]) for i in range(batch)])[:, 0]
    np.testing.assert_allclose(np.asarray(out_b, np.float64), ref_b, rtol=1e-5, atol=1e-5)

    # Single-input path matching the PyTorch forward() signature (shape (1,)).
    out1 = jax.block_until_ready(model.forward(xb[0]))
    np.testing.assert_allclose(np.asarray(out1, np.float64), model.reference(xb_np[0]),
                               rtol=1e-5, atol=1e-5)

    print("KERNEL_OK")
</pallas_src>

<mosaic_0001>
module attributes {stable_mosaic.version = 11 : i64} {
  func.func @kernel(%arg0: i32, %arg1: memref<256x128xf32, #tpu.memory_space<vmem>>, %arg2: memref<2x128x256xf32, #tpu.memory_space<vmem>>, %arg3: memref<2x2x128xf32, #tpu.memory_space<vmem>>, %arg4: memref<2x128x128xf32, #tpu.memory_space<vmem>>, %arg5: memref<256x128xf32, #tpu.memory_space<vmem>>) attributes {dimension_semantics = [#tpu.dimension_semantics<parallel>], iteration_bounds = array<i64: 2>, scalar_prefetch = 0 : i64, scratch_operands = 0 : i64, tpu.core_type = #tpu.core_type<tc>, window_params = [{transform_indices = @transform_0, window_bounds = array<i64: 256, 128>}, {pipeline_mode = #tpu.pipeline_mode<synchronous>, transform_indices = @transform_1, window_bounds = array<i64: 2, 128, 256>}, {pipeline_mode = #tpu.pipeline_mode<synchronous>, transform_indices = @transform_2, window_bounds = array<i64: 2, 2, 128>}, {pipeline_mode = #tpu.pipeline_mode<synchronous>, transform_indices = @transform_3, window_bounds = array<i64: 2, 128, 128>}, {transform_indices = @transform_4, window_bounds = array<i64: 256, 128>}]} {
    %c0 = arith.constant 0 : index
    %c0_0 = arith.constant 0 : index
    %0 = vector.load %arg1[%c0, %c0_0] : memref<256x128xf32, #tpu.memory_space<vmem>>, vector<256x128xf32>
    %c0_1 = arith.constant 0 : index
    %c0_2 = arith.constant 0 : index
    %c0_3 = arith.constant 0 : index
    %1 = vector.load %arg2[%c0_1, %c0_2, %c0_3] : memref<2x128x256xf32, #tpu.memory_space<vmem>>, vector<1x128x256xf32>
    %2 = vector.shape_cast %1 : vector<1x128x256xf32> to vector<128x256xf32>
    %cst = arith.constant dense<0.000000e+00> : vector<256x256xf32>
    %3 = tpu.matmul %0, %2, %cst {dimension_numbers = #tpu.dot_dimension_numbers<[1], [0], [0], [1], [0, 0, 1, 1], [], []>, precision = #tpu.contract_precision<fp32>} : vector<256x128xf32>, vector<128x256xf32>, vector<256x256xf32> -> vector<256x256xf32>
    %4 = vector.extract_strided_slice %3 {offsets = [0, 0], sizes = [256, 128], strides = [1, 1]} : vector<256x256xf32> to vector<256x128xf32>
    %5 = vector.extract_strided_slice %3 {offsets = [0, 128], sizes = [256, 128], strides = [1, 1]} : vector<256x256xf32> to vector<256x128xf32>
    %c0_4 = arith.constant 0 : index
    %c0_5 = arith.constant 0 : index
    %c0_6 = arith.constant 0 : index
    %6 = vector.load %arg3[%c0_4, %c0_5, %c0_6] : memref<2x2x128xf32, #tpu.memory_space<vmem>>, vector<1x2x128xf32>
    %7 = vector.shape_cast %6 : vector<1x2x128xf32> to vector<2x128xf32>
    %8 = vector.extract_strided_slice %7 {offsets = [0, 0], sizes = [1, 128], strides = [1, 1]} : vector<2x128xf32> to vector<1x128xf32>
    %9 = vector.extract_strided_slice %7 {offsets = [1, 0], sizes = [1, 128], strides = [1, 1]} : vector<2x128xf32> to vector<1x128xf32>
    %10 = arith.minimumf %4, %5 : vector<256x128xf32>
    %11 = vector.broadcast %8 : vector<1x128xf32> to vector<256x128xf32>
    %12 = arith.mulf %11, %10 : vector<256x128xf32>
    %13 = arith.addf %4, %5 : vector<256x128xf32>
    %14 = vector.broadcast %9 : vector<1x128xf32> to vector<256x128xf32>
    %15 = arith.mulf %14, %13 : vector<256x128xf32>
    %16 = arith.addf %12, %15 : vector<256x128xf32>
    %c0_7 = arith.constant 0 : index
    %c0_8 = arith.constant 0 : index
    %c0_9 = arith.constant 0 : index
    %17 = vector.load %arg4[%c0_7, %c0_8, %c0_9] : memref<2x128x128xf32, #tpu.memory_space<vmem>>, vector<1x128x128xf32>
    %18 = vector.shape_cast %17 : vector<1x128x128xf32> to vector<128x128xf32>
    %cst_10 = arith.constant dense<0.000000e+00> : vector<256x128xf32>
    %19 = tpu.matmul %16, %18, %cst_10 {dimension_numbers = #tpu.dot_dimension_numbers<[1], [0], [0], [1], [0, 0, 1, 1], [], []>, precision = #tpu.contract_precision<fp32>} : vector<256x128xf32>, vector<128x128xf32>, vector<256x128xf32> -> vector<256x128xf32>
    %20 = arith.addf %0, %19 : vector<256x128xf32>
    %c1 = arith.constant 1 : index
    %c0_11 = arith.constant 0 : index
    %c0_12 = arith.constant 0 : index
    %21 = vector.load %arg2[%c1, %c0_11, %c0_12] : memref<2x128x256xf32, #tpu.memory_space<vmem>>, vector<1x128x256xf32>
    %22 = vector.shape_cast %21 : vector<1x128x256xf32> to vector<128x256xf32>
    %cst_13 = arith.constant dense<0.000000e+00> : vector<256x256xf32>
    %23 = tpu.matmul %20, %22, %cst_13 {dimension_numbers = #tpu.dot_dimension_numbers<[1], [0], [0], [1], [0, 0, 1, 1], [], []>, precision = #tpu.contract_precision<fp32>} : vector<256x128xf32>, vector<128x256xf32>, vector<256x256xf32> -> vector<256x256xf32>
    %24 = vector.extract_strided_slice %23 {offsets = [0, 0], sizes = [256, 128], strides = [1, 1]} : vector<256x256xf32> to vector<256x128xf32>
    %25 = vector.extract_strided_slice %23 {offsets = [0, 128], sizes = [256, 128], strides = [1, 1]} : vector<256x256xf32> to vector<256x128xf32>
    %c1_14 = arith.constant 1 : index
    %c0_15 = arith.constant 0 : index
    %c0_16 = arith.constant 0 : index
    %26 = vector.load %arg3[%c1_14, %c0_15, %c0_16] : memref<2x2x128xf32, #tpu.memory_space<vmem>>, vector<1x2x128xf32>
    %27 = vector.shape_cast %26 : vector<1x2x128xf32> to vector<2x128xf32>
    %28 = vector.extract_strided_slice %27 {offsets = [0, 0], sizes = [1, 128], strides = [1, 1]} : vector<2x128xf32> to vector<1x128xf32>
    %29 = vector.extract_strided_slice %27 {offsets = [1, 0], sizes = [1, 128], strides = [1, 1]} : vector<2x128xf32> to vector<1x128xf32>
    %30 = arith.minimumf %24, %25 : vector<256x128xf32>
    %31 = vector.broadcast %28 : vector<1x128xf32> to vector<256x128xf32>
    %32 = arith.mulf %31, %30 : vector<256x128xf32>
    %33 = arith.addf %24, %25 : vector<256x128xf32>
    %34 = vector.broadcast %29 : vector<1x128xf32> to vector<256x128xf32>
    %35 = arith.mulf %34, %33 : vector<256x128xf32>
    %36 = arith.addf %32, %35 : vector<256x128xf32>
    %c1_17 = arith.constant 1 : index
    %c0_18 = arith.constant 0 : index
    %c0_19 = arith.constant 0 : index
    %37 = vector.load %arg4[%c1_17, %c0_18, %c0_19] : memref<2x128x128xf32, #tpu.memory_space<vmem>>, vector<1x128x128xf32>
    %38 = vector.shape_cast %37 : vector<1x128x128xf32> to vector<128x128xf32>
    %cst_20 = arith.constant dense<0.000000e+00> : vector<256x128xf32>
    %39 = tpu.matmul %36, %38, %cst_20 {dimension_numbers = #tpu.dot_dimension_numbers<[1], [0], [0], [1], [0, 0, 1, 1], [], []>, precision = #tpu.contract_precision<fp32>} : vector<256x128xf32>, vector<128x128xf32>, vector<256x128xf32> -> vector<256x128xf32>
    %40 = arith.addf %20, %39 : vector<256x128xf32>
    %c0_21 = arith.constant 0 : index
    %c0_22 = arith.constant 0 : index
    %41 = vector.load %arg5[%c0_21, %c0_22] : memref<256x128xf32, #tpu.memory_space<vmem>>, vector<256x128xf32>
    tpu.vector_store %arg5[%c0_21, %c0_22], %40 {strides = array<i32>} : memref<256x128xf32, #tpu.memory_space<vmem>>, vector<256x128xf32>,
    return
  }
  func.func @transform_0(%arg0: i32) -> (i32, i32) {
    %c0_i32 = arith.constant 0 : i32
    %c0_i32_0 = arith.constant 0 : i32
    return %arg0, %c0_i32 : i32, i32
  }
  func.func @transform_1(%arg0: i32) -> (i32, i32, i32) {
    %c0_i32 = arith.constant 0 : i32
    %c0_i32_0 = arith.constant 0 : i32
    %c0_i32_1 = arith.constant 0 : i32
    %c0_i32_2 = arith.constant 0 : i32
    return %c0_i32, %c0_i32_0, %c0_i32_1 : i32, i32, i32
  }
  func.func @transform_2(%arg0: i32) -> (i32, i32, i32) {
    %c0_i32 = arith.constant 0 : i32
    %c0_i32_0 = arith.constant 0 : i32
    %c0_i32_1 = arith.constant 0 : i32
    %c0_i32_2 = arith.constant 0 : i32
    return %c0_i32, %c0_i32_0, %c0_i32_1 : i32, i32, i32
  }
  func.func @transform_3(%arg0: i32) -> (i32, i32, i32) {
    %c0_i32 = arith.constant 0 : i32
    %c0_i32_0 = arith.constant 0 : i32
    %c0_i32_1 = arith.constant 0 : i32
    %c0_i32_2 = arith.constant 0 : i32
    return %c0_i32, %c0_i32_0, %c0_i32_1 : i32, i32, i32
  }
  func.func @transform_4(%arg0: i32) -> (i32, i32) {
    %c0_i32 = arith.constant 0 : i32
    %c0_i32_0 = arith.constant 0 : i32
    return %arg0, %c0_i32 : i32, i32
  }
}

</mosaic_0001>

<bundles_post_ra>
// kernel: _run_impl.1
= control target key start
LH: loop header
LB: loop body
LE: loop exit
PB: predicated region body
PF: predicated region fallthrough
CT: control target
= control target key end

     0   :  { %s11189_s15 = smov 0   ;;  %s17633_s0 = inlined_call_operand.vmem [shape: f32[512,128], index: 0, kind: input, shape index: {}]   ;;  %s17634_s1 = inlined_call_operand.vmem [shape: f32[2,128,256], index: 1, kind: input, shape index: {}]   ;;  %s17635_s2 = inlined_call_operand.vmem [shape: f32[2,2,128], index: 2, kind: input, shape index: {}]   ;;  %s17636_s3 = inlined_call_operand.vmem [shape: f32[2,128,128], index: 3, kind: input, shape index: {}]   ;;  %s17637_s4 = inlined_call_operand.vmem [shape: f32[512,128], index: 4, kind: output, shape index: {}]  }
   0x1 LB: > { %s9518_s16 = sadd.s32 4294967295, %s11161_s15   ;;  %p9522_p0 = scmp.ge.s32.totalorder %s11161_s15, 1  ;;  %s11161_s15 = sphi %s11189_s15, %s14_s15  }
   0x2   : > { %p163_p1 = scmp.lt.s32.totalorder %s11161_s15, 3 }
   0x4   : > { %p164_p2 = pnand %p9522_p0, %p163_p1 }
   0x6   : > { %167 = sbr.rel (%p164_p2) target bundleno = 1867 (0x74b), region = 36 }
   0xb   : > { %v264_v0 = vld [vmem:[%s17634_s1 + $0xf8] sm:$0xff]  ;;  %v263_v1 = vld [vmem:[%s17634_s1 + $0xf0] sm:$0xff]  ;;  %v262_v2 = vld [vmem:[%s17634_s1 + $0xe8] sm:$0xff]  ;;  %v17652_v9 = vmov 0.0   ;;  %s11386_s7 = sshll.u32 %s9518_s16, 5 }
   0xc   : > { %v11206_v3 = vand.u32 4294901760, %v264_v0  ;;  %v11208_v4 = vand.u32 4294901760, %v263_v1  ;;  %v11210_v5 = vand.u32 4294901760, %v262_v2  ;;  %v261_v6 = vld [vmem:[%s17634_s1 + $0xe0] sm:$0xff]  ;;  %v260_v7 = vld [vmem:[%s17634_s1 + $0xd8] sm:$0xff]  ;;  %v259_v8 = vld [vmem:[%s17634_s1 + $0xd0] sm:$0xff]  ;;  %361 = vmatprep.mubr.f32.mxu0 %v17652_v9  ;;  %938 = vmatprep.mubr.f32.mxu1 %v17652_v9 }
   0xd   : > { %v11223_v10 = vand.u32 4294901760, %v261_v6  ;;  %v11225_v11 = vand.u32 4294901760, %v260_v7  ;;  %v11227_v12 = vand.u32 4294901760, %v259_v8  ;;  %v258_v13 = vld [vmem:[%s17634_s1 + $0xc8] sm:$0xff]  ;;  %v257_v14 = vld [vmem:[%s17634_s1 + $0xc0] sm:$0xff]  ;;  %v11238_v15 = vld [vmem:[%s17634_s1 + $0xb8] sm:$0xff] }
   0xe   : > { %266 = vmatprep.subr.mxu0 %v11206_v3  ;;  %v11241_v16 = vand.u32 4294901760, %v258_v13  ;;  %v11243_v17 = vand.u32 4294901760, %v257_v14  ;;  %v11246_v18 = vand.u32 4294901760, %v11238_v15  ;;  %v11249_v19 = vsub.f32 %v264_v0, %v11206_v3  ;;  %v11254_v20 = vld [vmem:[%s17634_s1 + $0xb0] sm:$0xff]  ;;  %v11259_v21 = vld [vmem:[%s17634_s1 + $0xa8] sm:$0xff]  ;;  %v11264_v22 = vld [vmem:[%s17634_s1 + $0xa0] sm:$0xff] }
   0xf   : > { %268 = vmatpush1.msra.mxu0 %v11208_v4  ;;  %v11268_v23 = vand.u32 4294901760, %v11254_v20  ;;  %v11271_v24 = vsub.f32 %v263_v1, %v11208_v4  ;;  %v11274_v25 = vand.u32 4294901760, %v11259_v21  ;;  %v11277_v26 = vsub.f32 %v262_v2, %v11210_v5  ;;  %v11282_v27 = vld [vmem:[%s17634_s1 + $0x98] sm:$0xff]  ;;  %v11287_v28 = vld [vmem:[%s17634_s1 + $0x90] sm:$0xff]  ;;  %v11292_v29 = vld [vmem:[%s17634_s1 + $0x88] sm:$0xff]  ;;  %p190_p3 = scmp.lt.s32.totalorder %s11386_s7, 63 }
  0x10   : > { %18458 = vst [vmem:[#allocation2_spill] sm:$0xff] %v11249_v19  ;;  %270 = vmatprep.subr.mxu0 %v11210_v5  ;;  %v17651_v30 = vand.u32 4294901760, %v11249_v19  ;;  %v11297_v31 = vand.u32 4294901760, %v11264_v22  ;;  %v11300_v32 = vsub.f32 %v261_v6, %v11223_v10  ;;  %v11303_v33 = vand.u32 4294901760, %v11282_v27  ;;  %v11317_v38 = vld [vmem:[%s17634_s1 + $0x80] sm:$0xff]  ;;  %v11344_v47 = vld [vmem:[%s17634_s1 + $0x78] sm:$0xff] }
  0x11   : > { %272 = vmatpush1.msra.mxu0 %v11223_v10  ;;  %v17649_v34 = vand.u32 4294901760, %v11271_v24  ;;  %v17648_v35 = vand.u32 4294901760, %v11277_v26  ;;  %v11309_v36 = vsub.f32 %v260_v7, %v11225_v11  ;;  %v11312_v37 = vand.u32 4294901760, %v11287_v28  ;;  %v11357_v52 = vld [vmem:[%s17634_s1 + $0x70] sm:$0xff]  ;;  %v11367_v57 = vld [vmem:[%s17634_s1 + $0x68] sm:$0xff]  ;;  %v11382_v62 = vld [vmem:[%s17634_s1 + $0x60] sm:$0xff] }
  0x12   : > { %18459 = vst [vmem:[#allocation3_spill] sm:$0xff] %v11303_v33  ;;  %274 = vmatprep.subr.mxu0 %v11225_v11  ;;  %v717_v39 = vsub.f32 %v11249_v19, %v17651_v30  ;;  %v17646_v40 = vand.u32 4294901760, %v11300_v32  ;;  %v11325_v41 = vsub.f32 %v259_v8, %v11227_v12  ;;  %v11328_v42 = vand.u32 4294901760, %v11292_v29  ;;  %v11402_v6 = vld [vmem:[%s17634_s1 + $0x58] sm:$0xff]  ;;  %s19977_s7 = smov (!%p190_p3, %s11386_s7), 63 }
  0x13   : > { %18460 = vst [vmem:[#allocation4_spill] sm:$0xff] %v11312_v37  ;;  %276 = vmatpush1.msra.mxu0 %v11227_v12  ;;  %v723_v43 = vsub.f32 %v11271_v24, %v17649_v34  ;;  %v729_v44 = vsub.f32 %v11277_v26, %v17648_v35  ;;  %v17644_v45 = vand.u32 4294901760, %v11309_v36  ;;  %v11339_v46 = vsub.f32 %v258_v13, %v11241_v16  ;;  %v11544_v30 = vld [vmem:[%s17634_s1 + $0x18] sm:$0xff]  ;;  %s9524_s27 = sshll.u32 %s19977_s7, 3 }
  0x14   : > { %18461 = vst [vmem:[#allocation5_spill] sm:$0xff] %v11328_v42  ;;  %278 = vmatprep.subr.mxu0 %v11241_v16  ;;  %v718_v48 = vand.u32 4294901760, %v717_v39  ;;  %v735_v49 = vsub.f32 %v11300_v32, %v17646_v40  ;;  %v17643_v50 = vand.u32 4294901760, %v11325_v41  ;;  %v11352_v51 = vand.u32 4294901760, %v11317_v38  ;;  %v11517_v40 = vld [vmem:[%s17634_s1 + $0x28] sm:$0xff]  ;;  %s11594_s9 = scalar_lea.vmem %s17633_s0, %s9524_s27  ;;  %s17483_s11 = scalar_lea.vmem %s17637_s4, %s9524_s27 }
  0x15   : > { %280 = vmatpush1.msra.mxu0 %v11243_v17  ;;  %v724_v53 = vand.u32 4294901760, %v723_v43  ;;  %v730_v54 = vand.u32 4294901760, %v729_v44  ;;  %v741_v55 = vsub.f32 %v11309_v36, %v17644_v45  ;;  %v17642_v56 = vand.u32 4294901760, %v11339_v46  ;;  %v11501_v45 = vld [vmem:[%s17634_s1 + $0x30] sm:$0xff] }
  0x16   : > { %18462 = vst [vmem:[#allocation6_spill] sm:$0xff] %v11352_v51  ;;  %282 = vmatprep.subr.mxu0 %v11246_v18  ;;  %719 = vmatprep.subr.mxu1 %v718_v48  ;;  %v736_v58 = vand.u32 4294901760, %v735_v49  ;;  %v747_v59 = vsub.f32 %v11325_v41, %v17643_v50  ;;  %v11374_v60 = vsub.f32 %v257_v14, %v11243_v17  ;;  %v11377_v61 = vand.u32 4294901760, %v11344_v47 }
  0x17   : > { %284 = vmatpush1.msra.mxu0 %v11268_v23  ;;  %725 = vmatpush1.msra.mxu1 %v724_v53  ;;  %v742_v63 = vand.u32 4294901760, %v741_v55  ;;  %v753_v0 = vsub.f32 %v11339_v46, %v17642_v56  ;;  %v11394_v1 = vsub.f32 %v11238_v15, %v11246_v18  ;;  %v11397_v2 = vand.u32 4294901760, %v11357_v52  ;;  %v11416_v15 = vld [vmem:[%s17634_s1 + $0x50] sm:$0xff] }
  0x18   : > { %18463 = vst [vmem:[#allocation7_spill] sm:$0xff] %v11377_v61  ;;  %286 = vmatprep.subr.mxu0 %v11274_v25  ;;  %731 = vmatprep.subr.mxu1 %v730_v54  ;;  %v748_v7 = vand.u32 4294901760, %v747_v59  ;;  %v17639_v8 = vand.u32 4294901760, %v11374_v60  ;;  %v11408_v13 = vsub.f32 %v11254_v20, %v11268_v23  ;;  %v11411_v14 = vand.u32 4294901760, %v11367_v57  ;;  %v11443_v54 = vld [vmem:[%s17634_s1 + $0x48] sm:$0xff] }
  0x19   : > { %18464 = vst [vmem:[#allocation8_spill] sm:$0xff] %v11397_v2  ;;  %288 = vmatpush1.msra.mxu0 %v11297_v31  ;;  %737 = vmatpush1.msra.mxu1 %v736_v58  ;;  %v754_v39 = vand.u32 4294901760, %v753_v0  ;;  %v17638_v43 = vand.u32 4294901760, %v11394_v1  ;;  %v11422_v44 = vsub.f32 %v11259_v21, %v11274_v25  ;;  %v11425_v20 = vand.u32 4294901760, %v11382_v62 }
  0x1a   : > { %18465 = vst [vmem:[#allocation9_spill] sm:$0xff] %v11411_v14  ;;  %290 = vmatprep.subr.mxu0 %v11303_v33  ;;  %743 = vmatprep.subr.mxu1 %v742_v63  ;;  %v759_v48 = vsub.f32 %v11374_v60, %v17639_v8  ;;  %v17640_v49 = vand.u32 4294901760, %v11408_v13  ;;  %v11435_v53 = vsub.f32 %v11264_v22, %v11297_v31  ;;  %v11438_v21 = vand.u32 4294901760, %v11402_v6 }
  0x1b   : > { %18466 = vst [vmem:[#allocation10_spill] sm:$0xff] %v11425_v20  ;;  %292 = vmatpush1.msra.mxu0 %v11312_v37  ;;  %749 = vmatpush1.msra.mxu1 %v748_v7  ;;  %v765_v55 = vsub.f32 %v11394_v1, %v17638_v43  ;;  %v17641_v58 = vand.u32 4294901760, %v11422_v44  ;;  %v11452_v22 = vsub.f32 %v11282_v27, %v11303_v33  ;;  %v11455_v59 = vand.u32 4294901760, %v11416_v15  ;;  %v11469_v27 = vld [vmem:[%s17634_s1 + $0x40] sm:$0xff] }
  0x1c   : > { %18467 = vst [vmem:[#allocation11_spill] sm:$0xff] %v11438_v21  ;;  %294 = vmatprep.subr.mxu0 %v11328_v42  ;;  %755 = vmatprep.subr.mxu1 %v754_v39  ;;  %v760_v63 = vand.u32 4294901760, %v759_v48  ;;  %v771_v0 = vsub.f32 %v11408_v13, %v17640_v49  ;;  %v17645_v7 = vand.u32 4294901760, %v11435_v53  ;;  %v11464_v43 = vsub.f32 %v11287_v28, %v11312_v37  ;;  %v11482_v28 = vld [vmem:[%s17634_s1 + $0x38] sm:$0xff] }
  0x1d   : > { %18468 = vst [vmem:[#allocation12_spill] sm:$0xff] %v11455_v59  ;;  %296 = vmatpush1.msra.mxu0 %v11352_v51  ;;  %v766_v8 = vand.u32 4294901760, %v765_v55  ;;  %v777_v39 = vsub.f32 %v11422_v44, %v17641_v58  ;;  %v17647_v48 = vand.u32 4294901760, %v11452_v22  ;;  %v11477_v49 = vand.u32 4294901760, %v11443_v54 }
  0x1e   : > { %761 = vmatpush1.msra.mxu1 %v760_v63  ;;  %298 = vmatprep.subr.mxu0 %v11377_v61  ;;  %v772_v55 = vand.u32 4294901760, %v771_v0  ;;  %v783_v58 = vsub.f32 %v11435_v53, %v17645_v7  ;;  %v17650_v56 = vand.u32 4294901760, %v11464_v43  ;;  %v11496_v50 = vsub.f32 %v11292_v29, %v11328_v42 }
  0x1f   : > { %18469 = vst [vmem:[#allocation13_spill] sm:$0xff] %v11477_v49  ;;  %767 = vmatprep.subr.mxu1 %v766_v8  ;;  %300 = vmatpush1.msra.mxu0 %v11397_v2  ;;  %v778_v63 = vand.u32 4294901760, %v777_v39  ;;  %v789_v0 = vsub.f32 %v11452_v22, %v17647_v48  ;;  %v11508_v7 = vand.u32 4294901760, %v11469_v27  ;;  %v11512_v29 = vsub.f32 %v11317_v38, %v11352_v51  ;;  %v11530_v38 = vld [vmem:[%s17634_s1 + $0x20] sm:$0xff] }
  0x20   : > { %773 = vmatpush1.msra.mxu1 %v772_v55  ;;  %302 = vmatprep.subr.mxu0 %v11411_v14  ;;  %v784_v8 = vand.u32 4294901760, %v783_v58  ;;  %v795_v39 = vsub.f32 %v11464_v43, %v17650_v56  ;;  %v17654_v48 = vand.u32 4294901760, %v11496_v50  ;;  %v11525_v35 = vand.u32 4294901760, %v11482_v28 }
  0x21   : > { %18470 = vst [vmem:[#allocation14_spill] sm:$0xff] %v11508_v7  ;;  %779 = vmatprep.subr.mxu1 %v778_v63  ;;  %304 = vmatpush1.msra.mxu0 %v11425_v20  ;;  %v790_v55 = vand.u32 4294901760, %v789_v0  ;;  %v17657_v58 = vand.u32 4294901760, %v11512_v29  ;;  %v11536_v34 = vsub.f32 %v11344_v47, %v11377_v61  ;;  %v11539_v56 = vand.u32 4294901760, %v11501_v45 }
  0x22   : > { %18471 = vst [vmem:[#allocation15_spill] sm:$0xff] %v11525_v35  ;;  %785 = vmatpush1.msra.mxu1 %v784_v8  ;;  %306 = vmatprep.subr.mxu0 %v11438_v21  ;;  %v796_v63 = vand.u32 4294901760, %v795_v39  ;;  %v801_v0 = vsub.f32 %v11496_v50, %v17654_v48  ;;  %v11553_v47 = vsub.f32 %v11357_v52, %v11397_v2  ;;  %v11556_v9 = vand.u32 4294901760, %v11517_v40  ;;  %v11573_v2 = vld [vmem:[%s17634_s1 + $0x10] sm:$0xff] }
  0x23   : > { %18472 = vst [vmem:[#allocation16_spill] sm:$0xff] %v11539_v56  ;;  %791 = vmatprep.subr.mxu1 %v790_v55  ;;  %308 = vmatpush1.msra.mxu0 %v11455_v59  ;;  %v807_v8 = vsub.f32 %v11512_v29, %v17657_v58  ;;  %v11565_v48 = vsub.f32 %v11367_v57, %v11411_v14  ;;  %v11568_v52 = vand.u32 4294901760, %v11530_v38  ;;  %v11582_v57 = vand.u32 4294901760, %v11544_v30  ;;  %v11587_v14 = vld [vmem:[%s17634_s1 + $0x8] sm:$0xff] }
  0x24   : > { %18473 = vst [vmem:[#allocation17_spill] sm:$0xff] %v11553_v47  ;;  %18474 = vst [vmem:[#allocation18_spill] sm:$0xff] %v11556_v9  ;;  %797 = vmatpush1.msra.mxu1 %v796_v63  ;;  %310 = vmatprep.subr.mxu0 %v11477_v49  ;;  %v802_v55 = vand.u32 4294901760, %v801_v0  ;;  %v11579_v39 = vsub.f32 %v11382_v62, %v11425_v20  ;;  %v18479_v62 = vand.u32 4294901760, %v11536_v34  ;;  %v18481_v61 = vand.u32 4294901760, %v11553_v47 }
  0x25   : > { %18475 = vst [vmem:[#allocation19_spill] sm:$0xff] %v11565_v48  ;;  %18476 = vst [vmem:[#allocation20_spill] sm:$0xff] %v11568_v52  ;;  %312 = vmatpush1.msra.mxu0 %v11508_v7  ;;  %v808_v63 = vand.u32 4294901760, %v807_v8  ;;  %v17676_v58 = vand.u32 4294901760, %v11565_v48  ;;  %v11603_v20 = vsub.f32 %v11402_v6, %v11438_v21  ;;  %v11611_v42 = vand.u32 4294901760, %v11573_v2  ;;  %v11620_v6 = vld [vmem:[%s17634_s1] sm:$0xff] }
  0x26   : > { %18477 = vst [vmem:[#allocation21_spill] sm:$0xff] %v11579_v39  ;;  %18478 = vst [vmem:[#allocation22_spill] sm:$0xff] %v11582_v57  ;;  %v813_v0 = vsub.f32 %v11536_v34, %v18479_v62  ;;  %803 = vmatprep.subr.mxu1 %v802_v55  ;;  %314 = vmatprep.subr.mxu0 %v11525_v35  ;;  %v819_v51 = vsub.f32 %v11553_v47, %v18481_v61  ;;  %v11628_v21 = vand.u32 4294901760, %v11587_v14 }
  0x27   : > { %18480 = vst [vmem:[#allocation23_spill] sm:$0xff] %v11603_v20  ;;  %18482 = vst [vmem:[#allocation24_spill] sm:$0xff] %v11611_v42  ;;  %v11615_v62 = vsub.f32 %v11416_v15, %v11455_v59  ;;  %809 = vmatpush1.msra.mxu1 %v808_v63  ;;  %316 = vmatpush1.msra.mxu0 %v11539_v56  ;;  %v825_v61 = vsub.f32 %v11565_v48, %v17676_v58  ;;  %v17681_v8 = vand.u32 4294901760, %v11603_v20  ;;  %v201_v15 = vld [vmem:[%s11594_s9] sm:$0xff] }
  0x28   : > { %v814_v55 = vand.u32 4294901760, %v813_v0  ;;  %18484 = vst [vmem:[#allocation26_spill] sm:$0xff] %v11628_v21  ;;  %v820_v59 = vand.u32 4294901760, %v819_v51  ;;  %318 = vmatprep.subr.mxu0 %v11556_v9  ;;  %v18485_v37 = vand.u32 4294901760, %v11579_v39  ;;  %v11638_v47 = vsub.f32 %v11443_v54, %v11477_v49 }
  0x29   : > { %18483 = vst [vmem:[#allocation25_spill] sm:$0xff] %v11615_v62  ;;  %v826_v58 = vand.u32 4294901760, %v825_v61  ;;  %320 = vmatpush1.msra.mxu0 %v11568_v52  ;;  %v837_v51 = vsub.f32 %v11603_v20, %v17681_v8  ;;  %v11645_v48 = vand.u32 4294901760, %v11620_v6  ;;  %v18488_v54 = vand.u32 4294901760, %v11615_v62 }
  0x2a   : > { %v831_v63 = vsub.f32 %v11579_v39, %v18485_v37  ;;  %815 = vmatprep.subr.mxu1 %v814_v55  ;;  %v11649_v37 = vsub.f32 %v11469_v27, %v11508_v7  ;;  %322 = vmatprep.subr.mxu0 %v11582_v57  ;;  %v17684_v61 = vand.u32 4294901760, %v11638_v47  ;;  %v11656_v49 = vand.u32 4294901760, %v201_v15 }
  0x2b   : > { %18486 = vst [vmem:[#allocation27_spill] sm:$0xff] %v11645_v48  ;;  %821 = vmatpush1.msra.mxu1 %v820_v59  ;;  %v843_v55 = vsub.f32 %v11615_v62, %v18488_v54  ;;  %v838_v8 = vand.u32 4294901760, %v837_v51  ;;  %324 = vmatpush1.msra.mxu0 %v11611_v42  ;;  %v11662_v59 = vsub.f32 %v11482_v28, %v11525_v35 }
  0x2c   : > { %18487 = vst [vmem:[#allocation28_spill] sm:$0xff] %v11649_v37  ;;  %v832_v0 = vand.u32 4294901760, %v831_v63  ;;  %18489 = vst [vmem:[#allocation29_spill] sm:$0xff] %v11656_v49  ;;  %827 = vmatprep.subr.mxu1 %v826_v58  ;;  %v17687_v20 = vand.u32 4294901760, %v11649_v37  ;;  %v11666_v27 = vsub.f32 %v11501_v45, %v11539_v56  ;;  %v202_v63 = vld [vmem:[%s11594_s9 + $0x8] sm:$0xff]  ;;  %326 = vmatprep.subr.mxu0 %v11628_v21 }
  0x2d   : > { %v844_v54 = vand.u32 4294901760, %v843_v55  ;;  %v849_v58 = vsub.f32 %v11638_v47, %v17684_v61  ;;  %v11674_v51 = vsub.f32 %v201_v15, %v11656_v49  ;;  %v11678_v28 = vsub.f32 %v11517_v40, %v11556_v9  ;;  %328 = vmatpush1.msra.mxu0 %v11645_v48 }
  0x2e   : > { %18490 = vst [vmem:[#allocation30_spill] sm:$0xff] %v11666_v27  ;;  %833 = vmatpush1.msra.mxu1 %v832_v0  ;;  %v855_v45 = vsub.f32 %v11649_v37, %v17687_v20  ;;  %v17691_v0 = vand.u32 4294901760, %v11662_v59  ;;  %v11688_v61 = vsub.f32 %v11530_v38, %v11568_v52  ;;  %v11692_v9 = vand.u32 4294901760, %v202_v63  ;;  %1165 = vmatprep.subr.mxu0 %v11249_v19 }
  0x2f   : > { %18491 = vst [vmem:[#allocation31_spill] sm:$0xff] %v11674_v51  ;;  %839 = vmatprep.subr.mxu1 %v838_v8  ;;  %v850_v15 = vand.u32 4294901760, %v849_v58  ;;  %v17694_v40 = vand.u32 4294901760, %v11674_v51  ;;  %v18493_v38 = vand.u32 4294901760, %v11666_v27  ;;  %v18494_v19 = vand.u32 4294901760, %v11678_v28 }
  0x30   : > { %845 = vmatpush1.msra.mxu1 %v844_v54  ;;  %18492 = vst [vmem:[#allocation32_spill] sm:$0xff] %v11692_v9  ;;  %v856_v20 = vand.u32 4294901760, %v855_v45  ;;  %v861_v55 = vsub.f32 %v11662_v59, %v17691_v0  ;;  %v11709_v52 = vsub.f32 %v202_v63, %v11692_v9  ;;  %v11713_v0 = vsub.f32 %v11544_v30, %v11582_v57  ;;  %v205_v57 = vld [vmem:[%s11594_s9 + $0x20] sm:$0xff] }
  0x31   : > { %v867_v54 = vsub.f32 %v11666_v27, %v18493_v38  ;;  %851 = vmatprep.subr.mxu1 %v850_v15  ;;  %v365_v8 = vsub.f32 %v11674_v51, %v17694_v40  ;;  %v873_v45 = vsub.f32 %v11678_v28, %v18494_v19  ;;  %v18496_v15 = vand.u32 4294901760, %v11688_v61  ;;  %v203_v51 = vld [vmem:[%s11594_s9 + $0x10] sm:$0xff]  ;;  %v204_v19 = vld [vmem:[%s11594_s9 + $0x18] sm:$0xff] }
  0x32   : > { %18495 = vst [vmem:[#allocation33_spill] sm:$0xff] %v11709_v52  ;;  %857 = vmatpush1.msra.mxu1 %v856_v20  ;;  %v862_v38 = vand.u32 4294901760, %v861_v55  ;;  %v11720_v40 = vsub.f32 %v11573_v2, %v11611_v42  ;;  %v17703_v7 = vand.u32 4294901760, %v11709_v52  ;;  %v17704_v30 = vand.u32 4294901760, %v11713_v0 }
  0x33   : > { %v868_v58 = vand.u32 4294901760, %v867_v54  ;;  %v879_v56 = vsub.f32 %v11688_v61, %v18496_v15  ;;  %v366_v35 = vand.u32 4294901760, %v365_v8  ;;  %v874_v63 = vand.u32 4294901760, %v873_v45 }
  0x34   : > { %18497 = vst [vmem:[#allocation34_spill] sm:$0xff] %v11720_v40  ;;  %863 = vmatprep.subr.mxu1 %v862_v38  ;;  %v17711_v55 = vand.u32 4294901760, %v11720_v40  ;;  %v11730_v54 = vsub.f32 %v11587_v14, %v11628_v21  ;;  %v11734_v2 = vsub.f32 %v11620_v6, %v11645_v48  ;;  %v376_v8 = vsub.f32 %v11709_v52, %v17703_v7  ;;  %v206_v7 = vld [vmem:[%s11594_s9 + $0x28] sm:$0xff]  ;;  %v207_v21 = vld [vmem:[%s11594_s9 + $0x30] sm:$0xff] }
  0x35   : > { %v880_v20 = vand.u32 4294901760, %v879_v56  ;;  %367 = vmatmul.mubr.f32.vlgmr.msra.gmra.mxu0 %v366_v35  ;;  %869 = vmatpush1.msra.mxu1 %v868_v58  ;;  %v885_v56 = vsub.f32 %v11713_v0, %v17704_v30  ;;  %v11742_v45 = vand.u32 4294901760, %v203_v51  ;;  %v11744_v38 = vand.u32 4294901760, %v204_v19 }
  0x36   : > { %18498 = vst [vmem:[#allocation35_spill] sm:$0xff] %v11734_v2  ;;  %875 = vmatprep.subr.mxu1 %v874_v63  ;;  %v18501_v14 = vmov 0.0   ;;  %v891_v35 = vsub.f32 %v11720_v40, %v17711_v55  ;;  %v17714_v6 = vand.u32 4294901760, %v11730_v54  ;;  %v11752_v15 = vand.u32 4294901760, %v205_v57  ;;  %1168 = vmatpush1.msra.mxu0 %v11271_v24 }
  0x37   : > { %18499 = vst [vmem:[#allocation36_spill] sm:$0xff] %v11742_v45  ;;  %18500 = vst [vmem:[#allocation37_spill] sm:$0xff] %v11744_v38  ;;  %372 = vmatprep.mubr.f32.mxu0 %v18501_v14  ;;  %881 = vmatpush1.msra.mxu1 %v880_v20  ;;  %v377_v30 = vand.u32 4294901760, %v376_v8  ;;  %v886_v52 = vand.u32 4294901760, %v885_v56  ;;  %v11757_v63 = vsub.f32 %v203_v51, %v11742_v45  ;;  %v18503_v42 = vand.u32 4294901760, %v11734_v2 }
  0x38   : > { %18502 = vst [vmem:[#allocation38_spill] sm:$0xff] %v11752_v15  ;;  %v11760_v48 = vsub.f32 %v204_v19, %v11744_v38  ;;  %v892_v55 = vand.u32 4294901760, %v891_v35  ;;  %v897_v58 = vsub.f32 %v11730_v54, %v17714_v6  ;;  %1171 = vmatprep.subr.mxu0 %v11277_v26  ;;  %v11771_v8 = vsub.f32 %v205_v57, %v11752_v15 }
  0x39   : > { %v903_v20 = vsub.f32 %v11734_v2, %v18503_v42  ;;  %378 = vmatmul.mubr.f32.gmra.mxu0 %v377_v30  ;;  %887 = vmatprep.subr.mxu1 %v886_v52  ;;  %v17716_v51 = vand.u32 4294901760, %v11757_v63  ;;  %v11775_v56 = vand.u32 4294901760, %v206_v7  ;;  %v11778_v42 = vand.u32 4294901760, %v207_v21 }
  0x3a   : > { %18504 = vst [vmem:[#allocation39_spill] sm:$0xff] %v11771_v8  ;;  %v17715_v19 = vand.u32 4294901760, %v11760_v48  ;;  %893 = vmatpush1.msra.mxu1 %v892_v55  ;;  %v898_v35 = vand.u32 4294901760, %v897_v58  ;;  %383 = vmatprep.mubr.f32.mxu0 %v18501_v14  ;;  %v17717_v30 = vand.u32 4294901760, %v11771_v8  ;;  %v208_v58 = vld [vmem:[%s11594_s9 + $0x38] sm:$0xff] }
  0x3b   : > { %18505 = vst [vmem:[#allocation40_spill] sm:$0xff] %v11775_v56  ;;  %v904_v6 = vand.u32 4294901760, %v903_v20  ;;  %18506 = vst [vmem:[#allocation41_spill] sm:$0xff] %v11778_v42  ;;  %v387_v57 = vsub.f32 %v11757_v63, %v17716_v51  ;;  %1174 = vmatpush1.msra.mxu0 %v11300_v32  ;;  %v11789_v55 = vsub.f32 %v206_v7, %v11775_v56 }
  0x3c   : > { %v398_v52 = vsub.f32 %v11760_v48, %v17715_v19  ;;  %899 = vmatprep.subr.mxu1 %v898_v35  ;;  %1177 = vmatprep.subr.mxu0 %v11309_v36  ;;  %v11796_v19 = vand.u32 4294901760, %v208_v58  ;;  %v409_v35 = vsub.f32 %v11771_v8, %v17717_v30  ;;  %v210_v8 = vld [vmem:[%s11594_s9 + $0x48] sm:$0xff] }
  0x3d   : > { %18507 = vst [vmem:[#allocation42_spill] sm:$0xff] %v11789_v55  ;;  %905 = vmatpush1.msra.mxu1 %v904_v6  ;;  %v388_v20 = vand.u32 4294901760, %v387_v57  ;;  %1180 = vmatpush1.msra.mxu0 %v11325_v41  ;;  %v17722_v51 = vand.u32 4294901760, %v11789_v55  ;;  %v11804_v6 = vsub.f32 %v207_v21, %v11778_v42  ;;  %v209_v57 = vld [vmem:[%s11594_s9 + $0x40] sm:$0xff] }
  0x3e   : > { %940 = vmatmul.mubr.f32.vlgmr.msra.gmra.mxu1 %v11656_v49  ;;  %1549 = vmatprep.subr.mxu1 %v11206_v3  ;;  %18508 = vst [vmem:[#allocation43_spill] sm:$0xff] %v11796_v19  ;;  %v399_v7 = vand.u32 4294901760, %v398_v52  ;;  %v11813_v52 = vsub.f32 %v208_v58, %v11796_v19  ;;  %v410_v21 = vand.u32 4294901760, %v409_v35  ;;  %v11821_v49 = vand.u32 4294901760, %v209_v57 }
  0x3f   : > { %389 = vmatmul.mubr.f32.gmra.mxu0 %v388_v20  ;;  %1551 = vmatpush1.msra.mxu1 %v11208_v4  ;;  %18509 = vst [vmem:[#allocation44_spill] sm:$0xff] %v11804_v6  ;;  %v420_v20 = vsub.f32 %v11789_v55, %v17722_v51  ;;  %v17727_v30 = vand.u32 4294901760, %v11804_v6  ;;  %v11829_v58 = vand.u32 4294901760, %v210_v8  ;;  %v212_v55 = vld [vmem:[%s11594_s9 + $0x58] sm:$0xff] }
  0x40   : > { %394 = vmatprep.mubr.f32.mxu0 %v18501_v14  ;;  %945 = vmatprep.mubr.f32.mxu1 %v18501_v14  ;;  %18510 = vst [vmem:[#allocation45_spill] sm:$0xff] %v11813_v52  ;;  %18511 = vst [vmem:[#allocation46_spill] sm:$0xff] %v11821_v49  ;;  %v17732_v51 = vand.u32 4294901760, %v11813_v52 }
  0x41   : > { %1553 = vmatprep.subr.mxu1 %v11210_v5  ;;  %1183 = vmatprep.subr.mxu0 %v11339_v46  ;;  %18512 = vst [vmem:[#allocation47_spill] sm:$0xff] %v11829_v58  ;;  %v431_v35 = vsub.f32 %v11804_v6, %v17727_v30 }
  0x42   : > { %947 = vmatmul.mubr.f32.gmra.mxu1 %v11692_v9  ;;  %1186 = vmatpush1.msra.mxu0 %v11374_v60  ;;  %v11838_v9 = vsub.f32 %v209_v57, %v11821_v49 }
  0x43   : > { %400 = vmatmul.mubr.f32.gmra.mxu0 %v399_v7  ;;  %952 = vmatprep.mubr.f32.mxu1 %v18501_v14  ;;  %v421_v7 = vand.u32 4294901760, %v420_v20  ;;  %v432_v57 = vand.u32 4294901760, %v431_v35  ;;  %v442_v20 = vsub.f32 %v11813_v52, %v17732_v51  ;;  %v213_v52 = vld [vmem:[%s11594_s9 + $0x60] sm:$0xff] }
  0x44   : > { %405 = vmatprep.mubr.f32.mxu0 %v18501_v14  ;;  %1555 = vmatpush1.msra.mxu1 %v11223_v10  ;;  %18513 = vst [vmem:[#allocation48_spill] sm:$0xff] %v11838_v9  ;;  %v17737_v30 = vand.u32 4294901760, %v11838_v9 }
  0x45   : > { %1557 = vmatprep.subr.mxu1 %v11225_v11  ;;  %1189 = vmatprep.subr.mxu0 %v11394_v1 }
  0x46   : > { %954 = vmatmul.mubr.f32.gmra.mxu1 %v11742_v45  ;;  %1192 = vmatpush1.msra.mxu0 %v11408_v13  ;;  %v211_v45 = vld [vmem:[%s11594_s9 + $0x50] sm:$0xff]  ;;  %v453_v35 = vsub.f32 %v11838_v9, %v17737_v30 }
  0x47   : > { %411 = vmatmul.mubr.f32.gmra.mxu0 %v410_v21  ;;  %959 = vmatprep.mubr.f32.mxu1 %v18501_v14  ;;  %v11847_v21 = vsub.f32 %v210_v8, %v11829_v58  ;;  %v11855_v6 = vand.u32 4294901760, %v211_v45  ;;  %v11863_v8 = vand.u32 4294901760, %v212_v55 }
  0x48   : > { %416 = vmatprep.mubr.f32.mxu0 %v18501_v14  ;;  %1559 = vmatpush1.msra.mxu1 %v11227_v12 }
  0x49   : > { %1561 = vmatprep.subr.mxu1 %v11241_v16  ;;  %1195 = vmatprep.subr.mxu0 %v11422_v44  ;;  %18514 = vst [vmem:[#allocation49_spill] sm:$0xff] %v11847_v21  ;;  %18515 = vst [vmem:[#allocation50_spill] sm:$0xff] %v11855_v6  ;;  %v17742_v51 = vand.u32 4294901760, %v11847_v21 }
  0x4a   : > { %961 = vmatmul.mubr.f32.gmra.mxu1 %v11744_v38  ;;  %1198 = vmatpush1.msra.mxu0 %v11435_v53  ;;  %18516 = vst [vmem:[#allocation51_spill] sm:$0xff] %v11863_v8  ;;  %v11872_v38 = vsub.f32 %v211_v45, %v11855_v6  ;;  %v454_v45 = vand.u32 4294901760, %v453_v35  ;;  %v18521_v35 = vld [vmem:[#allocation17_spill] sm:$0xff] }
  0x4b   : > { %422 = vmatmul.mubr.f32.gmra.mxu0 %v421_v7  ;;  %966 = vmatprep.mubr.f32.mxu1 %v18501_v14  ;;  %v443_v7 = vand.u32 4294901760, %v442_v20  ;;  %v464_v20 = vsub.f32 %v11847_v21, %v17742_v51 }
  0x4c   : > { %427 = vmatprep.mubr.f32.mxu0 %v18501_v14  ;;  %1563 = vmatpush1.msra.mxu1 %v11243_v17  ;;  %18517 = vst [vmem:[#allocation52_spill] sm:$0xff] %v11872_v38  ;;  %v17750_v30 = vand.u32 4294901760, %v11872_v38 }
  0x4d   : > { %1565 = vmatprep.subr.mxu1 %v11246_v18  ;;  %1201 = vmatprep.subr.mxu0 %v11452_v22 }
  0x4e   : > { %968 = vmatmul.mubr.f32.gmra.mxu1 %v11752_v15  ;;  %1204 = vmatpush1.msra.mxu0 %v11464_v43  ;;  %v11889_v15 = vsub.f32 %v212_v55, %v11863_v8  ;;  %v465_v55 = vand.u32 4294901760, %v464_v20  ;;  %v475_v51 = vsub.f32 %v11872_v38, %v17750_v30 }
  0x4f   : > { %433 = vmatmul.mubr.f32.gmra.mxu0 %v432_v57  ;;  %973 = vmatprep.mubr.f32.mxu1 %v18501_v14  ;;  %v11880_v57 = vand.u32 4294901760, %v213_v52 }
  0x50   : > { %438 = vmatprep.mubr.f32.mxu0 %v18501_v14  ;;  %1567 = vmatpush1.msra.mxu1 %v11268_v23  ;;  %18519 = vst [vmem:[#allocation54_spill] sm:$0xff] %v11889_v15  ;;  %v17756_v21 = vand.u32 4294901760, %v11889_v15  ;;  %v476_v30 = vand.u32 4294901760, %v475_v51 }
  0x51   : > { %1569 = vmatprep.subr.mxu1 %v11274_v25  ;;  %1207 = vmatprep.subr.mxu0 %v11496_v50  ;;  %18518 = vst [vmem:[#allocation53_spill] sm:$0xff] %v11880_v57 }
  0x52   : > { %975 = vmatmul.mubr.f32.gmra.mxu1 %v11775_v56  ;;  %1210 = vmatpush1.msra.mxu0 %v11512_v29  ;;  %v214_v56 = vld [vmem:[%s11594_s9 + $0x68] sm:$0xff]  ;;  %v486_v38 = vsub.f32 %v11889_v15, %v17756_v21 }
  0x53   : > { %444 = vmatmul.mubr.f32.gmra.mxu0 %v443_v7  ;;  %980 = vmatprep.mubr.f32.mxu1 %v18501_v14  ;;  %v11898_v7 = vsub.f32 %v213_v52, %v11880_v57  ;;  %v11906_v9 = vand.u32 4294901760, %v214_v56  ;;  %v18523_v52 = vld [vmem:[#allocation4_spill] sm:$0xff] }
  0x54   : > { %449 = vmatprep.mubr.f32.mxu0 %v18501_v14  ;;  %1571 = vmatpush1.msra.mxu1 %v11297_v31 }
  0x55   : > { %1573 = vmatprep.subr.mxu1 %v11303_v33  ;;  %1213 = vmatprep.subr.mxu0 %v11536_v34  ;;  %18520 = vst [vmem:[#allocation55_spill] sm:$0xff] %v11898_v7  ;;  %18522 = vst [vmem:[#allocation17_spill] sm:$0xff] %v11906_v9  ;;  %v215_v33 = vld [vmem:[%s11594_s9 + $0x70] sm:$0xff] }
  0x56   : > { %982 = vmatmul.mubr.f32.gmra.mxu1 %v11778_v42  ;;  %1216 = vmatpush1.msra.mxu0 %v18521_v35  ;;  %v18524_v42 = vld [vmem:[#allocation5_spill] sm:$0xff]  ;;  %v11914_v20 = vand.u32 4294901760, %v215_v33 }
  0x57   : > { %455 = vmatmul.mubr.f32.gmra.mxu0 %v454_v45  ;;  %987 = vmatprep.mubr.f32.mxu1 %v18501_v14  ;;  %v18525_v45 = vld [vmem:[#allocation19_spill] sm:$0xff] }
  0x58   : > { %460 = vmatprep.mubr.f32.mxu0 %v18501_v14  ;;  %1575 = vmatpush1.msra.mxu1 %v18523_v52  ;;  %18526 = vst [vmem:[#allocation56_spill] sm:$0xff] %v11914_v20  ;;  %v17762_v52 = vand.u32 4294901760, %v11898_v7 }
  0x59   : > { %1577 = vmatprep.subr.mxu1 %v18524_v42  ;;  %1219 = vmatprep.subr.mxu0 %v18525_v45  ;;  %v11923_v42 = vsub.f32 %v214_v56, %v11906_v9  ;;  %v216_v45 = vld [vmem:[%s11594_s9 + $0x78] sm:$0xff]  ;;  %v487_v56 = vand.u32 4294901760, %v486_v38 }
  0x5a   : > { %989 = vmatmul.mubr.f32.gmra.mxu1 %v11796_v19  ;;  %1222 = vmatpush1.msra.mxu0 %v11579_v39  ;;  %v18528_v19 = vld [vmem:[#allocation6_spill] sm:$0xff]  ;;  %v18529_v39 = vld [vmem:[#allocation7_spill] sm:$0xff]  ;;  %v11931_v51 = vand.u32 4294901760, %v216_v45  ;;  %v497_v21 = vsub.f32 %v11898_v7, %v17762_v52 }
  0x5b   : > { %466 = vmatmul.mubr.f32.gmra.mxu0 %v465_v55  ;;  %994 = vmatprep.mubr.f32.mxu1 %v18501_v14  ;;  %18527 = vst [vmem:[#allocation57_spill] sm:$0xff] %v11923_v42  ;;  %v18530_v55 = vld [vmem:[#allocation23_spill] sm:$0xff]  ;;  %v17768_v15 = vand.u32 4294901760, %v11923_v42 }
  0x5c   : > { %471 = vmatprep.mubr.f32.mxu0 %v18501_v14  ;;  %1579 = vmatpush1.msra.mxu1 %v18528_v19  ;;  %18531 = vst [vmem:[#allocation23_spill] sm:$0xff] %v11931_v51  ;;  %v217_v19 = vld [vmem:[%s11594_s9 + $0x80] sm:$0xff]  ;;  %v11957_v7 = vsub.f32 %v216_v45, %v11931_v51 }
  0x5d   : > { %1581 = vmatprep.subr.mxu1 %v18529_v39  ;;  %1225 = vmatprep.subr.mxu0 %v18530_v55  ;;  %v11940_v39 = vsub.f32 %v215_v33, %v11914_v20  ;;  %v11948_v38 = vand.u32 4294901760, %v217_v19  ;;  %v498_v33 = vand.u32 4294901760, %v497_v21 }
  0x5e   : > { %996 = vmatmul.mubr.f32.gmra.mxu1 %v11821_v49  ;;  %1228 = vmatpush1.msra.mxu0 %v11615_v62  ;;  %v18533_v49 = vld [vmem:[#allocation8_spill] sm:$0xff]  ;;  %v18534_v62 = vld [vmem:[#allocation9_spill] sm:$0xff]  ;;  %18536 = vst [vmem:[#allocation59_spill] sm:$0xff] %v11957_v7 }
  0x5f   : > { %477 = vmatmul.mubr.f32.gmra.mxu0 %v476_v30  ;;  %1001 = vmatprep.mubr.f32.mxu1 %v18501_v14  ;;  %18532 = vst [vmem:[#allocation58_spill] sm:$0xff] %v11940_v39  ;;  %18535 = vst [vmem:[#allocation8_spill] sm:$0xff] %v11948_v38  ;;  %v508_v30 = vsub.f32 %v11923_v42, %v17768_v15  ;;  %v17774_v52 = vand.u32 4294901760, %v11940_v39  ;;  %v17779_v15 = vand.u32 4294901760, %v11957_v7 }
  0x60   : > { %482 = vmatprep.mubr.f32.mxu0 %v18501_v14  ;;  %1583 = vmatpush1.msra.mxu1 %v18533_v49  ;;  %v11974_v42 = vsub.f32 %v217_v19, %v11948_v38 }
  0x61   : > { %1585 = vmatprep.subr.mxu1 %v18534_v62  ;;  %1231 = vmatprep.subr.mxu0 %v11638_v47  ;;  %v218_v62 = vld [vmem:[%s11594_s9 + $0x88] sm:$0xff]  ;;  %v509_v45 = vand.u32 4294901760, %v508_v30  ;;  %v530_v30 = vsub.f32 %v11957_v7, %v17779_v15 }
  0x62   : > { %1003 = vmatmul.mubr.f32.gmra.mxu1 %v11829_v58  ;;  %1234 = vmatpush1.msra.mxu0 %v11649_v37  ;;  %v18537_v58 = vld [vmem:[#allocation10_spill] sm:$0xff]  ;;  %v18538_v37 = vld [vmem:[#allocation11_spill] sm:$0xff]  ;;  %v11965_v21 = vand.u32 4294901760, %v218_v62  ;;  %18540 = vst [vmem:[#allocation60_spill] sm:$0xff] %v11974_v42 }
  0x63   : > { %488 = vmatmul.mubr.f32.gmra.mxu0 %v487_v56  ;;  %1008 = vmatprep.mubr.f32.mxu1 %v18501_v14  ;;  %v519_v56 = vsub.f32 %v11940_v39, %v17774_v52  ;;  %v17785_v52 = vand.u32 4294901760, %v11974_v42 }
  0x64   : > { %493 = vmatprep.mubr.f32.mxu0 %v18501_v14  ;;  %1587 = vmatpush1.msra.mxu1 %v18537_v58  ;;  %18539 = vst [vmem:[#allocation10_spill] sm:$0xff] %v11965_v21 }
  0x65   : > { %1589 = vmatprep.subr.mxu1 %v18538_v37  ;;  %1237 = vmatprep.subr.mxu0 %v11662_v59  ;;  %v18541_v37 = vld [vmem:[#allocation12_spill] sm:$0xff]  ;;  %v520_v19 = vand.u32 4294901760, %v519_v56  ;;  %v531_v56 = vand.u32 4294901760, %v530_v30  ;;  %v541_v15 = vsub.f32 %v11974_v42, %v17785_v52 }
  0x66   : > { %1010 = vmatmul.mubr.f32.gmra.mxu1 %v11855_v6  ;;  %1240 = vmatpush1.msra.mxu0 %v11666_v27  ;;  %v219_v6 = vld [vmem:[%s11594_s9 + $0x90] sm:$0xff]  ;;  %v18542_v27 = vld [vmem:[#allocation13_spill] sm:$0xff] }
  0x67   : > { %499 = vmatmul.mubr.f32.gmra.mxu0 %v498_v33  ;;  %1015 = vmatprep.mubr.f32.mxu1 %v18501_v14  ;;  %v11983_v33 = vsub.f32 %v218_v62, %v11965_v21  ;;  %v11991_v39 = vand.u32 4294901760, %v219_v6  ;;  %v18545_v62 = vld [vmem:[#allocation14_spill] sm:$0xff] }
  0x68   : > { %504 = vmatprep.mubr.f32.mxu0 %v18501_v14  ;;  %1591 = vmatpush1.msra.mxu1 %v18541_v37 }
  0x69   : > { %1593 = vmatprep.subr.mxu1 %v18542_v27  ;;  %1243 = vmatprep.subr.mxu0 %v11678_v28  ;;  %18543 = vst [vmem:[#allocation12_spill] sm:$0xff] %v11983_v33  ;;  %18544 = vst [vmem:[#allocation61_spill] sm:$0xff] %v11991_v39  ;;  %v220_v27 = vld [vmem:[%s11594_s9 + $0x98] sm:$0xff]  ;;  %v17791_v7 = vand.u32 4294901760, %v11983_v33 }
  0x6a   : > { %1017 = vmatmul.mubr.f32.gmra.mxu1 %v11863_v8  ;;  %1246 = vmatpush1.msra.mxu0 %v11688_v61  ;;  %v18546_v8 = vld [vmem:[#allocation15_spill] sm:$0xff] }
  0x6b   : > { %510 = vmatmul.mubr.f32.gmra.mxu0 %v509_v45  ;;  %1022 = vmatprep.mubr.f32.mxu1 %v18501_v14  ;;  %v11999_v45 = vand.u32 4294901760, %v220_v27  ;;  %v552_v30 = vsub.f32 %v11983_v33, %v17791_v7 }
  0x6c   : > { %515 = vmatprep.mubr.f32.mxu0 %v18501_v14  ;;  %1595 = vmatpush1.msra.mxu1 %v18545_v62  ;;  %v221_v62 = vld [vmem:[%s11594_s9 + $0xa0] sm:$0xff] }
  0x6d   : > { %1597 = vmatprep.subr.mxu1 %v18546_v8  ;;  %1249 = vmatprep.subr.mxu0 %v11713_v0  ;;  %18547 = vst [vmem:[#allocation62_spill] sm:$0xff] %v11999_v45  ;;  %v12008_v8 = vsub.f32 %v219_v6, %v11991_v39  ;;  %v542_v6 = vand.u32 4294901760, %v541_v15  ;;  %v12025_v42 = vsub.f32 %v220_v27, %v11999_v45  ;;  %v553_v27 = vand.u32 4294901760, %v552_v30 }
  0x6e   : > { %1024 = vmatmul.mubr.f32.gmra.mxu1 %v11880_v57  ;;  %1252 = vmatpush1.msra.mxu0 %v11720_v40  ;;  %v18549_v57 = vld [vmem:[#allocation16_spill] sm:$0xff]  ;;  %v18550_v40 = vld [vmem:[#allocation18_spill] sm:$0xff] }
  0x6f   : > { %521 = vmatmul.mubr.f32.gmra.mxu0 %v520_v19  ;;  %1029 = vmatprep.mubr.f32.mxu1 %v18501_v14  ;;  %18548 = vst [vmem:[#allocation63_spill] sm:$0xff] %v12008_v8  ;;  %v12016_v19 = vand.u32 4294901760, %v221_v62  ;;  %v17794_v52 = vand.u32 4294901760, %v12008_v8  ;;  %18552 = vst [vmem:[#allocation65_spill] sm:$0xff] %v12025_v42  ;;  %v17801_v33 = vand.u32 4294901760, %v12025_v42 }
  0x70   : > { %526 = vmatprep.mubr.f32.mxu0 %v18501_v14  ;;  %1599 = vmatpush1.msra.mxu1 %v18549_v57 }
  0x71   : > { %1601 = vmatprep.subr.mxu1 %v18550_v40  ;;  %1255 = vmatprep.subr.mxu0 %v11730_v54  ;;  %18551 = vst [vmem:[#allocation64_spill] sm:$0xff] %v12016_v19  ;;  %v18553_v40 = vld [vmem:[#allocation20_spill] sm:$0xff]  ;;  %v12035_v15 = vsub.f32 %v221_v62, %v12016_v19  ;;  %v563_v7 = vsub.f32 %v12008_v8, %v17794_v52  ;;  %v18559_v62 = vld [vmem:[#allocation26_spill] sm:$0xff] }
  0x72   : > { %1031 = vmatmul.mubr.f32.gmra.mxu1 %v11906_v9  ;;  %1258 = vmatpush1.msra.mxu0 %v11734_v2  ;;  %v222_v9 = vld [vmem:[%s11594_s9 + $0xa8] sm:$0xff]  ;;  %v18554_v2 = vld [vmem:[#allocation22_spill] sm:$0xff]  ;;  %v574_v52 = vsub.f32 %v12025_v42, %v17801_v33 }
  0x73   : > { %532 = vmatmul.mubr.f32.gmra.mxu0 %v531_v56  ;;  %1036 = vmatprep.mubr.f32.mxu1 %v18501_v14  ;;  %v18555_v56 = vld [vmem:[#allocation2_spill] sm:$0xff]  ;;  %v564_v30 = vand.u32 4294901760, %v563_v7 }
  0x74   : > { %537 = vmatprep.mubr.f32.mxu0 %v18501_v14  ;;  %1603 = vmatpush1.msra.mxu1 %v18553_v40  ;;  %v18556_v57 = vand.u32 4294901760, %v18555_v56  ;;  %v18558_v56 = vld [vmem:[#allocation24_spill] sm:$0xff] }
  0x75   : > { %1605 = vmatprep.subr.mxu1 %v18554_v2  ;;  %v12042_v2 = vand.u32 4294901760, %v222_v9 }
  0x76   : > { %1936 = vmatprep.subr.mxu0 %v18556_v57  ;;  %1038 = vmatmul.mubr.f32.gmra.mxu1 %v11914_v20  ;;  %v223_v57 = vld [vmem:[%s11594_s9 + $0xb0] sm:$0xff] }
  0x77   : > { %543 = vmatmul.mubr.f32.gmra.mxu0 %v542_v6  ;;  %1043 = vmatprep.mubr.f32.mxu1 %v18501_v14  ;;  %18557 = vst [vmem:[#allocation20_spill] sm:$0xff] %v12042_v2  ;;  %v17804_v6 = vand.u32 4294901760, %v12035_v15  ;;  %v12055_v20 = vsub.f32 %v222_v9, %v12042_v2  ;;  %v12057_v8 = vand.u32 4294901760, %v223_v57 }
  0x78   : > { %548 = vmatprep.mubr.f32.mxu0 %v18501_v14  ;;  %1607 = vmatpush1.msra.mxu1 %v18558_v56  ;;  %v224_v56 = vld [vmem:[%s11594_s9 + $0xb8] sm:$0xff] }
  0x79   : > { %1609 = vmatprep.subr.mxu1 %v18559_v62  ;;  %18560 = vst [vmem:[#allocation2_spill] sm:$0xff] %v12055_v20  ;;  %18561 = vst [vmem:[#allocation26_spill] sm:$0xff] %v12057_v8  ;;  %v12064_v7 = vand.u32 4294901760, %v224_v56  ;;  %v585_v9 = vsub.f32 %v12035_v15, %v17804_v6  ;;  %v17809_v33 = vand.u32 4294901760, %v12055_v20  ;;  %v12072_v42 = vsub.f32 %v223_v57, %v12057_v8 }
  0x7a   : > { %1045 = vmatmul.mubr.f32.gmra.mxu1 %v11931_v51  ;;  %v18562_v51 = vld [vmem:[#allocation27_spill] sm:$0xff] }
  0x7b   : > { %554 = vmatmul.mubr.f32.gmra.mxu0 %v553_v27  ;;  %1050 = vmatprep.mubr.f32.mxu1 %v18501_v14  ;;  %18563 = vst [vmem:[#allocation66_spill] sm:$0xff] %v12064_v7  ;;  %v575_v27 = vand.u32 4294901760, %v574_v52  ;;  %18564 = vst [vmem:[#allocation67_spill] sm:$0xff] %v12072_v42  ;;  %v586_v52 = vand.u32 4294901760, %v585_v9  ;;  %v17812_v6 = vand.u32 4294901760, %v12072_v42  ;;  %v12085_v57 = vsub.f32 %v224_v56, %v12064_v7 }
  0x7c   : > { %559 = vmatprep.mubr.f32.mxu0 %v18501_v14  ;;  %1611 = vmatpush1.msra.mxu1 %v18562_v51  ;;  %v225_v51 = vld [vmem:[%s11594_s9 + $0xc0] sm:$0xff] }
  0x7d   : > { %2319 = vmatprep.subr.mxu1 %v11206_v3  ;;  %v12077_v3 = vand.u32 4294901760, %v225_v51  ;;  %18566 = vst [vmem:[#allocation69_spill] sm:$0xff] %v12085_v57  ;;  %v607_v9 = vsub.f32 %v12072_v42, %v17812_v6  ;;  %v228_v42 = vld [vmem:[%s11594_s9 + $0xd8] sm:$0xff] }
  0x7e   : > { %1052 = vmatmul.mubr.f32.gmra.mxu1 %v11948_v38  ;;  %v226_v38 = vld [vmem:[%s11594_s9 + $0xc8] sm:$0xff] }
  0x7f   : > { %565 = vmatmul.mubr.f32.gmra.mxu0 %v564_v30  ;;  %1057 = vmatprep.mubr.f32.mxu1 %v18501_v14  ;;  %18565 = vst [vmem:[#allocation68_spill] sm:$0xff] %v12077_v3  ;;  %v596_v30 = vsub.f32 %v12055_v20, %v17809_v33  ;;  %v17817_v33 = vand.u32 4294901760, %v12085_v57  ;;  %v12098_v56 = vsub.f32 %v225_v51, %v12077_v3  ;;  %v227_v20 = vld [vmem:[%s11594_s9 + $0xd0] sm:$0xff] }
  0x80   : > { %570 = vmatprep.mubr.f32.mxu0 %v18501_v14 }
  0x81   : > { %18567 = vst [vmem:[#allocation70_spill] sm:$0xff] %v12098_v56  ;;  %v618_v6 = vsub.f32 %v12085_v57, %v17817_v33  ;;  %v17824_v51 = vand.u32 4294901760, %v12098_v56  ;;  %v229_v57 = vld [vmem:[%s11594_s9 + $0xe0] sm:$0xff] }
  0x82   : > { %1059 = vmatmul.mubr.f32.gmra.mxu1 %v11965_v21  ;;  %v12090_v21 = vand.u32 4294901760, %v226_v38 }
  0x83   : > { %576 = vmatmul.mubr.f32.gmra.mxu0 %v575_v27  ;;  %1064 = vmatprep.mubr.f32.mxu1 %v18501_v14  ;;  %v597_v27 = vand.u32 4294901760, %v596_v30  ;;  %v608_v30 = vand.u32 4294901760, %v607_v9  ;;  %v629_v9 = vsub.f32 %v12098_v56, %v17824_v51  ;;  %v230_v56 = vld [vmem:[%s11594_s9 + $0xe8] sm:$0xff] }
  0x84   : > { %581 = vmatprep.mubr.f32.mxu0 %v18501_v14 }
  0x86   : > { %1066 = vmatmul.mubr.f32.gmra.mxu1 %v11991_v39  ;;  %v12111_v39 = vand.u32 4294901760, %v227_v20 }
  0x87   : > { %587 = vmatmul.mubr.f32.gmra.mxu0 %v586_v52  ;;  %1071 = vmatprep.mubr.f32.mxu1 %v18501_v14  ;;  %v12104_v52 = vsub.f32 %v226_v38, %v12090_v21  ;;  %v12116_v38 = vand.u32 4294901760, %v228_v42 }
  0x88   : > { %592 = vmatprep.mubr.f32.mxu0 %v18501_v14 }
  0x89   : > { %18568 = vst [vmem:[#allocation71_spill] sm:$0xff] %v12104_v52  ;;  %v17827_v33 = vand.u32 4294901760, %v12104_v52 }
  0x8a   : > { %1073 = vmatmul.mubr.f32.gmra.mxu1 %v11999_v45  ;;  %v12124_v45 = vsub.f32 %v227_v20, %v12111_v39  ;;  %v12137_v20 = vsub.f32 %v228_v42, %v12116_v38 }
  0x8b   : > { %598 = vmatmul.mubr.f32.gmra.mxu0 %v597_v27  ;;  %1078 = vmatprep.mubr.f32.mxu1 %v18501_v14  ;;  %v619_v27 = vand.u32 4294901760, %v618_v6  ;;  %v630_v6 = vand.u32 4294901760, %v629_v9 }
  0x8c   : > { %603 = vmatprep.mubr.f32.mxu0 %v18501_v14  ;;  %18569 = vst [vmem:[#allocation72_spill] sm:$0xff] %v12124_v45  ;;  %v17832_v51 = vand.u32 4294901760, %v12124_v45  ;;  %v17839_v42 = vand.u32 4294901760, %v12137_v20 }
  0x8e   : > { %1080 = vmatmul.mubr.f32.gmra.mxu1 %v12016_v19  ;;  %v12129_v19 = vand.u32 4294901760, %v229_v57 }
  0x8f   : > { %609 = vmatmul.mubr.f32.gmra.mxu0 %v608_v30  ;;  %1085 = vmatprep.mubr.f32.mxu1 %v18501_v14  ;;  %v640_v30 = vsub.f32 %v12104_v52, %v17827_v33  ;;  %v651_v33 = vsub.f32 %v12124_v45, %v17832_v51  ;;  %v231_v52 = vld [vmem:[%s11594_s9 + $0xf0] sm:$0xff]  ;;  %v232_v45 = vld [vmem:[%s11594_s9 + $0xf8] sm:$0xff] }
  0x90   : > { %614 = vmatprep.mubr.f32.mxu0 %v18501_v14 }
  0x91   : > { %v641_v9 = vand.u32 4294901760, %v640_v30  ;;  %v662_v30 = vsub.f32 %v12137_v20, %v17839_v42 }
  0x92   : > { %1087 = vmatmul.mubr.f32.gmra.mxu1 %v12042_v2  ;;  %v12150_v2 = vand.u32 4294901760, %v230_v56 }
  0x93   : > { %620 = vmatmul.mubr.f32.gmra.mxu0 %v619_v27  ;;  %1092 = vmatprep.mubr.f32.mxu1 %v18501_v14  ;;  %v12143_v27 = vsub.f32 %v229_v57, %v12129_v19 }
  0x94   : > { %625 = vmatprep.mubr.f32.mxu0 %v18501_v14  ;;  %v12161_v51 = vsub.f32 %v230_v56, %v12150_v2 }
  0x95   : > { %v17842_v57 = vand.u32 4294901760, %v12143_v27 }
  0x96   : > { %1094 = vmatmul.mubr.f32.gmra.mxu1 %v12057_v8  ;;  %v12163_v8 = vand.u32 4294901760, %v231_v52  ;;  %v683_v56 = vand.u32 4294901760, %v12161_v51 }
  0x97   : > { %631 = vmatmul.mubr.f32.gmra.mxu0 %v630_v6  ;;  %1099 = vmatprep.mubr.f32.mxu1 %v18501_v14  ;;  %v652_v6 = vand.u32 4294901760, %v651_v33  ;;  %v663_v33 = vand.u32 4294901760, %v662_v30 }
  0x98   : > { %636 = vmatprep.mubr.f32.mxu0 %v18501_v14  ;;  %v12176_v42 = vsub.f32 %v231_v52, %v12163_v8  ;;  %v684_v30 = vsub.f32 %v12161_v51, %v683_v56 }
  0x9a   : > { %1101 = vmatmul.mubr.f32.gmra.mxu1 %v12064_v7  ;;  %v12168_v7 = vand.u32 4294901760, %v232_v45  ;;  %v685_v52 = vand.u32 4294901760, %v684_v30 }
  0x9b   : > { %642 = vmatmul.mubr.f32.gmra.mxu0 %v641_v9  ;;  %1106 = vmatprep.mubr.f32.mxu1 %v18501_v14  ;;  %v673_v9 = vsub.f32 %v12143_v27, %v17842_v57 }
  0x9c   : > { %647 = vmatprep.mubr.f32.mxu0 %v18501_v14  ;;  %v12186_v57 = vsub.f32 %v232_v45, %v12168_v7 }
  0x9e   : > { %1108 = vmatmul.mubr.f32.gmra.mxu1 %v12077_v3  ;;  %v694_v3 = vand.u32 4294901760, %v12176_v42 }
  0x9f   : > { %653 = vmatmul.mubr.f32.gmra.mxu0 %v652_v6  ;;  %1113 = vmatprep.mubr.f32.mxu1 %v18501_v14  ;;  %v674_v6 = vand.u32 4294901760, %v673_v9  ;;  %v17843_v9 = vand.u32 4294901760, %v12186_v57 }
  0xa0   : > { %658 = vmatprep.mubr.f32.mxu0 %v18501_v14 }
  0xa2   : > { %1115 = vmatmul.mubr.f32.gmra.mxu1 %v12090_v21 }
  0xa3   : > { %664 = vmatmul.mubr.f32.gmra.mxu0 %v663_v33  ;;  %1120 = vmatprep.mubr.f32.mxu1 %v18501_v14  ;;  %v695_v33 = vsub.f32 %v12176_v42, %v694_v3 }
  0xa4   : > { %669 = vmatprep.mubr.f32.mxu0 %v18501_v14 }
  0xa5   : > { %v696_v45 = vand.u32 4294901760, %v695_v33  ;;  %v18571_v33 = vand.u32 4294901760, %v11271_v24  ;;  %v18576_v24 = vand.u32 4294901760, %v11325_v41  ;;  %v18581_v41 = vand.u32 4294901760, %v11394_v1 }
  0xa6   : > { %1122 = vmatmul.mubr.f32.gmra.mxu1 %v12111_v39  ;;  %v18588_v1 = vand.u32 4294901760, %v11452_v22 }
  0xa7   : > { %675 = vmatmul.mubr.f32.gmra.mxu0 %v674_v6  ;;  %1127 = vmatprep.mubr.f32.mxu1 %v18501_v14  ;;  %v706_v6 = vsub.f32 %v12186_v57, %v17843_v9  ;;  %v18575_v9 = vand.u32 4294901760, %v11309_v36 }
  0xa8   : > { %680 = vmatprep.mubr.f32.mxu0 %v18501_v14 }
  0xa9   : > { %v707_v30 = vand.u32 4294901760, %v706_v6  ;;  %v18573_v6 = vand.u32 4294901760, %v11300_v32  ;;  %v18579_v32 = vand.u32 4294901760, %v11374_v60  ;;  %v18585_v60 = vld [vmem:[#allocation39_spill] sm:$0xff] }
  0xaa   : > { %1129 = vmatmul.mubr.f32.gmra.mxu1 %v12116_v38 }
  0xab   : > { %686 = vmatmul.mubr.f32.gmra.mxu0 %v685_v52  ;;  %1134 = vmatprep.mubr.f32.mxu1 %v18501_v14  ;;  %v18570_v52 = vld [vmem:[#allocation31_spill] sm:$0xff] }
  0xac   : > { %691 = vmatprep.mubr.f32.mxu0 %v18501_v14 }
  0xae   : > { %1136 = vmatmul.mubr.f32.gmra.mxu1 %v12129_v19 }
  0xaf   : > { %697 = vmatmul.mubr.f32.gmra.mxu0 %v696_v45  ;;  %1141 = vmatprep.mubr.f32.mxu1 %v18501_v14  ;;  %v18572_v45 = vand.u32 4294901760, %v11277_v26  ;;  %v18577_v26 = vand.u32 4294901760, %v18570_v52 }
  0xb0   : > { %702 = vmatprep.mubr.f32.mxu0 %v18501_v14 }
  0xb2   : > { %1143 = vmatmul.mubr.f32.gmra.mxu1 %v12150_v2 }
  0xb3   : > { %708 = vmatmul.mubr.f32.gmra.mxu0 %v707_v30  ;;  %1148 = vmatprep.mubr.f32.mxu1 %v18501_v14  ;;  %v18574_v30 = vld [vmem:[#allocation33_spill] sm:$0xff] }
  0xb4   : > { %1291 = vmatprep.mubr.f32.mxu0 %v18501_v14  ;;  %v18580_v36 = vand.u32 4294901760, %v18574_v30 }
  0xb6   : > { %1150 = vmatmul.mubr.f32.gmra.mxu1 %v12163_v8 }
  0xb7   : > { %1294 = vmatmul.mubr.f32.vlgmr.msra.gmra.mxu0 %v18570_v52  ;;  %1155 = vmatprep.mubr.f32.mxu1 %v18501_v14 }
  0xb8   : > { %1299 = vmatprep.mubr.f32.mxu0 %v18501_v14  ;;  %1940 = vmatpush1.msra.mxu0 %v18571_v33  ;;  %v18578_v33 = vand.u32 4294901760, %v11339_v46  ;;  %v18584_v46 = vand.u32 4294901760, %v11422_v44  ;;  %v18592_v44 = vand.u32 4294901760, %v11496_v50  ;;  %v18597_v50 = vld [vmem:[#allocation45_spill] sm:$0xff] }
  0xb9   : > { %1944 = vmatprep.subr.mxu0 %v18572_v45  ;;  %v18609_v45 = vand.u32 4294901760, %v18530_v55  ;;  %v18617_v55 = vld [vmem:[#allocation52_spill] sm:$0xff] }
  0xba   : > { %1157 = vmatmul.mubr.f32.gmra.mxu1 %v12168_v7  ;;  %1948 = vmatpush1.msra.mxu0 %v18573_v6  ;;  %v18610_v6 = vld [vmem:[#allocation49_spill] sm:$0xff] }
  0xbb   : > { %1302 = vmatmul.mubr.f32.gmra.mxu0 %v18574_v30  ;;  %1644 = vmatprep.mubr.f32.mxu1 %v18501_v14  ;;  %v18611_v30 = vld [vmem:[#allocation6_spill] sm:$0xff] }
  0xbc   : > { %1307 = vmatprep.mubr.f32.mxu0 %v18501_v14  ;;  %1952 = vmatprep.subr.mxu0 %v18575_v9  ;;  %v18606_v9 = vld [vmem:[#allocation21_spill] sm:$0xff] }
  0xbd   : > { %1956 = vmatpush1.msra.mxu0 %v18576_v24  ;;  %v18607_v52 = vand.u32 4294901760, %v18606_v9  ;;  %v18612_v24 = vld [vmem:[#allocation7_spill] sm:$0xff] }
  0xbe   : > { %1648 = vmatmul.mubr.f32.vlgmr.msra.gmra.mxu1 %v18577_v26  ;;  %1960 = vmatprep.subr.mxu0 %v18578_v33  ;;  %v18613_v26 = vld [vmem:[#allocation25_spill] sm:$0xff] }
  0xbf   : > { %1310 = vmatmul.mubr.f32.gmra.mxu0 %v11757_v63  ;;  %2321 = vmatpush1.msra.mxu1 %v11208_v4  ;;  %v18582_v4 = vand.u32 4294901760, %v11408_v13  ;;  %v18589_v13 = vld [vmem:[#allocation42_spill] sm:$0xff]  ;;  %v18614_v33 = vand.u32 4294901760, %v18613_v26 }
  0xc0   : > { %1315 = vmatprep.mubr.f32.mxu0 %v18501_v14  ;;  %1653 = vmatprep.mubr.f32.mxu1 %v18501_v14 }
  0xc1   : > { %2323 = vmatprep.subr.mxu1 %v11210_v5  ;;  %1964 = vmatpush1.msra.mxu0 %v18579_v32  ;;  %v18583_v5 = vand.u32 4294901760, %v11757_v63  ;;  %v18604_v63 = vld [vmem:[#allocation4_spill] sm:$0xff] }
  0xc2   : > { %1657 = vmatmul.mubr.f32.gmra.mxu1 %v18580_v36  ;;  %1968 = vmatprep.subr.mxu0 %v18581_v41  ;;  %v18616_v36 = vand.u32 4294901760, %v11638_v47  ;;  %v18618_v41 = vld [vmem:[#allocation9_spill] sm:$0xff]  ;;  %v18623_v47 = vld [vmem:[#allocation54_spill] sm:$0xff] }
  0xc3   : > { %1318 = vmatmul.mubr.f32.gmra.mxu0 %v11760_v48  ;;  %1662 = vmatprep.mubr.f32.mxu1 %v18501_v14 }
  0xc4   : > { %1323 = vmatprep.mubr.f32.mxu0 %v18501_v14  ;;  %2325 = vmatpush1.msra.mxu1 %v11223_v10  ;;  %v18586_v10 = vand.u32 4294901760, %v11435_v53  ;;  %v18593_v53 = vld [vmem:[#allocation44_spill] sm:$0xff] }
  0xc5   : > { %2327 = vmatprep.subr.mxu1 %v11225_v11  ;;  %1972 = vmatpush1.msra.mxu0 %v18582_v4  ;;  %v18587_v11 = vand.u32 4294901760, %v11760_v48  ;;  %v18600_v22 = vand.u32 4294901760, %v18593_v53  ;;  %v18601_v48 = vld [vmem:[#allocation19_spill] sm:$0xff]  ;;  %v18619_v4 = vld [vmem:[#allocation28_spill] sm:$0xff] }
  0xc6   : > { %1666 = vmatmul.mubr.f32.gmra.mxu1 %v18583_v5  ;;  %1976 = vmatprep.subr.mxu0 %v18584_v46  ;;  %v18620_v5 = vand.u32 4294901760, %v18619_v4  ;;  %v18621_v46 = vand.u32 4294901760, %v18610_v6 }
  0xc7   : > { %1326 = vmatmul.mubr.f32.gmra.mxu0 %v18585_v60  ;;  %1671 = vmatprep.mubr.f32.mxu1 %v18501_v14 }
  0xc8   : > { %1331 = vmatprep.mubr.f32.mxu0 %v18501_v14  ;;  %2329 = vmatpush1.msra.mxu1 %v11227_v12  ;;  %v18590_v12 = vand.u32 4294901760, %v11464_v43  ;;  %v18596_v43 = vand.u32 4294901760, %v11536_v34  ;;  %v18603_v34 = vld [vmem:[#allocation48_spill] sm:$0xff] }
  0xc9   : > { %2331 = vmatprep.subr.mxu1 %v11241_v16  ;;  %1980 = vmatpush1.msra.mxu0 %v18586_v10  ;;  %v18591_v16 = vand.u32 4294901760, %v18585_v60  ;;  %v18615_v32 = vand.u32 4294901760, %v18603_v34  ;;  %v18622_v60 = vand.u32 4294901760, %v11662_v59  ;;  %v18625_v10 = vld [vmem:[#allocation30_spill] sm:$0xff]  ;;  %v18629_v59 = vld [vmem:[#allocation55_spill] sm:$0xff] }
  0xca   : > { %1675 = vmatmul.mubr.f32.gmra.mxu1 %v18587_v11  ;;  %1984 = vmatprep.subr.mxu0 %v18588_v1  ;;  %v18626_v11 = vand.u32 4294901760, %v18625_v10  ;;  %v18627_v1 = vand.u32 4294901760, %v18617_v55 }
  0xcb   : > { %1334 = vmatmul.mubr.f32.gmra.mxu0 %v18589_v13  ;;  %1680 = vmatprep.mubr.f32.mxu1 %v18501_v14 }
  0xcc   : > { %1339 = vmatprep.mubr.f32.mxu0 %v18501_v14  ;;  %2333 = vmatpush1.msra.mxu1 %v11243_v17  ;;  %v18594_v17 = vand.u32 4294901760, %v11512_v29  ;;  %v18602_v29 = vand.u32 4294901760, %v18601_v48 }
  0xcd   : > { %2335 = vmatprep.subr.mxu1 %v11246_v18  ;;  %1988 = vmatpush1.msra.mxu0 %v18590_v12  ;;  %v18595_v18 = vand.u32 4294901760, %v18589_v13  ;;  %v18628_v13 = vand.u32 4294901760, %v11678_v28  ;;  %v18631_v12 = vand.u32 4294901760, %v11688_v61  ;;  %v18634_v28 = vld [vmem:[#allocation57_spill] sm:$0xff]  ;;  %v18639_v61 = vand.u32 4294901760, %v18629_v59 }
  0xce   : > { %1684 = vmatmul.mubr.f32.gmra.mxu1 %v18591_v16  ;;  %1992 = vmatprep.subr.mxu0 %v18592_v44  ;;  %v18632_v16 = vand.u32 4294901760, %v18623_v47  ;;  %v18633_v44 = vand.u32 4294901760, %v11713_v0  ;;  %v18641_v0 = vld [vmem:[#allocation58_spill] sm:$0xff]  ;;  %v18646_v48 = vand.u32 4294901760, %v18634_v28 }
  0xcf   : > { %1342 = vmatmul.mubr.f32.gmra.mxu0 %v18593_v53  ;;  %1689 = vmatprep.mubr.f32.mxu1 %v18501_v14  ;;  %v18635_v53 = vld [vmem:[#allocation14_spill] sm:$0xff] }
  0xd0   : > { %1347 = vmatprep.mubr.f32.mxu0 %v18501_v14  ;;  %2337 = vmatpush1.msra.mxu1 %v11268_v23  ;;  %v18598_v23 = vld [vmem:[#allocation3_spill] sm:$0xff] }
  0xd1   : > { %2339 = vmatprep.subr.mxu1 %v11274_v25  ;;  %1996 = vmatpush1.msra.mxu0 %v18594_v17  ;;  %v18599_v25 = vand.u32 4294901760, %v18521_v35  ;;  %v18608_v35 = vand.u32 4294901760, %v18597_v50  ;;  %v18637_v17 = vld [vmem:[#allocation34_spill] sm:$0xff] }
  0xd2   : > { %1693 = vmatmul.mubr.f32.gmra.mxu1 %v18595_v18  ;;  %2000 = vmatprep.subr.mxu0 %v18596_v43  ;;  %v18638_v18 = vand.u32 4294901760, %v18637_v17  ;;  %v18640_v43 = vand.u32 4294901760, %v11730_v54 }
  0xd3   : > { %1350 = vmatmul.mubr.f32.gmra.mxu0 %v18597_v50  ;;  %1698 = vmatprep.mubr.f32.mxu1 %v18501_v14  ;;  %v18642_v50 = vld [vmem:[#allocation16_spill] sm:$0xff] }
  0xd4   : > { %1355 = vmatprep.mubr.f32.mxu0 %v18501_v14  ;;  %2341 = vmatpush1.msra.mxu1 %v11297_v31  ;;  %v18605_v31 = vld [vmem:[#allocation5_spill] sm:$0xff] }
  0xd5   : > { %2343 = vmatprep.subr.mxu1 %v18598_v23  ;;  %2004 = vmatpush1.msra.mxu0 %v18599_v25  ;;  %v18643_v23 = vld [vmem:[#allocation18_spill] sm:$0xff]  ;;  %v18644_v25 = vld [vmem:[#allocation35_spill] sm:$0xff] }
  0xd6   : > { %1702 = vmatmul.mubr.f32.gmra.mxu1 %v18600_v22  ;;  %2008 = vmatprep.subr.mxu0 %v18602_v29  ;;  %v18645_v22 = vand.u32 4294901760, %v18644_v25  ;;  %v18647_v29 = vld [vmem:[#allocation59_spill] sm:$0xff] }
  0xd7   : > { %1358 = vmatmul.mubr.f32.gmra.mxu0 %v18603_v34  ;;  %1707 = vmatprep.mubr.f32.mxu1 %v18501_v14  ;;  %v18648_v34 = vld [vmem:[#allocation22_spill] sm:$0xff] }
  0xd8   : > { %1363 = vmatprep.mubr.f32.mxu0 %v18501_v14  ;;  %2345 = vmatpush1.msra.mxu1 %v18604_v63  ;;  %v18649_v63 = vand.u32 4294901760, %v18641_v0 }
  0xd9   : > { %2347 = vmatprep.subr.mxu1 %v18605_v31  ;;  %2012 = vmatpush1.msra.mxu0 %v18607_v52  ;;  %v18650_v31 = vld [vmem:[#allocation60_spill] sm:$0xff] }
  0xda   : > { %1711 = vmatmul.mubr.f32.gmra.mxu1 %v18608_v35  ;;  %2016 = vmatprep.subr.mxu0 %v18609_v45  ;;  %v18651_v52 = vld [vmem:[#allocation24_spill] sm:$0xff]  ;;  %v18655_v26 = vand.u32 4294901760, %v18650_v31 }
  0xdb   : > { %1366 = vmatmul.mubr.f32.gmra.mxu0 %v18610_v6  ;;  %1716 = vmatprep.mubr.f32.mxu1 %v18501_v14  ;;  %v18653_v45 = vld [vmem:[#allocation12_spill] sm:$0xff] }
  0xdc   : > { %1371 = vmatprep.mubr.f32.mxu0 %v18501_v14  ;;  %2349 = vmatpush1.msra.mxu1 %v18611_v30  ;;  %v18654_v30 = vld [vmem:[#allocation27_spill] sm:$0xff] }
  0xdd   : > { %2351 = vmatprep.subr.mxu1 %v18612_v24  ;;  %2020 = vmatpush1.msra.mxu0 %v18614_v33 }
  0xde   : > { %1720 = vmatmul.mubr.f32.gmra.mxu1 %v18615_v32  ;;  %2024 = vmatprep.subr.mxu0 %v18616_v36 }
  0xdf   : > { %1374 = vmatmul.mubr.f32.gmra.mxu0 %v18617_v55  ;;  %1725 = vmatprep.mubr.f32.mxu1 %v18501_v14 }
  0xe0   : > { %1379 = vmatprep.mubr.f32.mxu0 %v18501_v14  ;;  %2353 = vmatpush1.msra.mxu1 %v18533_v49  ;;  %v18624_v49 = vld [vmem:[#allocation11_spill] sm:$0xff] }
  0xe1   : > { %2355 = vmatprep.subr.mxu1 %v18618_v41  ;;  %2028 = vmatpush1.msra.mxu0 %v18620_v5  ;;  %v18657_v5 = vand.u32 4294901760, %v18653_v45 }
  0xe2   : > { %1729 = vmatmul.mubr.f32.gmra.mxu1 %v18621_v46  ;;  %2032 = vmatprep.subr.mxu0 %v18622_v60 }
  0xe3   : > { %1382 = vmatmul.mubr.f32.gmra.mxu0 %v18623_v47  ;;  %1734 = vmatprep.mubr.f32.mxu1 %v18501_v14  ;;  %v18658_v47 = vld [vmem:[#allocation65_spill] sm:$0xff] }
  0xe4   : > { %1387 = vmatprep.mubr.f32.mxu0 %v18501_v14  ;;  %2357 = vmatpush1.msra.mxu1 %v18537_v58  ;;  %v18630_v58 = vld [vmem:[#allocation13_spill] sm:$0xff] }
  0xe5   : > { %2359 = vmatprep.subr.mxu1 %v18624_v49  ;;  %2036 = vmatpush1.msra.mxu0 %v18626_v11 }
  0xe6   : > { %1738 = vmatmul.mubr.f32.gmra.mxu1 %v18627_v1  ;;  %2040 = vmatprep.subr.mxu0 %v18628_v13 }
  0xe7   : > { %1390 = vmatmul.mubr.f32.gmra.mxu0 %v18629_v59  ;;  %1743 = vmatprep.mubr.f32.mxu1 %v18501_v14 }
  0xe8   : > { %1395 = vmatprep.mubr.f32.mxu0 %v18501_v14  ;;  %2361 = vmatpush1.msra.mxu1 %v18541_v37  ;;  %v18636_v37 = vld [vmem:[#allocation15_spill] sm:$0xff] }
  0xe9   : > { %2363 = vmatprep.subr.mxu1 %v18630_v58  ;;  %2044 = vmatpush1.msra.mxu0 %v18631_v12 }
  0xea   : > { %1747 = vmatmul.mubr.f32.gmra.mxu1 %v18632_v16  ;;  %2048 = vmatprep.subr.mxu0 %v18633_v44 }
  0xeb   : > { %1398 = vmatmul.mubr.f32.gmra.mxu0 %v18634_v28  ;;  %1752 = vmatprep.mubr.f32.mxu1 %v18501_v14 }
  0xec   : > { %1403 = vmatprep.mubr.f32.mxu0 %v18501_v14  ;;  %2365 = vmatpush1.msra.mxu1 %v18635_v53  ;;  %v18660_v53 = vand.u32 4294901760, %v18658_v47 }
  0xed   : > { %2367 = vmatprep.subr.mxu1 %v18636_v37  ;;  %2052 = vmatpush1.msra.mxu0 %v18638_v18  ;;  %v18661_v18 = vld [vmem:[#allocation2_spill] sm:$0xff] }
  0xee   : > { %1756 = vmatmul.mubr.f32.gmra.mxu1 %v18639_v61  ;;  %2056 = vmatprep.subr.mxu0 %v18640_v43 }
  0xef   : > { %1406 = vmatmul.mubr.f32.gmra.mxu0 %v18641_v0  ;;  %1761 = vmatprep.mubr.f32.mxu1 %v18501_v14 }
  0xf0   : > { %1411 = vmatprep.mubr.f32.mxu0 %v18501_v14  ;;  %2369 = vmatpush1.msra.mxu1 %v18642_v50 }
  0xf1   : > { %2371 = vmatprep.subr.mxu1 %v18643_v23  ;;  %2060 = vmatpush1.msra.mxu0 %v18645_v22  ;;  %v18662_v23 = vand.u32 4294901760, %v12035_v15 }
  0xf2   : > { %1765 = vmatmul.mubr.f32.gmra.mxu1 %v18646_v48  ;;  %v18663_v48 = vld [vmem:[#allocation67_spill] sm:$0xff] }
  0xf3   : > { %1414 = vmatmul.mubr.f32.gmra.mxu0 %v18647_v29  ;;  %1770 = vmatprep.mubr.f32.mxu1 %v18501_v14 }
  0xf4   : > { %1419 = vmatprep.mubr.f32.mxu0 %v18501_v14  ;;  %2373 = vmatpush1.msra.mxu1 %v18553_v40  ;;  %v18652_v40 = vand.u32 4294901760, %v18647_v29 }
  0xf5   : > { %v368_v54 = vpop.f32.mrf.mxu0  ;;  %2375 = vmatprep.subr.mxu1 %v18648_v34 }
  0xf6   : > { %1774 = vmatmul.mubr.f32.gmra.mxu1 %v18649_v63 }
  0xf7   : > { %1422 = vmatmul.mubr.f32.gmra.mxu0 %v18650_v31  ;;  %v370_v9 = vpop.f32.mrf.mxu0  ;;  %1779 = vmatprep.mubr.f32.mxu1 %v18501_v14  ;;  %v18664_v31 = vand.u32 4294901760, %v18661_v18 }
  0xf8   : > { %1427 = vmatprep.mubr.f32.mxu0 %v18501_v14  ;;  %2377 = vmatpush1.msra.mxu1 %v18651_v52  ;;  %v18665_v52 = vld [vmem:[#allocation69_spill] sm:$0xff] }
  0xf9   : > { %v379_v35 = vpop.f32.mrf.mxu0  ;;  %2379 = vmatprep.subr.mxu1 %v18559_v62  ;;  %v18656_v62 = vld [vmem:[#allocation63_spill] sm:$0xff] }
  0xfa   : > { %1783 = vmatmul.mubr.f32.gmra.mxu1 %v18652_v40  ;;  %v18659_v13 = vand.u32 4294901760, %v18656_v62 }
  0xfb   : > { %1430 = vmatmul.mubr.f32.gmra.mxu0 %v18653_v45  ;;  %v381_v6 = vpop.f32.mrf.mxu0  ;;  %1788 = vmatprep.mubr.f32.mxu1 %v18501_v14 }
  0xfc   : > { %1435 = vmatprep.mubr.f32.mxu0 %v18501_v14  ;;  %2381 = vmatpush1.msra.mxu1 %v18654_v30  ;;  %v18666_v30 = vand.u32 4294901760, %v18663_v48 }
  0xfe   : > { %v941_v24 = vpop.f32.mrf.mxu1  ;;  %1792 = vmatmul.mubr.f32.gmra.mxu1 %v18655_v26 }
  0xff   : > { %v390_v33 = vpop.f32.mrf.mxu0  ;;  %v12391_v32 = vadd.f32 %v941_v24, %v368_v54  ;;  %1438 = vmatmul.mubr.f32.gmra.mxu0 %v18656_v62  ;;  %1797 = vmatprep.mubr.f32.mxu1 %v18501_v14 }
 0x100   : > { %v943_v36 = vpop.f32.mrf.mxu1  ;;  %1443 = vmatprep.mubr.f32.mxu0 %v18501_v14 }
 0x101   : > { %v392_v55 = vpop.f32.mrf.mxu0  ;;  %v12396_v41 = vadd.f32 %v943_v36, %v370_v9 }
 0x102   : > { %v948_v4 = vpop.f32.mrf.mxu1  ;;  %1801 = vmatmul.mubr.f32.gmra.mxu1 %v18657_v5  ;;  %v18668_v5 = vand.u32 4294901760, %v18665_v52 }
 0x103   : > { %v401_v46 = vpop.f32.mrf.mxu0  ;;  %v12400_v60 = vadd.f32 %v948_v4, %v379_v35  ;;  %1446 = vmatmul.mubr.f32.gmra.mxu0 %v18658_v47  ;;  %1806 = vmatprep.mubr.f32.mxu1 %v18501_v14 }
 0x104   : > { %v950_v49 = vpop.f32.mrf.mxu1  ;;  %1451 = vmatprep.mubr.f32.mxu0 %v18501_v14 }
 0x105   : > { %v403_v10 = vpop.f32.mrf.mxu0  ;;  %v12405_v11 = vadd.f32 %v950_v49, %v381_v6  ;;  %v18669_v49 = vld [vmem:[#allocation71_spill] sm:$0xff] }
 0x106   : > { %v955_v1 = vpop.f32.mrf.mxu1  ;;  %1810 = vmatmul.mubr.f32.gmra.mxu1 %v18659_v13 }
 0x107   : > { %v412_v59 = vpop.f32.mrf.mxu0  ;;  %v12409_v58 = vadd.f32 %v955_v1, %v390_v33  ;;  %1454 = vmatmul.mubr.f32.gmra.mxu0 %v12035_v15  ;;  %1815 = vmatprep.mubr.f32.mxu1 %v18501_v14  ;;  %v18667_v33 = vld [vmem:[#allocation70_spill] sm:$0xff] }
 0x108   : > { %v957_v12 = vpop.f32.mrf.mxu1  ;;  %1459 = vmatprep.mubr.f32.mxu0 %v18501_v14 }
 0x109   : > { %v414_v16 = vpop.f32.mrf.mxu0  ;;  %v12414_v44 = vadd.f32 %v957_v12, %v392_v55  ;;  %v18670_v12 = vand.u32 4294901760, %v18667_v33 }
 0x10a   : > { %v962_v28 = vpop.f32.mrf.mxu1  ;;  %1819 = vmatmul.mubr.f32.gmra.mxu1 %v18660_v53  ;;  %v18671_v53 = vld [vmem:[#allocation72_spill] sm:$0xff] }
 0x10b   : > { %v423_v37 = vpop.f32.mrf.mxu0  ;;  %v12418_v17 = vadd.f32 %v962_v28, %v401_v46  ;;  %1462 = vmatmul.mubr.f32.gmra.mxu0 %v18661_v18  ;;  %1824 = vmatprep.mubr.f32.mxu1 %v18501_v14 }
 0x10c   : > { %v964_v61 = vpop.f32.mrf.mxu1  ;;  %1467 = vmatprep.mubr.f32.mxu0 %v18501_v14 }
 0x10d   : > { %v425_v43 = vpop.f32.mrf.mxu0  ;;  %v12423_v0 = vadd.f32 %v964_v61, %v403_v10 }
 0x10e   : > { %v969_v50 = vpop.f32.mrf.mxu1  ;;  %1828 = vmatmul.mubr.f32.gmra.mxu1 %v18662_v23 }
 0x10f   : > { %v434_v25 = vpop.f32.mrf.mxu0  ;;  %v12427_v22 = vadd.f32 %v969_v50, %v412_v59  ;;  %1470 = vmatmul.mubr.f32.gmra.mxu0 %v18663_v48  ;;  %1833 = vmatprep.mubr.f32.mxu1 %v18501_v14  ;;  %v18673_v50 = vand.u32 4294901760, %v18669_v49 }
 0x110   : > { %v971_v29 = vpop.f32.mrf.mxu1  ;;  %1475 = vmatprep.mubr.f32.mxu0 %v18501_v14 }
 0x111   : > { %v436_v54 = vpop.f32.mrf.mxu0  ;;  %v12432_v34 = vadd.f32 %v971_v29, %v414_v16 }
 0x112   : > { %v976_v63 = vpop.f32.mrf.mxu1  ;;  %1837 = vmatmul.mubr.f32.gmra.mxu1 %v18664_v31  ;;  %v18675_v31 = vand.u32 4294901760, %v18671_v53 }
 0x113   : > { %v445_v9 = vpop.f32.mrf.mxu0  ;;  %v12436_v15 = vadd.f32 %v976_v63, %v423_v37  ;;  %1478 = vmatmul.mubr.f32.gmra.mxu0 %v18665_v52  ;;  %1842 = vmatprep.mubr.f32.mxu1 %v18501_v14 }
 0x114   : > { %v978_v35 = vpop.f32.mrf.mxu1  ;;  %1483 = vmatprep.mubr.f32.mxu0 %v18501_v14 }
 0x115   : > { %v447_v40 = vpop.f32.mrf.mxu0  ;;  %v12441_v45 = vadd.f32 %v978_v35, %v425_v43 }
 0x116   : > { %v983_v6 = vpop.f32.mrf.mxu1  ;;  %1846 = vmatmul.mubr.f32.gmra.mxu1 %v18666_v30 }
 0x117   : > { %v456_v24 = vpop.f32.mrf.mxu0  ;;  %v12445_v26 = vadd.f32 %v983_v6, %v434_v25  ;;  %1486 = vmatmul.mubr.f32.gmra.mxu0 %v18667_v33  ;;  %1851 = vmatprep.mubr.f32.mxu1 %v18501_v14 }
 0x118   : > { %v985_v62 = vpop.f32.mrf.mxu1  ;;  %1491 = vmatprep.mubr.f32.mxu0 %v18501_v14 }
 0x119   : > { %v458_v36 = vpop.f32.mrf.mxu0  ;;  %v12450_v55 = vadd.f32 %v985_v62, %v436_v54 }
 0x11a   : > { %v990_v4 = vpop.f32.mrf.mxu1  ;;  %1855 = vmatmul.mubr.f32.gmra.mxu1 %v18668_v5 }
 0x11b   : > { %v467_v46 = vpop.f32.mrf.mxu0  ;;  %v12454_v47 = vadd.f32 %v990_v4, %v445_v9  ;;  %1494 = vmatmul.mubr.f32.gmra.mxu0 %v18669_v49  ;;  %1860 = vmatprep.mubr.f32.mxu1 %v18501_v14  ;;  %v18679_v49 = vand.u32 4294901760, %v12143_v27 }
 0x11c   : > { %v992_v10 = vpop.f32.mrf.mxu1  ;;  %1499 = vmatprep.mubr.f32.mxu0 %v18501_v14 }
 0x11d   : > { %v469_v1 = vpop.f32.mrf.mxu0  ;;  %v12459_v13 = vadd.f32 %v992_v10, %v447_v40 }
 0x11e   : > { %v997_v59 = vpop.f32.mrf.mxu1  ;;  %1864 = vmatmul.mubr.f32.gmra.mxu1 %v18670_v12 }
 0x11f   : > { %v478_v16 = vpop.f32.mrf.mxu0  ;;  %v12463_v28 = vadd.f32 %v997_v59, %v456_v24  ;;  %1502 = vmatmul.mubr.f32.gmra.mxu0 %v18671_v53  ;;  %1869 = vmatprep.mubr.f32.mxu1 %v18501_v14  ;;  %v18677_v24 = vand.u32 4294901760, %v12137_v20 }
 0x120   : > { %v999_v37 = vpop.f32.mrf.mxu1  ;;  %1507 = vmatprep.mubr.f32.mxu0 %v18501_v14 }
 0x121   : > { %v480_v18 = vpop.f32.mrf.mxu0  ;;  %v12468_v61 = vadd.f32 %v999_v37, %v458_v36 }
 0x122   : > { %v1004_v43 = vpop.f32.mrf.mxu1  ;;  %1873 = vmatmul.mubr.f32.gmra.mxu1 %v18673_v50 }
 0x123   : > { %18672 = vst [vmem:[#allocation31_spill] sm:$0xff] %v12468_v61  ;;  %v489_v23 = vpop.f32.mrf.mxu0  ;;  %v12472_v25 = vadd.f32 %v1004_v43, %v467_v46  ;;  %1510 = vmatmul.mubr.f32.gmra.mxu0 %v12137_v20  ;;  %1878 = vmatprep.mubr.f32.mxu1 %v18501_v14 }
 0x124   : > { %v1006_v48 = vpop.f32.mrf.mxu1  ;;  %1515 = vmatprep.mubr.f32.mxu0 %v18501_v14 }
 0x125   : > { %v491_v29 = vpop.f32.mrf.mxu0  ;;  %v12477_v54 = vadd.f32 %v1006_v48, %v469_v1 }
 0x126   : > { %v1011_v63 = vpop.f32.mrf.mxu1  ;;  %1882 = vmatmul.mubr.f32.gmra.mxu1 %v18675_v31 }
 0x127   : > { %18674 = vst [vmem:[#allocation33_spill] sm:$0xff] %v12477_v54  ;;  %v500_v9 = vpop.f32.mrf.mxu0  ;;  %v12481_v52 = vadd.f32 %v1011_v63, %v478_v16  ;;  %1518 = vmatmul.mubr.f32.gmra.mxu0 %v12143_v27  ;;  %1887 = vmatprep.mubr.f32.mxu1 %v18501_v14 }
 0x128   : > { %v1013_v35 = vpop.f32.mrf.mxu1  ;;  %1523 = vmatprep.mubr.f32.mxu0 %v18501_v14 }
 0x129   : > { %v502_v40 = vpop.f32.mrf.mxu0  ;;  %v12486_v6 = vadd.f32 %v1013_v35, %v480_v18 }
 0x12a   : > { %v1018_v30 = vpop.f32.mrf.mxu1  ;;  %1891 = vmatmul.mubr.f32.gmra.mxu1 %v18677_v24 }
 0x12b   : > { %18676 = vst [vmem:[#allocation39_spill] sm:$0xff] %v12486_v6  ;;  %v511_v33 = vpop.f32.mrf.mxu0  ;;  %v12490_v62 = vadd.f32 %v1018_v30, %v489_v23  ;;  %1526 = vmatmul.mubr.f32.gmra.mxu0 %v12161_v51  ;;  %1896 = vmatprep.mubr.f32.mxu1 %v18501_v14 }
 0x12c   : > { %v1020_v36 = vpop.f32.mrf.mxu1  ;;  %1531 = vmatprep.mubr.f32.mxu0 %v18501_v14 }
 0x12d   : > { %v513_v4 = vpop.f32.mrf.mxu0  ;;  %v12495_v5 = vadd.f32 %v1020_v36, %v491_v29 }
 0x12e   : > { %v1025_v46 = vpop.f32.mrf.mxu1  ;;  %1900 = vmatmul.mubr.f32.gmra.mxu1 %v18679_v49 }
 0x12f   : > { %18678 = vst [vmem:[#allocation42_spill] sm:$0xff] %v12495_v5  ;;  %v522_v10 = vpop.f32.mrf.mxu0  ;;  %v12499_v20 = vadd.f32 %v1025_v46, %v500_v9  ;;  %1534 = vmatmul.mubr.f32.gmra.mxu0 %v12176_v42  ;;  %1905 = vmatprep.mubr.f32.mxu1 %v18501_v14  ;;  %v18684_v9 = vand.u32 4294901760, %v12186_v57 }
 0x130   : > { %v1027_v1 = vpop.f32.mrf.mxu1  ;;  %1539 = vmatprep.mubr.f32.mxu0 %v18501_v14 }
 0x131   : > { %v524_v59 = vpop.f32.mrf.mxu0  ;;  %v12504_v12 = vadd.f32 %v1027_v1, %v502_v40 }
 0x132   : > { %v1032_v16 = vpop.f32.mrf.mxu1  ;;  %1909 = vmatmul.mubr.f32.gmra.mxu1 %v683_v56  ;;  %v18682_v56 = vld [vmem:[#allocation29_spill] sm:$0xff] }
 0x133   : > { %18680 = vst [vmem:[#allocation44_spill] sm:$0xff] %v12504_v12  ;;  %v533_v53 = vpop.f32.mrf.mxu0  ;;  %v12508_v27 = vadd.f32 %v1032_v16, %v511_v33  ;;  %1542 = vmatmul.mubr.f32.gmra.mxu0 %v12186_v57  ;;  %1914 = vmatprep.mubr.f32.mxu1 %v18501_v14  ;;  %v18687_v57 = vld [vmem:[#allocation36_spill] sm:$0xff] }
 0x134   : > { %v1034_v37 = vpop.f32.mrf.mxu1  ;;  %2093 = vmatprep.mubr.f32.mxu0 %v18501_v14 }
 0x135   : > { %v535_v18 = vpop.f32.mrf.mxu0  ;;  %v12513_v43 = vadd.f32 %v1034_v37, %v513_v4 }
 0x136   : > { %v1039_v50 = vpop.f32.mrf.mxu1  ;;  %1918 = vmatmul.mubr.f32.gmra.mxu1 %v694_v3  ;;  %v18685_v3 = vld [vmem:[#allocation32_spill] sm:$0xff] }
 0x137   : > { %18681 = vst [vmem:[#allocation45_spill] sm:$0xff] %v12513_v43  ;;  %v544_v23 = vpop.f32.mrf.mxu0  ;;  %v12517_v51 = vadd.f32 %v1039_v50, %v522_v10  ;;  %2095 = vmatmul.mubr.f32.vlgmr.msra.gmra.mxu0 %v18682_v56  ;;  %1923 = vmatprep.mubr.f32.mxu1 %v18501_v14 }
 0x138   : > { %v1041_v48 = vpop.f32.mrf.mxu1  ;;  %2100 = vmatprep.mubr.f32.mxu0 %v18501_v14 }
 0x139   : > { %v546_v29 = vpop.f32.mrf.mxu0  ;;  %v12522_v63 = vadd.f32 %v1041_v48, %v524_v59 }
 0x13a   : > { %v1046_v31 = vpop.f32.mrf.mxu1  ;;  %1927 = vmatmul.mubr.f32.gmra.mxu1 %v18684_v9 }
 0x13b   : > { %18683 = vst [vmem:[#allocation3_spill] sm:$0xff] %v12522_v63  ;;  %v555_v35 = vpop.f32.mrf.mxu0  ;;  %v12526_v42 = vadd.f32 %v1046_v31, %v533_v53  ;;  %2102 = vmatmul.mubr.f32.gmra.mxu0 %v18685_v3  ;;  %2414 = vmatprep.mubr.f32.mxu1 %v18501_v14  ;;  %v18689_v53 = vld [vmem:[#allocation37_spill] sm:$0xff] }
 0x13c   : > { %v1048_v40 = vpop.f32.mrf.mxu1  ;;  %2107 = vmatprep.mubr.f32.mxu0 %v18501_v14 }
 0x13d   : > { %v557_v30 = vpop.f32.mrf.mxu0  ;;  %v12531_v24 = vadd.f32 %v1048_v40, %v535_v18 }
 0x13e   : > { %v1053_v33 = vpop.f32.mrf.mxu1  ;;  %2416 = vmatmul.mubr.f32.vlgmr.msra.gmra.mxu1 %v18682_v56 }
 0x13f   : > { %18686 = vst [vmem:[#allocation19_spill] sm:$0xff] %v12531_v24  ;;  %v566_v36 = vpop.f32.mrf.mxu0  ;;  %v12534_v4 = vadd.f32 %v1053_v33, %v544_v23  ;;  %2109 = vmatmul.mubr.f32.gmra.mxu0 %v18687_v57  ;;  %2421 = vmatprep.mubr.f32.mxu1 %v18501_v14  ;;  %v18693_v33 = vld [vmem:[#allocation40_spill] sm:$0xff] }
 0x140   : > { %v1055_v46 = vpop.f32.mrf.mxu1  ;;  %2114 = vmatprep.mubr.f32.mxu0 %v18501_v14 }
 0x141   : > { %v568_v49 = vpop.f32.mrf.mxu0  ;;  %v12539_v10 = vadd.f32 %v1055_v46, %v546_v29  ;;  %v18691_v29 = vld [vmem:[#allocation38_spill] sm:$0xff] }
 0x142   : > { %v1060_v1 = vpop.f32.mrf.mxu1  ;;  %2423 = vmatmul.mubr.f32.gmra.mxu1 %v18685_v3 }
 0x143   : > { %18688 = vst [vmem:[#allocation48_spill] sm:$0xff] %v12539_v10  ;;  %v577_v59 = vpop.f32.mrf.mxu0  ;;  %v12542_v16 = vadd.f32 %v1060_v1, %v555_v35  ;;  %2116 = vmatmul.mubr.f32.gmra.mxu0 %v18689_v53  ;;  %2428 = vmatprep.mubr.f32.mxu1 %v18501_v14 }
 0x144   : > { %v1062_v37 = vpop.f32.mrf.mxu1  ;;  %2121 = vmatprep.mubr.f32.mxu0 %v18501_v14 }
 0x145   : > { %v579_v18 = vpop.f32.mrf.mxu0  ;;  %v12547_v50 = vadd.f32 %v1062_v37, %v557_v30 }
 0x146   : > { %v1067_v23 = vpop.f32.mrf.mxu1  ;;  %2430 = vmatmul.mubr.f32.gmra.mxu1 %v18687_v57 }
 0x147   : > { %18690 = vst [vmem:[#allocation4_spill] sm:$0xff] %v12547_v50  ;;  %v588_v56 = vpop.f32.mrf.mxu0  ;;  %v12550_v48 = vadd.f32 %v1067_v23, %v566_v36  ;;  %2123 = vmatmul.mubr.f32.gmra.mxu0 %v18691_v29  ;;  %2435 = vmatprep.mubr.f32.mxu1 %v18501_v14 }
 0x148   : > { %v1069_v31 = vpop.f32.mrf.mxu1  ;;  %2128 = vmatprep.mubr.f32.mxu0 %v18501_v14 }
 0x149   : > { %v590_v9 = vpop.f32.mrf.mxu0  ;;  %v12555_v35 = vadd.f32 %v1069_v31, %v568_v49 }
 0x14a   : > { %v1074_v3 = vpop.f32.mrf.mxu1  ;;  %2437 = vmatmul.mubr.f32.gmra.mxu1 %v18689_v53  ;;  %v18696_v53 = vld [vmem:[#allocation41_spill] sm:$0xff] }
 0x14b   : > { %18692 = vst [vmem:[#allocation5_spill] sm:$0xff] %v12555_v35  ;;  %v599_v40 = vpop.f32.mrf.mxu0  ;;  %v12558_v30 = vadd.f32 %v1074_v3, %v577_v59  ;;  %2130 = vmatmul.mubr.f32.gmra.mxu0 %v18693_v33  ;;  %2442 = vmatprep.mubr.f32.mxu1 %v18501_v14 }
 0x14c   : > { %v1076_v36 = vpop.f32.mrf.mxu1  ;;  %2135 = vmatprep.mubr.f32.mxu0 %v18501_v14 }
 0x14d   : > { %v601_v57 = vpop.f32.mrf.mxu0  ;;  %v12563_v46 = vadd.f32 %v1076_v36, %v579_v18 }
 0x14e   : > { %v1081_v1 = vpop.f32.mrf.mxu1  ;;  %2444 = vmatmul.mubr.f32.gmra.mxu1 %v18691_v29  ;;  %v18699_v29 = vld [vmem:[#allocation43_spill] sm:$0xff] }
 0x14f   : > { %18694 = vst [vmem:[#allocation21_spill] sm:$0xff] %v12563_v46  ;;  %v610_v49 = vpop.f32.mrf.mxu0  ;;  %v12566_v37 = vadd.f32 %v1081_v1, %v588_v56  ;;  %2137 = vmatmul.mubr.f32.gmra.mxu0 %v18696_v53  ;;  %2449 = vmatprep.mubr.f32.mxu1 %v18501_v14  ;;  %v2823_v1 = vld [vmem:[%s17636_s3 + $0x78] sm:$0xff] }
 0x150   : > { %v1083_v59 = vpop.f32.mrf.mxu1  ;;  %2142 = vmatprep.mubr.f32.mxu0 %v18501_v14 }
 0x151   : > { %18695 = vst [vmem:[#allocation49_spill] sm:$0xff] %v12566_v37  ;;  %v612_v23 = vpop.f32.mrf.mxu0  ;;  %v12571_v31 = vadd.f32 %v1083_v59, %v590_v9  ;;  %v12584_v59 = vand.u32 4294901760, %v2823_v1 }
 0x152   : > { %v1088_v3 = vpop.f32.mrf.mxu1  ;;  %2451 = vmatmul.mubr.f32.gmra.mxu1 %v18693_v33 }
 0x153   : > { %18697 = vst [vmem:[#allocation6_spill] sm:$0xff] %v12571_v31  ;;  %v621_v18 = vpop.f32.mrf.mxu0  ;;  %v12574_v36 = vadd.f32 %v1088_v3, %v599_v40  ;;  %2144 = vmatmul.mubr.f32.gmra.mxu0 %v18699_v29  ;;  %2456 = vmatprep.mubr.f32.mxu1 %v18501_v14  ;;  %v18702_v31 = vld [vmem:[#allocation46_spill] sm:$0xff]  ;;  %v12592_v35 = vsub.f32 %v2823_v1, %v12584_v59  ;;  %v18706_v1 = vld [vmem:[#allocation47_spill] sm:$0xff] }
 0x154   : > { %v1090_v56 = vpop.f32.mrf.mxu1  ;;  %2149 = vmatprep.mubr.f32.mxu0 %v18501_v14  ;;  %10154 = vmatprep.subr.mxu0 %v12584_v59 }
 0x155   : > { %18698 = vst [vmem:[#allocation7_spill] sm:$0xff] %v12574_v36  ;;  %v623_v46 = vpop.f32.mrf.mxu0  ;;  %v12582_v9 = vadd.f32 %v1090_v56, %v601_v57  ;;  %10155 = vmatpush3.msra.mxu0 %v12584_v59 }
 0x156   : > { %v1095_v33 = vpop.f32.mrf.mxu1  ;;  %2458 = vmatmul.mubr.f32.gmra.mxu1 %v18696_v53 }
 0x157   : > { %18700 = vst [vmem:[#allocation25_spill] sm:$0xff] %v12582_v9  ;;  %v632_v40 = vpop.f32.mrf.mxu0  ;;  %v12587_v3 = vadd.f32 %v1095_v33, %v610_v49  ;;  %2151 = vmatmul.mubr.f32.gmra.mxu0 %v18702_v31  ;;  %2463 = vmatprep.mubr.f32.mxu1 %v18501_v14  ;;  %v12600_v49 = vand.u32 4294901760, %v12592_v35 }
 0x158   : > { %v1097_v50 = vpop.f32.mrf.mxu1  ;;  %2156 = vmatprep.mubr.f32.mxu0 %v18501_v14 }
 0x159   : > { %18701 = vst [vmem:[#allocation52_spill] sm:$0xff] %v12587_v3  ;;  %v634_v57 = vpop.f32.mrf.mxu0  ;;  %v12596_v56 = vadd.f32 %v1097_v50, %v612_v23  ;;  %18704 = vst [vmem:[#allocation28_spill] sm:$0xff] %v12600_v49  ;;  %v3229_v10 = vsub.f32 %v12592_v35, %v12600_v49  ;;  %v2822_v23 = vld [vmem:[%s17636_s3 + $0x70] sm:$0xff]  ;;  %v18710_v49 = vld [vmem:[#allocation50_spill] sm:$0xff] }
 0x15a   : > { %v1102_v53 = vpop.f32.mrf.mxu1  ;;  %2465 = vmatmul.mubr.f32.gmra.mxu1 %v18699_v29  ;;  %v18746_v3 = vld [vmem:[#allocation8_spill] sm:$0xff] }
 0x15b   : > { %18703 = vst [vmem:[#allocation9_spill] sm:$0xff] %v12596_v56  ;;  %v643_v33 = vpop.f32.mrf.mxu0  ;;  %v12603_v9 = vadd.f32 %v1102_v53, %v621_v18  ;;  %2158 = vmatmul.mubr.f32.gmra.mxu0 %v18706_v1  ;;  %2470 = vmatprep.mubr.f32.mxu1 %v18501_v14  ;;  %v3230_v29 = vand.u32 4294901760, %v3229_v10  ;;  %v12615_v18 = vand.u32 4294901760, %v2822_v23 }
 0x15c   : > { %v1104_v50 = vpop.f32.mrf.mxu1  ;;  %2163 = vmatprep.mubr.f32.mxu0 %v18501_v14 }
 0x15d   : > { %18705 = vst [vmem:[#allocation54_spill] sm:$0xff] %v12603_v9  ;;  %v645_v56 = vpop.f32.mrf.mxu0  ;;  %v12613_v24 = vadd.f32 %v1104_v50, %v623_v46  ;;  %18708 = vst [vmem:[#allocation30_spill] sm:$0xff] %v12615_v18  ;;  %v12623_v12 = vsub.f32 %v2822_v23, %v12615_v18  ;;  %10234 = vmatprep.subr.mxu1 %v3230_v29  ;;  %10156 = vmatprep.subr.mxu0 %v12615_v18 }
 0x15e   : > { %v1109_v53 = vpop.f32.mrf.mxu1  ;;  %2472 = vmatmul.mubr.f32.gmra.mxu1 %v18702_v31  ;;  %10157 = vmatpush3.msra.mxu0 %v12615_v18 }
 0x15f   : > { %18707 = vst [vmem:[#allocation11_spill] sm:$0xff] %v12613_v24  ;;  %v654_v63 = vpop.f32.mrf.mxu0  ;;  %v12618_v43 = vadd.f32 %v1109_v53, %v632_v40  ;;  %2165 = vmatmul.mubr.f32.gmra.mxu0 %v18710_v49  ;;  %2477 = vmatprep.mubr.f32.mxu1 %v18501_v14  ;;  %18711 = vst [vmem:[#allocation13_spill] sm:$0xff] %v12623_v12  ;;  %v12630_v31 = vand.u32 4294901760, %v12623_v12  ;;  %v18715_v53 = vld [vmem:[#allocation51_spill] sm:$0xff] }
 0x160   : > { %v1111_v5 = vpop.f32.mrf.mxu1  ;;  %2170 = vmatprep.mubr.f32.mxu0 %v18501_v14  ;;  %10235 = vmatpush3.msra.mxu1 %v3230_v29  ;;  %v2821_v29 = vld [vmem:[%s17636_s3 + $0x68] sm:$0xff] }
 0x161   : > { %18709 = vst [vmem:[#allocation55_spill] sm:$0xff] %v12618_v43  ;;  %v656_v10 = vpop.f32.mrf.mxu0  ;;  %v12626_v46 = vadd.f32 %v1111_v5, %v634_v57  ;;  %18713 = vst [vmem:[#allocation14_spill] sm:$0xff] %v12630_v31  ;;  %v3236_v5 = vsub.f32 %v12623_v12, %v12630_v31  ;;  %v18719_v31 = vld [vmem:[#allocation53_spill] sm:$0xff] }
 0x162   : > { %v1116_v40 = vpop.f32.mrf.mxu1  ;;  %2479 = vmatmul.mubr.f32.gmra.mxu1 %v18706_v1 }
 0x163   : > { %18712 = vst [vmem:[#allocation57_spill] sm:$0xff] %v12626_v46  ;;  %v665_v50 = vpop.f32.mrf.mxu0  ;;  %v12634_v23 = vadd.f32 %v1116_v40, %v643_v33  ;;  %2172 = vmatmul.mubr.f32.gmra.mxu0 %v18715_v53  ;;  %2484 = vmatprep.mubr.f32.mxu1 %v18501_v14  ;;  %v3237_v24 = vand.u32 4294901760, %v3236_v5  ;;  %v12646_v33 = vand.u32 4294901760, %v2821_v29 }
 0x164   : > { %v1118_v57 = vpop.f32.mrf.mxu1  ;;  %2177 = vmatprep.mubr.f32.mxu0 %v18501_v14 }
 0x165   : > { %18714 = vst [vmem:[#allocation15_spill] sm:$0xff] %v12634_v23  ;;  %v667_v1 = vpop.f32.mrf.mxu0  ;;  %v12644_v46 = vadd.f32 %v1118_v57, %v645_v56  ;;  %18717 = vst [vmem:[#allocation58_spill] sm:$0xff] %v12646_v33  ;;  %v12654_v12 = vsub.f32 %v2821_v29, %v12646_v33  ;;  %10236 = vmatprep.subr.mxu1 %v3237_v24  ;;  %10158 = vmatprep.subr.mxu0 %v12646_v33 }
 0x166   : > { %v1123_v40 = vpop.f32.mrf.mxu1  ;;  %2486 = vmatmul.mubr.f32.gmra.mxu1 %v18710_v49  ;;  %10159 = vmatpush3.msra.mxu0 %v12646_v33 }
 0x167   : > { %18716 = vst [vmem:[#allocation34_spill] sm:$0xff] %v12644_v46  ;;  %v676_v18 = vpop.f32.mrf.mxu0  ;;  %v12649_v6 = vadd.f32 %v1123_v40, %v654_v63  ;;  %2179 = vmatmul.mubr.f32.gmra.mxu0 %v18719_v31  ;;  %2491 = vmatprep.mubr.f32.mxu1 %v18501_v14  ;;  %18720 = vst [vmem:[#allocation18_spill] sm:$0xff] %v12654_v12  ;;  %v12661_v63 = vand.u32 4294901760, %v12654_v12  ;;  %v18724_v40 = vld [vmem:[#allocation17_spill] sm:$0xff] }
 0x168   : > { %v1125_v54 = vpop.f32.mrf.mxu1  ;;  %2184 = vmatprep.mubr.f32.mxu0 %v18501_v14  ;;  %10237 = vmatpush3.msra.mxu1 %v3237_v24  ;;  %v2820_v24 = vld [vmem:[%s17636_s3 + $0x60] sm:$0xff] }
 0x169   : > { %18718 = vst [vmem:[#allocation16_spill] sm:$0xff] %v12649_v6  ;;  %v678_v56 = vpop.f32.mrf.mxu0  ;;  %v12657_v5 = vadd.f32 %v1125_v54, %v656_v10  ;;  %18722 = vst [vmem:[#allocation59_spill] sm:$0xff] %v12661_v63  ;;  %v3243_v54 = vsub.f32 %v12654_v12, %v12661_v63 }
 0x16a   : > { %v1130_v49 = vpop.f32.mrf.mxu1  ;;  %2493 = vmatmul.mubr.f32.gmra.mxu1 %v18715_v53  ;;  %v12675_v53 = vand.u32 4294901760, %v2820_v24 }
 0x16b   : > { %18721 = vst [vmem:[#allocation35_spill] sm:$0xff] %v12657_v5  ;;  %v687_v57 = vpop.f32.mrf.mxu0  ;;  %v12665_v29 = vadd.f32 %v1130_v49, %v665_v50  ;;  %2186 = vmatmul.mubr.f32.gmra.mxu0 %v18724_v40  ;;  %2498 = vmatprep.mubr.f32.mxu1 %v18501_v14  ;;  %v3244_v50 = vand.u32 4294901760, %v3243_v54  ;;  %v2819_v49 = vld [vmem:[%s17636_s3 + $0x58] sm:$0xff]  ;;  %v2818_v54 = vld [vmem:[%s17636_s3 + $0x50] sm:$0xff] }
 0x16c   : > { %v1132_v10 = vpop.f32.mrf.mxu1  ;;  %2191 = vmatprep.mubr.f32.mxu0 %v18501_v14  ;;  %18725 = vst [vmem:[#allocation60_spill] sm:$0xff] %v12675_v53  ;;  %10160 = vmatprep.subr.mxu0 %v12675_v53  ;;  %v12685_v63 = vsub.f32 %v2820_v24, %v12675_v53  ;;  %v12687_v12 = vand.u32 4294901760, %v2819_v49 }
 0x16d   : > { %18723 = vst [vmem:[#allocation22_spill] sm:$0xff] %v12665_v29  ;;  %v689_v5 = vpop.f32.mrf.mxu0  ;;  %v12677_v46 = vadd.f32 %v1132_v10, %v667_v1  ;;  %v18730_v1 = vld [vmem:[#allocation56_spill] sm:$0xff]  ;;  %10238 = vmatprep.subr.mxu1 %v3244_v50  ;;  %10161 = vmatpush3.msra.mxu0 %v12675_v53  ;;  %v18738_v53 = vld [vmem:[#allocation23_spill] sm:$0xff] }
 0x16e   : > { %v1137_v33 = vpop.f32.mrf.mxu1  ;;  %2500 = vmatmul.mubr.f32.gmra.mxu1 %v18719_v31  ;;  %18727 = vst [vmem:[#allocation12_spill] sm:$0xff] %v12685_v63  ;;  %18728 = vst [vmem:[#allocation27_spill] sm:$0xff] %v12687_v12  ;;  %v12698_v31 = vand.u32 4294901760, %v12685_v63  ;;  %v12701_v24 = vsub.f32 %v2819_v49, %v12687_v12  ;;  %10162 = vmatprep.subr.mxu0 %v12687_v12 }
 0x16f   : > { %18726 = vst [vmem:[#allocation24_spill] sm:$0xff] %v12677_v46  ;;  %v698_v61 = vpop.f32.mrf.mxu0  ;;  %v12689_v29 = vadd.f32 %v1137_v33, %v676_v18  ;;  %2193 = vmatmul.mubr.f32.gmra.mxu0 %v18730_v1  ;;  %2505 = vmatprep.mubr.f32.mxu1 %v18501_v14  ;;  %v12703_v18 = vand.u32 4294901760, %v2818_v54 }
 0x170   : > { %v1139_v10 = vpop.f32.mrf.mxu1  ;;  %2198 = vmatprep.mubr.f32.mxu0 %v18501_v14  ;;  %18731 = vst [vmem:[#allocation65_spill] sm:$0xff] %v12698_v31  ;;  %18732 = vst [vmem:[#allocation2_spill] sm:$0xff] %v12701_v24  ;;  %10239 = vmatpush3.msra.mxu1 %v3244_v50  ;;  %v3250_v23 = vsub.f32 %v12685_v63, %v12698_v31  ;;  %v12716_v49 = vand.u32 4294901760, %v12701_v24 }
 0x171   : > { %18729 = vst [vmem:[#allocation63_spill] sm:$0xff] %v12689_v29  ;;  %18733 = vst [vmem:[#allocation67_spill] sm:$0xff] %v12703_v18  ;;  %v700_v33 = vpop.f32.mrf.mxu0  ;;  %v12705_v46 = vadd.f32 %v1139_v10, %v678_v56  ;;  %v2817_v29 = vld [vmem:[%s17636_s3 + $0x48] sm:$0xff]  ;;  %v12719_v56 = vsub.f32 %v2818_v54, %v12703_v18  ;;  %10163 = vmatpush3.msra.mxu0 %v12687_v12 }
 0x172   : > { %v1144_v6 = vpop.f32.mrf.mxu1  ;;  %2507 = vmatmul.mubr.f32.gmra.mxu1 %v18724_v40  ;;  %18735 = vst [vmem:[#allocation70_spill] sm:$0xff] %v12716_v49  ;;  %v12721_v50 = vand.u32 4294901760, %v2817_v29  ;;  %v2816_v40 = vld [vmem:[%s17636_s3 + $0x40] sm:$0xff]  ;;  %v3251_v63 = vand.u32 4294901760, %v3250_v23  ;;  %v3257_v54 = vsub.f32 %v12701_v24, %v12716_v49  ;;  %10164 = vmatprep.subr.mxu0 %v12703_v18  ;;  %v2815_v23 = vld [vmem:[%s17636_s3 + $0x38] sm:$0xff] }
 0x173   : > { %18734 = vst [vmem:[#allocation69_spill] sm:$0xff] %v12705_v46  ;;  %18736 = vst [vmem:[#allocation71_spill] sm:$0xff] %v12719_v56  ;;  %v709_v10 = vpop.f32.mrf.mxu0  ;;  %v12723_v46 = vadd.f32 %v1144_v6, %v687_v57  ;;  %2200 = vmatmul.mubr.f32.gmra.mxu0 %v18738_v53  ;;  %2512 = vmatprep.mubr.f32.mxu1 %v18501_v14  ;;  %v12735_v6 = vand.u32 4294901760, %v12719_v56  ;;  %v12743_v9 = vand.u32 4294901760, %v2816_v40 }
 0x174   : > { %v1146_v31 = vpop.f32.mrf.mxu1  ;;  %2205 = vmatprep.mubr.f32.mxu0 %v18501_v14  ;;  %v12738_v57 = vsub.f32 %v2817_v29, %v12721_v50  ;;  %10240 = vmatprep.subr.mxu1 %v3251_v63  ;;  %v3258_v49 = vand.u32 4294901760, %v3257_v54 }
 0x175   : > { %18737 = vst [vmem:[#allocation72_spill] sm:$0xff] %v12723_v46  ;;  %18739 = vst [vmem:[#allocation29_spill] sm:$0xff] %v12735_v6  ;;  %v711_v46 = vpop.f32.mrf.mxu0  ;;  %v12740_v43 = vadd.f32 %v1146_v31, %v689_v5  ;;  %v3264_v29 = vsub.f32 %v12719_v56, %v12735_v6  ;;  %v12754_v5 = vand.u32 4294901760, %v2815_v23  ;;  %v12761_v36 = vsub.f32 %v2816_v40, %v12743_v9 }
 0x176   : > { %18740 = vst [vmem:[#allocation32_spill] sm:$0xff] %v12738_v57  ;;  %18742 = vst [vmem:[#allocation37_spill] sm:$0xff] %v12743_v9  ;;  %v1151_v12 = vpop.f32.mrf.mxu1  ;;  %2514 = vmatmul.mubr.f32.gmra.mxu1 %v18730_v1  ;;  %v12752_v24 = vand.u32 4294901760, %v12738_v57  ;;  %v2814_v1 = vld [vmem:[%s17636_s3 + $0x30] sm:$0xff]  ;;  %10165 = vmatpush3.msra.mxu0 %v12703_v18 }
 0x177   : > { %18741 = vst [vmem:[#allocation36_spill] sm:$0xff] %v12740_v43  ;;  %18744 = vst [vmem:[#allocation40_spill] sm:$0xff] %v12754_v5  ;;  %v12756_v31 = vadd.f32 %v1151_v12, %v698_v61  ;;  %v1295_v43 = vpop.f32.mrf.mxu0  ;;  %2207 = vmatmul.mubr.f32.gmra.mxu0 %v18746_v3  ;;  %2519 = vmatprep.mubr.f32.mxu1 %v18501_v14  ;;  %v12771_v12 = vsub.f32 %v2815_v23, %v12754_v5  ;;  %v12777_v37 = vand.u32 4294901760, %v12761_v36 }
 0x178   : > { %18743 = vst [vmem:[#allocation38_spill] sm:$0xff] %v12752_v24  ;;  %18747 = vst [vmem:[#allocation43_spill] sm:$0xff] %v12761_v36  ;;  %v1296_v54 = vadd.f32 %v1295_v43, %v12391_v32  ;;  %v1153_v6 = vpop.f32.mrf.mxu1  ;;  %2212 = vmatprep.mubr.f32.mxu0 %v18501_v14  ;;  %10241 = vmatpush3.msra.mxu1 %v3251_v63  ;;  %v3271_v61 = vsub.f32 %v12738_v57, %v12752_v24  ;;  %v12779_v32 = vand.u32 4294901760, %v2814_v1 }
 0x179   : > { %18745 = vst [vmem:[#allocation41_spill] sm:$0xff] %v12756_v31  ;;  %18748 = vst [vmem:[#allocation46_spill] sm:$0xff] %v12771_v12  ;;  %v12773_v56 = vadd.f32 %v1153_v6, %v700_v33  ;;  %v1297_v40 = vpop.f32.mrf.mxu0  ;;  %10242 = vmatprep.subr.mxu1 %v3258_v49  ;;  %v3265_v31 = vand.u32 4294901760, %v3264_v29  ;;  %10166 = vmatprep.subr.mxu0 %v12721_v50  ;;  %v2813_v33 = vld [vmem:[%s17636_s3 + $0x28] sm:$0xff]  ;;  %v18752_v29 = vld [vmem:[#allocation10_spill] sm:$0xff] }
 0x17a   : > { %18750 = vst [vmem:[#allocation50_spill] sm:$0xff] %v12777_v37  ;;  %18751 = vst [vmem:[#allocation51_spill] sm:$0xff] %v12779_v32  ;;  %v1298_v43 = vadd.f32 %v1297_v40, %v12396_v41  ;;  %v1158_v63 = vpop.f32.mrf.mxu1  ;;  %2521 = vmatmul.mubr.f32.gmra.mxu1 %v18738_v53  ;;  %v3272_v41 = vand.u32 4294901760, %v3271_v61  ;;  %v12794_v53 = vand.u32 4294901760, %v12771_v12  ;;  %v12803_v18 = vand.u32 4294901760, %v2813_v33  ;;  %10167 = vmatpush3.msra.mxu0 %v12721_v50 }
 0x17b   : > { %18749 = vst [vmem:[#allocation47_spill] sm:$0xff] %v12773_v56  ;;  %v12787_v6 = vadd.f32 %v1158_v63, %v709_v10  ;;  %v1303_v23 = vpop.f32.mrf.mxu0  ;;  %2214 = vmatmul.mubr.f32.gmra.mxu0 %v18752_v29  ;;  %2526 = vmatprep.mubr.f32.mxu1 %v18501_v14  ;;  %v3278_v10 = vsub.f32 %v12761_v36, %v12777_v37 }
 0x17c   : > { %v1304_v24 = vadd.f32 %v1303_v23, %v12400_v60  ;;  %v1160_v56 = vpop.f32.mrf.mxu1  ;;  %2219 = vmatprep.mubr.f32.mxu0 %v18501_v14  ;;  %10243 = vmatpush3.msra.mxu1 %v3258_v49  ;;  %18753 = vst [vmem:[#allocation53_spill] sm:$0xff] %v12794_v53  ;;  %v12801_v63 = vsub.f32 %v2814_v1, %v12779_v32  ;;  %18756 = vst [vmem:[#allocation23_spill] sm:$0xff] %v12803_v18  ;;  %v2812_v60 = vld [vmem:[%s17636_s3 + $0x20] sm:$0xff]  ;;  %v18757_v1 = vld [vmem:[#allocation61_spill] sm:$0xff] }
 0x17d   : > { %v12796_v40 = vadd.f32 %v1160_v56, %v711_v46  ;;  %v1305_v57 = vpop.f32.mrf.mxu0  ;;  %10244 = vmatprep.subr.mxu1 %v3265_v31  ;;  %10168 = vmatprep.subr.mxu0 %v12743_v9  ;;  %v12828_v36 = vsub.f32 %v2813_v33, %v12803_v18 }
 0x17e   : > { %18755 = vst [vmem:[#allocation56_spill] sm:$0xff] %v12801_v63  ;;  %v1306_v49 = vadd.f32 %v1305_v57, %v12405_v11  ;;  %v1649_v46 = vpop.f32.mrf.mxu1  ;;  %2528 = vmatmul.mubr.f32.gmra.mxu1 %v18746_v3  ;;  %v3285_v11 = vsub.f32 %v12771_v12, %v12794_v53  ;;  %v12820_v57 = vand.u32 4294901760, %v2812_v60  ;;  %10169 = vmatpush3.msra.mxu0 %v12743_v9 }
 0x17f   : > { %18754 = vst [vmem:[#allocation17_spill] sm:$0xff] %v12796_v40  ;;  %v1311_v56 = vpop.f32.mrf.mxu0  ;;  %v12812_v61 = vadd.f32 %v1649_v46, %v1296_v54  ;;  %2221 = vmatmul.mubr.f32.gmra.mxu0 %v18757_v1  ;;  %2533 = vmatprep.mubr.f32.mxu1 %v18501_v14  ;;  %v3279_v54 = vand.u32 4294901760, %v3278_v10  ;;  %v12825_v46 = vand.u32 4294901760, %v12801_v63  ;;  %18760 = vst [vmem:[#allocation61_spill] sm:$0xff] %v12828_v36  ;;  %v18761_v10 = vld [vmem:[#allocation62_spill] sm:$0xff]  ;;  %v12853_v9 = vand.u32 4294901760, %v12828_v36 }
 0x180   : > { %v1312_v23 = vadd.f32 %v1311_v56, %v12409_v58  ;;  %v1651_v37 = vpop.f32.mrf.mxu1  ;;  %2226 = vmatprep.mubr.f32.mxu0 %v18501_v14  ;;  %10245 = vmatpush3.msra.mxu1 %v3265_v31  ;;  %18758 = vst [vmem:[#allocation8_spill] sm:$0xff] %v12820_v57  ;;  %v2811_v58 = vld [vmem:[%s17636_s3 + $0x18] sm:$0xff] }
 0x181   : > { %v1313_v3 = vpop.f32.mrf.mxu0  ;;  %v12822_v40 = vadd.f32 %v1651_v37, %v1298_v43  ;;  %10246 = vmatprep.subr.mxu1 %v3272_v41  ;;  %18759 = vst [vmem:[#allocation10_spill] sm:$0xff] %v12825_v46  ;;  %10170 = vmatprep.subr.mxu0 %v12754_v5  ;;  %18764 = vst [vmem:[#allocation74_spill] sm:$0xff] %v12853_v9 }
 0x182   : > { %v1314_v31 = vadd.f32 %v1313_v3, %v12414_v44  ;;  %v1658_v56 = vpop.f32.mrf.mxu1  ;;  %2535 = vmatmul.mubr.f32.gmra.mxu1 %v18752_v29  ;;  %v12844_v44 = vsub.f32 %v2812_v60, %v12820_v57  ;;  %v12846_v3 = vand.u32 4294901760, %v2811_v58  ;;  %10171 = vmatpush3.msra.mxu0 %v12754_v5 }
 0x183   : > { %v1319_v37 = vpop.f32.mrf.mxu0  ;;  %v12837_v43 = vadd.f32 %v1658_v56, %v1304_v24  ;;  %2228 = vmatmul.mubr.f32.gmra.mxu0 %v18761_v10  ;;  %2540 = vmatprep.mubr.f32.mxu1 %v18501_v14  ;;  %v3286_v24 = vand.u32 4294901760, %v3285_v11  ;;  %v3292_v56 = vsub.f32 %v12801_v63, %v12825_v46  ;;  %v18765_v11 = vld [vmem:[#allocation64_spill] sm:$0xff] }
 0x184   : > { %v1320_v33 = vadd.f32 %v1319_v37, %v12418_v17  ;;  %v1660_v53 = vpop.f32.mrf.mxu1  ;;  %2233 = vmatprep.mubr.f32.mxu0 %v18501_v14  ;;  %10247 = vmatpush3.msra.mxu1 %v3272_v41  ;;  %18762 = vst [vmem:[#allocation62_spill] sm:$0xff] %v12844_v44  ;;  %18763 = vst [vmem:[#allocation73_spill] sm:$0xff] %v12846_v3 }
 0x185   : > { %v1321_v29 = vpop.f32.mrf.mxu0  ;;  %v12848_v12 = vadd.f32 %v1660_v53, %v1306_v49  ;;  %10248 = vmatprep.subr.mxu1 %v3279_v54  ;;  %10172 = vmatprep.subr.mxu0 %v12779_v32  ;;  %v2810_v53 = vld [vmem:[%s17636_s3 + $0x10] sm:$0xff] }
 0x186   : > { %v1322_v17 = vadd.f32 %v1321_v29, %v12423_v0  ;;  %v1667_v41 = vpop.f32.mrf.mxu1  ;;  %2542 = vmatmul.mubr.f32.gmra.mxu1 %v18757_v1  ;;  %v12869_v0 = vand.u32 4294901760, %v12844_v44  ;;  %v12872_v1 = vsub.f32 %v2811_v58, %v12846_v3  ;;  %v12878_v5 = vand.u32 4294901760, %v2810_v53  ;;  %10173 = vmatpush3.msra.mxu0 %v12779_v32 }
 0x187   : > { %v1327_v60 = vpop.f32.mrf.mxu0  ;;  %v12862_v49 = vadd.f32 %v1667_v41, %v1312_v23  ;;  %2235 = vmatmul.mubr.f32.gmra.mxu0 %v18765_v11  ;;  %2547 = vmatprep.mubr.f32.mxu1 %v18501_v14  ;;  %v3293_v23 = vand.u32 4294901760, %v3292_v56  ;;  %v3299_v41 = vsub.f32 %v12828_v36, %v12853_v9  ;;  %v18769_v56 = vld [vmem:[#allocation20_spill] sm:$0xff] }
 0x188   : > { %v1328_v37 = vadd.f32 %v1327_v60, %v12427_v22  ;;  %v1669_v46 = vpop.f32.mrf.mxu1  ;;  %2240 = vmatprep.mubr.f32.mxu0 %v18501_v14  ;;  %10249 = vmatpush3.msra.mxu1 %v3279_v54  ;;  %18766 = vst [vmem:[#allocation64_spill] sm:$0xff] %v12869_v0  ;;  %18767 = vst [vmem:[#allocation75_spill] sm:$0xff] %v12872_v1 }
 0x189   : > { %v1329_v29 = vpop.f32.mrf.mxu0  ;;  %v12874_v63 = vadd.f32 %v1669_v46, %v1314_v31  ;;  %10250 = vmatprep.subr.mxu1 %v3286_v24  ;;  %18768 = vst [vmem:[#allocation76_spill] sm:$0xff] %v12878_v5  ;;  %10174 = vmatprep.subr.mxu0 %v12803_v18  ;;  %v2809_v46 = vld [vmem:[%s17636_s3 + $0x8] sm:$0xff] }
 0x18a   : > { %v1330_v22 = vadd.f32 %v1329_v29, %v12432_v34  ;;  %v1676_v54 = vpop.f32.mrf.mxu1  ;;  %2549 = vmatmul.mubr.f32.gmra.mxu1 %v18761_v10  ;;  %v3306_v34 = vsub.f32 %v12844_v44, %v12869_v0  ;;  %v12896_v10 = vand.u32 4294901760, %v12872_v1  ;;  %v12903_v32 = vand.u32 4294901760, %v2809_v46  ;;  %10175 = vmatpush3.msra.mxu0 %v12803_v18 }
 0x18b   : > { %v1335_v58 = vpop.f32.mrf.mxu0  ;;  %v12887_v31 = vadd.f32 %v1676_v54, %v1320_v33  ;;  %2242 = vmatmul.mubr.f32.gmra.mxu0 %v18769_v56  ;;  %2554 = vmatprep.mubr.f32.mxu1 %v18501_v14  ;;  %v3300_v33 = vand.u32 4294901760, %v3299_v41  ;;  %v12901_v54 = vsub.f32 %v2810_v53, %v12878_v5  ;;  %v18773_v53 = vld [vmem:[#allocation26_spill] sm:$0xff] }
 0x18c   : > { %v1336_v60 = vadd.f32 %v1335_v58, %v12436_v15  ;;  %v1678_v9 = vpop.f32.mrf.mxu1  ;;  %2247 = vmatprep.mubr.f32.mxu0 %v18501_v14  ;;  %10251 = vmatpush3.msra.mxu1 %v3286_v24  ;;  %18770 = vst [vmem:[#allocation20_spill] sm:$0xff] %v12896_v10  ;;  %18772 = vst [vmem:[#allocation78_spill] sm:$0xff] %v12903_v32 }
 0x18d   : > { %v1337_v29 = vpop.f32.mrf.mxu0  ;;  %v12898_v36 = vadd.f32 %v1678_v9, %v1322_v17  ;;  %10252 = vmatprep.subr.mxu1 %v3293_v23  ;;  %18771 = vst [vmem:[#allocation77_spill] sm:$0xff] %v12901_v54  ;;  %10176 = vmatprep.subr.mxu0 %v12820_v57  ;;  %v2808_v9 = vld [vmem:[%s17636_s3] sm:$0xff] }
 0x18e   : > { %v1338_v15 = vadd.f32 %v1337_v29, %v12441_v45  ;;  %v1685_v24 = vpop.f32.mrf.mxu1  ;;  %2556 = vmatmul.mubr.f32.gmra.mxu1 %v18765_v11  ;;  %v3307_v45 = vand.u32 4294901760, %v3306_v34  ;;  %v3313_v11 = vsub.f32 %v12872_v1, %v12896_v10  ;;  %v12928_v18 = vand.u32 4294901760, %v2808_v9  ;;  %10177 = vmatpush3.msra.mxu0 %v12820_v57  ;;  %v18777_v34 = vld [vmem:[#allocation66_spill] sm:$0xff] }
 0x18f   : > { %v1343_v17 = vpop.f32.mrf.mxu0  ;;  %v12912_v41 = vadd.f32 %v1685_v24, %v1328_v37  ;;  %2249 = vmatmul.mubr.f32.gmra.mxu0 %v18773_v53  ;;  %2561 = vmatprep.mubr.f32.mxu1 %v18501_v14  ;;  %v12923_v37 = vand.u32 4294901760, %v12901_v54  ;;  %v12926_v24 = vsub.f32 %v2809_v46, %v12903_v32 }
 0x190   : > { %v1344_v58 = vadd.f32 %v1343_v17, %v12445_v26  ;;  %v1687_v0 = vpop.f32.mrf.mxu1  ;;  %2254 = vmatprep.mubr.f32.mxu0 %v18501_v14  ;;  %10253 = vmatpush3.msra.mxu1 %v3293_v23  ;;  %18776 = vst [vmem:[#allocation80_spill] sm:$0xff] %v12928_v18  ;;  %v3314_v10 = vand.u32 4294901760, %v3313_v11  ;;  %v18780_v11 = vld [vmem:[#allocation68_spill] sm:$0xff] }
 0x191   : > { %v1345_v29 = vpop.f32.mrf.mxu0  ;;  %v12920_v44 = vadd.f32 %v1687_v0, %v1330_v22  ;;  %10254 = vmatprep.subr.mxu1 %v3300_v33  ;;  %18774 = vst [vmem:[#allocation26_spill] sm:$0xff] %v12923_v37  ;;  %18775 = vst [vmem:[#allocation79_spill] sm:$0xff] %v12926_v24  ;;  %10178 = vmatprep.subr.mxu0 %v12846_v3 }
 0x192   : > { %v1346_v26 = vadd.f32 %v1345_v29, %v12450_v55  ;;  %v1694_v23 = vpop.f32.mrf.mxu1  ;;  %2563 = vmatmul.mubr.f32.gmra.mxu1 %v18769_v56  ;;  %v3320_v56 = vsub.f32 %v12901_v54, %v12923_v37  ;;  %10179 = vmatpush3.msra.mxu0 %v12846_v3 }
 0x193   : > { %v1351_v0 = vpop.f32.mrf.mxu0  ;;  %v12934_v22 = vadd.f32 %v1694_v23, %v1336_v60  ;;  %2256 = vmatmul.mubr.f32.gmra.mxu0 %v18777_v34  ;;  %2568 = vmatprep.mubr.f32.mxu1 %v18501_v14  ;;  %v12945_v60 = vand.u32 4294901760, %v12926_v24  ;;  %v12948_v23 = vsub.f32 %v2808_v9, %v12928_v18 }
 0x194   : > { %v1352_v46 = vadd.f32 %v1351_v0, %v12454_v47  ;;  %v1696_v17 = vpop.f32.mrf.mxu1  ;;  %2261 = vmatprep.mubr.f32.mxu0 %v18501_v14  ;;  %10255 = vmatpush3.msra.mxu1 %v3300_v33 }
 0x195   : > { %v1353_v55 = vpop.f32.mrf.mxu0  ;;  %v12940_v29 = vadd.f32 %v1696_v17, %v1338_v15  ;;  %10256 = vmatprep.subr.mxu1 %v3307_v45  ;;  %18778 = vst [vmem:[#allocation66_spill] sm:$0xff] %v12945_v60  ;;  %18779 = vst [vmem:[#allocation81_spill] sm:$0xff] %v12948_v23  ;;  %10180 = vmatprep.subr.mxu0 %v12878_v5 }
 0x196   : > { %v1354_v47 = vadd.f32 %v1353_v55, %v12459_v13  ;;  %v1703_v0 = vpop.f32.mrf.mxu1  ;;  %2570 = vmatmul.mubr.f32.gmra.mxu1 %v18773_v53  ;;  %v3321_v53 = vand.u32 4294901760, %v3320_v56  ;;  %v12967_v55 = vand.u32 4294901760, %v12948_v23  ;;  %10181 = vmatpush3.msra.mxu0 %v12878_v5 }
 0x197   : > { %v1359_v33 = vpop.f32.mrf.mxu0  ;;  %v12954_v15 = vadd.f32 %v1703_v0, %v1344_v58  ;;  %2263 = vmatmul.mubr.f32.gmra.mxu0 %v18780_v11  ;;  %2575 = vmatprep.mubr.f32.mxu1 %v18501_v14  ;;  %v3327_v58 = vsub.f32 %v12926_v24, %v12945_v60 }
 0x198   : > { %v1360_v17 = vadd.f32 %v1359_v33, %v12463_v28  ;;  %v1705_v9 = vpop.f32.mrf.mxu1  ;;  %2268 = vmatprep.mubr.f32.mxu0 %v18501_v14  ;;  %10257 = vmatpush3.msra.mxu1 %v3307_v45  ;;  %18781 = vst [vmem:[#allocation68_spill] sm:$0xff] %v12967_v55 }
 0x199   : > { %v12960_v37 = vpop.f32.mrf.mxu0  ;;  %v12962_v13 = vadd.f32 %v1705_v9, %v1346_v26  ;;  %10258 = vmatprep.subr.mxu1 %v3314_v10  ;;  %10182 = vmatprep.subr.mxu0 %v12903_v32 }
 0x19a   : > { %v1712_v0 = vpop.f32.mrf.mxu1  ;;  %2577 = vmatmul.mubr.f32.gmra.mxu1 %v18777_v34  ;;  %v3328_v34 = vand.u32 4294901760, %v3327_v58  ;;  %10183 = vmatpush3.msra.mxu0 %v12903_v32 }
 0x19b   : > { %v1367_v28 = vpop.f32.mrf.mxu0  ;;  %v12972_v45 = vadd.f32 %v1712_v0, %v1352_v46  ;;  %2270 = vmatmul.mubr.f32.gmra.mxu0 %v12090_v21  ;;  %2582 = vmatprep.mubr.f32.mxu1 %v18501_v14  ;;  %v3334_v46 = vsub.f32 %v12948_v23, %v12967_v55 }
 0x19c   : > { %v1368_v26 = vadd.f32 %v1367_v28, %v12472_v25  ;;  %v1714_v56 = vpop.f32.mrf.mxu1  ;;  %2275 = vmatprep.mubr.f32.mxu0 %v18501_v14  ;;  %10259 = vmatpush3.msra.mxu1 %v3314_v10 }
 0x19d   : > { %v12978_v33 = vpop.f32.mrf.mxu0  ;;  %v12980_v9 = vadd.f32 %v1714_v56, %v1354_v47  ;;  %10260 = vmatprep.subr.mxu1 %v3321_v53  ;;  %10184 = vmatprep.subr.mxu0 %v12928_v18 }
 0x19e   : > { %v1721_v0 = vpop.f32.mrf.mxu1  ;;  %2584 = vmatmul.mubr.f32.gmra.mxu1 %v18780_v11  ;;  %v3335_v11 = vand.u32 4294901760, %v3334_v46  ;;  %10185 = vmatpush3.msra.mxu0 %v12928_v18 }
 0x19f   : > { %v1375_v25 = vpop.f32.mrf.mxu0  ;;  %v12987_v28 = vadd.f32 %v1721_v0, %v1360_v17  ;;  %2277 = vmatmul.mubr.f32.gmra.mxu0 %v12111_v39  ;;  %2589 = vmatprep.mubr.f32.mxu1 %v18501_v14 }
 0x1a0   : > { %v1376_v10 = vadd.f32 %v1375_v25, %v12481_v52  ;;  %v12992_v47 = vpop.f32.mrf.mxu1  ;;  %2282 = vmatprep.mubr.f32.mxu0 %v18501_v14  ;;  %10261 = vmatpush3.msra.mxu1 %v3321_v53 }
 0x1a1   : > { %v12995_v58 = vpop.f32.mrf.mxu0  ;;  %10262 = vmatprep.subr.mxu1 %v3328_v34  ;;  %10314 = vmatprep.subr.mxu0 %v12592_v35 }
 0x1a2   : > { %v1730_v56 = vpop.f32.mrf.mxu1  ;;  %2591 = vmatmul.mubr.f32.gmra.mxu1 %v12090_v21 }
 0x1a3   : > { %v1383_v17 = vpop.f32.mrf.mxu0  ;;  %v13000_v0 = vadd.f32 %v1730_v56, %v1368_v26  ;;  %2284 = vmatmul.mubr.f32.gmra.mxu0 %v12116_v38  ;;  %2596 = vmatprep.mubr.f32.mxu1 %v18501_v14 }
 0x1a4   : > { %v1384_v52 = vadd.f32 %v1383_v17, %v12490_v62  ;;  %v13005_v53 = vpop.f32.mrf.mxu1  ;;  %2289 = vmatprep.mubr.f32.mxu0 %v18501_v14  ;;  %10263 = vmatpush3.msra.mxu1 %v3328_v34 }
 0x1a5   : > { %v13008_v46 = vpop.f32.mrf.mxu0  ;;  %10264 = vmatprep.subr.mxu1 %v3335_v11 }
 0x1a6   : > { %v1739_v21 = vpop.f32.mrf.mxu1  ;;  %2598 = vmatmul.mubr.f32.gmra.mxu1 %v12111_v39 }
 0x1a7   : > { %v1391_v25 = vpop.f32.mrf.mxu0  ;;  %v13011_v26 = vadd.f32 %v1739_v21, %v1376_v10  ;;  %2291 = vmatmul.mubr.f32.gmra.mxu0 %v12129_v19  ;;  %2603 = vmatprep.mubr.f32.mxu1 %v18501_v14 }
 0x1a8   : > { %v1392_v62 = vadd.f32 %v1391_v25, %v12499_v20  ;;  %v13016_v56 = vpop.f32.mrf.mxu1  ;;  %2296 = vmatprep.mubr.f32.mxu0 %v18501_v14  ;;  %10265 = vmatpush3.msra.mxu1 %v3335_v11 }
 0x1a9   : > { %v13019_v34 = vpop.f32.mrf.mxu0  ;;  %10394 = vmatprep.subr.mxu1 %v12584_v59 }
 0x1aa   : > { %v1748_v17 = vpop.f32.mrf.mxu1  ;;  %2605 = vmatmul.mubr.f32.gmra.mxu1 %v12116_v38 }
 0x1ab   : > { %v1399_v39 = vpop.f32.mrf.mxu0  ;;  %v13023_v10 = vadd.f32 %v1748_v17, %v1384_v52  ;;  %2298 = vmatmul.mubr.f32.gmra.mxu0 %v12150_v2  ;;  %2610 = vmatprep.mubr.f32.mxu1 %v18501_v14 }
 0x1ac   : > { %v1400_v20 = vadd.f32 %v1399_v39, %v12508_v27  ;;  %v13028_v21 = vpop.f32.mrf.mxu1  ;;  %2303 = vmatprep.mubr.f32.mxu0 %v18501_v14 }
 0x1ad   : > { %v13031_v11 = vpop.f32.mrf.mxu0 }
 0x1ae   : > { %v1757_v25 = vpop.f32.mrf.mxu1  ;;  %2612 = vmatmul.mubr.f32.gmra.mxu1 %v12129_v19 }
 0x1af   : > { %v1407_v55 = vpop.f32.mrf.mxu0  ;;  %v13034_v38 = vadd.f32 %v1757_v25, %v1392_v62  ;;  %2305 = vmatmul.mubr.f32.gmra.mxu0 %v12163_v8  ;;  %2617 = vmatprep.mubr.f32.mxu1 %v18501_v14 }
 0x1b0   : > { %v1408_v52 = vadd.f32 %v1407_v55, %v12517_v51  ;;  %v13039_v17 = vpop.f32.mrf.mxu1  ;;  %2310 = vmatprep.mubr.f32.mxu0 %v18501_v14 }
 0x1b1   : > { %v13042_v27 = vpop.f32.mrf.mxu0 }
 0x1b2   : > { %v1766_v39 = vpop.f32.mrf.mxu1  ;;  %2619 = vmatmul.mubr.f32.gmra.mxu1 %v12150_v2 }
 0x1b3   : > { %v1415_v60 = vpop.f32.mrf.mxu0  ;;  %v13045_v19 = vadd.f32 %v1766_v39, %v1400_v20  ;;  %2312 = vmatmul.mubr.f32.gmra.mxu0 %v12168_v7  ;;  %2624 = vmatprep.mubr.f32.mxu1 %v18501_v14 }
 0x1b4   : > { %v1416_v62 = vadd.f32 %v1415_v60, %v12526_v42  ;;  %v13050_v25 = vpop.f32.mrf.mxu1 }
 0x1b5   : > { %18782 = vst [vmem:[#allocation82_spill] sm:$0xff] %v13045_v19  ;;  %v13052_v51 = vpop.f32.mrf.mxu0 }
 0x1b6   : > { %v1775_v55 = vpop.f32.mrf.mxu1  ;;  %2626 = vmatmul.mubr.f32.gmra.mxu1 %v12163_v8 }
 0x1b7   : > { %v1423_v23 = vpop.f32.mrf.mxu0  ;;  %v13055_v18 = vadd.f32 %v1775_v55, %v1408_v52  ;;  %2631 = vmatprep.mubr.f32.mxu1 %v18501_v14 }
 0x1b8   : > { %v1424_v2 = vadd.f32 %v1423_v23, %v12534_v4  ;;  %v13059_v20 = vpop.f32.mrf.mxu1 }
 0x1b9   : > { %18783 = vst [vmem:[#allocation83_spill] sm:$0xff] %v13055_v18  ;;  %v13061_v39 = vpop.f32.mrf.mxu0 }
 0x1ba   : > { %v1784_v24 = vpop.f32.mrf.mxu1  ;;  %2633 = vmatmul.mubr.f32.gmra.mxu1 %v12168_v7 }
 0x1bb   : > { %v1431_v42 = vpop.f32.mrf.mxu0  ;;  %v13064_v60 = vadd.f32 %v1784_v24, %v1416_v62 }
 0x1bc   : > { %v1432_v32 = vadd.f32 %v1431_v42, %v12542_v16  ;;  %v13067_v8 = vpop.f32.mrf.mxu1 }
 0x1bd   : > { %18784 = vst [vmem:[#allocation84_spill] sm:$0xff] %v13064_v60  ;;  %v13069_v52 = vpop.f32.mrf.mxu0 }
 0x1be   : > { %18785 = vst [vmem:[#allocation85_spill] sm:$0xff] %v13069_v52  ;;  %v1793_v55 = vpop.f32.mrf.mxu1 }
 0x1bf   : > { %v1439_v14 = vpop.f32.mrf.mxu0  ;;  %v13071_v5 = vadd.f32 %v1793_v55, %v1424_v2  ;;  %v18793_v55 = vld [vmem:[#allocation49_spill] sm:$0xff] }
 0x1c0   : > { %v1440_v4 = vadd.f32 %v1439_v14, %v12550_v48  ;;  %v13074_v23 = vpop.f32.mrf.mxu1 }
 0x1c1   : > { %18786 = vst [vmem:[#allocation86_spill] sm:$0xff] %v13071_v5  ;;  %18787 = vst [vmem:[#allocation87_spill] sm:$0xff] %v13074_v23  ;;  %v13076_v54 = vpop.f32.mrf.mxu0 }
 0x1c2   : > { %18788 = vst [vmem:[#allocation88_spill] sm:$0xff] %v13076_v54  ;;  %v1802_v7 = vpop.f32.mrf.mxu1 }
 0x1c3   : > { %v1447_v3 = vpop.f32.mrf.mxu0  ;;  %v13078_v24 = vadd.f32 %v1802_v7, %v1432_v32  ;;  %v18797_v7 = vld [vmem:[#allocation7_spill] sm:$0xff] }
 0x1c4   : > { %v1448_v16 = vadd.f32 %v1447_v3, %v12558_v30  ;;  %v13081_v62 = vpop.f32.mrf.mxu1 }
 0x1c5   : > { %18789 = vst [vmem:[#allocation89_spill] sm:$0xff] %v13078_v24  ;;  %18790 = vst [vmem:[#allocation90_spill] sm:$0xff] %v13081_v62  ;;  %v13083_v42 = vpop.f32.mrf.mxu0 }
 0x1c6   : > { %18791 = vst [vmem:[#allocation91_spill] sm:$0xff] %v13083_v42  ;;  %v1811_v60 = vpop.f32.mrf.mxu1 }
 0x1c7   : > { %v1455_v1 = vpop.f32.mrf.mxu0  ;;  %v13085_v2 = vadd.f32 %v1811_v60, %v1440_v4  ;;  %v18801_v4 = vld [vmem:[#allocation52_spill] sm:$0xff] }
 0x1c8   : > { %v1456_v14 = vadd.f32 %v1455_v1, %v18793_v55  ;;  %v13088_v48 = vpop.f32.mrf.mxu1 }
 0x1c9   : > { %18792 = vst [vmem:[#allocation92_spill] sm:$0xff] %v13085_v2  ;;  %18794 = vst [vmem:[#allocation49_spill] sm:$0xff] %v13088_v48  ;;  %v13090_v5 = vpop.f32.mrf.mxu0 }
 0x1ca   : > { %18795 = vst [vmem:[#allocation93_spill] sm:$0xff] %v13090_v5  ;;  %v1820_v54 = vpop.f32.mrf.mxu1 }
 0x1cb   : > { %v1463_v18 = vpop.f32.mrf.mxu0  ;;  %v13092_v32 = vadd.f32 %v1820_v54, %v1448_v16  ;;  %v18805_v16 = vld [vmem:[#allocation54_spill] sm:$0xff] }
 0x1cc   : > { %v1464_v30 = vadd.f32 %v1463_v18, %v18797_v7  ;;  %v13095_v3 = vpop.f32.mrf.mxu1 }
 0x1cd   : > { %18796 = vst [vmem:[#allocation94_spill] sm:$0xff] %v13092_v32  ;;  %18798 = vst [vmem:[#allocation7_spill] sm:$0xff] %v13095_v3  ;;  %v13097_v24 = vpop.f32.mrf.mxu0 }
 0x1ce   : > { %18799 = vst [vmem:[#allocation95_spill] sm:$0xff] %v13097_v24  ;;  %v1829_v42 = vpop.f32.mrf.mxu1 }
 0x1cf   : > { %v1471_v62 = vpop.f32.mrf.mxu0  ;;  %v13099_v60 = vadd.f32 %v1829_v42, %v1456_v14  ;;  %v18809_v14 = vld [vmem:[#allocation55_spill] sm:$0xff] }
 0x1d0   : > { %v1472_v1 = vadd.f32 %v1471_v62, %v18801_v4  ;;  %v13102_v55 = vpop.f32.mrf.mxu1 }
 0x1d1   : > { %18800 = vst [vmem:[#allocation96_spill] sm:$0xff] %v13099_v60  ;;  %18802 = vst [vmem:[#allocation52_spill] sm:$0xff] %v13102_v55  ;;  %v13104_v2 = vpop.f32.mrf.mxu0 }
 0x1d2   : > { %18803 = vst [vmem:[#allocation97_spill] sm:$0xff] %v13104_v2  ;;  %v1838_v5 = vpop.f32.mrf.mxu1 }
 0x1d3   : > { %v1479_v48 = vpop.f32.mrf.mxu0  ;;  %v13106_v54 = vadd.f32 %v1838_v5, %v1464_v30  ;;  %v18813_v30 = vld [vmem:[#allocation15_spill] sm:$0xff] }
 0x1d4   : > { %v1480_v18 = vadd.f32 %v1479_v48, %v18805_v16  ;;  %v13109_v7 = vpop.f32.mrf.mxu1 }
 0x1d5   : > { %18804 = vst [vmem:[#allocation98_spill] sm:$0xff] %v13106_v54  ;;  %18806 = vst [vmem:[#allocation54_spill] sm:$0xff] %v13109_v7  ;;  %v13111_v32 = vpop.f32.mrf.mxu0 }
 0x1d6   : > { %18807 = vst [vmem:[#allocation99_spill] sm:$0xff] %v13111_v32  ;;  %v1847_v24 = vpop.f32.mrf.mxu1 }
 0x1d7   : > { %v1487_v3 = vpop.f32.mrf.mxu0  ;;  %v13113_v42 = vadd.f32 %v1847_v24, %v1472_v1  ;;  %v18817_v1 = vld [vmem:[#allocation16_spill] sm:$0xff] }
 0x1d8   : > { %v1488_v62 = vadd.f32 %v1487_v3, %v18809_v14  ;;  %v13116_v4 = vpop.f32.mrf.mxu1 }
 0x1d9   : > { %18808 = vst [vmem:[#allocation100_spill] sm:$0xff] %v13113_v42  ;;  %18810 = vst [vmem:[#allocation55_spill] sm:$0xff] %v13116_v4  ;;  %v13118_v60 = vpop.f32.mrf.mxu0 }
 0x1da   : > { %18811 = vst [vmem:[#allocation101_spill] sm:$0xff] %v13118_v60  ;;  %v1856_v2 = vpop.f32.mrf.mxu1 }
 0x1db   : > { %v1495_v55 = vpop.f32.mrf.mxu0  ;;  %v13120_v5 = vadd.f32 %v1856_v2, %v1480_v18  ;;  %v18821_v18 = vld [vmem:[#allocation22_spill] sm:$0xff] }
 0x1dc   : > { %v1496_v48 = vadd.f32 %v1495_v55, %v18813_v30  ;;  %v13123_v16 = vpop.f32.mrf.mxu1 }
 0x1dd   : > { %18812 = vst [vmem:[#allocation102_spill] sm:$0xff] %v13120_v5  ;;  %18814 = vst [vmem:[#allocation15_spill] sm:$0xff] %v13123_v16  ;;  %v13125_v54 = vpop.f32.mrf.mxu0 }
 0x1de   : > { %18815 = vst [vmem:[#allocation103_spill] sm:$0xff] %v13125_v54  ;;  %v1865_v32 = vpop.f32.mrf.mxu1 }
 0x1df   : > { %v1503_v7 = vpop.f32.mrf.mxu0  ;;  %v13127_v24 = vadd.f32 %v1865_v32, %v1488_v62  ;;  %v18825_v62 = vld [vmem:[#allocation63_spill] sm:$0xff] }
 0x1e0   : > { %v1504_v3 = vadd.f32 %v1503_v7, %v18817_v1  ;;  %v13130_v14 = vpop.f32.mrf.mxu1 }
 0x1e1   : > { %18816 = vst [vmem:[#allocation104_spill] sm:$0xff] %v13127_v24  ;;  %18818 = vst [vmem:[#allocation16_spill] sm:$0xff] %v13130_v14  ;;  %v13132_v42 = vpop.f32.mrf.mxu0 }
 0x1e2   : > { %18819 = vst [vmem:[#allocation105_spill] sm:$0xff] %v13132_v42  ;;  %v1874_v60 = vpop.f32.mrf.mxu1 }
 0x1e3   : > { %v1511_v4 = vpop.f32.mrf.mxu0  ;;  %v13134_v2 = vadd.f32 %v1874_v60, %v1496_v48  ;;  %v18829_v48 = vld [vmem:[#allocation72_spill] sm:$0xff] }
 0x1e4   : > { %v1512_v55 = vadd.f32 %v1511_v4, %v18821_v18  ;;  %v13137_v30 = vpop.f32.mrf.mxu1 }
 0x1e5   : > { %18820 = vst [vmem:[#allocation106_spill] sm:$0xff] %v13134_v2  ;;  %18822 = vst [vmem:[#allocation22_spill] sm:$0xff] %v13137_v30  ;;  %v13139_v5 = vpop.f32.mrf.mxu0 }
 0x1e6   : > { %18823 = vst [vmem:[#allocation107_spill] sm:$0xff] %v13139_v5  ;;  %v1883_v54 = vpop.f32.mrf.mxu1 }
 0x1e7   : > { %v1519_v16 = vpop.f32.mrf.mxu0  ;;  %v13141_v32 = vadd.f32 %v1883_v54, %v1504_v3  ;;  %v18833_v3 = vld [vmem:[#allocation41_spill] sm:$0xff] }
 0x1e8   : > { %v1520_v7 = vadd.f32 %v1519_v16, %v18825_v62  ;;  %v13144_v1 = vpop.f32.mrf.mxu1 }
 0x1e9   : > { %18824 = vst [vmem:[#allocation108_spill] sm:$0xff] %v13141_v32  ;;  %18826 = vst [vmem:[#allocation63_spill] sm:$0xff] %v13144_v1  ;;  %v13146_v24 = vpop.f32.mrf.mxu0 }
 0x1ea   : > { %18827 = vst [vmem:[#allocation109_spill] sm:$0xff] %v13146_v24  ;;  %v1892_v42 = vpop.f32.mrf.mxu1 }
 0x1eb   : > { %v1527_v14 = vpop.f32.mrf.mxu0  ;;  %v13148_v60 = vadd.f32 %v1892_v42, %v1512_v55 }
 0x1ec   : > { %v1528_v4 = vadd.f32 %v1527_v14, %v18829_v48  ;;  %v13151_v18 = vpop.f32.mrf.mxu1 }
 0x1ed   : > { %18828 = vst [vmem:[#allocation110_spill] sm:$0xff] %v13148_v60  ;;  %18830 = vst [vmem:[#allocation72_spill] sm:$0xff] %v13151_v18  ;;  %v13153_v2 = vpop.f32.mrf.mxu0 }
 0x1ee   : > { %18831 = vst [vmem:[#allocation111_spill] sm:$0xff] %v13153_v2  ;;  %v1901_v5 = vpop.f32.mrf.mxu1  ;;  %v2672_v2 = vlaneseq }
 0x1ef   : > { %v1535_v30 = vpop.f32.mrf.mxu0  ;;  %v13155_v54 = vadd.f32 %v1901_v5, %v1520_v7 }
 0x1f0   : > { %v1536_v16 = vadd.f32 %v1535_v30, %v18833_v3  ;;  %v13158_v62 = vpop.f32.mrf.mxu1 }
 0x1f1   : > { %18832 = vst [vmem:[#allocation112_spill] sm:$0xff] %v13155_v54  ;;  %18834 = vst [vmem:[#allocation41_spill] sm:$0xff] %v13158_v62  ;;  %v13160_v32 = vpop.f32.mrf.mxu0  ;;  %v13173_v54 = vshrl.u32 %v2672_v2, 7 }
 0x1f2   : > { %18835 = vst [vmem:[#allocation113_spill] sm:$0xff] %v13160_v32  ;;  %v1910_v24 = vpop.f32.mrf.mxu1 }
 0x1f3   : > { %v1543_v1 = vpop.f32.mrf.mxu0  ;;  %v13162_v42 = vadd.f32 %v1910_v24, %v1528_v4  ;;  %18841 = vst [vmem:[#allocation119_spill] sm:$0xff] %v13173_v54 }
 0x1f4   : > { %v1544_v14 = vadd.f32 %v1543_v1, %v12787_v6  ;;  %v13165_v55 = vpop.f32.mrf.mxu1  ;;  %v17935_v1 = vsub.s32 0, %v13173_v54 }
 0x1f5   : > { %18836 = vst [vmem:[#allocation114_spill] sm:$0xff] %v13162_v42  ;;  %18837 = vst [vmem:[#allocation115_spill] sm:$0xff] %v13165_v55  ;;  %v13167_v48 = vpop.f32.mrf.mxu0 }
 0x1f6   : > { %18838 = vst [vmem:[#allocation116_spill] sm:$0xff] %v13167_v48  ;;  %v1919_v60 = vpop.f32.mrf.mxu1  ;;  %v17938_v48 = vsub.s32 1, %v13173_v54 }
 0x1f7   : > { %v13169_v5 = vadd.f32 %v1919_v60, %v1536_v16  ;;  %v2096_v7 = vpop.f32.mrf.mxu0  ;;  %v2639_v60 = vld [vmem:[%s17635_s2] sm:$0x3] }
 0x1f8   : > { %v13171_v30 = vpop.f32.mrf.mxu1  ;;  %v2097_v16 = vadd.f32 %v2096_v7, %v12812_v61  ;;  %v13192_v55 = vrot.slane %v2639_v60, %v17938_v48 }
 0x1f9   : > { %18839 = vst [vmem:[#allocation117_spill] sm:$0xff] %v13169_v5  ;;  %18840 = vst [vmem:[#allocation118_spill] sm:$0xff] %v13171_v30  ;;  %v2098_v3 = vpop.f32.mrf.mxu0 }
 0x1fa   : > { %v1928_v32 = vpop.f32.mrf.mxu1  ;;  %v2099_v2 = vadd.f32 %v2098_v3, %v12822_v40 }
 0x1fb   : > { %v13175_v62 = vadd.f32 %v1928_v32, %v1544_v14  ;;  %v2103_v24 = vpop.f32.mrf.mxu0 }
 0x1fc   : > { %v13177_v4 = vpop.f32.mrf.mxu1  ;;  %v2104_v23 = vadd.f32 %v2103_v24, %v12837_v43 }
 0x1fd   : > { %18842 = vst [vmem:[#allocation120_spill] sm:$0xff] %v13175_v62  ;;  %18843 = vst [vmem:[#allocation121_spill] sm:$0xff] %v13177_v4  ;;  %v2105_v6 = vpop.f32.mrf.mxu0  ;;  %v13188_v4 = vrot.slane %v2639_v60, %v17935_v1 }
 0x1fe   : > { %v2417_v42 = vpop.f32.mrf.mxu1  ;;  %v2106_v61 = vadd.f32 %v2105_v6, %v12848_v12  ;;  %v18844_v6 = vld [vmem:[#allocation31_spill] sm:$0xff] }
 0x1ff   : > { %v2110_v5 = vpop.f32.mrf.mxu0  ;;  %v2418_v14 = vadd.f32 %v2417_v42, %v2097_v16 }
 0x200   : > { %v2419_v32 = vpop.f32.mrf.mxu1  ;;  %v2111_v54 = vadd.f32 %v2110_v5, %v12862_v49  ;;  %v18846_v49 = vld [vmem:[#allocation33_spill] sm:$0xff] }
 0x201   : > { %v2112_v62 = vpop.f32.mrf.mxu0  ;;  %v2420_v30 = vadd.f32 %v2419_v32, %v2099_v2 }
 0x202   : > { %v2424_v18 = vpop.f32.mrf.mxu1  ;;  %v2113_v48 = vadd.f32 %v2112_v62, %v12874_v63  ;;  %v1370_v63 = vadd.f32 %v12978_v33, %v18846_v49  ;;  %v18847_v62 = vld [vmem:[#allocation39_spill] sm:$0xff] }
 0x203   : > { %v2640_v7 = vmin.f32 %v2418_v14, %v2420_v30  ;;  %v2708_v40 = vadd.f32 %v2420_v30, %v2418_v14  ;;  %v2117_v3 = vpop.f32.mrf.mxu0  ;;  %v2425_v2 = vadd.f32 %v2424_v18, %v2104_v23  ;;  %v1362_v30 = vadd.f32 %v12960_v37, %v18844_v6 }
 0x204   : > { %v2426_v57 = vpop.f32.mrf.mxu1  ;;  %v1378_v5 = vadd.f32 %v12995_v58, %v18847_v62  ;;  %v2118_v37 = vadd.f32 %v2117_v3, %v12887_v31 }
 0x205   : > { %v2676_v42 = vmul.f32 %v13188_v4, %v2640_v7  ;;  %v2744_v16 = vmul.f32 %v13192_v55, %v2708_v40  ;;  %v2119_v32 = vpop.f32.mrf.mxu0  ;;  %v2427_v1 = vadd.f32 %v2426_v57, %v2106_v61 }
 0x206   : > { %v2431_v60 = vpop.f32.mrf.mxu1  ;;  %v2120_v40 = vadd.f32 %v2119_v32, %v12898_v36  ;;  %v13229_v6 = vadd.f32 %v13016_v56, %v1378_v5 }
 0x207   : > { %v2776_v19 = vadd.f32 %v2744_v16, %v2676_v42  ;;  %v2641_v43 = vmin.f32 %v2425_v2, %v2427_v1  ;;  %v2709_v24 = vadd.f32 %v2427_v1, %v2425_v2  ;;  %v2124_v12 = vpop.f32.mrf.mxu0  ;;  %v2432_v14 = vadd.f32 %v2431_v60, %v2111_v54 }
 0x208   : > { %v2433_v52 = vpop.f32.mrf.mxu1  ;;  %v13211_v1 = vadd.f32 %v12992_v47, %v1362_v30  ;;  %v13219_v60 = vadd.f32 %v13005_v53, %v1370_v63  ;;  %v18850_v63 = vld [vmem:[#allocation44_spill] sm:$0xff] }
 0x209   : > { %v2677_v7 = vmul.f32 %v13188_v4, %v2641_v43  ;;  %v2745_v23 = vmul.f32 %v13192_v55, %v2709_v24  ;;  %v2126_v18 = vpop.f32.mrf.mxu0  ;;  %v2434_v57 = vadd.f32 %v2433_v52, %v2113_v48  ;;  %v13204_v61 = vand.u32 4294901760, %v2776_v19  ;;  %v18848_v48 = vld [vmem:[#allocation42_spill] sm:$0xff] }
 0x20a   : > { %v2438_v54 = vpop.f32.mrf.mxu1  ;;  %v1386_v33 = vadd.f32 %v13008_v46, %v18848_v48  ;;  %v2125_v46 = vadd.f32 %v2124_v12, %v12912_v41  ;;  %v2127_v53 = vadd.f32 %v2126_v18, %v12920_v44  ;;  %v1394_v56 = vadd.f32 %v13019_v34, %v18850_v63  ;;  %v18851_v34 = vld [vmem:[#allocation30_spill] sm:$0xff] }
 0x20b   : > { %18845 = vst [vmem:[#allocation31_spill] sm:$0xff] %v13204_v61  ;;  %v2777_v42 = vadd.f32 %v2745_v23, %v2677_v7  ;;  %v2642_v16 = vmin.f32 %v2432_v14, %v2434_v57  ;;  %v2710_v2 = vadd.f32 %v2434_v57, %v2432_v14  ;;  %v2131_v52 = vpop.f32.mrf.mxu0  ;;  %10266 = vmatprep.mubr.f32.mxu1 %v13204_v61 }
 0x20c   : > { %v2439_v58 = vadd.f32 %v2438_v54, %v2118_v37  ;;  %v2440_v47 = vpop.f32.mrf.mxu1  ;;  %v13222_v43 = vsub.f32 %v2776_v19, %v13204_v61  ;;  %v13241_v62 = vadd.f32 %v13028_v21, %v1386_v33  ;;  %v2132_v21 = vadd.f32 %v2131_v52, %v12934_v22 }
 0x20d   : > { %v13224_v31 = vand.u32 4294901760, %v2777_v42  ;;  %v2678_v36 = vmul.f32 %v13188_v4, %v2642_v16  ;;  %v2746_v3 = vmul.f32 %v13192_v55, %v2710_v2  ;;  %v2133_v32 = vpop.f32.mrf.mxu0  ;;  %v2441_v24 = vadd.f32 %v2440_v47, %v2120_v40 }
 0x20e   : > { %v2445_v30 = vpop.f32.mrf.mxu1  ;;  %v17948_v14 = vand.u32 4294901760, %v13222_v43 }
 0x20f   : > { %18849 = vst [vmem:[#allocation33_spill] sm:$0xff] %v13224_v31  ;;  %v13235_v19 = vsub.f32 %v2777_v42, %v13224_v31  ;;  %v2778_v7 = vadd.f32 %v2746_v3, %v2678_v36  ;;  %v2643_v23 = vmin.f32 %v2439_v58, %v2441_v24  ;;  %v2711_v57 = vadd.f32 %v2441_v24, %v2439_v58  ;;  %v2138_v49 = vpop.f32.mrf.mxu0  ;;  %v18853_v24 = vld [vmem:[#allocation58_spill] sm:$0xff] }
 0x210   : > { %10267 = vmatmul.mubr.f32.vlgmr.msra.gmra.mxu1 %v13224_v31  ;;  %v2446_v41 = vadd.f32 %v2445_v30, %v2125_v46  ;;  %v2447_v44 = vpop.f32.mrf.mxu1  ;;  %v2908_v12 = vsub.f32 %v13222_v43, %v17948_v14  ;;  %v2134_v42 = vadd.f32 %v2133_v32, %v12940_v29  ;;  %v18854_v46 = vld [vmem:[#allocation45_spill] sm:$0xff] }
 0x211   : > { %10395 = vmatpush3.msra.mxu1 %v12584_v59  ;;  %v17947_v18 = vand.u32 4294901760, %v13235_v19  ;;  %v2679_v5 = vmul.f32 %v13188_v4, %v2643_v23  ;;  %v2747_v37 = vmul.f32 %v13192_v55, %v2711_v57  ;;  %v2140_v54 = vpop.f32.mrf.mxu0  ;;  %v2448_v40 = vadd.f32 %v2447_v44, %v2127_v53 }
 0x212   : > { %10396 = vmatprep.subr.mxu1 %v18851_v34  ;;  %v2452_v16 = vpop.f32.mrf.mxu1  ;;  %v2909_v2 = vand.u32 4294901760, %v2908_v12  ;;  %v13253_v48 = vand.u32 4294901760, %v2778_v7  ;;  %v13262_v22 = vadd.f32 %v13031_v11, %v18854_v46  ;;  %v13272_v11 = vadd.f32 %v13039_v17, %v1394_v56  ;;  %v18859_v46 = vld [vmem:[#allocation3_spill] sm:$0xff] }
 0x213   : > { %10397 = vmatpush3.msra.mxu1 %v18851_v34  ;;  %v2918_v33 = vsub.f32 %v13235_v19, %v17947_v18  ;;  %v2779_v58 = vadd.f32 %v2747_v37, %v2679_v5  ;;  %v2644_v47 = vmin.f32 %v2446_v41, %v2448_v40  ;;  %v2712_v36 = vadd.f32 %v2448_v40, %v2446_v41  ;;  %v2145_v3 = vpop.f32.mrf.mxu0  ;;  %v18856_v5 = vld [vmem:[#allocation60_spill] sm:$0xff] }
 0x214   : > { %18852 = vst [vmem:[#allocation39_spill] sm:$0xff] %v13253_v48  ;;  %10398 = vmatprep.subr.mxu1 %v18853_v24  ;;  %v2453_v29 = vadd.f32 %v2452_v16, %v2132_v21  ;;  %10186 = vmatprep.mubr.f32.mxu0 %v2909_v2  ;;  %v2454_v52 = vpop.f32.mrf.mxu1  ;;  %v13266_v32 = vsub.f32 %v2778_v7, %v13253_v48 }
 0x215   : > { %10269 = vmatprep.mubr.f32.mxu1 %v13253_v48  ;;  %v2919_v53 = vand.u32 4294901760, %v2918_v33  ;;  %v2680_v30 = vmul.f32 %v13188_v4, %v2644_v47  ;;  %v2748_v23 = vmul.f32 %v13192_v55, %v2712_v36  ;;  %v2147_v57 = vpop.f32.mrf.mxu0  ;;  %v2455_v63 = vadd.f32 %v2454_v52, %v2134_v42  ;;  %10399 = vmatpush3.msra.mxu1 %v18853_v24  ;;  %v18858_v36 = vld [vmem:[#allocation13_spill] sm:$0xff] }
 0x216   : > { %v2139_v41 = vadd.f32 %v2138_v49, %v12954_v15  ;;  %v2459_v44 = vpop.f32.mrf.mxu1  ;;  %v13275_v12 = vand.u32 4294901760, %v2779_v58  ;;  %v17945_v7 = vand.u32 4294901760, %v13266_v32  ;;  %10400 = vmatprep.subr.mxu1 %v18856_v5  ;;  %v2141_v37 = vadd.f32 %v2140_v54, %v12962_v13 }
 0x217   : > { %v2780_v40 = vadd.f32 %v2748_v23, %v2680_v30  ;;  %v2645_v21 = vmin.f32 %v2453_v29, %v2455_v63  ;;  %v2713_v16 = vadd.f32 %v2455_v63, %v2453_v29  ;;  %v2152_v42 = vpop.f32.mrf.mxu0  ;;  %10187 = vmatmul.mubr.f32.vlgmr.msra.gmra.mxu0 %v2919_v53  ;;  %10401 = vmatpush3.msra.mxu1 %v18856_v5  ;;  %v18860_v30 = vld [vmem:[#allocation27_spill] sm:$0xff] }
 0x218   : > { %18855 = vst [vmem:[#allocation42_spill] sm:$0xff] %v13275_v12  ;;  %v2460_v2 = vadd.f32 %v2459_v44, %v2139_v41  ;;  %10270 = vmatmul.mubr.f32.gmra.mxu1 %v13275_v12  ;;  %v2461_v17 = vpop.f32.mrf.mxu1  ;;  %v2928_v15 = vsub.f32 %v13266_v32, %v17945_v7  ;;  %v13285_v49 = vsub.f32 %v2779_v58, %v13275_v12 }
 0x219   : > { %10315 = vmatpush3.msra.mxu0 %v12592_v35  ;;  %v2681_v13 = vmul.f32 %v13188_v4, %v2645_v21  ;;  %v2749_v56 = vmul.f32 %v13192_v55, %v2713_v16  ;;  %v2154_v54 = vpop.f32.mrf.mxu0  ;;  %v2462_v33 = vadd.f32 %v2461_v17, %v2141_v37  ;;  %v13290_v47 = vand.u32 4294901760, %v2780_v40  ;;  %10402 = vmatprep.subr.mxu1 %v18860_v30  ;;  %v18861_v16 = vld [vmem:[#allocation18_spill] sm:$0xff] }
 0x21a   : > { %10316 = vmatprep.subr.mxu0 %v18858_v36  ;;  %v13296_v29 = vadd.f32 %v13042_v27, %v18859_v46  ;;  %v2146_v58 = vadd.f32 %v2145_v3, %v12972_v45  ;;  %v2466_v52 = vpop.f32.mrf.mxu1  ;;  %v2929_v35 = vand.u32 4294901760, %v2928_v15  ;;  %v17944_v53 = vand.u32 4294901760, %v13285_v49  ;;  %10403 = vmatpush3.msra.mxu1 %v18860_v30  ;;  %v18863_v46 = vld [vmem:[#allocation12_spill] sm:$0xff] }
 0x21b   : > { %18857 = vst [vmem:[#allocation44_spill] sm:$0xff] %v13290_v47  ;;  %10317 = vmatpush3.msra.mxu0 %v18858_v36  ;;  %v2148_v23 = vadd.f32 %v2147_v57, %v12980_v9  ;;  %v2781_v63 = vadd.f32 %v2749_v56, %v2681_v13  ;;  %v2646_v41 = vmin.f32 %v2460_v2, %v2462_v33  ;;  %v2159_v37 = vpop.f32.mrf.mxu0 }
 0x21c   : > { %v2714_v44 = vadd.f32 %v2462_v33, %v2460_v2  ;;  %10272 = vmatprep.mubr.f32.mxu1 %v13290_v47  ;;  %v2467_v27 = vadd.f32 %v2466_v52, %v2146_v58  ;;  %10189 = vmatprep.mubr.f32.mxu0 %v2929_v35  ;;  %v2468_v21 = vpop.f32.mrf.mxu1  ;;  %v2938_v45 = vsub.f32 %v13285_v49, %v17944_v53  ;;  %v18864_v58 = vld [vmem:[#allocation67_spill] sm:$0xff]  ;;  %v18885_v53 = vld [vmem:[#allocation61_spill] sm:$0xff] }
 0x21d   : > { %v13308_v3 = vsub.f32 %v2780_v40, %v13290_v47  ;;  %10318 = vmatprep.subr.mxu0 %v18861_v16  ;;  %v2682_v9 = vmul.f32 %v13188_v4, %v2646_v41  ;;  %v2161_v2 = vpop.f32.mrf.mxu0  ;;  %v2469_v17 = vadd.f32 %v2468_v21, %v2148_v23  ;;  %v13313_v15 = vand.u32 4294901760, %v2781_v63  ;;  %10404 = vmatprep.subr.mxu1 %v18864_v58 }
 0x21e   : > { %v2750_v57 = vmul.f32 %v13192_v55, %v2714_v44  ;;  %10319 = vmatpush3.msra.mxu0 %v18861_v16  ;;  %v13319_v13 = vadd.f32 %v13050_v25, %v13262_v22  ;;  %v2153_v40 = vadd.f32 %v2152_v42, %v12987_v28  ;;  %v2473_v56 = vpop.f32.mrf.mxu1  ;;  %v2939_v33 = vand.u32 4294901760, %v2938_v45  ;;  %10405 = vmatpush3.msra.mxu1 %v18864_v58  ;;  %v18866_v16 = vld [vmem:[#allocation19_spill] sm:$0xff] }
 0x21f   : > { %18862 = vst [vmem:[#allocation30_spill] sm:$0xff] %v13313_v15  ;;  %v17943_v36 = vand.u32 4294901760, %v13308_v3  ;;  %10320 = vmatprep.subr.mxu0 %v18863_v46  ;;  %v2155_v52 = vadd.f32 %v2154_v54, %v13211_v1  ;;  %v2647_v23 = vmin.f32 %v2467_v27, %v2469_v17  ;;  %v2715_v41 = vadd.f32 %v2469_v17, %v2467_v27  ;;  %v2166_v44 = vpop.f32.mrf.mxu0 }
 0x220   : > { %v2782_v35 = vadd.f32 %v2750_v57, %v2682_v9  ;;  %10273 = vmatmul.mubr.f32.gmra.mxu1 %v13313_v15  ;;  %v2474_v25 = vadd.f32 %v2473_v56, %v2153_v40  ;;  %10190 = vmatmul.mubr.f32.gmra.mxu0 %v2939_v33  ;;  %v2475_v22 = vpop.f32.mrf.mxu1  ;;  %v13331_v42 = vsub.f32 %v2781_v63, %v13313_v15  ;;  %v18867_v56 = vld [vmem:[#allocation2_spill] sm:$0xff] }
 0x221   : > { %v2948_v28 = vsub.f32 %v13308_v3, %v17943_v36  ;;  %v2683_v1 = vmul.f32 %v13188_v4, %v2647_v23  ;;  %v2751_v54 = vmul.f32 %v13192_v55, %v2715_v41  ;;  %v2168_v27 = vpop.f32.mrf.mxu0  ;;  %v2476_v21 = vadd.f32 %v2475_v22, %v2155_v52  ;;  %10321 = vmatpush3.msra.mxu0 %v18863_v46 }
 0x222   : > { %v13336_v45 = vand.u32 4294901760, %v2782_v35  ;;  %10406 = vmatprep.subr.mxu1 %v12721_v50  ;;  %v13342_v9 = vadd.f32 %v13052_v51, %v18866_v16  ;;  %v2160_v63 = vadd.f32 %v2159_v37, %v13000_v0  ;;  %v2480_v57 = vpop.f32.mrf.mxu1  ;;  %v17940_v40 = vand.u32 4294901760, %v13331_v42  ;;  %10322 = vmatprep.subr.mxu0 %v18867_v56 }
 0x223   : > { %v2949_v17 = vand.u32 4294901760, %v2948_v28  ;;  %10407 = vmatpush3.msra.mxu1 %v12721_v50  ;;  %v2162_v33 = vadd.f32 %v2161_v2, %v13219_v60  ;;  %v2783_v52 = vadd.f32 %v2751_v54, %v2683_v1  ;;  %v2648_v46 = vmin.f32 %v2474_v25, %v2476_v21  ;;  %v2173_v41 = vpop.f32.mrf.mxu0  ;;  %10323 = vmatpush3.msra.mxu0 %v18867_v56  ;;  %v18869_v54 = vld [vmem:[#allocation71_spill] sm:$0xff] }
 0x224   : > { %18865 = vst [vmem:[#allocation58_spill] sm:$0xff] %v13336_v45  ;;  %v2716_v23 = vadd.f32 %v2476_v21, %v2474_v25  ;;  %10275 = vmatprep.mubr.f32.mxu1 %v13336_v45  ;;  %v2481_v51 = vadd.f32 %v2480_v57, %v2160_v63  ;;  %v2482_v22 = vpop.f32.mrf.mxu1  ;;  %v2958_v0 = vsub.f32 %v13331_v42, %v17940_v40  ;;  %v18870_v21 = vld [vmem:[#allocation37_spill] sm:$0xff] }
 0x225   : > { %10192 = vmatprep.mubr.f32.mxu0 %v2949_v17  ;;  %v13354_v37 = vsub.f32 %v2782_v35, %v13336_v45  ;;  %v2684_v60 = vmul.f32 %v13188_v4, %v2648_v46  ;;  %v2175_v25 = vpop.f32.mrf.mxu0  ;;  %v2483_v28 = vadd.f32 %v2482_v22, %v2162_v33  ;;  %v13359_v1 = vand.u32 4294901760, %v2783_v52  ;;  %10324 = vmatprep.subr.mxu0 %v18869_v54 }
 0x226   : > { %v2752_v2 = vmul.f32 %v13192_v55, %v2716_v23  ;;  %10408 = vmatprep.subr.mxu1 %v18870_v21  ;;  %v13365_v16 = vadd.f32 %v13059_v20, %v13296_v29  ;;  %v2167_v35 = vadd.f32 %v2166_v44, %v13011_v26  ;;  %v2487_v63 = vpop.f32.mrf.mxu1  ;;  %v2959_v57 = vand.u32 4294901760, %v2958_v0  ;;  %10325 = vmatpush3.msra.mxu0 %v18869_v54  ;;  %v18871_v0 = vld [vmem:[#allocation32_spill] sm:$0xff] }
 0x227   : > { %18868 = vst [vmem:[#allocation45_spill] sm:$0xff] %v13359_v1  ;;  %v17939_v17 = vand.u32 4294901760, %v13354_v37  ;;  %10409 = vmatpush3.msra.mxu1 %v18870_v21  ;;  %v2169_v56 = vadd.f32 %v2168_v27, %v13229_v6  ;;  %v2649_v46 = vmin.f32 %v2481_v51, %v2483_v28  ;;  %v2717_v23 = vadd.f32 %v2483_v28, %v2481_v51  ;;  %v2180_v22 = vpop.f32.mrf.mxu0  ;;  %v18873_v28 = vld [vmem:[#allocation40_spill] sm:$0xff] }
 0x228   : > { %v2784_v33 = vadd.f32 %v2752_v2, %v2684_v60  ;;  %10276 = vmatmul.mubr.f32.gmra.mxu1 %v13359_v1  ;;  %v2488_v20 = vadd.f32 %v2487_v63, %v2167_v35  ;;  %10193 = vmatmul.mubr.f32.gmra.mxu0 %v2959_v57  ;;  %v2489_v29 = vpop.f32.mrf.mxu1  ;;  %v13377_v44 = vsub.f32 %v2783_v52, %v13359_v1  ;;  %v18874_v54 = vld [vmem:[#allocation48_spill] sm:$0xff] }
 0x229   : > { %v2968_v26 = vsub.f32 %v13354_v37, %v17939_v17  ;;  %10326 = vmatprep.subr.mxu0 %v18871_v0  ;;  %v2685_v6 = vmul.f32 %v13188_v4, %v2649_v46  ;;  %v2753_v27 = vmul.f32 %v13192_v55, %v2717_v23  ;;  %v2182_v51 = vpop.f32.mrf.mxu0  ;;  %v2490_v60 = vadd.f32 %v2489_v29, %v2169_v56  ;;  %v18875_v17 = vld [vmem:[#allocation43_spill] sm:$0xff] }
 0x22a   : > { %v13382_v2 = vand.u32 4294901760, %v2784_v33  ;;  %10327 = vmatpush3.msra.mxu0 %v18871_v0  ;;  %10410 = vmatprep.subr.mxu1 %v18873_v28  ;;  %v13388_v35 = vadd.f32 %v13061_v39, %v18874_v54  ;;  %v2174_v52 = vadd.f32 %v2173_v41, %v13023_v10  ;;  %v2494_v63 = vpop.f32.mrf.mxu1  ;;  %v17941_v46 = vand.u32 4294901760, %v13377_v44 }
 0x22b   : > { %v2969_v57 = vand.u32 4294901760, %v2968_v26  ;;  %10328 = vmatprep.subr.mxu0 %v18875_v17  ;;  %10411 = vmatpush3.msra.mxu1 %v18873_v28  ;;  %v2176_v56 = vadd.f32 %v2175_v25, %v13241_v62  ;;  %v2785_v23 = vadd.f32 %v2753_v27, %v2685_v6  ;;  %v2650_v29 = vmin.f32 %v2488_v20, %v2490_v60  ;;  %v2187_v40 = vpop.f32.mrf.mxu0  ;;  %v18877_v27 = vld [vmem:[#allocation46_spill] sm:$0xff] }
 0x22c   : > { %18872 = vst [vmem:[#allocation60_spill] sm:$0xff] %v13382_v2  ;;  %v2718_v0 = vadd.f32 %v2490_v60, %v2488_v20  ;;  %10278 = vmatprep.mubr.f32.mxu1 %v13382_v2  ;;  %v2495_v39 = vadd.f32 %v2494_v63, %v2174_v52  ;;  %v2496_v54 = vpop.f32.mrf.mxu1  ;;  %v2978_v10 = vsub.f32 %v13377_v44, %v17941_v46  ;;  %v18878_v60 = vld [vmem:[#allocation51_spill] sm:$0xff] }
 0x22d   : > { %10195 = vmatprep.mubr.f32.mxu0 %v2969_v57  ;;  %v13400_v41 = vsub.f32 %v2784_v33, %v13382_v2  ;;  %10329 = vmatpush3.msra.mxu0 %v18875_v17  ;;  %v2686_v62 = vmul.f32 %v13188_v4, %v2650_v29  ;;  %v2189_v20 = vpop.f32.mrf.mxu0  ;;  %v2497_v26 = vadd.f32 %v2496_v54, %v2176_v56  ;;  %v13405_v6 = vand.u32 4294901760, %v2785_v23 }
 0x22e   : > { %v2754_v25 = vmul.f32 %v13192_v55, %v2718_v0  ;;  %10330 = vmatprep.subr.mxu0 %v18877_v27  ;;  %10412 = vmatprep.subr.mxu1 %v18878_v60  ;;  %v13411_v52 = vadd.f32 %v13067_v8, %v13342_v9  ;;  %v2181_v33 = vadd.f32 %v2180_v22, %v13034_v38  ;;  %v2501_v63 = vpop.f32.mrf.mxu1  ;;  %v2979_v17 = vand.u32 4294901760, %v2978_v10  ;;  %v18879_v10 = vld [vmem:[#allocation56_spill] sm:$0xff] }
 0x22f   : > { %18876 = vst [vmem:[#allocation13_spill] sm:$0xff] %v13405_v6  ;;  %v17942_v57 = vand.u32 4294901760, %v13400_v41  ;;  %10331 = vmatpush3.msra.mxu0 %v18877_v27  ;;  %10413 = vmatpush3.msra.mxu1 %v18878_v60  ;;  %v2183_v56 = vadd.f32 %v2182_v51, %v13272_v11  ;;  %v2651_v0 = vmin.f32 %v2495_v39, %v2497_v26  ;;  %v2194_v46 = vpop.f32.mrf.mxu0  ;;  %v18882_v27 = vld [vmem:[#allocation4_spill] sm:$0xff] }
 0x230   : > { %v2786_v29 = vadd.f32 %v2754_v25, %v2686_v62  ;;  %v2719_v54 = vadd.f32 %v2497_v26, %v2495_v39  ;;  %10279 = vmatmul.mubr.f32.gmra.mxu1 %v13405_v6  ;;  %v2502_v8 = vadd.f32 %v2501_v63, %v2181_v33  ;;  %10196 = vmatmul.mubr.f32.gmra.mxu0 %v2979_v17  ;;  %v2503_v9 = vpop.f32.mrf.mxu1  ;;  %v18881_v26 = vld [vmem:[#allocation23_spill] sm:$0xff]  ;;  %v18883_v33 = vld [vmem:[#allocation85_spill] sm:$0xff] }
 0x231   : > { %v2988_v38 = vsub.f32 %v13400_v41, %v17942_v57  ;;  %v13423_v22 = vsub.f32 %v2785_v23, %v13405_v6  ;;  %10332 = vmatprep.subr.mxu0 %v18879_v10  ;;  %v2687_v11 = vmul.f32 %v13188_v4, %v2651_v0  ;;  %v2196_v39 = vpop.f32.mrf.mxu0  ;;  %v2504_v62 = vadd.f32 %v2503_v9, %v2183_v56  ;;  %v18884_v23 = vld [vmem:[#allocation82_spill] sm:$0xff] }
 0x232   : > { %v2755_v51 = vmul.f32 %v13192_v55, %v2719_v54  ;;  %v13428_v25 = vand.u32 4294901760, %v2786_v29  ;;  %10333 = vmatpush3.msra.mxu0 %v18879_v10  ;;  %10414 = vmatprep.subr.mxu1 %v18881_v26  ;;  %v13434_v63 = vadd.f32 %v18883_v33, %v18882_v27  ;;  %v2188_v17 = vadd.f32 %v2187_v40, %v18884_v23  ;;  %v2508_v57 = vpop.f32.mrf.mxu1 }
 0x233   : > { %v2989_v36 = vand.u32 4294901760, %v2988_v38  ;;  %v17946_v0 = vand.u32 4294901760, %v13423_v22  ;;  %10334 = vmatprep.subr.mxu0 %v18885_v53  ;;  %10415 = vmatpush3.msra.mxu1 %v18881_v26  ;;  %v2190_v56 = vadd.f32 %v2189_v20, %v13319_v13  ;;  %v2652_v9 = vmin.f32 %v2502_v8, %v2504_v62  ;;  %v2201_v7 = vpop.f32.mrf.mxu0 }
 0x234   : > { %18880 = vst [vmem:[#allocation3_spill] sm:$0xff] %v13428_v25  ;;  %v2787_v54 = vadd.f32 %v2755_v51, %v2687_v11  ;;  %v2720_v10 = vadd.f32 %v2504_v62, %v2502_v8  ;;  %10281 = vmatprep.mubr.f32.mxu1 %v13428_v25  ;;  %v2509_v27 = vadd.f32 %v2508_v57, %v2188_v17  ;;  %v2510_v33 = vpop.f32.mrf.mxu1  ;;  %v18887_v57 = vld [vmem:[#allocation62_spill] sm:$0xff]  ;;  %v18889_v62 = vld [vmem:[#allocation87_spill] sm:$0xff] }
 0x235   : > { %10198 = vmatprep.mubr.f32.mxu0 %v2989_v36  ;;  %v2998_v40 = vsub.f32 %v13423_v22, %v17946_v0  ;;  %v13446_v38 = vsub.f32 %v2786_v29, %v13428_v25  ;;  %10335 = vmatpush3.msra.mxu0 %v18885_v53  ;;  %v2688_v13 = vmul.f32 %v13188_v4, %v2652_v9  ;;  %v2203_v8 = vpop.f32.mrf.mxu0  ;;  %v18888_v36 = vld [vmem:[#allocation8_spill] sm:$0xff]  ;;  %v18890_v17 = vld [vmem:[#allocation83_spill] sm:$0xff] }
 0x236   : > { %v2756_v20 = vmul.f32 %v13192_v55, %v2720_v10  ;;  %v2511_v11 = vadd.f32 %v2510_v33, %v2190_v56  ;;  %v13451_v51 = vand.u32 4294901760, %v2787_v54  ;;  %10336 = vmatprep.subr.mxu0 %v18887_v57  ;;  %10416 = vmatprep.subr.mxu1 %v18888_v36  ;;  %v1796_v23 = vadd.f32 %v18889_v62, %v13388_v35  ;;  %v2515_v0 = vpop.f32.mrf.mxu1 }
 0x237   : > { %v2195_v29 = vadd.f32 %v2194_v46, %v18890_v17  ;;  %v2999_v18 = vand.u32 4294901760, %v2998_v40  ;;  %v17951_v53 = vand.u32 4294901760, %v13446_v38  ;;  %10337 = vmatpush3.msra.mxu0 %v18887_v57  ;;  %10417 = vmatpush3.msra.mxu1 %v18888_v36  ;;  %v2197_v56 = vadd.f32 %v2196_v39, %v13365_v16  ;;  %v2208_v14 = vpop.f32.mrf.mxu0  ;;  %v18891_v57 = vld [vmem:[#allocation75_spill] sm:$0xff]  ;;  %v18896_v17 = vld [vmem:[#allocation84_spill] sm:$0xff] }
 0x238   : > { %18886 = vst [vmem:[#allocation27_spill] sm:$0xff] %v13451_v51  ;;  %v2788_v9 = vadd.f32 %v2756_v20, %v2688_v13  ;;  %v2653_v10 = vmin.f32 %v2509_v27, %v2511_v11  ;;  %v2721_v33 = vadd.f32 %v2511_v11, %v2509_v27  ;;  %10282 = vmatmul.mubr.f32.gmra.mxu1 %v13451_v51  ;;  %v2517_v35 = vpop.f32.mrf.mxu1  ;;  %v18895_v11 = vld [vmem:[#allocation88_spill] sm:$0xff] }
 0x239   : > { %v2516_v25 = vadd.f32 %v2515_v0, %v2195_v29  ;;  %10199 = vmatmul.mubr.f32.gmra.mxu0 %v2999_v18  ;;  %v3008_v46 = vsub.f32 %v13446_v38, %v17951_v53  ;;  %v13467_v40 = vsub.f32 %v2787_v54, %v13451_v51  ;;  %10338 = vmatprep.subr.mxu0 %v18891_v57  ;;  %v2210_v27 = vpop.f32.mrf.mxu0  ;;  %v18893_v0 = vld [vmem:[#allocation73_spill] sm:$0xff] }
 0x23a   : > { %v2689_v16 = vmul.f32 %v13188_v4, %v2653_v10  ;;  %v2757_v39 = vmul.f32 %v13192_v55, %v2721_v33  ;;  %v2518_v13 = vadd.f32 %v2517_v35, %v2197_v56  ;;  %v13472_v20 = vand.u32 4294901760, %v2788_v9  ;;  %10418 = vmatprep.subr.mxu1 %v18893_v0  ;;  %10339 = vmatpush3.msra.mxu0 %v18891_v57  ;;  %v18894_v18 = vld [vmem:[#allocation5_spill] sm:$0xff]  ;;  %v2522_v29 = vpop.f32.mrf.mxu1 }
 0x23b   : > { %v1442_v62 = vadd.f32 %v18895_v11, %v18894_v18  ;;  %v2202_v54 = vadd.f32 %v2201_v7, %v18896_v17  ;;  %v3009_v53 = vand.u32 4294901760, %v3008_v46  ;;  %v17958_v51 = vand.u32 4294901760, %v13467_v40  ;;  %10419 = vmatpush3.msra.mxu1 %v18893_v0  ;;  %v18897_v10 = vld [vmem:[#allocation77_spill] sm:$0xff]  ;;  %v2215_v2 = vpop.f32.mrf.mxu0  ;;  %v18898_v11 = vld [vmem:[#allocation76_spill] sm:$0xff]  ;;  %v18901_v17 = vld [vmem:[#allocation86_spill] sm:$0xff] }
 0x23c   : > { %18892 = vst [vmem:[#allocation18_spill] sm:$0xff] %v13472_v20  ;;  %10340 = vmatprep.subr.mxu0 %v18897_v10  ;;  %v2204_v56 = vadd.f32 %v2203_v8, %v13411_v52  ;;  %v2789_v33 = vadd.f32 %v2757_v39, %v2689_v16  ;;  %v2654_v35 = vmin.f32 %v2516_v25, %v2518_v13  ;;  %v2524_v18 = vpop.f32.mrf.mxu1 }
 0x23d   : > { %v2722_v6 = vadd.f32 %v2518_v13, %v2516_v25  ;;  %10284 = vmatprep.mubr.f32.mxu1 %v13472_v20  ;;  %v2523_v57 = vadd.f32 %v2522_v29, %v2202_v54  ;;  %10201 = vmatprep.mubr.f32.mxu0 %v3009_v53  ;;  %v3018_v7 = vsub.f32 %v13467_v40, %v17958_v51  ;;  %v2217_v25 = vpop.f32.mrf.mxu0  ;;  %v18900_v53 = vld [vmem:[#allocation90_spill] sm:$0xff] }
 0x23e   : > { %v13488_v46 = vsub.f32 %v2788_v9, %v13472_v20  ;;  %10420 = vmatprep.subr.mxu1 %v18898_v11  ;;  %v2690_v52 = vmul.f32 %v13188_v4, %v2654_v35  ;;  %v2525_v16 = vadd.f32 %v2524_v18, %v2204_v56  ;;  %v13493_v39 = vand.u32 4294901760, %v2789_v33  ;;  %10341 = vmatpush3.msra.mxu0 %v18897_v10  ;;  %v2529_v54 = vpop.f32.mrf.mxu1  ;;  %v18902_v35 = vld [vmem:[#allocation78_spill] sm:$0xff] }
 0x23f   : > { %v2758_v8 = vmul.f32 %v13192_v55, %v2722_v6  ;;  %10421 = vmatpush3.msra.mxu1 %v18898_v11  ;;  %v1805_v13 = vadd.f32 %v18900_v53, %v13434_v63  ;;  %v2209_v9 = vadd.f32 %v2208_v14, %v18901_v17  ;;  %v3019_v29 = vand.u32 4294901760, %v3018_v7  ;;  %v18903_v6 = vld [vmem:[#allocation79_spill] sm:$0xff]  ;;  %v2222_v45 = vpop.f32.mrf.mxu0  ;;  %v18906_v53 = vld [vmem:[#allocation49_spill] sm:$0xff] }
 0x240   : > { %18899 = vst [vmem:[#allocation12_spill] sm:$0xff] %v13493_v39  ;;  %v17965_v51 = vand.u32 4294901760, %v13488_v46  ;;  %10422 = vmatprep.subr.mxu1 %v18902_v35  ;;  %10342 = vmatprep.subr.mxu0 %v18903_v6  ;;  %v2211_v56 = vadd.f32 %v2210_v27, %v1796_v23  ;;  %v2655_v20 = vmin.f32 %v2523_v57, %v2525_v16  ;;  %v2531_v63 = vpop.f32.mrf.mxu1 }
 0x241   : > { %v2790_v18 = vadd.f32 %v2758_v8, %v2690_v52  ;;  %v2723_v1 = vadd.f32 %v2525_v16, %v2523_v57  ;;  %10285 = vmatmul.mubr.f32.gmra.mxu1 %v13493_v39  ;;  %v2530_v10 = vadd.f32 %v2529_v54, %v2209_v9  ;;  %10202 = vmatmul.mubr.f32.gmra.mxu0 %v3019_v29  ;;  %v2224_v57 = vpop.f32.mrf.mxu0  ;;  %v18905_v16 = vld [vmem:[#allocation80_spill] sm:$0xff]  ;;  %v18907_v9 = vld [vmem:[#allocation89_spill] sm:$0xff] }
 0x242   : > { %v3028_v14 = vsub.f32 %v13488_v46, %v17965_v51  ;;  %v13508_v7 = vsub.f32 %v2789_v33, %v13493_v39  ;;  %10423 = vmatpush3.msra.mxu1 %v18902_v35  ;;  %v2691_v23 = vmul.f32 %v13188_v4, %v2655_v20  ;;  %v2532_v52 = vadd.f32 %v2531_v63, %v2211_v56  ;;  %v2536_v33 = vpop.f32.mrf.mxu1  ;;  %v18908_v20 = vld [vmem:[#allocation81_spill] sm:$0xff] }
 0x243   : > { %v2759_v27 = vmul.f32 %v13192_v55, %v2723_v1  ;;  %v13513_v8 = vand.u32 4294901760, %v2790_v18  ;;  %10424 = vmatprep.subr.mxu1 %v18905_v16  ;;  %10343 = vmatpush3.msra.mxu0 %v18903_v6  ;;  %v1814_v17 = vadd.f32 %v18906_v53, %v1442_v62  ;;  %v2216_v54 = vadd.f32 %v2215_v2, %v18907_v9  ;;  %v2229_v15 = vpop.f32.mrf.mxu0  ;;  %v18911_v53 = vld [vmem:[#allocation21_spill] sm:$0xff]  ;;  %v18912_v9 = vld [vmem:[#allocation91_spill] sm:$0xff] }
 0x244   : > { %v3029_v29 = vand.u32 4294901760, %v3028_v14  ;;  %v17970_v51 = vand.u32 4294901760, %v13508_v7  ;;  %10425 = vmatpush3.msra.mxu1 %v18905_v16  ;;  %10344 = vmatprep.subr.mxu0 %v18908_v20  ;;  %v2218_v1 = vadd.f32 %v2217_v25, %v1805_v13  ;;  %v2656_v63 = vmin.f32 %v2530_v10, %v2532_v52  ;;  %v2538_v62 = vpop.f32.mrf.mxu1 }
 0x245   : > { %18904 = vst [vmem:[#allocation67_spill] sm:$0xff] %v13513_v8  ;;  %v2791_v56 = vadd.f32 %v2759_v27, %v2691_v23  ;;  %v2724_v39 = vadd.f32 %v2532_v52, %v2530_v10  ;;  %10287 = vmatprep.mubr.f32.mxu1 %v13513_v8  ;;  %v2537_v6 = vadd.f32 %v2536_v33, %v2216_v54  ;;  %v2231_v10 = vpop.f32.mrf.mxu0  ;;  %v18910_v52 = vld [vmem:[#allocation28_spill] sm:$0xff] }
 0x246   : > { %10204 = vmatprep.mubr.f32.mxu0 %v3029_v29  ;;  %v3038_v2 = vsub.f32 %v13508_v7, %v17970_v51  ;;  %v13527_v14 = vsub.f32 %v2790_v18, %v13513_v8  ;;  %10345 = vmatpush3.msra.mxu0 %v18908_v20  ;;  %v2692_v25 = vmul.f32 %v13188_v4, %v2656_v63  ;;  %v18913_v33 = vld [vmem:[#allocation92_spill] sm:$0xff]  ;;  %v2543_v29 = vpop.f32.mrf.mxu1 }
 0x247   : > { %v2760_v13 = vmul.f32 %v13192_v55, %v2724_v39  ;;  %v2539_v23 = vadd.f32 %v2538_v62, %v2218_v1  ;;  %v13532_v27 = vand.u32 4294901760, %v2791_v56  ;;  %10474 = vmatprep.subr.mxu0 %v18910_v52  ;;  %10554 = vmatprep.subr.mxu1 %v12584_v59  ;;  %v1450_v54 = vadd.f32 %v18912_v9, %v18911_v53  ;;  %v2236_v1 = vpop.f32.mrf.mxu0  ;;  %v18914_v62 = vld [vmem:[#allocation7_spill] sm:$0xff]  ;;  %v18917_v53 = vld [vmem:[#allocation93_spill] sm:$0xff] }
 0x248   : > { %v2223_v18 = vadd.f32 %v2222_v45, %v18913_v33  ;;  %v3039_v51 = vand.u32 4294901760, %v3038_v2  ;;  %v17981_v20 = vand.u32 4294901760, %v13527_v14  ;;  %v2225_v63 = vadd.f32 %v2224_v57, %v1814_v17  ;;  %v2545_v31 = vpop.f32.mrf.mxu1 }
 0x249   : > { %18909 = vst [vmem:[#allocation19_spill] sm:$0xff] %v13532_v27  ;;  %v2792_v8 = vadd.f32 %v2760_v13, %v2692_v25  ;;  %v2657_v39 = vmin.f32 %v2537_v6, %v2539_v23  ;;  %v2725_v47 = vadd.f32 %v2539_v23, %v2537_v6  ;;  %10288 = vmatmul.mubr.f32.gmra.mxu1 %v13532_v27  ;;  %v2238_v6 = vpop.f32.mrf.mxu0  ;;  %v18916_v23 = vld [vmem:[#allocation6_spill] sm:$0xff] }
 0x24a   : > { %v1823_v12 = vadd.f32 %v18914_v62, %v1450_v54  ;;  %v2544_v48 = vadd.f32 %v2543_v29, %v2223_v18  ;;  %10205 = vmatmul.mubr.f32.gmra.mxu0 %v3039_v51  ;;  %v3048_v45 = vsub.f32 %v13527_v14, %v17981_v20  ;;  %v13546_v2 = vsub.f32 %v2791_v56, %v13532_v27  ;;  %v18918_v51 = vld [vmem:[#allocation94_spill] sm:$0xff]  ;;  %v2550_v33 = vpop.f32.mrf.mxu1 }
 0x24b   : > { %v2693_v57 = vmul.f32 %v13188_v4, %v2657_v39  ;;  %v2761_v17 = vmul.f32 %v13192_v55, %v2725_v47  ;;  %v2546_v25 = vadd.f32 %v2545_v31, %v2225_v63  ;;  %v13550_v13 = vand.u32 4294901760, %v2792_v8  ;;  %v2243_v39 = vpop.f32.mrf.mxu0  ;;  %v18919_v47 = vld [vmem:[#allocation52_spill] sm:$0xff] }
 0x24c   : > { %v1458_v9 = vadd.f32 %v18917_v53, %v18916_v23  ;;  %v2230_v54 = vadd.f32 %v2229_v15, %v18918_v51  ;;  %v3049_v18 = vand.u32 4294901760, %v3048_v45  ;;  %v17986_v29 = vand.u32 4294901760, %v13546_v2  ;;  %v2552_v61 = vpop.f32.mrf.mxu1  ;;  %v18922_v23 = vld [vmem:[#allocation95_spill] sm:$0xff] }
 0x24d   : > { %18915 = vst [vmem:[#allocation2_spill] sm:$0xff] %v13550_v13  ;;  %v2232_v62 = vadd.f32 %v2231_v10, %v1823_v12  ;;  %v2793_v56 = vadd.f32 %v2761_v17, %v2693_v57  ;;  %v2658_v20 = vmin.f32 %v2544_v48, %v2546_v25  ;;  %v2726_v27 = vadd.f32 %v2546_v25, %v2544_v48  ;;  %v2245_v48 = vpop.f32.mrf.mxu0  ;;  %v18921_v25 = vld [vmem:[#allocation25_spill] sm:$0xff] }
 0x24e   : > { %10290 = vmatprep.mubr.f32.mxu1 %v13550_v13  ;;  %v1832_v31 = vadd.f32 %v18919_v47, %v1458_v9  ;;  %v2551_v63 = vadd.f32 %v2550_v33, %v2230_v54  ;;  %10207 = vmatprep.mubr.f32.mxu0 %v3049_v18  ;;  %v3058_v15 = vsub.f32 %v13546_v2, %v17986_v29  ;;  %v18923_v9 = vld [vmem:[#allocation96_spill] sm:$0xff]  ;;  %v2557_v54 = vpop.f32.mrf.mxu1 }
 0x24f   : > { %v13562_v45 = vsub.f32 %v2792_v8, %v13550_v13  ;;  %v2694_v12 = vmul.f32 %v13188_v4, %v2658_v20  ;;  %v2762_v10 = vmul.f32 %v13192_v55, %v2726_v27  ;;  %v2553_v57 = vadd.f32 %v2552_v61, %v2232_v62  ;;  %v2250_v20 = vpop.f32.mrf.mxu0  ;;  %v18924_v27 = vld [vmem:[#allocation54_spill] sm:$0xff] }
 0x250   : > { %v13566_v17 = vand.u32 4294901760, %v2793_v56  ;;  %v1466_v53 = vadd.f32 %v18922_v23, %v18921_v25  ;;  %v2237_v51 = vadd.f32 %v2236_v1, %v18923_v9  ;;  %v3059_v33 = vand.u32 4294901760, %v3058_v15  ;;  %v2559_v16 = vpop.f32.mrf.mxu1  ;;  %v18927_v25 = vld [vmem:[#allocation97_spill] sm:$0xff] }
 0x251   : > { %v17990_v18 = vand.u32 4294901760, %v13562_v45  ;;  %v2239_v47 = vadd.f32 %v2238_v6, %v1832_v31  ;;  %v2794_v8 = vadd.f32 %v2762_v10, %v2694_v12  ;;  %v2659_v29 = vmin.f32 %v2551_v63, %v2553_v57 }
 0x252   : > { %18920 = vst [vmem:[#allocation71_spill] sm:$0xff] %v13566_v17  ;;  %v2727_v13 = vadd.f32 %v2553_v57, %v2551_v63  ;;  %10291 = vmatmul.mubr.f32.gmra.mxu1 %v13566_v17  ;;  %v1841_v61 = vadd.f32 %v18924_v27, %v1466_v53  ;;  %v2558_v62 = vadd.f32 %v2557_v54, %v2237_v51  ;;  %v2252_v63 = vpop.f32.mrf.mxu0  ;;  %v18926_v57 = vld [vmem:[#allocation9_spill] sm:$0xff]  ;;  %v18928_v53 = vld [vmem:[#allocation98_spill] sm:$0xff]  ;;  %v2564_v51 = vpop.f32.mrf.mxu1 }
 0x253   : > { %10208 = vmatmul.mubr.f32.gmra.mxu0 %v3059_v33  ;;  %v3068_v1 = vsub.f32 %v13562_v45, %v17990_v18  ;;  %v13578_v15 = vsub.f32 %v2793_v56, %v13566_v17  ;;  %v2695_v6 = vmul.f32 %v13188_v4, %v2659_v29  ;;  %v2560_v12 = vadd.f32 %v2559_v16, %v2239_v47 }
 0x254   : > { %v2763_v31 = vmul.f32 %v13192_v55, %v2727_v13  ;;  %v13582_v10 = vand.u32 4294901760, %v2794_v8  ;;  %v1474_v23 = vadd.f32 %v18927_v25, %v18926_v57  ;;  %v2244_v9 = vadd.f32 %v2243_v39, %v18928_v53  ;;  %v2257_v29 = vpop.f32.mrf.mxu0  ;;  %v18929_v13 = vld [vmem:[#allocation55_spill] sm:$0xff]  ;;  %v2566_v35 = vpop.f32.mrf.mxu1 }
 0x255   : > { %v3069_v54 = vand.u32 4294901760, %v3068_v1  ;;  %v17994_v33 = vand.u32 4294901760, %v13578_v15  ;;  %v2246_v27 = vadd.f32 %v2245_v48, %v1841_v61  ;;  %v2660_v18 = vmin.f32 %v2558_v62, %v2560_v12  ;;  %v18932_v57 = vld [vmem:[#allocation99_spill] sm:$0xff] }
 0x256   : > { %18925 = vst [vmem:[#allocation37_spill] sm:$0xff] %v13582_v10  ;;  %v2795_v56 = vadd.f32 %v2763_v31, %v2695_v6  ;;  %v2728_v17 = vadd.f32 %v2560_v12, %v2558_v62  ;;  %10293 = vmatprep.mubr.f32.mxu1 %v13582_v10  ;;  %v1850_v16 = vadd.f32 %v18929_v13, %v1474_v23  ;;  %v2259_v62 = vpop.f32.mrf.mxu0  ;;  %v18931_v12 = vld [vmem:[#allocation11_spill] sm:$0xff]  ;;  %v18933_v23 = vld [vmem:[#allocation100_spill] sm:$0xff] }
 0x257   : > { %v2565_v47 = vadd.f32 %v2564_v51, %v2244_v9  ;;  %10210 = vmatprep.mubr.f32.mxu0 %v3069_v54  ;;  %v3078_v39 = vsub.f32 %v13578_v15, %v17994_v33  ;;  %v13594_v1 = vsub.f32 %v2794_v8, %v13582_v10  ;;  %v2696_v48 = vmul.f32 %v13188_v4, %v2660_v18  ;;  %v2571_v9 = vpop.f32.mrf.mxu1 }
 0x258   : > { %v2764_v61 = vmul.f32 %v13192_v55, %v2728_v17  ;;  %v2567_v6 = vadd.f32 %v2566_v35, %v2246_v27  ;;  %v13598_v31 = vand.u32 4294901760, %v2795_v56  ;;  %v1482_v25 = vadd.f32 %v18932_v57, %v18931_v12  ;;  %v2264_v18 = vpop.f32.mrf.mxu0  ;;  %v18934_v17 = vld [vmem:[#allocation15_spill] sm:$0xff]  ;;  %v18937_v12 = vld [vmem:[#allocation101_spill] sm:$0xff] }
 0x259   : > { %v2251_v53 = vadd.f32 %v2250_v20, %v18933_v23  ;;  %v3079_v51 = vand.u32 4294901760, %v3078_v39  ;;  %v17998_v54 = vand.u32 4294901760, %v13594_v1  ;;  %v2253_v13 = vadd.f32 %v2252_v63, %v1850_v16  ;;  %v2573_v11 = vpop.f32.mrf.mxu1 }
 0x25a   : > { %18930 = vst [vmem:[#allocation32_spill] sm:$0xff] %v13598_v31  ;;  %v2796_v8 = vadd.f32 %v2764_v61, %v2696_v48  ;;  %v2661_v33 = vmin.f32 %v2565_v47, %v2567_v6  ;;  %v2729_v10 = vadd.f32 %v2567_v6, %v2565_v47  ;;  %10294 = vmatmul.mubr.f32.gmra.mxu1 %v13598_v31  ;;  %v2266_v47 = vpop.f32.mrf.mxu0  ;;  %v18936_v6 = vld [vmem:[#allocation57_spill] sm:$0xff] }
 0x25b   : > { %v1859_v35 = vadd.f32 %v18934_v17, %v1482_v25  ;;  %v2572_v27 = vadd.f32 %v2571_v9, %v2251_v53  ;;  %10211 = vmatmul.mubr.f32.gmra.mxu0 %v3079_v51  ;;  %v3088_v20 = vsub.f32 %v13594_v1, %v17998_v54  ;;  %v13610_v39 = vsub.f32 %v2795_v56, %v13598_v31  ;;  %v18938_v25 = vld [vmem:[#allocation102_spill] sm:$0xff]  ;;  %v2578_v53 = vpop.f32.mrf.mxu1 }
 0x25c   : > { %v2697_v63 = vmul.f32 %v13188_v4, %v2661_v33  ;;  %v2765_v16 = vmul.f32 %v13192_v55, %v2729_v10  ;;  %v2574_v48 = vadd.f32 %v2573_v11, %v2253_v13  ;;  %v13614_v61 = vand.u32 4294901760, %v2796_v8  ;;  %v2271_v33 = vpop.f32.mrf.mxu0  ;;  %v18939_v10 = vld [vmem:[#allocation16_spill] sm:$0xff] }
 0x25d   : > { %v1490_v57 = vadd.f32 %v18937_v12, %v18936_v6  ;;  %v2258_v23 = vadd.f32 %v2257_v29, %v18938_v25  ;;  %v3089_v9 = vand.u32 4294901760, %v3088_v20  ;;  %v18002_v51 = vand.u32 4294901760, %v13610_v39  ;;  %v2580_v0 = vpop.f32.mrf.mxu1  ;;  %v18942_v6 = vld [vmem:[#allocation103_spill] sm:$0xff] }
 0x25e   : > { %18935 = vst [vmem:[#allocation40_spill] sm:$0xff] %v13614_v61  ;;  %v2260_v17 = vadd.f32 %v2259_v62, %v1859_v35  ;;  %v2797_v56 = vadd.f32 %v2765_v16, %v2697_v63  ;;  %v2662_v54 = vmin.f32 %v2572_v27, %v2574_v48  ;;  %v2730_v31 = vadd.f32 %v2574_v48, %v2572_v27  ;;  %v2273_v27 = vpop.f32.mrf.mxu0  ;;  %v18941_v48 = vld [vmem:[#allocation34_spill] sm:$0xff] }
 0x25f   : > { %10296 = vmatprep.mubr.f32.mxu1 %v13614_v61  ;;  %v1868_v11 = vadd.f32 %v18939_v10, %v1490_v57  ;;  %v2579_v13 = vadd.f32 %v2578_v53, %v2258_v23  ;;  %10213 = vmatprep.mubr.f32.mxu0 %v3089_v9  ;;  %v3098_v29 = vsub.f32 %v13610_v39, %v18002_v51  ;;  %v18943_v57 = vld [vmem:[#allocation104_spill] sm:$0xff]  ;;  %v2585_v23 = vpop.f32.mrf.mxu1 }
 0x260   : > { %v13626_v20 = vsub.f32 %v2796_v8, %v13614_v61  ;;  %v2698_v62 = vmul.f32 %v13188_v4, %v2662_v54  ;;  %v2766_v35 = vmul.f32 %v13192_v55, %v2730_v31  ;;  %v2581_v63 = vadd.f32 %v2580_v0, %v2260_v17  ;;  %v2278_v54 = vpop.f32.mrf.mxu0  ;;  %v18944_v31 = vld [vmem:[#allocation22_spill] sm:$0xff] }
 0x261   : > { %v13630_v16 = vand.u32 4294901760, %v2797_v56  ;;  %v1498_v12 = vadd.f32 %v18942_v6, %v18941_v48  ;;  %v2265_v25 = vadd.f32 %v2264_v18, %v18943_v57  ;;  %v3099_v53 = vand.u32 4294901760, %v3098_v29  ;;  %v2587_v36 = vpop.f32.mrf.mxu1  ;;  %v18948_v48 = vld [vmem:[#allocation105_spill] sm:$0xff] }
 0x262   : > { %v18006_v9 = vand.u32 4294901760, %v13626_v20  ;;  %v2267_v10 = vadd.f32 %v2266_v47, %v1868_v11  ;;  %v2798_v8 = vadd.f32 %v2766_v35, %v2698_v62  ;;  %v2663_v51 = vmin.f32 %v2579_v13, %v2581_v63 }
 0x263   : > { %18940 = vst [vmem:[#allocation48_spill] sm:$0xff] %v13630_v16  ;;  %v2731_v61 = vadd.f32 %v2581_v63, %v2579_v13  ;;  %10297 = vmatmul.mubr.f32.gmra.mxu1 %v13630_v16  ;;  %v1877_v0 = vadd.f32 %v18944_v31, %v1498_v12  ;;  %v2586_v17 = vadd.f32 %v2585_v23, %v2265_v25  ;;  %v2280_v13 = vpop.f32.mrf.mxu0  ;;  %v18947_v63 = vld [vmem:[#allocation35_spill] sm:$0xff]  ;;  %v18949_v12 = vld [vmem:[#allocation106_spill] sm:$0xff]  ;;  %v2592_v25 = vpop.f32.mrf.mxu1 }
 0x264   : > { %10214 = vmatmul.mubr.f32.gmra.mxu0 %v3099_v53  ;;  %v3108_v18 = vsub.f32 %v13626_v20, %v18006_v9  ;;  %v13642_v29 = vsub.f32 %v2797_v56, %v13630_v16  ;;  %v2699_v47 = vmul.f32 %v13188_v4, %v2663_v51  ;;  %v2588_v62 = vadd.f32 %v2587_v36, %v2267_v10 }
 0x265   : > { %v2767_v11 = vmul.f32 %v13192_v55, %v2731_v61  ;;  %v13646_v35 = vand.u32 4294901760, %v2798_v8  ;;  %v1506_v6 = vadd.f32 %v18948_v48, %v18947_v63  ;;  %v2272_v57 = vadd.f32 %v2271_v33, %v18949_v12  ;;  %v2285_v51 = vpop.f32.mrf.mxu0  ;;  %v18950_v61 = vld [vmem:[#allocation63_spill] sm:$0xff]  ;;  %v2594_v26 = vpop.f32.mrf.mxu1 }
 0x266   : > { %18945 = vst [vmem:[#allocation43_spill] sm:$0xff] %v13642_v29  ;;  %v3109_v23 = vand.u32 4294901760, %v3108_v18  ;;  %v18010_v53 = vand.u32 4294901760, %v13642_v29  ;;  %v2274_v31 = vadd.f32 %v2273_v27, %v1877_v0  ;;  %v2664_v9 = vmin.f32 %v2586_v17, %v2588_v62  ;;  %v18954_v63 = vld [vmem:[#allocation107_spill] sm:$0xff] }
 0x267   : > { %18946 = vst [vmem:[#allocation46_spill] sm:$0xff] %v13646_v35  ;;  %v2799_v56 = vadd.f32 %v2767_v11, %v2699_v47  ;;  %v2732_v16 = vadd.f32 %v2588_v62, %v2586_v17  ;;  %10299 = vmatprep.mubr.f32.mxu1 %v13646_v35  ;;  %v1886_v36 = vadd.f32 %v18950_v61, %v1506_v6  ;;  %v2287_v17 = vpop.f32.mrf.mxu0  ;;  %v18953_v62 = vld [vmem:[#allocation24_spill] sm:$0xff] }
 0x268   : > { %v2593_v10 = vadd.f32 %v2592_v25, %v2272_v57  ;;  %10216 = vmatprep.mubr.f32.mxu0 %v3109_v23  ;;  %v3118_v33 = vsub.f32 %v13642_v29, %v18010_v53  ;;  %v13658_v18 = vsub.f32 %v2798_v8, %v13646_v35  ;;  %v2700_v27 = vmul.f32 %v13188_v4, %v2664_v9  ;;  %v18955_v6 = vld [vmem:[#allocation108_spill] sm:$0xff]  ;;  %v2599_v57 = vpop.f32.mrf.mxu1 }
 0x269   : > { %v2768_v0 = vmul.f32 %v13192_v55, %v2732_v16  ;;  %v2595_v47 = vadd.f32 %v2594_v26, %v2274_v31  ;;  %v13662_v11 = vand.u32 4294901760, %v2799_v56  ;;  %v1514_v48 = vadd.f32 %v18954_v63, %v18953_v62  ;;  %v2292_v9 = vpop.f32.mrf.mxu0  ;;  %v18956_v16 = vld [vmem:[#allocation72_spill] sm:$0xff]  ;;  %v18960_v62 = vld [vmem:[#allocation109_spill] sm:$0xff] }
 0x26a   : > { %18951 = vst [vmem:[#allocation51_spill] sm:$0xff] %v13658_v18  ;;  %v2279_v12 = vadd.f32 %v2278_v54, %v18955_v6  ;;  %v3119_v25 = vand.u32 4294901760, %v3118_v33  ;;  %v18015_v23 = vand.u32 4294901760, %v13658_v18  ;;  %v2281_v61 = vadd.f32 %v2280_v13, %v1886_v36  ;;  %v2601_v29 = vpop.f32.mrf.mxu1 }
 0x26b   : > { %18952 = vst [vmem:[#allocation56_spill] sm:$0xff] %v13662_v11  ;;  %v2800_v8 = vadd.f32 %v2768_v0, %v2700_v27  ;;  %v2665_v53 = vmin.f32 %v2593_v10, %v2595_v47  ;;  %v2733_v35 = vadd.f32 %v2595_v47, %v2593_v10  ;;  %10300 = vmatmul.mubr.f32.gmra.mxu1 %v13662_v11  ;;  %v2294_v10 = vpop.f32.mrf.mxu0  ;;  %v18959_v47 = vld [vmem:[#allocation69_spill] sm:$0xff] }
 0x26c   : > { %v1895_v26 = vadd.f32 %v18956_v16, %v1514_v48  ;;  %v2600_v31 = vadd.f32 %v2599_v57, %v2279_v12  ;;  %10217 = vmatmul.mubr.f32.gmra.mxu0 %v3119_v25  ;;  %v3128_v54 = vsub.f32 %v13658_v18, %v18015_v23  ;;  %v13674_v33 = vsub.f32 %v2799_v56, %v13662_v11  ;;  %v18961_v48 = vld [vmem:[#allocation110_spill] sm:$0xff]  ;;  %v2606_v12 = vpop.f32.mrf.mxu1 }
 0x26d   : > { %v2701_v13 = vmul.f32 %v13188_v4, %v2665_v53  ;;  %v2769_v36 = vmul.f32 %v13192_v55, %v2733_v35  ;;  %v2602_v27 = vadd.f32 %v2601_v29, %v2281_v61  ;;  %v13678_v0 = vand.u32 4294901760, %v2800_v8  ;;  %v2299_v53 = vpop.f32.mrf.mxu0  ;;  %v18962_v35 = vld [vmem:[#allocation41_spill] sm:$0xff] }
 0x26e   : > { %18957 = vst [vmem:[#allocation4_spill] sm:$0xff] %v13674_v33  ;;  %v1522_v63 = vadd.f32 %v18960_v62, %v18959_v47  ;;  %v2286_v6 = vadd.f32 %v2285_v51, %v18961_v48  ;;  %v3129_v57 = vand.u32 4294901760, %v3128_v54  ;;  %v18020_v25 = vand.u32 4294901760, %v13674_v33  ;;  %v2608_v18 = vpop.f32.mrf.mxu1  ;;  %v18966_v47 = vld [vmem:[#allocation111_spill] sm:$0xff] }
 0x26f   : > { %18958 = vst [vmem:[#allocation85_spill] sm:$0xff] %v13678_v0  ;;  %v2288_v16 = vadd.f32 %v2287_v17, %v1895_v26  ;;  %v2801_v56 = vadd.f32 %v2769_v36, %v2701_v13  ;;  %v2666_v23 = vmin.f32 %v2600_v31, %v2602_v27  ;;  %v2734_v11 = vadd.f32 %v2602_v27, %v2600_v31  ;;  %v2301_v31 = vpop.f32.mrf.mxu0  ;;  %v18965_v27 = vld [vmem:[#allocation36_spill] sm:$0xff] }
 0x270   : > { %10302 = vmatprep.mubr.f32.mxu1 %v13678_v0  ;;  %v1904_v29 = vadd.f32 %v18962_v35, %v1522_v63  ;;  %v2607_v61 = vadd.f32 %v2606_v12, %v2286_v6  ;;  %10219 = vmatprep.mubr.f32.mxu0 %v3129_v57  ;;  %v3138_v51 = vsub.f32 %v13674_v33, %v18020_v25  ;;  %v18967_v63 = vld [vmem:[#allocation112_spill] sm:$0xff]  ;;  %v2613_v6 = vpop.f32.mrf.mxu1 }
 0x271   : > { %v13690_v54 = vsub.f32 %v2800_v8, %v13678_v0  ;;  %v2702_v17 = vmul.f32 %v13188_v4, %v2666_v23  ;;  %v2770_v26 = vmul.f32 %v13192_v55, %v2734_v11  ;;  %v2609_v13 = vadd.f32 %v2608_v18, %v2288_v16  ;;  %v2306_v23 = vpop.f32.mrf.mxu0  ;;  %v18968_v11 = vld [vmem:[#allocation115_spill] sm:$0xff] }
 0x272   : > { %v13694_v36 = vand.u32 4294901760, %v2801_v56  ;;  %v1530_v62 = vadd.f32 %v18966_v47, %v18965_v27  ;;  %v2293_v48 = vadd.f32 %v2292_v9, %v18967_v63  ;;  %v3139_v12 = vand.u32 4294901760, %v3138_v51  ;;  %v2615_v33 = vpop.f32.mrf.mxu1  ;;  %v18971_v27 = vld [vmem:[#allocation113_spill] sm:$0xff] }
 0x273   : > { %18963 = vst [vmem:[#allocation82_spill] sm:$0xff] %v13690_v54  ;;  %v18025_v57 = vand.u32 4294901760, %v13690_v54  ;;  %v2295_v35 = vadd.f32 %v2294_v10, %v1904_v29  ;;  %v2802_v8 = vadd.f32 %v2770_v26, %v2702_v17  ;;  %v2667_v25 = vmin.f32 %v2607_v61, %v2609_v13 }
 0x274   : > { %18964 = vst [vmem:[#allocation61_spill] sm:$0xff] %v13694_v36  ;;  %v2735_v0 = vadd.f32 %v2609_v13, %v2607_v61  ;;  %10303 = vmatmul.mubr.f32.gmra.mxu1 %v13694_v36  ;;  %v1913_v18 = vadd.f32 %v18968_v11, %v1530_v62  ;;  %v2614_v16 = vadd.f32 %v2613_v6, %v2293_v48  ;;  %v2308_v61 = vpop.f32.mrf.mxu0  ;;  %v18970_v13 = vld [vmem:[#allocation47_spill] sm:$0xff]  ;;  %v18972_v62 = vld [vmem:[#allocation114_spill] sm:$0xff]  ;;  %v2620_v48 = vpop.f32.mrf.mxu1 }
 0x275   : > { %10220 = vmatmul.mubr.f32.gmra.mxu0 %v3139_v12  ;;  %v3148_v9 = vsub.f32 %v13690_v54, %v18025_v57  ;;  %v13706_v51 = vsub.f32 %v2801_v56, %v13694_v36  ;;  %v2703_v10 = vmul.f32 %v13188_v4, %v2667_v25  ;;  %v2616_v17 = vadd.f32 %v2615_v33, %v2295_v35 }
 0x276   : > { %v2771_v29 = vmul.f32 %v13192_v55, %v2735_v0  ;;  %v13710_v26 = vand.u32 4294901760, %v2802_v8  ;;  %v1538_v47 = vadd.f32 %v18971_v27, %v18970_v13  ;;  %v2300_v63 = vadd.f32 %v2299_v53, %v18972_v62  ;;  %v18973_v0 = vld [vmem:[#allocation118_spill] sm:$0xff]  ;;  %v2313_v33 = vpop.f32.mrf.mxu0  ;;  %v2622_v54 = vpop.f32.mrf.mxu1  ;;  %v18976_v27 = vld [vmem:[#allocation117_spill] sm:$0xff] }
 0x277   : > { %v3149_v6 = vand.u32 4294901760, %v3148_v9  ;;  %v18030_v12 = vand.u32 4294901760, %v13706_v51  ;;  %v2302_v11 = vadd.f32 %v2301_v31, %v1913_v18  ;;  %v2668_v57 = vmin.f32 %v2614_v16, %v2616_v17 }
 0x278   : > { %18969 = vst [vmem:[#allocation62_spill] sm:$0xff] %v13710_v26  ;;  %v2803_v56 = vadd.f32 %v2771_v29, %v2703_v10  ;;  %v2736_v36 = vadd.f32 %v2616_v17, %v2614_v16  ;;  %10305 = vmatprep.mubr.f32.mxu1 %v13710_v26  ;;  %v1922_v25 = vadd.f32 %v18973_v0, %v1538_v47  ;;  %v18974_v29 = vld [vmem:[#allocation17_spill] sm:$0xff]  ;;  %v18975_v17 = vld [vmem:[#allocation116_spill] sm:$0xff]  ;;  %v2627_v62 = vpop.f32.mrf.mxu1 }
 0x279   : > { %v2621_v35 = vadd.f32 %v2620_v48, %v2300_v63  ;;  %10222 = vmatprep.mubr.f32.mxu0 %v3149_v6  ;;  %v3158_v53 = vsub.f32 %v13706_v51, %v18030_v12  ;;  %v13722_v9 = vsub.f32 %v2802_v8, %v13710_v26  ;;  %v2704_v31 = vmul.f32 %v13188_v4, %v2668_v57  ;;  %v18977_v57 = vld [vmem:[#allocation121_spill] sm:$0xff] }
 0x27a   : > { %v2772_v18 = vmul.f32 %v13192_v55, %v2736_v36  ;;  %v2623_v16 = vadd.f32 %v2622_v54, %v2302_v11  ;;  %v13726_v10 = vand.u32 4294901760, %v2803_v56  ;;  %v1546_v13 = vadd.f32 %v18975_v17, %v18974_v29  ;;  %v2315_v54 = vpop.f32.mrf.mxu0  ;;  %v2629_v26 = vpop.f32.mrf.mxu1 }
 0x27b   : > { %v2307_v47 = vadd.f32 %v2306_v23, %v18976_v27  ;;  %v3159_v63 = vand.u32 4294901760, %v3158_v53  ;;  %v3167_v48 = vand.u32 4294901760, %v13722_v9  ;;  %v2309_v6 = vadd.f32 %v2308_v61, %v1922_v25 }
 0x27c   : > { %v2804_v0 = vadd.f32 %v2772_v18, %v2704_v31  ;;  %v2669_v8 = vmin.f32 %v2621_v35, %v2623_v16  ;;  %v2737_v12 = vadd.f32 %v2623_v16, %v2621_v35  ;;  %10306 = vmatmul.mubr.f32.gmra.mxu1 %v13726_v10  ;;  %v1931_v36 = vadd.f32 %v18977_v57, %v1546_v13  ;;  %v18978_v18 = vld [vmem:[#allocation120_spill] sm:$0xff]  ;;  %v2634_v29 = vpop.f32.mrf.mxu1 }
 0x27d   : > { %v2628_v11 = vadd.f32 %v2627_v62, %v2307_v47  ;;  %10223 = vmatmul.mubr.f32.gmra.mxu0 %v3159_v63  ;;  %v3168_v23 = vsub.f32 %v13722_v9, %v3167_v48  ;;  %v13738_v53 = vsub.f32 %v2803_v56, %v13726_v10  ;;  %v2630_v35 = vadd.f32 %v2629_v26, %v2309_v6 }
 0x27e   : > { %v2705_v61 = vmul.f32 %v13188_v4, %v2669_v8  ;;  %v2773_v25 = vmul.f32 %v13192_v55, %v2737_v12  ;;  %v13742_v31 = vand.u32 4294901760, %v2804_v0  ;;  %v2314_v16 = vadd.f32 %v2313_v33, %v18978_v18  ;;  %v2636_v8 = vpop.f32.mrf.mxu1 }
 0x27f   : > { %v3169_v17 = vand.u32 4294901760, %v3168_v23  ;;  %v3177_v13 = vand.u32 4294901760, %v13738_v53  ;;  %v2316_v27 = vadd.f32 %v2315_v54, %v1931_v36  ;;  %v2670_v62 = vmin.f32 %v2628_v11, %v2630_v35 }
 0x280   : > { %v2805_v47 = vadd.f32 %v2773_v25, %v2705_v61  ;;  %v2738_v63 = vadd.f32 %v2630_v35, %v2628_v11  ;;  %10308 = vmatprep.mubr.f32.mxu1 %v13742_v31  ;;  %v2635_v56 = vadd.f32 %v2634_v29, %v2314_v16  ;;  %v13751_v12 = vsub.f32 %v2804_v0, %v13742_v31 }
 0x281   : > { %10225 = vmatprep.mubr.f32.mxu0 %v3169_v17  ;;  %v3178_v26 = vsub.f32 %v13738_v53, %v3177_v13  ;;  %v2706_v33 = vmul.f32 %v13188_v4, %v2670_v62  ;;  %v2637_v57 = vadd.f32 %v2636_v8, %v2316_v27 }
 0x282   : > { %v2774_v6 = vmul.f32 %v13192_v55, %v2738_v63  ;;  %v13755_v36 = vand.u32 4294901760, %v2805_v47  ;;  %v3187_v11 = vand.u32 4294901760, %v13751_v12 }
 0x283   : > { %v3179_v54 = vand.u32 4294901760, %v3178_v26  ;;  %v2671_v61 = vmin.f32 %v2635_v56, %v2637_v57  ;;  %v2739_v25 = vadd.f32 %v2637_v57, %v2635_v56 }
 0x284   : > { %v2806_v23 = vadd.f32 %v2774_v6, %v2706_v33  ;;  %10309 = vmatmul.mubr.f32.gmra.mxu1 %v13755_v36  ;;  %v13760_v35 = vsub.f32 %v2805_v47, %v13755_v36  ;;  %v3188_v0 = vsub.f32 %v13751_v12, %v3187_v11  ;;  %v18979_v33 = vand.u32 4294901760, %v13222_v43 }
 0x285   : > { %10226 = vmatmul.mubr.f32.gmra.mxu0 %v3179_v54  ;;  %v2707_v18 = vmul.f32 %v13188_v4, %v2671_v61  ;;  %v2775_v16 = vmul.f32 %v13192_v55, %v2739_v25  ;;  %v18980_v54 = vand.u32 4294901760, %v13235_v19  ;;  %v18981_v61 = vand.u32 4294901760, %v13266_v32 }
 0x286   : > { %v13767_v29 = vand.u32 4294901760, %v2806_v23  ;;  %v3197_v17 = vand.u32 4294901760, %v13760_v35  ;;  %v3189_v27 = vand.u32 4294901760, %v3188_v0  ;;  %v18982_v0 = vand.u32 4294901760, %v13285_v49 }
 0x287   : > { %v2807_v62 = vadd.f32 %v2775_v16, %v2707_v18  ;;  %v18983_v18 = vand.u32 4294901760, %v13308_v3  ;;  %v19011_v16 = vld [vmem:[#allocation51_spill] sm:$0xff] }
 0x288   : > { %10311 = vmatprep.mubr.f32.mxu1 %v13767_v29  ;;  %v3198_v47 = vsub.f32 %v13760_v35, %v3197_v17  ;;  %v13775_v63 = vsub.f32 %v2806_v23, %v13767_v29  ;;  %10228 = vmatprep.mubr.f32.mxu0 %v3189_v27  ;;  %v19013_v27 = vld [vmem:[#allocation8_spill] sm:$0xff] }
 0x289   : > { %v13777_v4 = vand.u32 4294901760, %v2807_v62 }
 0x28a   : > { %v3199_v56 = vand.u32 4294901760, %v3198_v47  ;;  %v3207_v55 = vand.u32 4294901760, %v13775_v63  ;;  %v19015_v47 = vld [vmem:[#allocation4_spill] sm:$0xff] }
 0x28b   : > { %10312 = vmatmul.mubr.f32.gmra.mxu1 %v13777_v4  ;;  %v13785_v26 = vsub.f32 %v2807_v62, %v13777_v4  ;;  %v19014_v62 = vld [vmem:[#allocation10_spill] sm:$0xff] }
 0x28c   : > { %10229 = vmatmul.mubr.f32.gmra.mxu0 %v3199_v56  ;;  %v3208_v8 = vsub.f32 %v13775_v63, %v3207_v55  ;;  %10426 = vmatprep.mubr.f32.mxu1 %v18979_v33  ;;  %v19017_v56 = vld [vmem:[#allocation82_spill] sm:$0xff] }
 0x28d   : > { %v3217_v57 = vand.u32 4294901760, %v13785_v26  ;;  %v19020_v33 = vld [vmem:[#allocation74_spill] sm:$0xff] }
 0x28e   : > { %v3209_v6 = vand.u32 4294901760, %v3208_v8  ;;  %v19019_v8 = vld [vmem:[#allocation73_spill] sm:$0xff] }
 0x28f   : > { %10427 = vmatmul.mubr.f32.vlgmr.msra.gmra.mxu1 %v18980_v54  ;;  %v3218_v23 = vsub.f32 %v13785_v26, %v3217_v57  ;;  %v19025_v54 = vld [vmem:[#allocation20_spill] sm:$0xff] }
 0x290   : > { %10231 = vmatprep.mubr.f32.mxu0 %v3209_v6  ;;  %10429 = vmatprep.mubr.f32.mxu1 %v18981_v61  ;;  %v19023_v6 = vld [vmem:[#allocation64_spill] sm:$0xff] }
 0x291   : > { %10555 = vmatpush3.msra.mxu1 %v12584_v59  ;;  %v3219_v25 = vand.u32 4294901760, %v3218_v23  ;;  %v18984_v59 = vand.u32 4294901760, %v13331_v42 }
 0x292   : > { %10556 = vmatprep.subr.mxu1 %v18851_v34 }
 0x293   : > { %10557 = vmatpush3.msra.mxu1 %v18851_v34  ;;  %10232 = vmatmul.mubr.f32.gmra.mxu0 %v3219_v25  ;;  %v18985_v34 = vand.u32 4294901760, %v13354_v37  ;;  %v19037_v25 = vld [vmem:[#allocation45_spill] sm:$0xff] }
 0x294   : > { %10430 = vmatmul.mubr.f32.gmra.mxu1 %v18982_v0  ;;  %10346 = vmatprep.mubr.f32.mxu0 %v13222_v43  ;;  %v18986_v43 = vld [vmem:[#allocation14_spill] sm:$0xff]  ;;  %v19038_v0 = vld [vmem:[#allocation60_spill] sm:$0xff] }
 0x295   : > { %10432 = vmatprep.mubr.f32.mxu1 %v18983_v18  ;;  %10558 = vmatprep.subr.mxu1 %v18853_v24  ;;  %v19039_v18 = vld [vmem:[#allocation13_spill] sm:$0xff] }
 0x296   : > { %10559 = vmatpush3.msra.mxu1 %v18853_v24  ;;  %v18988_v24 = vand.u32 4294901760, %v13400_v41 }
 0x297   : > { %10347 = vmatmul.mubr.f32.vlgmr.msra.gmra.mxu0 %v13235_v19  ;;  %10560 = vmatprep.subr.mxu1 %v18856_v5  ;;  %v18987_v19 = vand.u32 4294901760, %v13377_v44 }
 0x298   : > { %10433 = vmatmul.mubr.f32.gmra.mxu1 %v18984_v59  ;;  %10349 = vmatprep.mubr.f32.mxu0 %v13266_v32  ;;  %v18989_v32 = vld [vmem:[#allocation59_spill] sm:$0xff] }
 0x299   : > { %10435 = vmatprep.mubr.f32.mxu1 %v18985_v34  ;;  %10475 = vmatpush3.msra.mxu0 %v18910_v52  ;;  %v19008_v52 = vld [vmem:[#allocation53_spill] sm:$0xff]  ;;  %v19040_v59 = vld [vmem:[#allocation3_spill] sm:$0xff] }
 0x29a   : > { %10476 = vmatprep.subr.mxu0 %v18986_v43  ;;  %10561 = vmatpush3.msra.mxu1 %v18856_v5  ;;  %v18990_v5 = vand.u32 4294901760, %v13423_v22 }
 0x29b   : > { %10350 = vmatmul.mubr.f32.gmra.mxu0 %v13285_v49  ;;  %10562 = vmatprep.subr.mxu1 %v18860_v30  ;;  %v18991_v49 = vand.u32 4294901760, %v13446_v38 }
 0x29c   : > { %10436 = vmatmul.mubr.f32.gmra.mxu1 %v18987_v19  ;;  %10352 = vmatprep.mubr.f32.mxu0 %v13308_v3  ;;  %v18992_v3 = vld [vmem:[#allocation65_spill] sm:$0xff]  ;;  %v19041_v19 = vld [vmem:[#allocation27_spill] sm:$0xff] }
 0x29d   : > { %10438 = vmatprep.mubr.f32.mxu1 %v18988_v24  ;;  %10477 = vmatpush3.msra.mxu0 %v18986_v43 }
 0x29e   : > { %10478 = vmatprep.subr.mxu0 %v18989_v32  ;;  %10563 = vmatpush3.msra.mxu1 %v18860_v30  ;;  %v18993_v30 = vand.u32 4294901760, %v13467_v40 }
 0x29f   : > { %10353 = vmatmul.mubr.f32.gmra.mxu0 %v13331_v42  ;;  %10564 = vmatprep.subr.mxu1 %v18864_v58  ;;  %v18994_v42 = vand.u32 4294901760, %v13488_v46 }
 0x2a0   : > { %10439 = vmatmul.mubr.f32.gmra.mxu1 %v18990_v5  ;;  %10355 = vmatprep.mubr.f32.mxu0 %v13354_v37  ;;  %v18995_v37 = vld [vmem:[#allocation70_spill] sm:$0xff] }
 0x2a1   : > { %10441 = vmatprep.mubr.f32.mxu1 %v18991_v49  ;;  %10479 = vmatpush3.msra.mxu0 %v18989_v32  ;;  %v19042_v5 = vld [vmem:[#allocation18_spill] sm:$0xff] }
 0x2a2   : > { %10480 = vmatprep.subr.mxu0 %v18992_v3  ;;  %10565 = vmatpush3.msra.mxu1 %v18864_v58  ;;  %v18996_v58 = vand.u32 4294901760, %v13508_v7 }
 0x2a3   : > { %10356 = vmatmul.mubr.f32.gmra.mxu0 %v13377_v44  ;;  %10566 = vmatprep.subr.mxu1 %v12721_v50  ;;  %v18997_v44 = vand.u32 4294901760, %v13527_v14 }
 0x2a4   : > { %10442 = vmatmul.mubr.f32.gmra.mxu1 %v18993_v30  ;;  %10358 = vmatprep.mubr.f32.mxu0 %v13400_v41  ;;  %v18998_v41 = vld [vmem:[#allocation29_spill] sm:$0xff]  ;;  %v19044_v30 = vld [vmem:[#allocation67_spill] sm:$0xff] }
 0x2a5   : > { %10444 = vmatprep.mubr.f32.mxu1 %v18994_v42  ;;  %10481 = vmatpush3.msra.mxu0 %v18992_v3  ;;  %v19043_v3 = vld [vmem:[#allocation12_spill] sm:$0xff] }
 0x2a6   : > { %10482 = vmatprep.subr.mxu0 %v18995_v37  ;;  %10567 = vmatpush3.msra.mxu1 %v12721_v50  ;;  %v18999_v50 = vand.u32 4294901760, %v13546_v2 }
 0x2a7   : > { %10359 = vmatmul.mubr.f32.gmra.mxu0 %v13423_v22  ;;  %10568 = vmatprep.subr.mxu1 %v18870_v21  ;;  %v19000_v22 = vand.u32 4294901760, %v13562_v45 }
 0x2a8   : > { %10445 = vmatmul.mubr.f32.gmra.mxu1 %v18996_v58  ;;  %10361 = vmatprep.mubr.f32.mxu0 %v13446_v38  ;;  %v19001_v38 = vld [vmem:[#allocation38_spill] sm:$0xff]  ;;  %v9558_v58 = vld [vmem:[%s17634_s1 + $0x1f8] sm:$0xff] }
 0x2a9   : > { %10447 = vmatprep.mubr.f32.mxu1 %v18997_v44  ;;  %10483 = vmatpush3.msra.mxu0 %v18995_v37  ;;  %v19045_v44 = vld [vmem:[#allocation19_spill] sm:$0xff] }
 0x2aa   : > { %10484 = vmatprep.subr.mxu0 %v18998_v41  ;;  %10569 = vmatpush3.msra.mxu1 %v18870_v21  ;;  %v19002_v21 = vand.u32 4294901760, %v13578_v15 }
 0x2ab   : > { %10362 = vmatmul.mubr.f32.gmra.mxu0 %v13467_v40  ;;  %10570 = vmatprep.subr.mxu1 %v18873_v28  ;;  %v19003_v40 = vand.u32 4294901760, %v13594_v1 }
 0x2ac   : > { %10448 = vmatmul.mubr.f32.gmra.mxu1 %v18999_v50  ;;  %10364 = vmatprep.mubr.f32.mxu0 %v13488_v46  ;;  %v19004_v46 = vld [vmem:[#allocation50_spill] sm:$0xff] }
 0x2ad   : > { %10450 = vmatprep.mubr.f32.mxu1 %v19000_v22  ;;  %10485 = vmatpush3.msra.mxu0 %v18998_v41  ;;  %v13992_v41 = vand.u32 4294901760, %v9558_v58 }
 0x2ae   : > { %10486 = vmatprep.subr.mxu0 %v19001_v38  ;;  %10571 = vmatpush3.msra.mxu1 %v18873_v28  ;;  %v19005_v28 = vand.u32 4294901760, %v13610_v39 }
 0x2af   : > { %10365 = vmatmul.mubr.f32.gmra.mxu0 %v13508_v7  ;;  %10572 = vmatprep.subr.mxu1 %v18878_v60  ;;  %v19006_v7 = vand.u32 4294901760, %v13626_v20  ;;  %19046 = vst [vmem:[#allocation87_spill] sm:$0xff] %v13992_v41 }
 0x2b0   : > { %10451 = vmatmul.mubr.f32.gmra.mxu1 %v19002_v21  ;;  %10367 = vmatprep.mubr.f32.mxu0 %v13527_v14  ;;  %v19007_v14 = vld [vmem:[#allocation23_spill] sm:$0xff]  ;;  %v9557_v21 = vld [vmem:[%s17634_s1 + $0x1f0] sm:$0xff] }
 0x2b1   : > { %10453 = vmatprep.mubr.f32.mxu1 %v19003_v40  ;;  %10487 = vmatpush3.msra.mxu0 %v19001_v38  ;;  %v19047_v38 = vld [vmem:[#allocation2_spill] sm:$0xff] }
 0x2b2   : > { %10488 = vmatprep.subr.mxu0 %v19004_v46  ;;  %10573 = vmatpush3.msra.mxu1 %v18878_v60  ;;  %v19009_v60 = vld [vmem:[#allocation43_spill] sm:$0xff] }
 0x2b3   : > { %10368 = vmatmul.mubr.f32.gmra.mxu0 %v13546_v2  ;;  %10574 = vmatprep.subr.mxu1 %v19007_v14  ;;  %v19010_v2 = vand.u32 4294901760, %v19009_v60 }
 0x2b4   : > { %10454 = vmatmul.mubr.f32.gmra.mxu1 %v19005_v28  ;;  %10370 = vmatprep.mubr.f32.mxu0 %v13562_v45  ;;  %v19012_v45 = vand.u32 4294901760, %v19011_v16  ;;  %v14005_v28 = vsub.f32 %v9558_v58, %v13992_v41 }
 0x2b5   : > { %10456 = vmatprep.mubr.f32.mxu1 %v19006_v7  ;;  %10489 = vmatpush3.msra.mxu0 %v19004_v46  ;;  %v14002_v46 = vand.u32 4294901760, %v9557_v21  ;;  %v9556_v7 = vld [vmem:[%s17634_s1 + $0x1e8] sm:$0xff] }
 0x2b6   : > { %10490 = vmatprep.subr.mxu0 %v19008_v52  ;;  %10575 = vmatpush3.msra.mxu1 %v19007_v14  ;;  %19048 = vst [vmem:[#allocation83_spill] sm:$0xff] %v14005_v28  ;;  %v19049_v14 = vld [vmem:[#allocation71_spill] sm:$0xff] }
 0x2b7   : > { %10371 = vmatmul.mubr.f32.gmra.mxu0 %v13578_v15  ;;  %10576 = vmatprep.subr.mxu1 %v19013_v27  ;;  %v19016_v15 = vand.u32 4294901760, %v19015_v47 }
 0x2b8   : > { %10457 = vmatmul.mubr.f32.gmra.mxu1 %v19010_v2  ;;  %10373 = vmatprep.mubr.f32.mxu0 %v13594_v1  ;;  %v19018_v1 = vand.u32 4294901760, %v19017_v56  ;;  %v14016_v2 = vand.u32 4294901760, %v9556_v7 }
 0x2b9   : > { %10459 = vmatprep.mubr.f32.mxu1 %v19012_v45  ;;  %10491 = vmatpush3.msra.mxu0 %v19008_v52  ;;  %v14013_v52 = vsub.f32 %v9557_v21, %v14002_v46  ;;  %v9555_v45 = vld [vmem:[%s17634_s1 + $0x1e0] sm:$0xff] }
 0x2ba   : > { %10492 = vmatprep.subr.mxu0 %v19014_v62  ;;  %10577 = vmatpush3.msra.mxu1 %v19013_v27 }
 0x2bb   : > { %10374 = vmatmul.mubr.f32.gmra.mxu0 %v13610_v39  ;;  %10578 = vmatprep.subr.mxu1 %v19019_v8  ;;  %v19021_v39 = vand.u32 4294901760, %v13706_v51 }
 0x2bc   : > { %10460 = vmatmul.mubr.f32.gmra.mxu1 %v19016_v15  ;;  %10376 = vmatprep.mubr.f32.mxu0 %v13626_v20  ;;  %v19022_v20 = vld [vmem:[#allocation76_spill] sm:$0xff]  ;;  %v14031_v15 = vsub.f32 %v9556_v7, %v14016_v2 }
 0x2bd   : > { %10462 = vmatprep.mubr.f32.mxu1 %v19018_v1  ;;  %10493 = vmatpush3.msra.mxu0 %v19014_v62  ;;  %v18043_v62 = vand.u32 4294901760, %v14013_v52 }
 0x2be   : > { %10494 = vmatprep.subr.mxu0 %v19020_v33  ;;  %10579 = vmatpush3.msra.mxu1 %v19019_v8  ;;  %v9554_v8 = vld [vmem:[%s17634_s1 + $0x1d8] sm:$0xff] }
 0x2bf   : > { %10377 = vmatmul.mubr.f32.gmra.mxu0 %v19009_v60  ;;  %10580 = vmatprep.subr.mxu1 %v19022_v20  ;;  %v18044_v60 = vand.u32 4294901760, %v14005_v28 }
 0x2c0   : > { %10463 = vmatmul.mubr.f32.gmra.mxu1 %v19021_v39  ;;  %10379 = vmatprep.mubr.f32.mxu0 %v19011_v16  ;;  %v19050_v16 = vld [vmem:[#allocation37_spill] sm:$0xff] }
 0x2c1   : > { %10465 = vmatprep.mubr.f32.mxu1 %v3167_v48  ;;  %10495 = vmatpush3.msra.mxu0 %v19020_v33  ;;  %v19024_v48 = vld [vmem:[#allocation78_spill] sm:$0xff]  ;;  %v5315_v27 = vsub.f32 %v14005_v28, %v18044_v60  ;;  %v19051_v33 = vld [vmem:[#allocation32_spill] sm:$0xff] }
 0x2c2   : > { %10496 = vmatprep.subr.mxu0 %v19023_v6  ;;  %10581 = vmatpush3.msra.mxu1 %v19022_v20  ;;  %v5321_v20 = vsub.f32 %v14013_v52, %v18043_v62 }
 0x2c3   : > { %10380 = vmatmul.mubr.f32.gmra.mxu0 %v19015_v47  ;;  %10582 = vmatprep.subr.mxu1 %v19024_v48  ;;  %v14028_v47 = vand.u32 4294901760, %v9555_v45  ;;  %v5316_v39 = vand.u32 4294901760, %v5315_v27  ;;  %v19062_v27 = vld [vmem:[#allocation85_spill] sm:$0xff] }
 0x2c4   : > { %10466 = vmatmul.mubr.f32.gmra.mxu1 %v3177_v13  ;;  %10382 = vmatprep.mubr.f32.mxu0 %v19017_v56  ;;  %v19026_v13 = vld [vmem:[#allocation80_spill] sm:$0xff] }
 0x2c5   : > { %10468 = vmatprep.mubr.f32.mxu1 %v3187_v11  ;;  %10497 = vmatpush3.msra.mxu0 %v19023_v6  ;;  %v19027_v11 = vld [vmem:[#allocation26_spill] sm:$0xff]  ;;  %v14047_v6 = vsub.f32 %v9555_v45, %v14028_v47 }
 0x2c6   : > { %10498 = vmatprep.subr.mxu0 %v19025_v54  ;;  %10583 = vmatpush3.msra.mxu1 %v19024_v48  ;;  %v18042_v48 = vand.u32 4294901760, %v14031_v15 }
 0x2c7   : > { %10383 = vmatmul.mubr.f32.gmra.mxu0 %v13706_v51  ;;  %10584 = vmatprep.subr.mxu1 %v19026_v13  ;;  %v19028_v51 = vld [vmem:[#allocation31_spill] sm:$0xff] }
 0x2c8   : > { %10469 = vmatmul.mubr.f32.gmra.mxu1 %v3197_v17  ;;  %10385 = vmatprep.mubr.f32.mxu0 %v13722_v9  ;;  %v19029_v9 = vld [vmem:[#allocation66_spill] sm:$0xff]  ;;  %v19030_v17 = vld [vmem:[#allocation33_spill] sm:$0xff] }
 0x2c9   : > { %10471 = vmatprep.mubr.f32.mxu1 %v3207_v55  ;;  %10499 = vmatpush3.msra.mxu0 %v19025_v54  ;;  %v19032_v55 = vld [vmem:[#allocation68_spill] sm:$0xff] }
 0x2ca   : > { %10500 = vmatprep.subr.mxu0 %v19027_v11  ;;  %10585 = vmatpush3.msra.mxu1 %v19026_v13 }
 0x2cb   : > { %10386 = vmatmul.mubr.f32.gmra.mxu0 %v13738_v53  ;;  %v19031_v53 = vld [vmem:[#allocation39_spill] sm:$0xff]  ;;  %5317 = vmatprep.subr.mxu1 %v5316_v39  ;;  %v9549_v39 = vld [vmem:[%s17634_s1 + $0x1b0] sm:$0xff] }
 0x2cc   : > { %10472 = vmatmul.mubr.f32.gmra.mxu1 %v3217_v57  ;;  %10388 = vmatprep.mubr.f32.mxu0 %v13751_v12  ;;  %v19033_v12 = vld [vmem:[#allocation42_spill] sm:$0xff]  ;;  %v19034_v57 = vld [vmem:[#allocation44_spill] sm:$0xff] }
 0x2cd   : > { %10501 = vmatpush3.msra.mxu0 %v19027_v11  ;;  %10586 = vmatprep.mubr.f32.mxu1 %v19028_v51  ;;  %v19052_v11 = vld [vmem:[#allocation40_spill] sm:$0xff] }
 0x2ce   : > { %10502 = vmatprep.subr.mxu0 %v19029_v9 }
 0x2cf   : > { %10503 = vmatpush3.msra.mxu0 %v19029_v9  ;;  %v9553_v9 = vld [vmem:[%s17634_s1 + $0x1d0] sm:$0xff] }
 0x2d0   : > { %10389 = vmatmul.mubr.f32.gmra.mxu0 %v13760_v35  ;;  %10587 = vmatmul.mubr.f32.vlgmr.msra.gmra.mxu1 %v19030_v17  ;;  %v19035_v35 = vld [vmem:[#allocation30_spill] sm:$0xff]  ;;  %v10268_v23 = vpop.f32.mrf.mxu1 }
 0x2d1   : > { %10391 = vmatprep.mubr.f32.mxu0 %v13775_v63  ;;  %10589 = vmatprep.mubr.f32.mxu1 %v19031_v53  ;;  %v19036_v63 = vld [vmem:[#allocation58_spill] sm:$0xff] }
 0x2d2   : > { %10504 = vmatprep.subr.mxu0 %v19032_v55  ;;  %v13969_v34 = vpop.f32.mrf.mxu1 }
 0x2d3   : > { %10505 = vmatpush3.msra.mxu0 %v19032_v55  ;;  %v5327_v55 = vsub.f32 %v14031_v15, %v18042_v48 }
 0x2d4   : > { %10392 = vmatmul.mubr.f32.gmra.mxu0 %v13785_v26  ;;  %10590 = vmatmul.mubr.f32.gmra.mxu1 %v19033_v12 }
 0x2d5   : > { %10506 = vmatprep.mubr.f32.mxu0 %v19028_v51  ;;  %10592 = vmatprep.mubr.f32.mxu1 %v19034_v57  ;;  %v14052_v51 = vand.u32 4294901760, %v9554_v8 }
 0x2d6   : > { %4864 = vmatprep.subr.mxu0 %v13992_v41 }
 0x2d7   : > { %v10188_v61 = vpop.f32.mrf.mxu0 }
 0x2d8   : > { %10507 = vmatmul.mubr.f32.vlgmr.msra.gmra.mxu0 %v19030_v17  ;;  %10593 = vmatmul.mubr.f32.gmra.mxu1 %v19035_v35  ;;  %v13961_v26 = vadd.f32 %v10268_v23, %v10188_v61  ;;  %v10271_v24 = vpop.f32.mrf.mxu1  ;;  %v19054_v23 = vld [vmem:[#allocation48_spill] sm:$0xff]  ;;  %v5328_v61 = vand.u32 4294901760, %v5327_v55  ;;  %v9548_v55 = vld [vmem:[%s17634_s1 + $0x1a8] sm:$0xff] }
 0x2d9   : > { %10509 = vmatprep.mubr.f32.mxu0 %v19031_v53  ;;  %10595 = vmatprep.mubr.f32.mxu1 %v19036_v63  ;;  %v13971_v43 = vpop.f32.mrf.mxu0  ;;  %v5322_v53 = vand.u32 4294901760, %v5321_v20 }
 0x2da   : > { %v13983_v42 = vpop.f32.mrf.mxu1  ;;  %4866 = vmatpush1.msra.mxu0 %v14002_v46 }
 0x2db   : > { %4868 = vmatprep.subr.mxu0 %v14016_v2  ;;  %5323 = vmatpush1.msra.mxu1 %v5322_v53 }
 0x2dc   : > { %10510 = vmatmul.mubr.f32.gmra.mxu0 %v19033_v12  ;;  %10596 = vmatmul.mubr.f32.gmra.mxu1 %v19037_v25  ;;  %v18039_v12 = vand.u32 4294901760, %v14047_v6 }
 0x2dd   : > { %10512 = vmatprep.mubr.f32.mxu0 %v19034_v57  ;;  %10598 = vmatprep.mubr.f32.mxu1 %v19038_v0  ;;  %v14065_v57 = vand.u32 4294901760, %v9553_v9 }
 0x2de   : > { %4870 = vmatpush1.msra.mxu0 %v14028_v47  ;;  %5329 = vmatprep.subr.mxu1 %v5328_v61 }
 0x2df   : > { %4872 = vmatprep.subr.mxu0 %v14052_v51 }
 0x2e0   : > { %10513 = vmatmul.mubr.f32.gmra.mxu0 %v19035_v35  ;;  %10599 = vmatmul.mubr.f32.gmra.mxu1 %v19039_v18  ;;  %v10191_v32 = vpop.f32.mrf.mxu0  ;;  %v10274_v50 = vpop.f32.mrf.mxu1  ;;  %v14068_v35 = vsub.f32 %v9554_v8, %v14052_v51 }
 0x2e1   : > { %10515 = vmatprep.mubr.f32.mxu0 %v19036_v63  ;;  %10601 = vmatprep.mubr.f32.mxu1 %v19040_v59  ;;  %v13977_v49 = vadd.f32 %v10271_v24, %v10191_v32  ;;  %v9552_v63 = vld [vmem:[%s17634_s1 + $0x1c8] sm:$0xff]  ;;  %v9551_v24 = vld [vmem:[%s17634_s1 + $0x1c0] sm:$0xff] }
 0x2e2   : > { %v13985_v37 = vpop.f32.mrf.mxu0  ;;  %v14033_v56 = vpop.f32.mrf.mxu1  ;;  %19053 = vst [vmem:[#allocation75_spill] sm:$0xff] %v14068_v35  ;;  %4874 = vmatpush1.msra.mxu0 %v14065_v57 }
 0x2e4   : > { %10516 = vmatmul.mubr.f32.gmra.mxu0 %v19037_v25  ;;  %10602 = vmatmul.mubr.f32.gmra.mxu1 %v19041_v19  ;;  %v5333_v25 = vsub.f32 %v14047_v6, %v18039_v12 }
 0x2e5   : > { %10518 = vmatprep.mubr.f32.mxu0 %v19038_v0  ;;  %10604 = vmatprep.mubr.f32.mxu1 %v19042_v5  ;;  %v14078_v0 = vand.u32 4294901760, %v9552_v63 }
 0x2e6   : > { %v5334_v32 = vand.u32 4294901760, %v5333_v25 }
 0x2e7   : > { %4876 = vmatprep.subr.mxu0 %v14078_v0 }
 0x2e8   : > { %10519 = vmatmul.mubr.f32.gmra.mxu0 %v19039_v18  ;;  %10605 = vmatmul.mubr.f32.gmra.mxu1 %v19043_v3  ;;  %v10194_v22 = vpop.f32.mrf.mxu0  ;;  %v10277_v54 = vpop.f32.mrf.mxu1  ;;  %v19055_v18 = vld [vmem:[#allocation46_spill] sm:$0xff] }
 0x2e9   : > { %10521 = vmatprep.mubr.f32.mxu0 %v19040_v59  ;;  %10607 = vmatprep.mubr.f32.mxu1 %v19044_v30  ;;  %v13999_v40 = vadd.f32 %v10274_v50, %v10194_v22  ;;  %v14083_v59 = vsub.f32 %v9553_v9, %v14065_v57  ;;  %v9550_v22 = vld [vmem:[%s17634_s1 + $0x1b8] sm:$0xff] }
 0x2ea   : > { %v14035_v1 = vpop.f32.mrf.mxu0  ;;  %5335 = vmatpush1.msra.mxu1 %v5334_v32  ;;  %v19067_v32 = vld [vmem:[#allocation62_spill] sm:$0xff] }
 0x2eb   : > { %19056 = vst [vmem:[#allocation5_spill] sm:$0xff] %v14083_v59  ;;  %v18036_v50 = vand.u32 4294901760, %v14083_v59 }
 0x2ec   : > { %10522 = vmatmul.mubr.f32.gmra.mxu0 %v19041_v19  ;;  %10608 = vmatmul.mubr.f32.gmra.mxu1 %v19045_v44  ;;  %v18037_v19 = vand.u32 4294901760, %v14068_v35 }
 0x2ed   : > { %10524 = vmatprep.mubr.f32.mxu0 %v19042_v5  ;;  %10610 = vmatprep.mubr.f32.mxu1 %v19047_v38  ;;  %v14090_v5 = vand.u32 4294901760, %v9551_v24 }
 0x2ef   : > { %19057 = vst [vmem:[#allocation88_spill] sm:$0xff] %v14090_v5  ;;  %v14110_v21 = vsub.f32 %v9551_v24, %v14090_v5  ;;  %4878 = vmatpush1.msra.mxu0 %v14090_v5 }
 0x2f0   : > { %10525 = vmatmul.mubr.f32.gmra.mxu0 %v19043_v3  ;;  %10611 = vmatmul.mubr.f32.gmra.mxu1 %v19049_v14  ;;  %v10197_v13 = vpop.f32.mrf.mxu0  ;;  %v14093_v3 = vsub.f32 %v9552_v63, %v14078_v0  ;;  %v19065_v63 = vld [vmem:[#allocation61_spill] sm:$0xff] }
 0x2f1   : > { %10527 = vmatprep.mubr.f32.mxu0 %v19044_v30  ;;  %10613 = vmatprep.mubr.f32.mxu1 %v19050_v16  ;;  %v14057_v17 = vadd.f32 %v10277_v54, %v10197_v13  ;;  %v14095_v30 = vpop.f32.mrf.mxu1  ;;  %19060 = vst [vmem:[#allocation77_spill] sm:$0xff] %v14110_v21  ;;  %v18034_v13 = vand.u32 4294901760, %v14110_v21 }
 0x2f2   : > { %19058 = vst [vmem:[#allocation84_spill] sm:$0xff] %v14093_v3  ;;  %v14097_v58 = vpop.f32.mrf.mxu0  ;;  %v18035_v7 = vand.u32 4294901760, %v14093_v3 }
 0x2f3   : > { %v5357_v25 = vsub.f32 %v14110_v21, %v18034_v13 }
 0x2f4   : > { %10528 = vmatmul.mubr.f32.gmra.mxu0 %v19045_v44  ;;  %10614 = vmatmul.mubr.f32.gmra.mxu1 %v19051_v33  ;;  %v5339_v44 = vsub.f32 %v14068_v35, %v18037_v19  ;;  %v5351_v54 = vsub.f32 %v14093_v3, %v18035_v7 }
 0x2f5   : > { %10530 = vmatprep.mubr.f32.mxu0 %v19047_v38  ;;  %10616 = vmatprep.mubr.f32.mxu1 %v19052_v11  ;;  %v19059_v38 = vld [vmem:[#allocation56_spill] sm:$0xff] }
 0x2f6   : > { %v5340_v8 = vand.u32 4294901760, %v5339_v44  ;;  %v5352_v61 = vand.u32 4294901760, %v5351_v54 }
 0x2f8   : > { %10531 = vmatmul.mubr.f32.gmra.mxu0 %v19049_v14  ;;  %10617 = vmatmul.mubr.f32.gmra.mxu1 %v19054_v23  ;;  %v14113_v14 = vand.u32 4294901760, %v9550_v22 }
 0x2f9   : > { %10533 = vmatprep.mubr.f32.mxu0 %v19050_v16  ;;  %10619 = vmatprep.mubr.f32.mxu1 %v19055_v18  ;;  %v10280_v16 = vpop.f32.mrf.mxu1  ;;  %v10200_v45 = vpop.f32.mrf.mxu0 }
 0x2fa   : > { %19061 = vst [vmem:[#allocation90_spill] sm:$0xff] %v14113_v14  ;;  %v14123_v20 = vadd.f32 %v10280_v16, %v10200_v45  ;;  %5341 = vmatprep.subr.mxu1 %v5340_v8  ;;  %4880 = vmatprep.subr.mxu0 %v14113_v14  ;;  %v14134_v53 = vsub.f32 %v9550_v22, %v14113_v14  ;;  %v14150_v22 = vand.u32 4294901760, %v9548_v55  ;;  %v5358_v16 = vand.u32 4294901760, %v5357_v25 }
 0x2fc   : > { %10534 = vmatmul.mubr.f32.gmra.mxu0 %v19051_v33  ;;  %10620 = vmatmul.mubr.f32.gmra.mxu1 %v19059_v38  ;;  %v5345_v33 = vsub.f32 %v14083_v59, %v18036_v50  ;;  %19064 = vst [vmem:[#allocation79_spill] sm:$0xff] %v14134_v53  ;;  %v18033_v44 = vand.u32 4294901760, %v14134_v53  ;;  %19068 = vst [vmem:[#allocation89_spill] sm:$0xff] %v14150_v22  ;;  %v14168_v54 = vsub.f32 %v9548_v55, %v14150_v22  ;;  %v9545_v50 = vld [vmem:[%s17634_s1 + $0x190] sm:$0xff] }
 0x2fd   : > { %10536 = vmatprep.mubr.f32.mxu0 %v19052_v11  ;;  %10622 = vmatprep.mubr.f32.mxu1 %v19062_v27  ;;  %v14130_v11 = vand.u32 4294901760, %v9549_v39  ;;  %v14193_v12 = vand.u32 4294901760, %v9545_v50 }
 0x2fe   : > { %v5346_v9 = vand.u32 4294901760, %v5345_v33  ;;  %v14159_v33 = vpop.f32.mrf.mxu1  ;;  %19070 = vst [vmem:[#allocation28_spill] sm:$0xff] %v14168_v54 }
 0x2ff   : > { %19063 = vst [vmem:[#allocation86_spill] sm:$0xff] %v14130_v11  ;;  %v14145_v24 = vsub.f32 %v9549_v39, %v14130_v11  ;;  %4882 = vmatpush1.msra.mxu0 %v14130_v11  ;;  %v5363_v39 = vsub.f32 %v14134_v53, %v18033_v44  ;;  %19073 = vst [vmem:[#allocation92_spill] sm:$0xff] %v14193_v12 }
 0x300   : > { %10537 = vmatmul.mubr.f32.gmra.mxu0 %v19054_v23  ;;  %10623 = vmatmul.mubr.f32.gmra.mxu1 %v19065_v63  ;;  %v9547_v23 = vld [vmem:[%s17634_s1 + $0x1a0] sm:$0xff]  ;;  %v10283_v13 = vpop.f32.mrf.mxu1 }
 0x301   : > { %19066 = vst [vmem:[#allocation49_spill] sm:$0xff] %v14145_v24  ;;  %10539 = vmatprep.mubr.f32.mxu0 %v19055_v18  ;;  %10625 = vmatprep.mubr.f32.mxu1 %v19067_v32  ;;  %v18038_v45 = vand.u32 4294901760, %v14145_v24  ;;  %v14157_v8 = vand.u32 4294901760, %v9547_v23  ;;  %v14161_v18 = vpop.f32.mrf.mxu0  ;;  %v5364_v7 = vand.u32 4294901760, %v5363_v39 }
 0x302   : > { %5347 = vmatpush1.msra.mxu1 %v5346_v9  ;;  %4884 = vmatprep.subr.mxu0 %v14150_v22  ;;  %v9546_v9 = vld [vmem:[%s17634_s1 + $0x198] sm:$0xff]  ;;  %v14236_v60 = vpop.f32.mrf.mxu1 }
 0x303   : > { %19069 = vst [vmem:[#allocation81_spill] sm:$0xff] %v14157_v8  ;;  %5353 = vmatprep.subr.mxu1 %v5352_v61  ;;  %v5369_v61 = vsub.f32 %v14145_v24, %v18038_v45  ;;  %v14179_v25 = vsub.f32 %v9547_v23, %v14157_v8  ;;  %v14181_v44 = vand.u32 4294901760, %v9546_v9  ;;  %v10203_v55 = vpop.f32.mrf.mxu0  ;;  %4886 = vmatpush1.msra.mxu0 %v14157_v8 }
 0x304   : > { %10540 = vmatmul.mubr.f32.gmra.mxu0 %v19059_v38  ;;  %10626 = vmatmul.mubr.f32.gmra.mxu1 %v13726_v10  ;;  %v18040_v38 = vand.u32 4294901760, %v14168_v54  ;;  %v14189_v19 = vadd.f32 %v10283_v13, %v10203_v55  ;;  %v9544_v13 = vld [vmem:[%s17634_s1 + $0x188] sm:$0xff] }
 0x305   : > { %19071 = vst [vmem:[#allocation21_spill] sm:$0xff] %v14179_v25  ;;  %19072 = vst [vmem:[#allocation91_spill] sm:$0xff] %v14181_v44  ;;  %10542 = vmatprep.mubr.f32.mxu0 %v19062_v27  ;;  %10628 = vmatprep.mubr.f32.mxu1 %v13742_v31  ;;  %v5370_v23 = vand.u32 4294901760, %v5369_v61  ;;  %v18041_v45 = vand.u32 4294901760, %v14179_v25  ;;  %v14200_v39 = vsub.f32 %v9546_v9, %v14181_v44  ;;  %v14213_v61 = vand.u32 4294901760, %v9544_v13  ;;  %v9543_v9 = vld [vmem:[%s17634_s1 + $0x180] sm:$0xff]  ;;  %v14238_v55 = vpop.f32.mrf.mxu0 }
 0x306   : > { %5359 = vmatpush1.msra.mxu1 %v5358_v16  ;;  %v5375_v27 = vsub.f32 %v14168_v54, %v18040_v38  ;;  %4888 = vmatprep.subr.mxu0 %v14181_v44  ;;  %v14211_v16 = vsub.f32 %v9545_v50, %v14193_v12  ;;  %v14221_v38 = vand.u32 4294901760, %v9543_v9  ;;  %v9542_v50 = vld [vmem:[%s17634_s1 + $0x178] sm:$0xff]  ;;  %v19089_v44 = vmov 0.0  }
 0x307   : > { %5365 = vmatprep.subr.mxu1 %v5364_v7  ;;  %19074 = vst [vmem:[#allocation7_spill] sm:$0xff] %v14200_v39  ;;  %v5381_v7 = vsub.f32 %v14179_v25, %v18041_v45  ;;  %19076 = vst [vmem:[#allocation93_spill] sm:$0xff] %v14213_v61  ;;  %4890 = vmatpush1.msra.mxu0 %v14193_v12  ;;  %v14229_v62 = vsub.f32 %v9544_v13, %v14213_v61  ;;  %v9540_v25 = vld [vmem:[%s17634_s1 + $0x168] sm:$0xff]  ;;  %v10286_v12 = vpop.f32.mrf.mxu1 }
 0x308   : > { %10543 = vmatmul.mubr.f32.gmra.mxu0 %v19065_v63  ;;  %10629 = vmatmul.mubr.f32.gmra.mxu1 %v13755_v36  ;;  %19075 = vst [vmem:[#allocation6_spill] sm:$0xff] %v14211_v16  ;;  %v5376_v63 = vand.u32 4294901760, %v5375_v27  ;;  %19077 = vst [vmem:[#allocation94_spill] sm:$0xff] %v14221_v38  ;;  %v9541_v27 = vld [vmem:[%s17634_s1 + $0x170] sm:$0xff]  ;;  %v14245_v13 = vsub.f32 %v9543_v9, %v14221_v38  ;;  %v14261_v9 = vand.u32 4294901760, %v9540_v25 }
 0x309   : > { %10545 = vmatprep.mubr.f32.mxu0 %v19067_v32  ;;  %10631 = vmatprep.mubr.f32.mxu1 %v13767_v29  ;;  %v5382_v45 = vand.u32 4294901760, %v5381_v7  ;;  %19078 = vst [vmem:[#allocation52_spill] sm:$0xff] %v14229_v62  ;;  %v14231_v32 = vand.u32 4294901760, %v9542_v50  ;;  %v14247_v48 = vand.u32 4294901760, %v9541_v27 }
 0x30a   : > { %5371 = vmatpush1.msra.mxu1 %v5370_v23  ;;  %v19080_v23 = vand.u32 4294901760, %v14200_v39  ;;  %4892 = vmatprep.subr.mxu0 %v14213_v61  ;;  %19081 = vst [vmem:[#allocation95_spill] sm:$0xff] %v14245_v13  ;;  %19085 = vst [vmem:[#allocation9_spill] sm:$0xff] %v14261_v9  ;;  %v9539_v61 = vld [vmem:[%s17634_s1 + $0x160] sm:$0xff]  ;;  %v10206_v24 = vpop.f32.mrf.mxu0 }
 0x30b   : > { %19079 = vst [vmem:[#allocation25_spill] sm:$0xff] %v14231_v32  ;;  %5377 = vmatprep.subr.mxu1 %v5376_v63  ;;  %19082 = vst [vmem:[#allocation96_spill] sm:$0xff] %v14247_v48  ;;  %v19083_v63 = vand.u32 4294901760, %v14211_v16  ;;  %4894 = vmatpush1.msra.mxu0 %v14221_v38 }
 0x30c   : > { %v5387_v7 = vsub.f32 %v14200_v39, %v19080_v23  ;;  %10546 = vmatmul.mubr.f32.gmra.mxu0 %v13726_v10  ;;  %10632 = vmatmul.mubr.f32.gmra.mxu1 %v13777_v4  ;;  %v14259_v39 = vsub.f32 %v9542_v50, %v14231_v32  ;;  %v14271_v23 = vand.u32 4294901760, %v9539_v61  ;;  %v9538_v50 = vld [vmem:[%s17634_s1 + $0x158] sm:$0xff] }
 0x30d   : > { %v5393_v54 = vsub.f32 %v14211_v16, %v19083_v63  ;;  %10548 = vmatprep.mubr.f32.mxu0 %v13742_v31  ;;  %5383 = vmatpush1.msra.mxu1 %v5382_v45  ;;  %v14269_v63 = vsub.f32 %v9541_v27, %v14247_v48  ;;  %v14276_v16 = vadd.f32 %v10286_v12, %v10206_v24  ;;  %v19088_v31 = vand.u32 4294901760, %v14229_v62 }
 0x30e   : > { %19084 = vst [vmem:[#allocation54_spill] sm:$0xff] %v14259_v39  ;;  %v5388_v10 = vand.u32 4294901760, %v5387_v7  ;;  %19087 = vst [vmem:[#allocation98_spill] sm:$0xff] %v14271_v23  ;;  %v18069_v7 = vand.u32 4294901760, %v14259_v39  ;;  %5536 = vmatprep.mubr.f32.mxu1 %v19089_v44  ;;  %v19090_v27 = vand.u32 4294901760, %v14245_v13  ;;  %4896 = vmatprep.subr.mxu0 %v14231_v32  ;;  %v14290_v24 = vsub.f32 %v9539_v61, %v14271_v23 }
 0x30f   : > { %19086 = vst [vmem:[#allocation97_spill] sm:$0xff] %v14269_v63  ;;  %v5394_v53 = vand.u32 4294901760, %v5393_v54  ;;  %v5399_v45 = vsub.f32 %v14229_v62, %v19088_v31  ;;  %v14293_v54 = vsub.f32 %v9540_v25, %v14261_v9  ;;  %v9537_v31 = vld [vmem:[%s17634_s1 + $0x150] sm:$0xff]  ;;  %v14305_v12 = vand.u32 4294901760, %v9538_v50  ;;  %v9535_v25 = vld [vmem:[%s17634_s1 + $0x140] sm:$0xff]  ;;  %4898 = vmatpush1.msra.mxu0 %v14247_v48 }
 0x310   : > { %5389 = vmatprep.subr.mxu1 %v5388_v10  ;;  %v5405_v8 = vsub.f32 %v14245_v13, %v19090_v27  ;;  %19091 = vst [vmem:[#allocation55_spill] sm:$0xff] %v14290_v24  ;;  %v9536_v10 = vld [vmem:[%s17634_s1 + $0x148] sm:$0xff]  ;;  %10549 = vmatmul.mubr.f32.gmra.mxu0 %v13755_v36  ;;  %v5411_v61 = vsub.f32 %v14259_v39, %v18069_v7  ;;  %v19094_v62 = vand.u32 4294901760, %v14269_v63  ;;  %v9534_v7 = vld [vmem:[%s17634_s1 + $0x138] sm:$0xff]  ;;  %v14342_v32 = vand.u32 4294901760, %v9535_v25 }
 0x311   : > { %19092 = vst [vmem:[#allocation11_spill] sm:$0xff] %v14293_v54  ;;  %5395 = vmatpush1.msra.mxu1 %v5394_v53  ;;  %v5400_v27 = vand.u32 4294901760, %v5399_v45  ;;  %19093 = vst [vmem:[#allocation99_spill] sm:$0xff] %v14305_v12  ;;  %10551 = vmatprep.mubr.f32.mxu0 %v13767_v29  ;;  %v14321_v29 = vand.u32 4294901760, %v9537_v31  ;;  %v14326_v48 = vand.u32 4294901760, %v9536_v10  ;;  %v14331_v45 = vpop.f32.mrf.mxu1  ;;  %v14333_v53 = vpop.f32.mrf.mxu0 }
 0x312   : > { %v5406_v13 = vand.u32 4294901760, %v5405_v8  ;;  %v5417_v36 = vsub.f32 %v14269_v63, %v19094_v62  ;;  %v5412_v39 = vand.u32 4294901760, %v5411_v61  ;;  %4900 = vmatprep.subr.mxu0 %v14261_v9  ;;  %v14324_v8 = vsub.f32 %v9538_v50, %v14305_v12  ;;  %v9533_v62 = vld [vmem:[%s17634_s1 + $0x130] sm:$0xff]  ;;  %19098 = vst [vmem:[#allocation101_spill] sm:$0xff] %v14331_v45  ;;  %19099 = vst [vmem:[#allocation102_spill] sm:$0xff] %v14333_v53 }
 0x313   : > { %5401 = vmatprep.subr.mxu1 %v5400_v27  ;;  %19095 = vst [vmem:[#allocation100_spill] sm:$0xff] %v14321_v29  ;;  %19097 = vst [vmem:[#allocation57_spill] sm:$0xff] %v14326_v48  ;;  %4902 = vmatpush1.msra.mxu0 %v14271_v23  ;;  %v19100_v61 = vand.u32 4294901760, %v14293_v54  ;;  %v19101_v50 = vand.u32 4294901760, %v14290_v24  ;;  %v14346_v38 = vsub.f32 %v9537_v31, %v14321_v29  ;;  %v14352_v23 = vand.u32 4294901760, %v9534_v7 }
 0x314   : > { %19096 = vst [vmem:[#allocation15_spill] sm:$0xff] %v14324_v8  ;;  %5407 = vmatpush1.msra.mxu1 %v5406_v13  ;;  %v5418_v27 = vand.u32 4294901760, %v5417_v36  ;;  %19102 = vst [vmem:[#allocation16_spill] sm:$0xff] %v14342_v32  ;;  %10552 = vmatmul.mubr.f32.gmra.mxu0 %v13777_v4  ;;  %v18092_v13 = vand.u32 4294901760, %v14324_v8  ;;  %v14350_v36 = vsub.f32 %v9536_v10, %v14326_v48  ;;  %v14361_v31 = vand.u32 4294901760, %v9533_v62 }
 0x315   : > { %v5423_v63 = vsub.f32 %v14293_v54, %v19100_v61  ;;  %v5429_v9 = vsub.f32 %v14290_v24, %v19101_v50  ;;  %5413 = vmatprep.subr.mxu1 %v5412_v39  ;;  %19103 = vst [vmem:[#allocation34_spill] sm:$0xff] %v14346_v38  ;;  %19105 = vst [vmem:[#allocation104_spill] sm:$0xff] %v14352_v23  ;;  %v9532_v61 = vld [vmem:[%s17634_s1 + $0x128] sm:$0xff]  ;;  %v10289_v50 = vpop.f32.mrf.mxu1  ;;  %v10209_v24 = vpop.f32.mrf.mxu0  ;;  %4904 = vmatprep.subr.mxu0 %v14305_v12  ;;  %v18097_v22 = vand.u32 4294901760, %v14346_v38 }
 0x316   : > { %19104 = vst [vmem:[#allocation103_spill] sm:$0xff] %v14350_v36  ;;  %5419 = vmatpush1.msra.mxu1 %v5418_v27  ;;  %v14359_v39 = vsub.f32 %v9535_v25, %v14342_v32  ;;  %19107 = vst [vmem:[#allocation35_spill] sm:$0xff] %v14361_v31  ;;  %v14363_v10 = vadd.f32 %v10289_v50, %v10209_v24  ;;  %4906 = vmatpush1.msra.mxu0 %v14321_v29  ;;  %v14380_v27 = vand.u32 4294901760, %v9532_v61  ;;  %v9531_v50 = vld [vmem:[%s17634_s1 + $0x120] sm:$0xff] }
 0x317   : > { %v5424_v54 = vand.u32 4294901760, %v5423_v63  ;;  %v5430_v4 = vand.u32 4294901760, %v5429_v9  ;;  %v5435_v21 = vsub.f32 %v14324_v8, %v18092_v13  ;;  %v18098_v63 = vand.u32 4294901760, %v14350_v36  ;;  %4959 = vmatprep.mubr.f32.mxu0 %v19089_v44  ;;  %4908 = vmatprep.subr.mxu0 %v14326_v48 }
 0x318   : > { %19106 = vst [vmem:[#allocation22_spill] sm:$0xff] %v14359_v39  ;;  %v18101_v9 = vand.u32 4294901760, %v14359_v39  ;;  %v14375_v24 = vsub.f32 %v9534_v7, %v14352_v23  ;;  %v14378_v25 = vsub.f32 %v9533_v62, %v14361_v31  ;;  %19110 = vst [vmem:[#allocation63_spill] sm:$0xff] %v14380_v27  ;;  %v5441_v7 = vsub.f32 %v14346_v38, %v18097_v22  ;;  %v9529_v22 = vld [vmem:[%s17634_s1 + $0x110] sm:$0xff]  ;;  %v14420_v38 = vpop.f32.mrf.mxu0 }
 0x319   : > { %5425 = vmatprep.subr.mxu1 %v5424_v54  ;;  %v9530_v54 = vld [vmem:[%s17634_s1 + $0x118] sm:$0xff]  ;;  %v5436_v13 = vand.u32 4294901760, %v5435_v21  ;;  %4910 = vmatpush1.msra.mxu0 %v14342_v32  ;;  %v5447_v62 = vsub.f32 %v14350_v36, %v18098_v63  ;;  %v9528_v63 = vld [vmem:[%s17634_s1 + $0x108] sm:$0xff]  ;;  %v14418_v21 = vpop.f32.mrf.mxu1  ;;  %19115 = vst [vmem:[#allocation69_spill] sm:$0xff] %v14420_v38 }
 0x31a   : > { %19108 = vst [vmem:[#allocation105_spill] sm:$0xff] %v14375_v24  ;;  %19109 = vst [vmem:[#allocation106_spill] sm:$0xff] %v14378_v25  ;;  %5431 = vmatpush1.msra.mxu1 %v5430_v4  ;;  %v5453_v8 = vsub.f32 %v14359_v39, %v18101_v9  ;;  %4912 = vmatprep.subr.mxu0 %v14352_v23  ;;  %v14402_v4 = vsub.f32 %v9532_v61, %v14380_v27  ;;  %v5442_v36 = vand.u32 4294901760, %v5441_v7  ;;  %v9527_v61 = vld [vmem:[%s17634_s1 + $0x100] sm:$0xff] }
 0x31b   : > { %5437 = vmatprep.subr.mxu1 %v5436_v13  ;;  %v5448_v9 = vand.u32 4294901760, %v5447_v62  ;;  %4914 = vmatpush1.msra.mxu0 %v14361_v31  ;;  %v14411_v39 = vand.u32 4294901760, %v9531_v50  ;;  %v14413_v48 = vand.u32 4294901760, %v9530_v54  ;;  %19114 = vst [vmem:[#allocation72_spill] sm:$0xff] %v14418_v21  ;;  %v19116_v32 = vand.u32 4294901760, %v14375_v24  ;;  %v10212_v21 = vpop.f32.mrf.mxu0 }
 0x31c   : > { %19111 = vst [vmem:[#allocation24_spill] sm:$0xff] %v14402_v4  ;;  %v5454_v23 = vand.u32 4294901760, %v5453_v8  ;;  %v19117_v7 = vand.u32 4294901760, %v14378_v25  ;;  %4916 = vmatprep.subr.mxu0 %v14380_v27  ;;  %5443 = vmatpush1.msra.mxu1 %v5442_v36  ;;  %v14437_v8 = vand.u32 4294901760, %v9529_v22 }
 0x31d   : > { %19112 = vst [vmem:[#allocation107_spill] sm:$0xff] %v14411_v39  ;;  %19113 = vst [vmem:[#allocation108_spill] sm:$0xff] %v14413_v48  ;;  %v5459_v13 = vsub.f32 %v14375_v24, %v19116_v32  ;;  %v14431_v29 = vsub.f32 %v9531_v50, %v14411_v39  ;;  %v14434_v12 = vsub.f32 %v9530_v54, %v14413_v48  ;;  %4918 = vmatpush1.msra.mxu0 %v14411_v39  ;;  %v10292_v24 = vpop.f32.mrf.mxu1 }
 0x31e   : > { %v5465_v62 = vsub.f32 %v14378_v25, %v19117_v7  ;;  %19120 = vst [vmem:[#allocation41_spill] sm:$0xff] %v14437_v8  ;;  %v14439_v32 = vand.u32 4294901760, %v9528_v63  ;;  %5449 = vmatprep.subr.mxu1 %v5448_v9  ;;  %v19122_v25 = vand.u32 4294901760, %v14402_v4  ;;  %v14444_v50 = vand.u32 4294901760, %v9527_v61  ;;  %4920 = vmatprep.subr.mxu0 %v14413_v48 }
 0x31f   : > { %19118 = vst [vmem:[#allocation109_spill] sm:$0xff] %v14431_v29  ;;  %19119 = vst [vmem:[#allocation110_spill] sm:$0xff] %v14434_v12  ;;  %v5460_v7 = vand.u32 4294901760, %v5459_v13  ;;  %v14447_v54 = vadd.f32 %v10292_v24, %v10212_v21  ;;  %5455 = vmatpush1.msra.mxu1 %v5454_v23  ;;  %v18125_v39 = vand.u32 4294901760, %v14431_v29  ;;  %v18124_v27 = vand.u32 4294901760, %v14434_v12  ;;  %4922 = vmatpush1.msra.mxu0 %v14437_v8 }
 0x320   : > { %19121 = vst [vmem:[#allocation36_spill] sm:$0xff] %v14439_v32  ;;  %v5466_v31 = vand.u32 4294901760, %v5465_v62  ;;  %v5471_v36 = vsub.f32 %v14402_v4, %v19122_v25  ;;  %19123 = vst [vmem:[#allocation111_spill] sm:$0xff] %v14444_v50  ;;  %v14452_v38 = vsub.f32 %v9529_v22, %v14437_v8  ;;  %v14456_v25 = vsub.f32 %v9528_v63, %v14439_v32 }
 0x321   : > { %5461 = vmatprep.subr.mxu1 %v5460_v7  ;;  %v14459_v13 = vsub.f32 %v9527_v61, %v14444_v50  ;;  %4924 = vmatprep.subr.mxu0 %v14439_v32  ;;  %v5477_v23 = vsub.f32 %v14431_v29, %v18125_v39  ;;  %v5483_v22 = vsub.f32 %v14434_v12, %v18124_v27  ;;  %v14476_v7 = vpop.f32.mrf.mxu1 }
 0x322   : > { %19124 = vst [vmem:[#allocation112_spill] sm:$0xff] %v14452_v38  ;;  %v5472_v9 = vand.u32 4294901760, %v5471_v36  ;;  %19125 = vst [vmem:[#allocation115_spill] sm:$0xff] %v14456_v25  ;;  %5467 = vmatpush1.msra.mxu1 %v5466_v31  ;;  %v18129_v24 = vand.u32 4294901760, %v14452_v38  ;;  %4926 = vmatpush1.msra.mxu0 %v14444_v50  ;;  %v18132_v63 = vand.u32 4294901760, %v14456_v25  ;;  %v14478_v36 = vpop.f32.mrf.mxu0 }
 0x323   : > { %19126 = vst [vmem:[#allocation47_spill] sm:$0xff] %v14459_v13  ;;  %v18135_v21 = vand.u32 4294901760, %v14459_v13  ;;  %5763 = vmatprep.subr.mxu0 %v14005_v28  ;;  %v5478_v31 = vand.u32 4294901760, %v5477_v23  ;;  %v5484_v61 = vand.u32 4294901760, %v5483_v22  ;;  %19127 = vst [vmem:[#allocation113_spill] sm:$0xff] %v14476_v7  ;;  %v10295_v23 = vpop.f32.mrf.mxu1 }
 0x324   : > { %5473 = vmatprep.subr.mxu1 %v5472_v9  ;;  %v5489_v62 = vsub.f32 %v14452_v38, %v18129_v24  ;;  %19128 = vst [vmem:[#allocation114_spill] sm:$0xff] %v14478_v36  ;;  %v5495_v9 = vsub.f32 %v14456_v25, %v18132_v63  ;;  %v10215_v22 = vpop.f32.mrf.mxu0 }
 0x325   : > { %v5501_v27 = vsub.f32 %v14459_v13, %v18135_v21  ;;  %5479 = vmatpush1.msra.mxu1 %v5478_v31  ;;  %v14486_v24 = vadd.f32 %v10295_v23, %v10215_v22  ;;  %v14489_v38 = vpop.f32.mrf.mxu1 }
 0x326   : > { %v5490_v39 = vand.u32 4294901760, %v5489_v62  ;;  %5485 = vmatprep.subr.mxu1 %v5484_v61  ;;  %v5496_v28 = vand.u32 4294901760, %v5495_v9  ;;  %19129 = vst [vmem:[#allocation118_spill] sm:$0xff] %v14489_v38  ;;  %v14491_v63 = vpop.f32.mrf.mxu0 }
 0x327   : > { %v5502_v12 = vand.u32 4294901760, %v5501_v27  ;;  %19130 = vst [vmem:[#allocation17_spill] sm:$0xff] %v14491_v63  ;;  %v10298_v25 = vpop.f32.mrf.mxu1 }
 0x328   : > { %5491 = vmatpush1.msra.mxu1 %v5490_v39 }
 0x329   : > { %5497 = vmatprep.subr.mxu1 %v5496_v28  ;;  %v14495_v62 = vpop.f32.mrf.mxu1 }
 0x32a   : > { %5503 = vmatpush1.msra.mxu1 %v5502_v12  ;;  %19131 = vst [vmem:[#allocation116_spill] sm:$0xff] %v14495_v62 }
 0x32b   : > { %6147 = vmatprep.subr.mxu1 %v13992_v41  ;;  %v10301_v27 = vpop.f32.mrf.mxu1 }
 0x32c   : > { %v10218_v21 = vpop.f32.mrf.mxu0 }
 0x32d   : > { %v14493_v31 = vadd.f32 %v10298_v25, %v10218_v21  ;;  %v14501_v28 = vpop.f32.mrf.mxu1 }
 0x32e   : > { %v14497_v61 = vpop.f32.mrf.mxu0  ;;  %19133 = vst [vmem:[#allocation121_spill] sm:$0xff] %v14501_v28 }
 0x32f   : > { %19132 = vst [vmem:[#allocation117_spill] sm:$0xff] %v14497_v61 }
 0x334   : > { %v10304_v12 = vpop.f32.mrf.mxu1 }
 0x335   : > { %v10221_v9 = vpop.f32.mrf.mxu0 }
 0x336   : > { %v14499_v23 = vadd.f32 %v10301_v27, %v10221_v9  ;;  %v14505_v13 = vpop.f32.mrf.mxu1 }
 0x337   : > { %v14503_v39 = vpop.f32.mrf.mxu0  ;;  %19135 = vst [vmem:[#allocation14_spill] sm:$0xff] %v14505_v13 }
 0x338   : > { %19134 = vst [vmem:[#allocation120_spill] sm:$0xff] %v14503_v39 }
 0x33c   : > { %v10307_v25 = vpop.f32.mrf.mxu1 }
 0x33d   : > { %v10224_v22 = vpop.f32.mrf.mxu0 }
 0x33e   : > { %v14507_v41 = vadd.f32 %v10304_v12, %v10224_v22  ;;  %v14511_v50 = vpop.f32.mrf.mxu1 }
 0x33f   : > { %v14509_v21 = vpop.f32.mrf.mxu0  ;;  %19137 = vst [vmem:[#allocation65_spill] sm:$0xff] %v14511_v50 }
 0x340   : > { %19136 = vst [vmem:[#allocation59_spill] sm:$0xff] %v14509_v21 }
 0x344   : > { %v10310_v27 = vpop.f32.mrf.mxu1 }
 0x345   : > { %v10227_v29 = vpop.f32.mrf.mxu0 }
 0x346   : > { %v14513_v32 = vadd.f32 %v10307_v25, %v10227_v29  ;;  %v14517_v4 = vpop.f32.mrf.mxu1 }
 0x347   : > { %v14515_v9 = vpop.f32.mrf.mxu0  ;;  %19139 = vst [vmem:[#allocation29_spill] sm:$0xff] %v14517_v4 }
 0x348   : > { %19138 = vst [vmem:[#allocation70_spill] sm:$0xff] %v14515_v9 }
 0x34b   : > { %v10313_v39 = vpop.f32.mrf.mxu1 }
 0x34c   : > { %v10230_v28 = vpop.f32.mrf.mxu0 }
 0x34d   : > { %v14519_v8 = vadd.f32 %v10310_v27, %v10230_v28  ;;  %v14521_v13 = vpop.f32.mrf.mxu1 }
 0x34e   : > { %19140 = vst [vmem:[#allocation38_spill] sm:$0xff] %v14521_v13  ;;  %v14523_v22 = vpop.f32.mrf.mxu0 }
 0x34f   : > { %v10428_v12 = vpop.f32.mrf.mxu1  ;;  %19141 = vst [vmem:[#allocation50_spill] sm:$0xff] %v14523_v22 }
 0x351   : > { %v14525_v21 = vpop.f32.mrf.mxu1 }
 0x353   : > { %v10233_v50 = vpop.f32.mrf.mxu0 }
 0x354   : > { %v10431_v48 = vpop.f32.mrf.mxu1  ;;  %v14527_v29 = vadd.f32 %v10313_v39, %v10233_v50 }
 0x355   : > { %v14529_v25 = vpop.f32.mrf.mxu0 }
 0x356   : > { %19142 = vst [vmem:[#allocation23_spill] sm:$0xff] %v14529_v25  ;;  %v14531_v9 = vpop.f32.mrf.mxu1 }
 0x357   : > { %v10348_v4 = vpop.f32.mrf.mxu0 }
 0x358   : > { %v10434_v62 = vpop.f32.mrf.mxu1  ;;  %v3670_v28 = vadd.f32 %v10348_v4, %v13961_v26 }
 0x359   : > { %v14534_v27 = vpop.f32.mrf.mxu0 }
 0x35a   : > { %v14536_v13 = vpop.f32.mrf.mxu1  ;;  %v14538_v61 = vadd.f32 %v10428_v12, %v3670_v28 }
 0x35b   : > { %v10351_v22 = vpop.f32.mrf.mxu0 }
 0x35c   : > { %v10437_v38 = vpop.f32.mrf.mxu1  ;;  %v3684_v63 = vadd.f32 %v10351_v22, %v13977_v49 }
 0x35d   : > { %v14541_v50 = vpop.f32.mrf.mxu0 }
 0x35e   : > { %v14543_v39 = vpop.f32.mrf.mxu1  ;;  %v14545_v25 = vadd.f32 %v10431_v48, %v3684_v63 }
 0x35f   : > { %v10354_v7 = vpop.f32.mrf.mxu0 }
 0x360   : > { %v10440_v36 = vpop.f32.mrf.mxu1  ;;  %v3698_v26 = vadd.f32 %v10354_v7, %v13999_v40 }
 0x361   : > { %v14548_v4 = vpop.f32.mrf.mxu0 }
 0x362   : > { %v14550_v3 = vpop.f32.mrf.mxu1  ;;  %v14552_v12 = vadd.f32 %v10434_v62, %v3698_v26 }
 0x363   : > { %v10357_v28 = vpop.f32.mrf.mxu0 }
 0x364   : > { %v10443_v45 = vpop.f32.mrf.mxu1  ;;  %v3712_v49 = vadd.f32 %v10357_v28, %v14057_v17 }
 0x365   : > { %v14555_v22 = vpop.f32.mrf.mxu0 }
 0x366   : > { %v14557_v53 = vpop.f32.mrf.mxu1  ;;  %v14559_v48 = vadd.f32 %v10437_v38, %v3712_v49 }
 0x367   : > { %19143 = vst [vmem:[#allocation53_spill] sm:$0xff] %v14557_v53  ;;  %v10360_v63 = vpop.f32.mrf.mxu0 }
 0x368   : > { %v10446_v11 = vpop.f32.mrf.mxu1  ;;  %v3726_v40 = vadd.f32 %v10360_v63, %v14123_v20 }
 0x369   : > { %v14562_v7 = vpop.f32.mrf.mxu0 }
 0x36a   : > { %v14564_v59 = vpop.f32.mrf.mxu1  ;;  %v14566_v62 = vadd.f32 %v10440_v36, %v3726_v40 }
 0x36b   : > { %19144 = vst [vmem:[#allocation43_spill] sm:$0xff] %v14564_v59  ;;  %v10363_v26 = vpop.f32.mrf.mxu0 }
 0x36c   : > { %19145 = vst [vmem:[#allocation51_spill] sm:$0xff] %v14566_v62  ;;  %v10449_v14 = vpop.f32.mrf.mxu1  ;;  %v3740_v17 = vadd.f32 %v10363_v26, %v14189_v19 }
 0x36d   : > { %v14569_v28 = vpop.f32.mrf.mxu0 }
 0x36e   : > { %v14571_v35 = vpop.f32.mrf.mxu1  ;;  %v14573_v38 = vadd.f32 %v10443_v45, %v3740_v17 }
 0x36f   : > { %19146 = vst [vmem:[#allocation8_spill] sm:$0xff] %v14571_v35  ;;  %v10366_v49 = vpop.f32.mrf.mxu0 }
 0x370   : > { %19147 = vst [vmem:[#allocation10_spill] sm:$0xff] %v14573_v38  ;;  %v10452_v53 = vpop.f32.mrf.mxu1  ;;  %v3754_v20 = vadd.f32 %v10366_v49, %v14276_v16 }
 0x371   : > { %v14576_v63 = vpop.f32.mrf.mxu0 }
 0x372   : > { %v14578_v5 = vpop.f32.mrf.mxu1  ;;  %v14580_v36 = vadd.f32 %v10446_v11, %v3754_v20 }
 0x373   : > { %19148 = vst [vmem:[#allocation4_spill] sm:$0xff] %v14578_v5  ;;  %v10369_v40 = vpop.f32.mrf.mxu0 }
 0x374   : > { %19149 = vst [vmem:[#allocation82_spill] sm:$0xff] %v14580_v36  ;;  %v10455_v59 = vpop.f32.mrf.mxu1  ;;  %v3768_v19 = vadd.f32 %v10369_v40, %v14363_v10 }
 0x375   : > { %v14583_v26 = vpop.f32.mrf.mxu0 }
 0x376   : > { %v14585_v62 = vpop.f32.mrf.mxu1  ;;  %v14587_v45 = vadd.f32 %v10449_v14, %v3768_v19 }
 0x377   : > { %19150 = vst [vmem:[#allocation73_spill] sm:$0xff] %v14585_v62  ;;  %v10372_v17 = vpop.f32.mrf.mxu0 }
 0x378   : > { %19151 = vst [vmem:[#allocation74_spill] sm:$0xff] %v14587_v45  ;;  %v10458_v35 = vpop.f32.mrf.mxu1  ;;  %v3782_v16 = vadd.f32 %v10372_v17, %v14447_v54 }
 0x379   : > { %v14590_v49 = vpop.f32.mrf.mxu0 }
 0x37a   : > { %v14592_v38 = vpop.f32.mrf.mxu1  ;;  %v14594_v11 = vadd.f32 %v10452_v53, %v3782_v16 }
 0x37b   : > { %19152 = vst [vmem:[#allocation76_spill] sm:$0xff] %v14592_v38  ;;  %v10375_v20 = vpop.f32.mrf.mxu0 }
 0x37c   : > { %19153 = vst [vmem:[#allocation64_spill] sm:$0xff] %v14594_v11  ;;  %v10461_v5 = vpop.f32.mrf.mxu1  ;;  %v3796_v10 = vadd.f32 %v10375_v20, %v14486_v24 }
 0x37d   : > { %v14597_v40 = vpop.f32.mrf.mxu0 }
 0x37e   : > { %v14599_v36 = vpop.f32.mrf.mxu1  ;;  %v14601_v14 = vadd.f32 %v10455_v59, %v3796_v10 }
 0x37f   : > { %19154 = vst [vmem:[#allocation78_spill] sm:$0xff] %v14599_v36  ;;  %v10378_v19 = vpop.f32.mrf.mxu0 }
 0x380   : > { %19155 = vst [vmem:[#allocation20_spill] sm:$0xff] %v14601_v14  ;;  %v10464_v62 = vpop.f32.mrf.mxu1  ;;  %v3810_v54 = vadd.f32 %v10378_v19, %v14493_v31 }
 0x381   : > { %v14604_v17 = vpop.f32.mrf.mxu0 }
 0x382   : > { %v14606_v45 = vpop.f32.mrf.mxu1  ;;  %v14608_v53 = vadd.f32 %v10458_v35, %v3810_v54 }
 0x383   : > { %19156 = vst [vmem:[#allocation80_spill] sm:$0xff] %v14606_v45  ;;  %v10381_v16 = vpop.f32.mrf.mxu0 }
 0x384   : > { %19157 = vst [vmem:[#allocation26_spill] sm:$0xff] %v14608_v53  ;;  %v10467_v38 = vpop.f32.mrf.mxu1  ;;  %v3824_v24 = vadd.f32 %v10381_v16, %v14499_v23 }
 0x385   : > { %v14611_v20 = vpop.f32.mrf.mxu0 }
 0x386   : > { %v14613_v11 = vpop.f32.mrf.mxu1  ;;  %v14615_v59 = vadd.f32 %v10461_v5, %v3824_v24 }
 0x387   : > { %19158 = vst [vmem:[#allocation31_spill] sm:$0xff] %v14613_v11  ;;  %v10384_v10 = vpop.f32.mrf.mxu0 }
 0x388   : > { %19159 = vst [vmem:[#allocation66_spill] sm:$0xff] %v14615_v59  ;;  %v10470_v36 = vpop.f32.mrf.mxu1  ;;  %v3838_v31 = vadd.f32 %v10384_v10, %v14507_v41 }
 0x389   : > { %v14618_v19 = vpop.f32.mrf.mxu0 }
 0x38a   : > { %v14620_v14 = vpop.f32.mrf.mxu1  ;;  %v14622_v35 = vadd.f32 %v10464_v62, %v3838_v31  ;;  %v3373_v62 = vadd.f32 %v13969_v34, %v13971_v43 }
 0x38b   : > { %19160 = vst [vmem:[#allocation33_spill] sm:$0xff] %v14620_v14  ;;  %v10387_v54 = vpop.f32.mrf.mxu0 }
 0x38c   : > { %v10473_v45 = vpop.f32.mrf.mxu1  ;;  %v3852_v23 = vadd.f32 %v10387_v54, %v14513_v32  ;;  %v3663_v54 = vadd.f32 %v14534_v27, %v3373_v62 }
 0x38d   : > { %v14625_v16 = vpop.f32.mrf.mxu0 }
 0x38e   : > { %v14627_v53 = vpop.f32.mrf.mxu1  ;;  %v14629_v5 = vadd.f32 %v10467_v38, %v3852_v23 }
 0x38f   : > { %19161 = vst [vmem:[#allocation39_spill] sm:$0xff] %v14627_v53 }
 0x390   : > { %19162 = vst [vmem:[#allocation68_spill] sm:$0xff] %v14629_v5  ;;  %v10390_v24 = vpop.f32.mrf.mxu0  ;;  %v10588_v11 = vpop.f32.mrf.mxu1 }
 0x391   : > { %v3866_v41 = vadd.f32 %v10390_v24, %v14519_v8  ;;  %v3385_v8 = vadd.f32 %v13983_v42, %v13985_v37 }
 0x392   : > { %v14632_v10 = vpop.f32.mrf.mxu0  ;;  %v4608_v59 = vpop.f32.mrf.mxu1 }
 0x393   : > { %v14636_v31 = vadd.f32 %v10470_v36, %v3866_v41  ;;  %v3677_v34 = vadd.f32 %v14541_v50, %v3385_v8  ;;  %v3969_v36 = vadd.f32 %v14525_v21, %v3663_v54  ;;  %v3409_v21 = vadd.f32 %v14095_v30, %v14097_v58  ;;  %v11125_v30 = vld [vmem:[%s11594_s9 + $0x18] sm:$0xff] }
 0x394   : > { %v10393_v14 = vpop.f32.mrf.mxu0  ;;  %v10591_v32 = vpop.f32.mrf.mxu1 }
 0x395   : > { %v3880_v53 = vadd.f32 %v10393_v14, %v14527_v29  ;;  %v3397_v29 = vadd.f32 %v14033_v56, %v14035_v1  ;;  %v11124_v1 = vld [vmem:[%s11594_s9] sm:$0xff] }
 0x396   : > { %v14640_v38 = vpop.f32.mrf.mxu0  ;;  %v4620_v23 = vpop.f32.mrf.mxu1 }
 0x397   : > { %v14644_v24 = vadd.f32 %v10473_v45, %v3880_v53  ;;  %v3691_v42 = vadd.f32 %v14548_v4, %v3397_v29  ;;  %v11123_v45 = vld [vmem:[%s11594_s9 + $0x8] sm:$0xff] }
 0x398   : > { %v10508_v5 = vpop.f32.mrf.mxu0  ;;  %v10594_v41 = vpop.f32.mrf.mxu1 }
 0x399   : > { %v4342_v43 = vadd.f32 %v10508_v5, %v14538_v61  ;;  %v3985_v5 = vadd.f32 %v14531_v9, %v3677_v34 }
 0x39a   : > { %v4335_v27 = vpop.f32.mrf.mxu0  ;;  %v4632_v54 = vpop.f32.mrf.mxu1 }
 0x39b   : > { %v4615_v14 = vadd.f32 %v10588_v11, %v4342_v43  ;;  %v4336_v62 = vadd.f32 %v4335_v27, %v3969_v36 }
 0x39c   : > { %v10511_v37 = vpop.f32.mrf.mxu0 }
 0x39d   : > { %v14653_v53 = vadd.f32 %v11123_v45, %v4615_v14  ;;  %v4609_v50 = vadd.f32 %v4608_v59, %v4336_v62  ;;  %v4354_v61 = vadd.f32 %v10511_v37, %v14545_v25  ;;  %v3705_v59 = vadd.f32 %v14555_v22, %v3409_v21  ;;  %v10597_v14 = vpop.f32.mrf.mxu1 }
 0x39e   : > { %v4347_v56 = vpop.f32.mrf.mxu0  ;;  %v4001_v25 = vadd.f32 %v14536_v13, %v3691_v42  ;;  %v11126_v13 = vld [vmem:[%s11594_s9 + $0x10] sm:$0xff] }
 0x39f   : > { %19163 = vst [vmem:[#allocation42_spill] sm:$0xff] %v14653_v53  ;;  %v14660_v11 = vadd.f32 %v11124_v1, %v4609_v50  ;;  %v4627_v4 = vadd.f32 %v10591_v32, %v4354_v61  ;;  %v4348_v8 = vadd.f32 %v4347_v56, %v3985_v5  ;;  %v14663_v43 = vand.u32 4294901760, %v14653_v53  ;;  %v4644_v1 = vpop.f32.mrf.mxu1 }
 0x3a0   : > { %v10514_v36 = vpop.f32.mrf.mxu0 }
 0x3a1   : > { %19164 = vst [vmem:[#allocation44_spill] sm:$0xff] %v14660_v11  ;;  %19165 = vst [vmem:[#allocation30_spill] sm:$0xff] %v14663_v43  ;;  %v14668_v9 = vand.u32 4294901760, %v14660_v11  ;;  %v14671_v58 = vadd.f32 %v11125_v30, %v4627_v4  ;;  %v4621_v34 = vadd.f32 %v4620_v23, %v4348_v8  ;;  %v4366_v29 = vadd.f32 %v10514_v36, %v14552_v12 }
 0x3a2   : > { %v4359_v27 = vpop.f32.mrf.mxu0  ;;  %v14676_v32 = vsub.f32 %v14653_v53, %v14663_v43  ;;  %v3421_v12 = vadd.f32 %v14159_v33, %v14161_v18 }
 0x3a3   : > { %19166 = vst [vmem:[#allocation58_spill] sm:$0xff] %v14668_v9  ;;  %19167 = vst [vmem:[#allocation45_spill] sm:$0xff] %v14671_v58  ;;  %v14680_v22 = vsub.f32 %v14660_v11, %v14668_v9  ;;  %v14683_v62 = vadd.f32 %v11126_v13, %v4621_v34  ;;  %v4639_v42 = vadd.f32 %v10594_v41, %v4366_v29  ;;  %5538 = vmatmul.mubr.f32.vlgmr.msra.gmra.mxu1 %v14668_v9  ;;  %v11132_v11 = vld [vmem:[%s11594_s9 + $0x48] sm:$0xff] }
 0x3a4   : > { %v4360_v37 = vadd.f32 %v4359_v27, %v4001_v25  ;;  %v10517_v23 = vpop.f32.mrf.mxu0  ;;  %5543 = vmatprep.mubr.f32.mxu1 %v19089_v44  ;;  %6149 = vmatpush1.msra.mxu1 %v14002_v46  ;;  %v14691_v45 = vand.u32 4294901760, %v14671_v58  ;;  %v4017_v41 = vadd.f32 %v14543_v39, %v3705_v59  ;;  %v18165_v5 = vand.u32 4294901760, %v14676_v32  ;;  %v11128_v39 = vld [vmem:[%s11594_s9 + $0x20] sm:$0xff] }
 0x3a5   : > { %19168 = vst [vmem:[#allocation60_spill] sm:$0xff] %v14683_v62  ;;  %v18166_v50 = vand.u32 4294901760, %v14680_v22  ;;  %6151 = vmatprep.subr.mxu1 %v14016_v2  ;;  %v3719_v33 = vadd.f32 %v14562_v7, %v3421_v12  ;;  %v14699_v21 = vand.u32 4294901760, %v14683_v62  ;;  %v4378_v7 = vadd.f32 %v10517_v23, %v14559_v48  ;;  %v10600_v12 = vpop.f32.mrf.mxu1 }
 0x3a6   : > { %19169 = vst [vmem:[#allocation13_spill] sm:$0xff] %v14691_v45  ;;  %v4633_v61 = vadd.f32 %v4632_v54, %v4360_v37  ;;  %v4371_v18 = vpop.f32.mrf.mxu0  ;;  %6153 = vmatpush1.msra.mxu1 %v14028_v47  ;;  %v11127_v54 = vld [vmem:[%s11594_s9 + $0x28] sm:$0xff]  ;;  %v14720_v30 = vsub.f32 %v14671_v58, %v14691_v45  ;;  %v4974_v48 = vsub.f32 %v14676_v32, %v18165_v5  ;;  %v19184_v5 = vld [vmem:[#allocation86_spill] sm:$0xff]  ;;  %v19194_v58 = vld [vmem:[#allocation81_spill] sm:$0xff] }
 0x3a7   : > { %19170 = vst [vmem:[#allocation3_spill] sm:$0xff] %v14699_v21  ;;  %v4963_v56 = vsub.f32 %v14680_v22, %v18166_v50  ;;  %v14706_v4 = vadd.f32 %v11127_v54, %v4639_v42  ;;  %v4372_v59 = vadd.f32 %v4371_v18, %v4017_v41  ;;  %5545 = vmatmul.mubr.f32.gmra.mxu1 %v14663_v43  ;;  %v11129_v41 = vld [vmem:[%s11594_s9 + $0x30] sm:$0xff]  ;;  %v19206_v43 = vld [vmem:[#allocation43_spill] sm:$0xff] }
 0x3a8   : > { %v14709_v8 = vadd.f32 %v11128_v39, %v4633_v61  ;;  %v10520_v36 = vpop.f32.mrf.mxu0  ;;  %5550 = vmatprep.mubr.f32.mxu1 %v19089_v44  ;;  %v14716_v25 = vsub.f32 %v14683_v62, %v14699_v21  ;;  %6155 = vmatprep.subr.mxu1 %v14052_v51  ;;  %v3433_v37 = vadd.f32 %v14236_v60, %v14238_v55  ;;  %v19176_v39 = vld [vmem:[#allocation88_spill] sm:$0xff] }
 0x3a9   : > { %19171 = vst [vmem:[#allocation27_spill] sm:$0xff] %v14706_v4  ;;  %v4964_v34 = vand.u32 4294901760, %v4963_v56  ;;  %v4645_v29 = vadd.f32 %v4644_v1, %v4372_v59  ;;  %6157 = vmatpush1.msra.mxu1 %v14065_v57  ;;  %v4033_v23 = vadd.f32 %v14550_v3, %v3719_v33  ;;  %v4651_v61 = vadd.f32 %v10597_v14, %v4378_v7  ;;  %v4656_v59 = vpop.f32.mrf.mxu1  ;;  %v19177_v7 = vld [vmem:[#allocation51_spill] sm:$0xff] }
 0x3aa   : > { %19172 = vst [vmem:[#allocation18_spill] sm:$0xff] %v14709_v8  ;;  %v4383_v27 = vpop.f32.mrf.mxu0  ;;  %v18163_v13 = vand.u32 4294901760, %v14716_v25  ;;  %v14729_v42 = vand.u32 4294901760, %v14709_v8  ;;  %6159 = vmatprep.subr.mxu1 %v14078_v0  ;;  %v18164_v56 = vand.u32 4294901760, %v14720_v30  ;;  %v14743_v1 = vand.u32 4294901760, %v14706_v4 }
 0x3ab   : > { %4965 = vmatmul.mubr.f32.vlgmr.msra.gmra.mxu0 %v4964_v34  ;;  %5552 = vmatmul.mubr.f32.gmra.mxu1 %v14699_v21  ;;  %v14737_v18 = vadd.f32 %v11129_v41, %v4645_v29  ;;  %v4384_v60 = vadd.f32 %v4383_v27, %v4033_v23  ;;  %v4975_v3 = vand.u32 4294901760, %v4974_v48  ;;  %v3733_v54 = vadd.f32 %v14569_v28, %v3433_v37  ;;  %v11130_v29 = vld [vmem:[%s11594_s9 + $0x38] sm:$0xff]  ;;  %v10603_v50 = vpop.f32.mrf.mxu1 }
 0x3ac   : > { %19173 = vst [vmem:[#allocation12_spill] sm:$0xff] %v14729_v42  ;;  %5766 = vmatpush1.msra.mxu0 %v14013_v52  ;;  %4970 = vmatprep.mubr.f32.mxu0 %v19089_v44  ;;  %19175 = vst [vmem:[#allocation19_spill] sm:$0xff] %v14743_v1  ;;  %v10523_v55 = vpop.f32.mrf.mxu0  ;;  %v4985_v14 = vsub.f32 %v14716_v25, %v18163_v13  ;;  %v14752_v33 = vsub.f32 %v14709_v8, %v14729_v42 }
 0x3ad   : > { %19174 = vst [vmem:[#allocation67_spill] sm:$0xff] %v14737_v18  ;;  %5557 = vmatprep.mubr.f32.mxu1 %v19089_v44  ;;  %5769 = vmatprep.subr.mxu0 %v14031_v15  ;;  %v4390_v34 = vadd.f32 %v10520_v36, %v19177_v7  ;;  %v14760_v48 = vadd.f32 %v11130_v29, %v4651_v61  ;;  %v14773_v61 = vand.u32 4294901760, %v14737_v18  ;;  %v19181_v7 = vld [vmem:[#allocation90_spill] sm:$0xff]  ;;  %v19182_v29 = vld [vmem:[#allocation53_spill] sm:$0xff] }
 0x3ae   : > { %5772 = vmatpush1.msra.mxu0 %v14047_v6  ;;  %6161 = vmatpush1.msra.mxu1 %v19176_v39  ;;  %v4996_v28 = vsub.f32 %v14720_v30, %v18164_v56  ;;  %v14769_v27 = vsub.f32 %v14706_v4, %v14743_v1  ;;  %v4657_v37 = vadd.f32 %v4656_v59, %v4384_v60  ;;  %v4395_v36 = vpop.f32.mrf.mxu0  ;;  %v4986_v23 = vand.u32 4294901760, %v4985_v14  ;;  %v19183_v56 = vld [vmem:[#allocation5_spill] sm:$0xff]  ;;  %v19185_v14 = vld [vmem:[#allocation102_spill] sm:$0xff] }
 0x3af   : > { %4976 = vmatmul.mubr.f32.gmra.mxu0 %v4975_v3  ;;  %5559 = vmatmul.mubr.f32.gmra.mxu1 %v14691_v45  ;;  %19178 = vst [vmem:[#allocation2_spill] sm:$0xff] %v14760_v48  ;;  %19179 = vst [vmem:[#allocation71_spill] sm:$0xff] %v14773_v61  ;;  %v19180_v3 = vld [vmem:[#allocation75_spill] sm:$0xff]  ;;  %v4049_v13 = vadd.f32 %v19182_v29, %v3733_v54  ;;  %v4663_v60 = vadd.f32 %v10600_v12, %v4390_v34  ;;  %v19186_v59 = vld [vmem:[#allocation101_spill] sm:$0xff]  ;;  %v14786_v54 = vand.u32 4294901760, %v14760_v48 }
 0x3b0   : > { %4981 = vmatprep.mubr.f32.mxu0 %v19089_v44  ;;  %5564 = vmatprep.mubr.f32.mxu1 %v19089_v44  ;;  %v3445_v41 = vadd.f32 %v19186_v59, %v19185_v14  ;;  %v4997_v4 = vand.u32 4294901760, %v4996_v28  ;;  %v11131_v29 = vld [vmem:[%s11594_s9 + $0x40] sm:$0xff]  ;;  %v10526_v12 = vpop.f32.mrf.mxu0  ;;  %v19189_v34 = vand.u32 4294901760, %v14752_v33  ;;  %v19192_v28 = vld [vmem:[#allocation89_spill] sm:$0xff]  ;;  %v19205_v45 = vld [vmem:[#allocation72_spill] sm:$0xff] }
 0x3b1   : > { %5775 = vmatprep.subr.mxu0 %v19180_v3  ;;  %6163 = vmatprep.subr.mxu1 %v19181_v7  ;;  %v4396_v8 = vadd.f32 %v4395_v36, %v4049_v13  ;;  %19187 = vst [vmem:[#allocation37_spill] sm:$0xff] %v14786_v54  ;;  %v14789_v62 = vadd.f32 %v11131_v29, %v4657_v37  ;;  %v19191_v36 = vld [vmem:[#allocation84_spill] sm:$0xff]  ;;  %v19193_v59 = vld [vmem:[#allocation77_spill] sm:$0xff]  ;;  %v4668_v29 = vpop.f32.mrf.mxu1 }
 0x3b2   : > { %5778 = vmatpush1.msra.mxu0 %v19183_v56  ;;  %6165 = vmatpush1.msra.mxu1 %v19184_v5  ;;  %v14797_v13 = vsub.f32 %v14737_v18, %v14773_v61  ;;  %v3747_v37 = vadd.f32 %v14576_v63, %v3445_v41  ;;  %v14805_v53 = vadd.f32 %v11132_v11, %v4663_v60  ;;  %v4407_v63 = vpop.f32.mrf.mxu0  ;;  %v19198_v11 = vand.u32 4294901760, %v14769_v27  ;;  %v11133_v60 = vld [vmem:[%s11594_s9 + $0x50] sm:$0xff] }
 0x3b3   : > { %4987 = vmatmul.mubr.f32.gmra.mxu0 %v4986_v23  ;;  %5566 = vmatmul.mubr.f32.gmra.mxu1 %v14729_v42  ;;  %19188 = vst [vmem:[#allocation32_spill] sm:$0xff] %v14789_v62  ;;  %v5007_v23 = vsub.f32 %v14752_v33, %v19189_v34  ;;  %v19196_v34 = vld [vmem:[#allocation10_spill] sm:$0xff]  ;;  %v4669_v18 = vadd.f32 %v4668_v29, %v4396_v8  ;;  %v19200_v8 = vld [vmem:[#allocation79_spill] sm:$0xff]  ;;  %v10606_v21 = vpop.f32.mrf.mxu1 }
 0x3b4   : > { %4992 = vmatprep.mubr.f32.mxu0 %v19089_v44  ;;  %5571 = vmatprep.mubr.f32.mxu1 %v19089_v44  ;;  %19190 = vst [vmem:[#allocation40_spill] sm:$0xff] %v14797_v13  ;;  %19195 = vst [vmem:[#allocation48_spill] sm:$0xff] %v14805_v53  ;;  %v4402_v14 = vadd.f32 %v10523_v55, %v19196_v34  ;;  %v14813_v42 = vsub.f32 %v14760_v48, %v14786_v54  ;;  %v14820_v55 = vand.u32 4294901760, %v14789_v62  ;;  %v19201_v29 = vld [vmem:[#allocation91_spill] sm:$0xff]  ;;  %v19202_v34 = vld [vmem:[#allocation49_spill] sm:$0xff] }
 0x3b5   : > { %5781 = vmatprep.subr.mxu0 %v19191_v36  ;;  %6167 = vmatprep.subr.mxu1 %v19192_v28  ;;  %v5008_v41 = vand.u32 4294901760, %v5007_v23  ;;  %v19203_v48 = vld [vmem:[#allocation92_spill] sm:$0xff]  ;;  %v4065_v9 = vadd.f32 %v19206_v43, %v3747_v37  ;;  %v19209_v37 = vand.u32 4294901760, %v14797_v13 }
 0x3b6   : > { %5784 = vmatpush1.msra.mxu0 %v19193_v59  ;;  %6169 = vmatpush1.msra.mxu1 %v19194_v58  ;;  %19197 = vst [vmem:[#allocation46_spill] sm:$0xff] %v14813_v42  ;;  %19199 = vst [vmem:[#allocation56_spill] sm:$0xff] %v14820_v55  ;;  %v14831_v58 = vadd.f32 %v11133_v60, %v4669_v18  ;;  %v14844_v18 = vsub.f32 %v14789_v62, %v14820_v55  ;;  %v19217_v62 = vand.u32 4294901760, %v14813_v42 }
 0x3b7   : > { %4998 = vmatmul.mubr.f32.gmra.mxu0 %v4997_v4  ;;  %5573 = vmatmul.mubr.f32.gmra.mxu1 %v14743_v1  ;;  %v5018_v4 = vsub.f32 %v14769_v27, %v19198_v11  ;;  %v19204_v1 = vld [vmem:[#allocation69_spill] sm:$0xff]  ;;  %v4675_v11 = vadd.f32 %v10603_v50, %v4402_v14  ;;  %v5029_v50 = vsub.f32 %v14797_v13, %v19209_v37  ;;  %v19211_v14 = vld [vmem:[#allocation28_spill] sm:$0xff] }
 0x3b8   : > { %5003 = vmatprep.mubr.f32.mxu0 %v19089_v44  ;;  %5578 = vmatprep.mubr.f32.mxu1 %v19089_v44  ;;  %v3457_v23 = vadd.f32 %v19205_v45, %v19204_v1  ;;  %19207 = vst [vmem:[#allocation85_spill] sm:$0xff] %v14831_v58  ;;  %v4408_v45 = vadd.f32 %v4407_v63, %v4065_v9  ;;  %v10529_v1 = vpop.f32.mrf.mxu0  ;;  %19210 = vst [vmem:[#allocation62_spill] sm:$0xff] %v14844_v18  ;;  %v4680_v9 = vpop.f32.mrf.mxu1  ;;  %v19215_v63 = vld [vmem:[#allocation82_spill] sm:$0xff]  ;;  %v11134_v37 = vld [vmem:[%s11594_s9 + $0x58] sm:$0xff] }
 0x3b9   : > { %5787 = vmatprep.subr.mxu0 %v19200_v8  ;;  %6171 = vmatprep.subr.mxu1 %v19201_v29  ;;  %v5019_v43 = vand.u32 4294901760, %v5018_v4  ;;  %v19213_v29 = vld [vmem:[#allocation21_spill] sm:$0xff]  ;;  %v4414_v4 = vadd.f32 %v10526_v12, %v19215_v63  ;;  %v14854_v13 = vadd.f32 %v11134_v37, %v4675_v11  ;;  %v14867_v11 = vand.u32 4294901760, %v14831_v58  ;;  %v19220_v37 = vld [vmem:[#allocation7_spill] sm:$0xff] }
 0x3ba   : > { %5790 = vmatpush1.msra.mxu0 %v19202_v34  ;;  %6173 = vmatpush1.msra.mxu1 %v19203_v48  ;;  %v14837_v48 = vand.u32 4294901760, %v14805_v53  ;;  %v3761_v60 = vadd.f32 %v14583_v26, %v3457_v23  ;;  %v5040_v26 = vsub.f32 %v14813_v42, %v19217_v62  ;;  %v4419_v12 = vpop.f32.mrf.mxu0  ;;  %v19223_v62 = vld [vmem:[#allocation6_spill] sm:$0xff]  ;;  %v19224_v42 = vld [vmem:[#allocation96_spill] sm:$0xff] }
 0x3bb   : > { %5009 = vmatmul.mubr.f32.gmra.mxu0 %v5008_v41  ;;  %5580 = vmatmul.mubr.f32.gmra.mxu1 %v14773_v61  ;;  %v19212_v41 = vld [vmem:[#allocation93_spill] sm:$0xff]  ;;  %v19214_v61 = vld [vmem:[#allocation94_spill] sm:$0xff]  ;;  %19216 = vst [vmem:[#allocation88_spill] sm:$0xff] %v14854_v13  ;;  %19219 = vst [vmem:[#allocation75_spill] sm:$0xff] %v14867_v11 }
 0x3bc   : > { %5014 = vmatprep.mubr.f32.mxu0 %v19089_v44  ;;  %5585 = vmatprep.mubr.f32.mxu1 %v19089_v44  ;;  %19208 = vst [vmem:[#allocation61_spill] sm:$0xff] %v14837_v48  ;;  %v14863_v23 = vsub.f32 %v14805_v53, %v14837_v48  ;;  %v10609_v53 = vpop.f32.mrf.mxu1 }
 0x3bd   : > { %5793 = vmatprep.subr.mxu0 %v19211_v14  ;;  %6175 = vmatprep.subr.mxu1 %v19212_v41  ;;  %v19222_v41 = vld [vmem:[#allocation8_spill] sm:$0xff] }
 0x3be   : > { %5796 = vmatpush1.msra.mxu0 %v19213_v29  ;;  %6177 = vmatpush1.msra.mxu1 %v19214_v61  ;;  %19218 = vst [vmem:[#allocation51_spill] sm:$0xff] %v14863_v23  ;;  %v4681_v61 = vadd.f32 %v4680_v9, %v4408_v45  ;;  %v4081_v29 = vadd.f32 %v19222_v41, %v3761_v60  ;;  %v19226_v9 = vld [vmem:[#allocation113_spill] sm:$0xff]  ;;  %v14880_v41 = vand.u32 4294901760, %v14854_v13  ;;  %v11135_v60 = vld [vmem:[%s11594_s9 + $0x60] sm:$0xff] }
 0x3bf   : > { %5020 = vmatmul.mubr.f32.gmra.mxu0 %v5019_v43  ;;  %5587 = vmatmul.mubr.f32.gmra.mxu1 %v14786_v54  ;;  %v5030_v43 = vand.u32 4294901760, %v5029_v50  ;;  %v19221_v54 = vld [vmem:[#allocation25_spill] sm:$0xff]  ;;  %v4687_v45 = vadd.f32 %v10606_v21, %v4414_v4  ;;  %v19225_v50 = vld [vmem:[#allocation114_spill] sm:$0xff]  ;;  %v10532_v21 = vpop.f32.mrf.mxu0  ;;  %v19229_v4 = vand.u32 4294901760, %v14844_v18 }
 0x3c0   : > { %5025 = vmatprep.mubr.f32.mxu0 %v19089_v44  ;;  %5592 = vmatprep.mubr.f32.mxu1 %v19089_v44  ;;  %v3469_v63 = vadd.f32 %v19226_v9, %v19225_v50  ;;  %v4420_v14 = vadd.f32 %v4419_v12, %v4081_v29  ;;  %19227 = vst [vmem:[#allocation90_spill] sm:$0xff] %v14880_v41  ;;  %v19231_v12 = vld [vmem:[#allocation52_spill] sm:$0xff]  ;;  %v19233_v9 = vld [vmem:[#allocation95_spill] sm:$0xff] }
 0x3c1   : > { %5799 = vmatprep.subr.mxu0 %v19220_v37  ;;  %6179 = vmatprep.subr.mxu1 %v19221_v54  ;;  %v5041_v54 = vand.u32 4294901760, %v5040_v26  ;;  %v14891_v29 = vsub.f32 %v14831_v58, %v14867_v11  ;;  %v19232_v26 = vld [vmem:[#allocation9_spill] sm:$0xff] }
 0x3c2   : > { %5802 = vmatpush1.msra.mxu0 %v19223_v62  ;;  %6181 = vmatpush1.msra.mxu1 %v19224_v42  ;;  %v14883_v42 = vadd.f32 %v11135_v60, %v4681_v61  ;;  %v3775_v61 = vadd.f32 %v14590_v49, %v3469_v63  ;;  %v4692_v60 = vpop.f32.mrf.mxu1  ;;  %v11136_v62 = vld [vmem:[%s11594_s9 + $0x68] sm:$0xff]  ;;  %v4431_v49 = vpop.f32.mrf.mxu0 }
 0x3c3   : > { %5031 = vmatmul.mubr.f32.gmra.mxu0 %v5030_v43  ;;  %5594 = vmatmul.mubr.f32.gmra.mxu1 %v14820_v55  ;;  %v5051_v43 = vsub.f32 %v14844_v18, %v19229_v4  ;;  %19230 = vst [vmem:[#allocation5_spill] sm:$0xff] %v14891_v29  ;;  %v19234_v55 = vld [vmem:[#allocation98_spill] sm:$0xff]  ;;  %v14899_v37 = vadd.f32 %v11136_v62, %v4687_v45  ;;  %v19238_v62 = vand.u32 4294901760, %v14863_v23  ;;  %v11137_v45 = vld [vmem:[%s11594_s9 + $0x70] sm:$0xff] }
 0x3c4   : > { %5036 = vmatprep.mubr.f32.mxu0 %v19089_v44  ;;  %5599 = vmatprep.mubr.f32.mxu1 %v19089_v44  ;;  %19228 = vst [vmem:[#allocation53_spill] sm:$0xff] %v14883_v42  ;;  %v19236_v4 = vld [vmem:[#allocation74_spill] sm:$0xff]  ;;  %v4693_v58 = vadd.f32 %v4692_v60, %v4420_v14  ;;  %v19241_v60 = vld [vmem:[#allocation99_spill] sm:$0xff] }
 0x3c5   : > { %5805 = vmatprep.subr.mxu0 %v19231_v12  ;;  %6183 = vmatprep.subr.mxu1 %v19232_v26  ;;  %19235 = vst [vmem:[#allocation86_spill] sm:$0xff] %v14899_v37  ;;  %v4426_v50 = vadd.f32 %v10529_v1, %v19236_v4  ;;  %v14907_v26 = vsub.f32 %v14854_v13, %v14880_v41  ;;  %v5052_v63 = vand.u32 4294901760, %v5051_v43  ;;  %v14914_v1 = vand.u32 4294901760, %v14883_v42  ;;  %v19240_v14 = vld [vmem:[#allocation54_spill] sm:$0xff]  ;;  %v19242_v4 = vld [vmem:[#allocation97_spill] sm:$0xff]  ;;  %v19243_v13 = vld [vmem:[#allocation100_spill] sm:$0xff] }
 0x3c6   : > { %5808 = vmatpush1.msra.mxu0 %v19233_v9  ;;  %6185 = vmatpush1.msra.mxu1 %v19234_v55  ;;  %v19245_v55 = vld [vmem:[#allocation118_spill] sm:$0xff]  ;;  %v10612_v9 = vpop.f32.mrf.mxu1  ;;  %v19246_v12 = vld [vmem:[#allocation4_spill] sm:$0xff] }
 0x3c7   : > { %5042 = vmatmul.mubr.f32.gmra.mxu0 %v5041_v54  ;;  %5601 = vmatmul.mubr.f32.gmra.mxu1 %v14837_v48  ;;  %19237 = vst [vmem:[#allocation102_spill] sm:$0xff] %v14907_v26  ;;  %v5062_v54 = vsub.f32 %v14863_v23, %v19238_v62  ;;  %19239 = vst [vmem:[#allocation101_spill] sm:$0xff] %v14914_v1  ;;  %v19244_v48 = vld [vmem:[#allocation17_spill] sm:$0xff]  ;;  %v4097_v18 = vadd.f32 %v19246_v12, %v3775_v61  ;;  %v19249_v61 = vand.u32 4294901760, %v14891_v29 }
 0x3c8   : > { %5047 = vmatprep.mubr.f32.mxu0 %v19089_v44  ;;  %5606 = vmatprep.mubr.f32.mxu1 %v19089_v44  ;;  %v3481_v43 = vadd.f32 %v19245_v55, %v19244_v48  ;;  %v4699_v62 = vadd.f32 %v10609_v53, %v4426_v50  ;;  %v14925_v23 = vadd.f32 %v11137_v45, %v4693_v58  ;;  %v10535_v55 = vpop.f32.mrf.mxu0  ;;  %v19251_v50 = vld [vmem:[#allocation11_spill] sm:$0xff] }
 0x3c9   : > { %5811 = vmatprep.subr.mxu0 %v19240_v14  ;;  %6187 = vmatprep.subr.mxu1 %v19241_v60  ;;  %v4432_v48 = vadd.f32 %v4431_v49, %v4097_v18  ;;  %v5063_v12 = vand.u32 4294901760, %v5062_v54  ;;  %v5073_v53 = vsub.f32 %v14891_v29, %v19249_v61  ;;  %v14938_v58 = vsub.f32 %v14883_v42, %v14914_v1  ;;  %v19253_v60 = vld [vmem:[#allocation55_spill] sm:$0xff]  ;;  %v4704_v18 = vpop.f32.mrf.mxu1  ;;  %v19255_v49 = vld [vmem:[#allocation64_spill] sm:$0xff]  ;;  %v11138_v61 = vld [vmem:[%s11594_s9 + $0x78] sm:$0xff] }
 0x3ca   : > { %5814 = vmatpush1.msra.mxu0 %v19242_v4  ;;  %6189 = vmatpush1.msra.mxu1 %v19243_v13  ;;  %19247 = vst [vmem:[#allocation84_spill] sm:$0xff] %v14925_v23  ;;  %v14931_v13 = vand.u32 4294901760, %v14899_v37  ;;  %v3789_v45 = vadd.f32 %v14597_v40, %v3481_v43  ;;  %v4438_v54 = vadd.f32 %v10532_v21, %v19255_v49  ;;  %v19257_v42 = vand.u32 4294901760, %v14907_v26  ;;  %v4443_v21 = vpop.f32.mrf.mxu0 }
 0x3cb   : > { %5053 = vmatmul.mubr.f32.gmra.mxu0 %v5052_v63  ;;  %5608 = vmatmul.mubr.f32.gmra.mxu1 %v14867_v11  ;;  %19250 = vst [vmem:[#allocation77_spill] sm:$0xff] %v14938_v58  ;;  %v19252_v63 = vld [vmem:[#allocation57_spill] sm:$0xff]  ;;  %v19254_v11 = vld [vmem:[#allocation16_spill] sm:$0xff]  ;;  %v14948_v29 = vadd.f32 %v11138_v61, %v4699_v62  ;;  %v14961_v62 = vand.u32 4294901760, %v14925_v23  ;;  %v19260_v61 = vld [vmem:[#allocation15_spill] sm:$0xff] }
 0x3cc   : > { %5058 = vmatprep.mubr.f32.mxu0 %v19089_v44  ;;  %5613 = vmatprep.mubr.f32.mxu1 %v19089_v44  ;;  %19248 = vst [vmem:[#allocation89_spill] sm:$0xff] %v14931_v13  ;;  %v5084_v40 = vsub.f32 %v14907_v26, %v19257_v42  ;;  %v14957_v43 = vsub.f32 %v14899_v37, %v14931_v13  ;;  %v19263_v42 = vld [vmem:[#allocation34_spill] sm:$0xff]  ;;  %v19264_v26 = vld [vmem:[#allocation35_spill] sm:$0xff]  ;;  %v10615_v37 = vpop.f32.mrf.mxu1 }
 0x3cd   : > { %5817 = vmatprep.subr.mxu0 %v19251_v50  ;;  %6191 = vmatprep.subr.mxu1 %v19252_v63  ;;  %19256 = vst [vmem:[#allocation10_spill] sm:$0xff] %v14948_v29  ;;  %19259 = vst [vmem:[#allocation49_spill] sm:$0xff] %v14961_v62  ;;  %v19262_v63 = vld [vmem:[#allocation73_spill] sm:$0xff] }
 0x3ce   : > { %5820 = vmatpush1.msra.mxu0 %v19253_v60  ;;  %6193 = vmatpush1.msra.mxu1 %v19254_v11  ;;  %19258 = vst [vmem:[#allocation79_spill] sm:$0xff] %v14957_v43  ;;  %v4705_v11 = vadd.f32 %v4704_v18, %v4432_v48  ;;  %v4113_v60 = vadd.f32 %v19262_v63, %v3789_v45  ;;  %v19266_v18 = vld [vmem:[#allocation116_spill] sm:$0xff]  ;;  %v14974_v63 = vand.u32 4294901760, %v14948_v29  ;;  %v11139_v45 = vld [vmem:[%s11594_s9 + $0x80] sm:$0xff] }
 0x3cf   : > { %5064 = vmatmul.mubr.f32.gmra.mxu0 %v5063_v12  ;;  %5615 = vmatmul.mubr.f32.gmra.mxu1 %v14880_v41  ;;  %v5074_v12 = vand.u32 4294901760, %v5073_v53  ;;  %v19261_v41 = vld [vmem:[#allocation104_spill] sm:$0xff]  ;;  %v4711_v48 = vadd.f32 %v10612_v9, %v4438_v54  ;;  %v19265_v53 = vld [vmem:[#allocation117_spill] sm:$0xff]  ;;  %v19269_v9 = vand.u32 4294901760, %v14938_v58 }
 0x3d0   : > { %5069 = vmatprep.mubr.f32.mxu0 %v19089_v44  ;;  %5620 = vmatprep.mubr.f32.mxu1 %v19089_v44  ;;  %v3493_v49 = vadd.f32 %v19266_v18, %v19265_v53  ;;  %v4444_v50 = vadd.f32 %v4443_v21, %v4113_v60  ;;  %19267 = vst [vmem:[#allocation69_spill] sm:$0xff] %v14974_v63  ;;  %v19271_v21 = vld [vmem:[#allocation103_spill] sm:$0xff]  ;;  %v19273_v18 = vld [vmem:[#allocation22_spill] sm:$0xff] }
 0x3d1   : > { %5823 = vmatprep.subr.mxu0 %v19260_v61  ;;  %6195 = vmatprep.subr.mxu1 %v19261_v41  ;;  %v5085_v41 = vand.u32 4294901760, %v5084_v40  ;;  %v5095_v54 = vsub.f32 %v14938_v58, %v19269_v9  ;;  %v14985_v60 = vsub.f32 %v14925_v23, %v14961_v62  ;;  %v19272_v53 = vld [vmem:[#allocation63_spill] sm:$0xff]  ;;  %v10538_v40 = vpop.f32.mrf.mxu0 }
 0x3d2   : > { %5826 = vmatpush1.msra.mxu0 %v19263_v42  ;;  %6197 = vmatpush1.msra.mxu1 %v19264_v26  ;;  %v14977_v26 = vadd.f32 %v11139_v45, %v4705_v11  ;;  %v3803_v11 = vadd.f32 %v14604_v17, %v3493_v49  ;;  %v4716_v45 = vpop.f32.mrf.mxu1  ;;  %v11140_v42 = vld [vmem:[%s11594_s9 + $0x88] sm:$0xff]  ;;  %v19278_v49 = vand.u32 4294901760, %v14957_v43 }
 0x3d3   : > { %5075 = vmatmul.mubr.f32.gmra.mxu0 %v5074_v12  ;;  %5622 = vmatmul.mubr.f32.gmra.mxu1 %v14914_v1  ;;  %19270 = vst [vmem:[#allocation43_spill] sm:$0xff] %v14985_v60  ;;  %v19274_v1 = vld [vmem:[#allocation107_spill] sm:$0xff]  ;;  %v14993_v9 = vadd.f32 %v11140_v42, %v4711_v48  ;;  %v19276_v12 = vld [vmem:[#allocation20_spill] sm:$0xff]  ;;  %v4717_v58 = vadd.f32 %v4716_v45, %v4444_v50  ;;  %v5096_v17 = vand.u32 4294901760, %v5095_v54  ;;  %v19282_v45 = vld [vmem:[#allocation106_spill] sm:$0xff] }
 0x3d4   : > { %5080 = vmatprep.mubr.f32.mxu0 %v19089_v44  ;;  %5627 = vmatprep.mubr.f32.mxu1 %v19089_v44  ;;  %19268 = vst [vmem:[#allocation72_spill] sm:$0xff] %v14977_v26  ;;  %v4450_v23 = vadd.f32 %v10535_v55, %v19276_v12  ;;  %v5106_v42 = vsub.f32 %v14957_v43, %v19278_v49  ;;  %v15008_v48 = vand.u32 4294901760, %v14977_v26  ;;  %v19280_v55 = vld [vmem:[#allocation105_spill] sm:$0xff]  ;;  %v19281_v50 = vld [vmem:[#allocation108_spill] sm:$0xff]  ;;  %v4455_v12 = vpop.f32.mrf.mxu0  ;;  %v10618_v49 = vpop.f32.mrf.mxu1 }
 0x3d5   : > { %5829 = vmatprep.subr.mxu0 %v19271_v21  ;;  %6199 = vmatprep.subr.mxu1 %v19272_v53  ;;  %19275 = vst [vmem:[#allocation82_spill] sm:$0xff] %v14993_v9  ;;  %v15001_v53 = vsub.f32 %v14948_v29, %v14974_v63  ;;  %v19283_v29 = vld [vmem:[#allocation41_spill] sm:$0xff]  ;;  %v11141_v43 = vld [vmem:[%s11594_s9 + $0x90] sm:$0xff] }
 0x3d6   : > { %5832 = vmatpush1.msra.mxu0 %v19273_v18  ;;  %6201 = vmatpush1.msra.mxu1 %v19274_v1  ;;  %19279 = vst [vmem:[#allocation114_spill] sm:$0xff] %v15008_v48  ;;  %v19285_v54 = vld [vmem:[#allocation121_spill] sm:$0xff]  ;;  %v19286_v18 = vld [vmem:[#allocation76_spill] sm:$0xff]  ;;  %v15019_v61 = vadd.f32 %v11141_v43, %v4717_v58  ;;  %v10541_v43 = vpop.f32.mrf.mxu0 }
 0x3d7   : > { %5086 = vmatmul.mubr.f32.gmra.mxu0 %v5085_v41  ;;  %5629 = vmatmul.mubr.f32.gmra.mxu1 %v14931_v13  ;;  %19277 = vst [vmem:[#allocation8_spill] sm:$0xff] %v15001_v53  ;;  %v19284_v13 = vld [vmem:[#allocation120_spill] sm:$0xff]  ;;  %v4129_v21 = vadd.f32 %v19286_v18, %v3803_v11  ;;  %v4723_v41 = vadd.f32 %v10615_v37, %v4450_v23  ;;  %v5107_v18 = vand.u32 4294901760, %v5106_v42  ;;  %v19289_v11 = vand.u32 4294901760, %v14985_v60  ;;  %v19294_v42 = vld [vmem:[#allocation26_spill] sm:$0xff] }
 0x3d8   : > { %5091 = vmatprep.mubr.f32.mxu0 %v19089_v44  ;;  %5634 = vmatprep.mubr.f32.mxu1 %v19089_v44  ;;  %v3505_v1 = vadd.f32 %v19285_v54, %v19284_v13  ;;  %19287 = vst [vmem:[#allocation113_spill] sm:$0xff] %v15019_v61  ;;  %v15032_v23 = vsub.f32 %v14977_v26, %v15008_v48  ;;  %v19290_v37 = vld [vmem:[#allocation24_spill] sm:$0xff]  ;;  %v19292_v54 = vld [vmem:[#allocation109_spill] sm:$0xff] }
 0x3d9   : > { %5835 = vmatprep.subr.mxu0 %v19280_v55  ;;  %6203 = vmatprep.subr.mxu1 %v19281_v50  ;;  %v4456_v13 = vadd.f32 %v4455_v12, %v4129_v21  ;;  %v19291_v58 = vld [vmem:[#allocation36_spill] sm:$0xff]  ;;  %v19293_v50 = vld [vmem:[#allocation111_spill] sm:$0xff]  ;;  %v4462_v12 = vadd.f32 %v10538_v40, %v19294_v42  ;;  %v15055_v42 = vand.u32 4294901760, %v15019_v61 }
 0x3da   : > { %5838 = vmatpush1.msra.mxu0 %v19282_v45  ;;  %6205 = vmatpush1.msra.mxu1 %v19283_v29  ;;  %v15025_v29 = vand.u32 4294901760, %v14993_v9  ;;  %v3817_v21 = vadd.f32 %v14611_v20, %v3505_v1 }
 0x3db   : > { %5097 = vmatmul.mubr.f32.gmra.mxu0 %v5096_v17  ;;  %5636 = vmatmul.mubr.f32.gmra.mxu1 %v14961_v62  ;;  %v5117_v17 = vsub.f32 %v14985_v60, %v19289_v11  ;;  %v4728_v11 = vpop.f32.mrf.mxu1  ;;  %v11142_v62 = vld [vmem:[%s11594_s9 + $0x98] sm:$0xff]  ;;  %19298 = vst [vmem:[#allocation17_spill] sm:$0xff] %v15055_v42 }
 0x3dc   : > { %5102 = vmatprep.mubr.f32.mxu0 %v19089_v44  ;;  %5641 = vmatprep.mubr.f32.mxu1 %v19089_v44  ;;  %19288 = vst [vmem:[#allocation74_spill] sm:$0xff] %v15025_v29  ;;  %v15042_v26 = vadd.f32 %v11142_v62, %v4723_v41  ;;  %v15051_v20 = vsub.f32 %v14993_v9, %v15025_v29  ;;  %v19299_v62 = vld [vmem:[#allocation110_spill] sm:$0xff]  ;;  %v19300_v41 = vld [vmem:[#allocation87_spill] sm:$0xff] }
 0x3dd   : > { %5841 = vmatprep.subr.mxu0 %v19290_v37  ;;  %6207 = vmatprep.subr.mxu1 %v19291_v58  ;;  %v19296_v58 = vand.u32 4294901760, %v15001_v53  ;;  %v4729_v1 = vadd.f32 %v4728_v11, %v4456_v13  ;;  %v5118_v40 = vand.u32 4294901760, %v5117_v17  ;;  %v19303_v13 = vld [vmem:[#allocation59_spill] sm:$0xff]  ;;  %v19304_v17 = vld [vmem:[#allocation14_spill] sm:$0xff] }
 0x3de   : > { %5844 = vmatpush1.msra.mxu0 %v19292_v54  ;;  %6209 = vmatpush1.msra.mxu1 %v19293_v50  ;;  %19295 = vst [vmem:[#allocation54_spill] sm:$0xff] %v15042_v26  ;;  %19297 = vst [vmem:[#allocation97_spill] sm:$0xff] %v15051_v20  ;;  %v19301_v50 = vld [vmem:[#allocation112_spill] sm:$0xff]  ;;  %v3517_v11 = vadd.f32 %v19304_v17, %v19303_v13  ;;  %v15078_v13 = vsub.f32 %v15019_v61, %v15055_v42  ;;  %v19308_v17 = vld [vmem:[#allocation115_spill] sm:$0xff] }
 0x3df   : > { %5108 = vmatmul.mubr.f32.gmra.mxu0 %v5107_v18  ;;  %5643 = vmatmul.mubr.f32.gmra.mxu1 %v14974_v63  ;;  %v5128_v54 = vsub.f32 %v15001_v53, %v19296_v58  ;;  %v4467_v63 = vpop.f32.mrf.mxu0  ;;  %v4735_v58 = vadd.f32 %v10618_v49, %v4462_v12  ;;  %v19302_v53 = vld [vmem:[#allocation78_spill] sm:$0xff]  ;;  %v10621_v18 = vpop.f32.mrf.mxu1  ;;  %v19307_v12 = vand.u32 4294901760, %v15032_v23 }
 0x3e0   : > { %5113 = vmatprep.mubr.f32.mxu0 %v19089_v44  ;;  %5648 = vmatprep.mubr.f32.mxu1 %v19089_v44  ;;  %v4145_v37 = vadd.f32 %v19302_v53, %v3817_v21  ;;  %v11143_v49 = vld [vmem:[%s11594_s9 + $0xa0] sm:$0xff] }
 0x3e1   : > { %5847 = vmatprep.subr.mxu0 %v19299_v62  ;;  %6917 = vmatprep.subr.mxu1 %v19300_v41  ;;  %v5129_v9 = vand.u32 4294901760, %v5128_v54  ;;  %v15071_v53 = vadd.f32 %v11143_v49, %v4729_v1  ;;  %v10544_v54 = vpop.f32.mrf.mxu0  ;;  %v3831_v41 = vadd.f32 %v14618_v19, %v3517_v11  ;;  %v11144_v62 = vld [vmem:[%s11594_s9 + $0xa8] sm:$0xff]  ;;  %v19312_v49 = vand.u32 4294901760, %v15051_v20 }
 0x3e2   : > { %5850 = vmatpush1.msra.mxu0 %v19301_v50  ;;  %v15068_v50 = vand.u32 4294901760, %v15042_v26  ;;  %v4468_v21 = vadd.f32 %v4467_v63, %v4145_v37  ;;  %v15084_v60 = vadd.f32 %v11144_v62, %v4735_v58  ;;  %v4740_v63 = vpop.f32.mrf.mxu1  ;;  %v19311_v37 = vld [vmem:[#allocation66_spill] sm:$0xff] }
 0x3e3   : > { %5119 = vmatmul.mubr.f32.gmra.mxu0 %v5118_v40  ;;  %5650 = vmatmul.mubr.f32.gmra.mxu1 %v15008_v48  ;;  %19306 = vst [vmem:[#allocation4_spill] sm:$0xff] %v15071_v53  ;;  %v5139_v40 = vsub.f32 %v15032_v23, %v19307_v12  ;;  %v19309_v48 = vld [vmem:[#allocation47_spill] sm:$0xff]  ;;  %v4474_v1 = vadd.f32 %v10541_v43, %v19311_v37  ;;  %v15099_v11 = vand.u32 4294901760, %v15071_v53  ;;  %v4479_v61 = vpop.f32.mrf.mxu0 }
 0x3e4   : > { %5124 = vmatprep.mubr.f32.mxu0 %v19089_v44  ;;  %5655 = vmatprep.mubr.f32.mxu1 %v19089_v44  ;;  %19305 = vst [vmem:[#allocation118_spill] sm:$0xff] %v15068_v50  ;;  %19310 = vst [vmem:[#allocation64_spill] sm:$0xff] %v15084_v60  ;;  %v5150_v12 = vsub.f32 %v15051_v20, %v19312_v49  ;;  %v15095_v19 = vsub.f32 %v15042_v26, %v15068_v50  ;;  %v19314_v43 = vld [vmem:[#allocation83_spill] sm:$0xff]  ;;  %v19318_v49 = vld [vmem:[#allocation80_spill] sm:$0xff] }
 0x3e5   : > { %5853 = vmatprep.subr.mxu0 %v19308_v17  ;;  %v4741_v62 = vadd.f32 %v4740_v63, %v4468_v21  ;;  %v5140_v58 = vand.u32 4294901760, %v5139_v40  ;;  %19313 = vst [vmem:[#allocation73_spill] sm:$0xff] %v15099_v11  ;;  %v19315_v37 = vand.u32 4294901760, %v19314_v43  ;;  %v4161_v20 = vadd.f32 %v19318_v49, %v3831_v41  ;;  %v10624_v21 = vpop.f32.mrf.mxu1  ;;  %v19326_v26 = vld [vmem:[#allocation29_spill] sm:$0xff] }
 0x3e6   : > { %5856 = vmatpush1.msra.mxu0 %v19309_v48  ;;  %v19317_v48 = vld [vmem:[#allocation65_spill] sm:$0xff]  ;;  %v4747_v40 = vadd.f32 %v10621_v18, %v4474_v1  ;;  %v5151_v63 = vand.u32 4294901760, %v5150_v12  ;;  %v19321_v41 = vand.u32 4294901760, %v15078_v13  ;;  %v15121_v18 = vsub.f32 %v15071_v53, %v15099_v11  ;;  %v10547_v1 = vpop.f32.mrf.mxu0 }
 0x3e7   : > { %5130 = vmatmul.mubr.f32.gmra.mxu0 %v5129_v9  ;;  %5657 = vmatmul.mubr.f32.gmra.mxu1 %v15025_v29  ;;  %v19316_v29 = vld [vmem:[#allocation70_spill] sm:$0xff]  ;;  %v11145_v9 = vld [vmem:[%s11594_s9 + $0xb0] sm:$0xff]  ;;  %v4486_v49 = vadd.f32 %v10544_v54, %v14622_v35  ;;  %v4752_v43 = vpop.f32.mrf.mxu1 }
 0x3e8   : > { %5135 = vmatprep.mubr.f32.mxu0 %v19089_v44  ;;  %5662 = vmatprep.mubr.f32.mxu1 %v19089_v44  ;;  %v3529_v17 = vadd.f32 %v19317_v48, %v19316_v29  ;;  %v15114_v29 = vadd.f32 %v11145_v9, %v4741_v62  ;;  %v4480_v48 = vadd.f32 %v4479_v61, %v4161_v20  ;;  %v11146_v62 = vld [vmem:[%s11594_s9 + $0xb8] sm:$0xff]  ;;  %v19323_v61 = vand.u32 4294901760, %v15095_v19 }
 0x3e9   : > { %6534 = vmatprep.subr.mxu0 %v19315_v37  ;;  %v15111_v37 = vand.u32 4294901760, %v15084_v60  ;;  %v15127_v9 = vadd.f32 %v11146_v62, %v4747_v40  ;;  %v18249_v54 = vand.u32 4294901760, %v15121_v18  ;;  %v19324_v62 = vld [vmem:[#allocation31_spill] sm:$0xff] }
 0x3ea   : > { %19320 = vst [vmem:[#allocation116_spill] sm:$0xff] %v15114_v29  ;;  %v3845_v12 = vadd.f32 %v14625_v16, %v3529_v17  ;;  %v5172_v20 = vsub.f32 %v15095_v19, %v19323_v61  ;;  %v4753_v35 = vadd.f32 %v4752_v43, %v4480_v48  ;;  %v15140_v40 = vand.u32 4294901760, %v15114_v29  ;;  %v19325_v61 = vld [vmem:[#allocation50_spill] sm:$0xff] }
 0x3eb   : > { %5141 = vmatmul.mubr.f32.gmra.mxu0 %v5140_v58  ;;  %5664 = vmatmul.mubr.f32.gmra.mxu1 %v15055_v42  ;;  %19319 = vst [vmem:[#allocation117_spill] sm:$0xff] %v15111_v37  ;;  %v5161_v58 = vsub.f32 %v15078_v13, %v19321_v41  ;;  %19322 = vst [vmem:[#allocation20_spill] sm:$0xff] %v15127_v9  ;;  %v15136_v16 = vsub.f32 %v15084_v60, %v15111_v37 }
 0x3ec   : > { %5146 = vmatprep.mubr.f32.mxu0 %v19089_v44  ;;  %5669 = vmatprep.mubr.f32.mxu1 %v19089_v44  ;;  %v4759_v41 = vadd.f32 %v10624_v21, %v4486_v49  ;;  %v4177_v53 = vadd.f32 %v19324_v62, %v3845_v12  ;;  %v3541_v60 = vadd.f32 %v19326_v26, %v19325_v61  ;;  %v5173_v43 = vand.u32 4294901760, %v5172_v20  ;;  %v11147_v21 = vld [vmem:[%s11594_s9 + $0xc0] sm:$0xff]  ;;  %v11148_v61 = vld [vmem:[%s11594_s9 + $0xc8] sm:$0xff] }
 0x3ed   : > { %v5162_v17 = vand.u32 4294901760, %v5161_v58  ;;  %v15150_v58 = vand.u32 4294901760, %v15127_v9  ;;  %v15153_v12 = vadd.f32 %v11147_v21, %v4753_v35  ;;  %v15160_v26 = vsub.f32 %v15114_v29, %v15140_v40  ;;  %v19329_v21 = vld [vmem:[#allocation68_spill] sm:$0xff]  ;;  %v19333_v29 = vld [vmem:[#allocation38_spill] sm:$0xff] }
 0x3ee   : > { %v3859_v20 = vadd.f32 %v14632_v10, %v3541_v60  ;;  %v15164_v48 = vadd.f32 %v11148_v61, %v4759_v41 }
 0x3ef   : > { %5152 = vmatmul.mubr.f32.gmra.mxu0 %v5151_v63  ;;  %5671 = vmatmul.mubr.f32.gmra.mxu1 %v15068_v50  ;;  %v4491_v63 = vpop.f32.mrf.mxu0  ;;  %v10627_v50 = vpop.f32.mrf.mxu1  ;;  %19327 = vst [vmem:[#allocation105_spill] sm:$0xff] %v15153_v12  ;;  %v15175_v10 = vsub.f32 %v15127_v9, %v15150_v58  ;;  %v15179_v61 = vand.u32 4294901760, %v15153_v12 }
 0x3f0   : > { %5157 = vmatprep.mubr.f32.mxu0 %v19089_v44  ;;  %5676 = vmatprep.mubr.f32.mxu1 %v19089_v44  ;;  %v4492_v49 = vadd.f32 %v4491_v63, %v4177_v53  ;;  %19328 = vst [vmem:[#allocation106_spill] sm:$0xff] %v15164_v48  ;;  %v4498_v53 = vadd.f32 %v10547_v1, %v19329_v21  ;;  %v19330_v63 = vand.u32 4294901760, %v15136_v16  ;;  %v19332_v21 = vld [vmem:[#allocation23_spill] sm:$0xff] }
 0x3f1   : > { %v10550_v62 = vpop.f32.mrf.mxu0  ;;  %v4764_v35 = vpop.f32.mrf.mxu1  ;;  %19331 = vst [vmem:[#allocation120_spill] sm:$0xff] %v15179_v61 }
 0x3f2   : > { %v4765_v60 = vadd.f32 %v4764_v35, %v4492_v49  ;;  %v4771_v9 = vadd.f32 %v10627_v50, %v4498_v53  ;;  %v15189_v35 = vand.u32 4294901760, %v15164_v48  ;;  %v15199_v50 = vsub.f32 %v15153_v12, %v15179_v61 }
 0x3f3   : > { %5163 = vmatmul.mubr.f32.gmra.mxu0 %v5162_v17  ;;  %5678 = vmatmul.mubr.f32.gmra.mxu1 %v15099_v11  ;;  %v5183_v17 = vsub.f32 %v15121_v18, %v18249_v54  ;;  %v5194_v54 = vsub.f32 %v15136_v16, %v19330_v63  ;;  %v4503_v1 = vpop.f32.mrf.mxu0  ;;  %v19334_v11 = vld [vmem:[#allocation33_spill] sm:$0xff]  ;;  %v10630_v63 = vpop.f32.mrf.mxu1 }
 0x3f4   : > { %5168 = vmatprep.mubr.f32.mxu0 %v19089_v44  ;;  %5683 = vmatprep.mubr.f32.mxu1 %v19089_v44  ;;  %v4193_v42 = vadd.f32 %v19334_v11, %v3859_v20  ;;  %v19336_v20 = vand.u32 4294901760, %v15160_v26 }
 0x3f5   : > { %v5184_v41 = vand.u32 4294901760, %v5183_v17  ;;  %v5195_v49 = vand.u32 4294901760, %v5194_v54  ;;  %v10553_v53 = vpop.f32.mrf.mxu0  ;;  %v4776_v17 = vpop.f32.mrf.mxu1 }
 0x3f6   : > { %v4504_v11 = vadd.f32 %v4503_v1, %v4193_v42  ;;  %v19338_v42 = vand.u32 4294901760, %v15175_v10 }
 0x3f7   : > { %5174 = vmatmul.mubr.f32.gmra.mxu0 %v5173_v43  ;;  %5685 = vmatmul.mubr.f32.gmra.mxu1 %v15111_v37  ;;  %v3553_v37 = vadd.f32 %v19333_v29, %v19332_v21  ;;  %v11149_v43 = vld [vmem:[%s11594_s9 + $0xd0] sm:$0xff]  ;;  %v4510_v21 = vadd.f32 %v10550_v62, %v14636_v31  ;;  %v11151_v62 = vld [vmem:[%s11594_s9 + $0xe0] sm:$0xff] }
 0x3f8   : > { %5179 = vmatprep.mubr.f32.mxu0 %v19089_v44  ;;  %5690 = vmatprep.mubr.f32.mxu1 %v19089_v44  ;;  %v15192_v29 = vadd.f32 %v11149_v43, %v4765_v60  ;;  %v11150_v60 = vld [vmem:[%s11594_s9 + $0xd8] sm:$0xff]  ;;  %v5216_v1 = vsub.f32 %v15175_v10, %v19338_v42  ;;  %v4777_v31 = vadd.f32 %v4776_v17, %v4504_v11  ;;  %v10633_v42 = vpop.f32.mrf.mxu1 }
 0x3f9   : > { %v3873_v54 = vadd.f32 %v14640_v38, %v3553_v37  ;;  %v15205_v43 = vadd.f32 %v11150_v60, %v4771_v9  ;;  %v15214_v38 = vsub.f32 %v15164_v48, %v15189_v35  ;;  %v19339_v60 = vld [vmem:[#allocation39_spill] sm:$0xff]  ;;  %v4522_v11 = vadd.f32 %v10553_v53, %v14644_v24 }
 0x3fa   : > { %19335 = vst [vmem:[#allocation121_spill] sm:$0xff] %v15192_v29  ;;  %v15218_v9 = vand.u32 4294901760, %v15192_v29  ;;  %v5217_v17 = vand.u32 4294901760, %v5216_v1  ;;  %v15229_v48 = vadd.f32 %v11151_v62, %v4777_v31  ;;  %v4788_v1 = vpop.f32.mrf.mxu1 }
 0x3fb   : > { %5185 = vmatmul.mubr.f32.gmra.mxu0 %v5184_v41  ;;  %5692 = vmatmul.mubr.f32.gmra.mxu1 %v15140_v40  ;;  %v5205_v41 = vsub.f32 %v15160_v26, %v19336_v20  ;;  %19337 = vst [vmem:[#allocation76_spill] sm:$0xff] %v15205_v43  ;;  %v4783_v20 = vadd.f32 %v10630_v63, %v4510_v21 }
 0x3fc   : > { %5190 = vmatprep.mubr.f32.mxu0 %v19089_v44  ;;  %5697 = vmatprep.mubr.f32.mxu1 %v19089_v44  ;;  %v4209_v12 = vadd.f32 %v19339_v60, %v3873_v54  ;;  %19340 = vst [vmem:[#allocation26_spill] sm:$0xff] %v15229_v48  ;;  %v19341_v54 = vand.u32 4294901760, %v15199_v50  ;;  %v11152_v60 = vld [vmem:[%s11594_s9 + $0xe8] sm:$0xff]  ;;  %v15254_v24 = vand.u32 4294901760, %v15229_v48  ;;  %v4795_v53 = vadd.f32 %v10633_v42, %v4522_v11  ;;  %v11154_v11 = vld [vmem:[%s11594_s9 + $0xf8] sm:$0xff] }
 0x3fd   : > { %v5206_v37 = vand.u32 4294901760, %v5205_v41  ;;  %v15226_v41 = vand.u32 4294901760, %v15205_v43 }
 0x3fe   : > { %v5227_v21 = vsub.f32 %v15199_v50, %v19341_v54  ;;  %v15271_v42 = vsub.f32 %v15229_v48, %v15254_v24 }
 0x3ff   : > { %5196 = vmatmul.mubr.f32.gmra.mxu0 %v5195_v49  ;;  %5699 = vmatmul.mubr.f32.gmra.mxu1 %v15150_v58  ;;  %v4515_v49 = vpop.f32.mrf.mxu0  ;;  %v15250_v62 = vsub.f32 %v15205_v43, %v15226_v41 }
 0x400   : > { %5201 = vmatprep.mubr.f32.mxu0 %v19089_v44  ;;  %5704 = vmatprep.mubr.f32.mxu1 %v19089_v44  ;;  %v4516_v63 = vadd.f32 %v4515_v49, %v4209_v12  ;;  %v19343_v12 = vand.u32 4294901760, %v15214_v38 }
 0x402   : > { %v5238_v31 = vsub.f32 %v15214_v38, %v19343_v12  ;;  %v4789_v49 = vadd.f32 %v4788_v1, %v4516_v63  ;;  %v11153_v63 = vld [vmem:[%s11594_s9 + $0xf0] sm:$0xff]  ;;  %v18263_v12 = vand.u32 4294901760, %v15250_v62 }
 0x403   : > { %5207 = vmatmul.mubr.f32.gmra.mxu0 %v5206_v37  ;;  %5706 = vmatmul.mubr.f32.gmra.mxu1 %v15179_v61  ;;  %v15236_v37 = vsub.f32 %v15192_v29, %v15218_v9  ;;  %v15239_v61 = vadd.f32 %v11152_v60, %v4783_v20  ;;  %v5228_v20 = vand.u32 4294901760, %v5227_v21 }
 0x404   : > { %5212 = vmatprep.mubr.f32.mxu0 %v19089_v44  ;;  %5711 = vmatprep.mubr.f32.mxu1 %v19089_v44  ;;  %v5239_v54 = vand.u32 4294901760, %v5238_v31  ;;  %v15263_v21 = vadd.f32 %v11153_v63, %v4789_v49  ;;  %v15275_v31 = vadd.f32 %v11154_v11, %v4795_v53  ;;  %v5260_v63 = vsub.f32 %v15250_v62, %v18263_v12 }
 0x405   : > { %19342 = vst [vmem:[#allocation87_spill] sm:$0xff] %v15239_v61  ;;  %v15260_v60 = vand.u32 4294901760, %v15239_v61 }
 0x406   : > { %19344 = vst [vmem:[#allocation78_spill] sm:$0xff] %v15263_v21  ;;  %19345 = vst [vmem:[#allocation59_spill] sm:$0xff] %v15275_v31  ;;  %v5261_v11 = vand.u32 4294901760, %v5260_v63  ;;  %v15298_v12 = vand.u32 4294901760, %v15275_v31 }
 0x407   : > { %5218 = vmatmul.mubr.f32.gmra.mxu0 %v5217_v17  ;;  %5713 = vmatmul.mubr.f32.gmra.mxu1 %v15189_v35  ;;  %v18262_v17 = vand.u32 4294901760, %v15236_v37  ;;  %v15281_v49 = vsub.f32 %v15239_v61, %v15260_v60 }
 0x408   : > { %5223 = vmatprep.mubr.f32.mxu0 %v19089_v44  ;;  %5718 = vmatprep.mubr.f32.mxu1 %v19089_v44  ;;  %v15313_v61 = vsub.f32 %v15275_v31, %v15298_v12 }
 0x409   : > { %v5249_v1 = vsub.f32 %v15236_v37, %v18262_v17  ;;  %v15288_v17 = vand.u32 4294901760, %v15263_v21  ;;  %v18267_v53 = vand.u32 4294901760, %v15281_v49 }
 0x40b   : > { %5229 = vmatmul.mubr.f32.gmra.mxu0 %v5228_v20  ;;  %5720 = vmatmul.mubr.f32.gmra.mxu1 %v15218_v9  ;;  %v5250_v20 = vand.u32 4294901760, %v5249_v1  ;;  %v15302_v48 = vsub.f32 %v15263_v21, %v15288_v17  ;;  %v5282_v63 = vsub.f32 %v15281_v49, %v18267_v53  ;;  %v5303_v53 = vand.u32 4294901760, %v15313_v61 }
 0x40c   : > { %5234 = vmatprep.mubr.f32.mxu0 %v19089_v44  ;;  %5725 = vmatprep.mubr.f32.mxu1 %v19089_v44 }
 0x40d   : > { %v5304_v21 = vsub.f32 %v15313_v61, %v5303_v53 }
 0x40f   : > { %5240 = vmatmul.mubr.f32.gmra.mxu0 %v5239_v54  ;;  %5727 = vmatmul.mubr.f32.gmra.mxu1 %v15226_v41  ;;  %v18265_v54 = vand.u32 4294901760, %v15271_v42 }
 0x410   : > { %5245 = vmatprep.mubr.f32.mxu0 %v19089_v44  ;;  %5732 = vmatprep.mubr.f32.mxu1 %v19089_v44 }
 0x411   : > { %v5271_v1 = vsub.f32 %v15271_v42, %v18265_v54  ;;  %v5292_v54 = vand.u32 4294901760, %v15302_v48 }
 0x413   : > { %5251 = vmatmul.mubr.f32.gmra.mxu0 %v5250_v20  ;;  %5734 = vmatmul.mubr.f32.gmra.mxu1 %v15254_v24  ;;  %v5272_v20 = vand.u32 4294901760, %v5271_v1  ;;  %v5293_v1 = vsub.f32 %v15302_v48, %v5292_v54 }
 0x414   : > { %5256 = vmatprep.mubr.f32.mxu0 %v19089_v44  ;;  %5739 = vmatprep.mubr.f32.mxu1 %v19089_v44 }
 0x417   : > { %5262 = vmatmul.mubr.f32.gmra.mxu0 %v5261_v11  ;;  %5741 = vmatmul.mubr.f32.gmra.mxu1 %v15260_v60  ;;  %v5283_v11 = vand.u32 4294901760, %v5282_v63  ;;  %v19346_v63 = vand.u32 4294901760, %v14680_v22 }
 0x418   : > { %5267 = vmatprep.mubr.f32.mxu0 %v19089_v44  ;;  %5746 = vmatprep.mubr.f32.mxu1 %v19089_v44 }
 0x41b   : > { %5273 = vmatmul.mubr.f32.gmra.mxu0 %v5272_v20  ;;  %5748 = vmatmul.mubr.f32.gmra.mxu1 %v15288_v17  ;;  %v5294_v20 = vand.u32 4294901760, %v5293_v1  ;;  %v19347_v1 = vand.u32 4294901760, %v14676_v32 }
 0x41c   : > { %5278 = vmatprep.mubr.f32.mxu0 %v19089_v44  ;;  %5753 = vmatprep.mubr.f32.mxu1 %v19089_v44 }
 0x41f   : > { %5284 = vmatmul.mubr.f32.gmra.mxu0 %v5283_v11  ;;  %5755 = vmatmul.mubr.f32.gmra.mxu1 %v15298_v12  ;;  %v5305_v11 = vand.u32 4294901760, %v5304_v21  ;;  %v19348_v21 = vand.u32 4294901760, %v14716_v25 }
 0x420   : > { %5289 = vmatprep.mubr.f32.mxu0 %v19089_v44  ;;  %6242 = vmatprep.mubr.f32.mxu1 %v19089_v44 }
 0x423   : > { %5295 = vmatmul.mubr.f32.gmra.mxu0 %v5294_v20  ;;  %6246 = vmatmul.mubr.f32.vlgmr.msra.gmra.mxu1 %v19346_v63  ;;  %v19351_v20 = vand.u32 4294901760, %v14047_v6  ;;  %v19355_v6 = vand.u32 4294901760, %v14752_v33  ;;  %v19374_v63 = vld [vmem:[#allocation93_spill] sm:$0xff] }
 0x424   : > { %5300 = vmatprep.mubr.f32.mxu0 %v19089_v44  ;;  %6251 = vmatprep.mubr.f32.mxu1 %v19089_v44 }
 0x425   : > { %6919 = vmatpush1.msra.mxu1 %v14002_v46  ;;  %v19349_v46 = vand.u32 4294901760, %v14013_v52  ;;  %v19353_v52 = vand.u32 4294901760, %v19180_v3  ;;  %v19366_v3 = vld [vmem:[#allocation91_spill] sm:$0xff] }
 0x426   : > { %6921 = vmatprep.subr.mxu1 %v14016_v2  ;;  %v19350_v2 = vand.u32 4294901760, %v14031_v15  ;;  %v19354_v15 = vand.u32 4294901760, %v19183_v56  ;;  %v19364_v56 = vld [vmem:[#allocation28_spill] sm:$0xff] }
 0x427   : > { %5306 = vmatmul.mubr.f32.gmra.mxu0 %v5305_v11  ;;  %6255 = vmatmul.mubr.f32.gmra.mxu1 %v19347_v1  ;;  %v19375_v11 = vld [vmem:[#allocation6_spill] sm:$0xff] }
 0x428   : > { %5889 = vmatprep.mubr.f32.mxu0 %v19089_v44  ;;  %6260 = vmatprep.mubr.f32.mxu1 %v19089_v44  ;;  %v19376_v1 = vand.u32 4294901760, %v19375_v11  ;;  %v19407_v11 = vld [vmem:[#allocation16_spill] sm:$0xff] }
 0x429   : > { %6923 = vmatpush1.msra.mxu1 %v14028_v47  ;;  %v19352_v47 = vand.u32 4294901760, %v14720_v30 }
 0x42a   : > { %6925 = vmatprep.subr.mxu1 %v14052_v51  ;;  %v19356_v51 = vand.u32 4294901760, %v19191_v36 }
 0x42b   : > { %5892 = vmatmul.mubr.f32.vlgmr.msra.gmra.mxu0 %v14680_v22  ;;  %6264 = vmatmul.mubr.f32.gmra.mxu1 %v19348_v21  ;;  %v19360_v22 = vand.u32 4294901760, %v19202_v34  ;;  %v19377_v21 = vld [vmem:[#allocation94_spill] sm:$0xff] }
 0x42c   : > { %6538 = vmatpush1.msra.mxu0 %v19349_v46  ;;  %5897 = vmatprep.mubr.f32.mxu0 %v19089_v44 }
 0x42d   : > { %6269 = vmatprep.mubr.f32.mxu1 %v19089_v44  ;;  %6542 = vmatprep.subr.mxu0 %v19350_v2  ;;  %v19380_v2 = vld [vmem:[#allocation52_spill] sm:$0xff] }
 0x42e   : > { %6546 = vmatpush1.msra.mxu0 %v19351_v20  ;;  %6927 = vmatpush1.msra.mxu1 %v14065_v57  ;;  %v19357_v57 = vand.u32 4294901760, %v19193_v59  ;;  %v19381_v20 = vand.u32 4294901760, %v19380_v2  ;;  %v19412_v2 = vld [vmem:[#allocation104_spill] sm:$0xff] }
 0x42f   : > { %5900 = vmatmul.mubr.f32.gmra.mxu0 %v14676_v32  ;;  %6273 = vmatmul.mubr.f32.gmra.mxu1 %v19352_v47  ;;  %v19359_v32 = vand.u32 4294901760, %v19200_v8  ;;  %v19372_v8 = vld [vmem:[#allocation7_spill] sm:$0xff]  ;;  %v19382_v47 = vld [vmem:[#allocation25_spill] sm:$0xff] }
 0x430   : > { %5905 = vmatprep.mubr.f32.mxu0 %v19089_v44  ;;  %6278 = vmatprep.mubr.f32.mxu1 %v19089_v44  ;;  %v19373_v34 = vand.u32 4294901760, %v19372_v8  ;;  %v19404_v8 = vld [vmem:[#allocation57_spill] sm:$0xff] }
 0x431   : > { %6550 = vmatprep.subr.mxu0 %v19353_v52  ;;  %6929 = vmatprep.subr.mxu1 %v14078_v0  ;;  %v19358_v0 = vand.u32 4294901760, %v14769_v27  ;;  %v19383_v52 = vld [vmem:[#allocation95_spill] sm:$0xff] }
 0x432   : > { %6554 = vmatpush1.msra.mxu0 %v19354_v15  ;;  %6931 = vmatpush1.msra.mxu1 %v19176_v39  ;;  %v19365_v39 = vand.u32 4294901760, %v19364_v56  ;;  %v19384_v15 = vand.u32 4294901760, %v19383_v52  ;;  %v19394_v56 = vld [vmem:[#allocation11_spill] sm:$0xff] }
 0x433   : > { %5908 = vmatmul.mubr.f32.gmra.mxu0 %v14716_v25  ;;  %6282 = vmatmul.mubr.f32.gmra.mxu1 %v19355_v6  ;;  %v19361_v25 = vld [vmem:[#allocation81_spill] sm:$0xff]  ;;  %v19385_v6 = vld [vmem:[#allocation96_spill] sm:$0xff]  ;;  %v19415_v52 = vld [vmem:[#allocation35_spill] sm:$0xff] }
 0x434   : > { %5913 = vmatprep.mubr.f32.mxu0 %v19089_v44  ;;  %6287 = vmatprep.mubr.f32.mxu1 %v19089_v44 }
 0x435   : > { %6558 = vmatprep.subr.mxu0 %v19356_v51  ;;  %6933 = vmatprep.subr.mxu1 %v19181_v7  ;;  %v19367_v7 = vld [vmem:[#allocation21_spill] sm:$0xff]  ;;  %v19386_v51 = vld [vmem:[#allocation51_spill] sm:$0xff] }
 0x436   : > { %6562 = vmatpush1.msra.mxu0 %v19357_v57  ;;  %6935 = vmatpush1.msra.mxu1 %v19184_v5  ;;  %v19362_v5 = vld [vmem:[#allocation40_spill] sm:$0xff]  ;;  %v19368_v36 = vand.u32 4294901760, %v19367_v7  ;;  %v19387_v57 = vand.u32 4294901760, %v19386_v51 }
 0x437   : > { %5916 = vmatmul.mubr.f32.gmra.mxu0 %v14720_v30  ;;  %6291 = vmatmul.mubr.f32.gmra.mxu1 %v19358_v0  ;;  %v19363_v30 = vand.u32 4294901760, %v19362_v5  ;;  %v19388_v0 = vand.u32 4294901760, %v19240_v14  ;;  %v19396_v14 = vld [vmem:[#allocation99_spill] sm:$0xff] }
 0x438   : > { %5921 = vmatprep.mubr.f32.mxu0 %v19089_v44  ;;  %6296 = vmatprep.mubr.f32.mxu1 %v19089_v44 }
 0x439   : > { %6566 = vmatprep.subr.mxu0 %v19359_v32  ;;  %6937 = vmatprep.subr.mxu1 %v19192_v28  ;;  %v19369_v28 = vld [vmem:[#allocation92_spill] sm:$0xff]  ;;  %v19389_v32 = vld [vmem:[#allocation9_spill] sm:$0xff] }
 0x43a   : > { %6570 = vmatpush1.msra.mxu0 %v19360_v22  ;;  %6939 = vmatpush1.msra.mxu1 %v19361_v25  ;;  %v19390_v22 = vand.u32 4294901760, %v19242_v4  ;;  %v19391_v25 = vld [vmem:[#allocation98_spill] sm:$0xff]  ;;  %v19399_v4 = vld [vmem:[#allocation100_spill] sm:$0xff] }
 0x43b   : > { %5924 = vmatmul.mubr.f32.gmra.mxu0 %v14752_v33  ;;  %6300 = vmatmul.mubr.f32.gmra.mxu1 %v19363_v30  ;;  %v19370_v33 = vld [vmem:[#allocation46_spill] sm:$0xff] }
 0x43c   : > { %5929 = vmatprep.mubr.f32.mxu0 %v19089_v44  ;;  %6305 = vmatprep.mubr.f32.mxu1 %v19089_v44  ;;  %v19371_v59 = vand.u32 4294901760, %v19370_v33 }
 0x43d   : > { %6574 = vmatprep.subr.mxu0 %v19365_v39  ;;  %6941 = vmatprep.subr.mxu1 %v19366_v3  ;;  %v19395_v39 = vand.u32 4294901760, %v19394_v56  ;;  %v19397_v3 = vld [vmem:[#allocation55_spill] sm:$0xff]  ;;  %v19427_v56 = vld [vmem:[#allocation109_spill] sm:$0xff] }
 0x43e   : > { %6578 = vmatpush1.msra.mxu0 %v19368_v36  ;;  %6943 = vmatpush1.msra.mxu1 %v19369_v28  ;;  %v19398_v7 = vand.u32 4294901760, %v19397_v3  ;;  %v19400_v36 = vld [vmem:[#allocation102_spill] sm:$0xff] }
 0x43f   : > { %5932 = vmatmul.mubr.f32.gmra.mxu0 %v14769_v27  ;;  %6309 = vmatmul.mubr.f32.gmra.mxu1 %v19371_v59  ;;  %v19378_v27 = vld [vmem:[#allocation62_spill] sm:$0xff]  ;;  %v19401_v28 = vand.u32 4294901760, %v19400_v36 }
 0x440   : > { %5937 = vmatprep.mubr.f32.mxu0 %v19089_v44  ;;  %6314 = vmatprep.mubr.f32.mxu1 %v19089_v44  ;;  %v19379_v46 = vand.u32 4294901760, %v19378_v27 }
 0x441   : > { %6582 = vmatprep.subr.mxu0 %v19373_v34  ;;  %6945 = vmatprep.subr.mxu1 %v19374_v63  ;;  %v19405_v34 = vld [vmem:[#allocation34_spill] sm:$0xff] }
 0x442   : > { %6586 = vmatpush1.msra.mxu0 %v19376_v1  ;;  %6947 = vmatpush1.msra.mxu1 %v19377_v21  ;;  %v19406_v63 = vand.u32 4294901760, %v19405_v34  ;;  %v19408_v1 = vld [vmem:[#allocation77_spill] sm:$0xff]  ;;  %v19438_v34 = vand.u32 4294901760, %v15032_v23 }
 0x443   : > { %5940 = vmatmul.mubr.f32.gmra.mxu0 %v19362_v5  ;;  %6318 = vmatmul.mubr.f32.gmra.mxu1 %v19379_v46  ;;  %v19392_v5 = vld [vmem:[#allocation5_spill] sm:$0xff]  ;;  %v19409_v21 = vand.u32 4294901760, %v19408_v1 }
 0x444   : > { %5945 = vmatprep.mubr.f32.mxu0 %v19089_v44  ;;  %6323 = vmatprep.mubr.f32.mxu1 %v19089_v44  ;;  %v19393_v30 = vand.u32 4294901760, %v19392_v5 }
 0x445   : > { %6590 = vmatprep.subr.mxu0 %v19381_v20  ;;  %6949 = vmatprep.subr.mxu1 %v19382_v47  ;;  %v19413_v20 = vld [vmem:[#allocation22_spill] sm:$0xff] }
 0x446   : > { %6594 = vmatpush1.msra.mxu0 %v19384_v15  ;;  %6951 = vmatpush1.msra.mxu1 %v19385_v6  ;;  %v19414_v47 = vand.u32 4294901760, %v19413_v20  ;;  %v19416_v15 = vld [vmem:[#allocation79_spill] sm:$0xff] }
 0x447   : > { %5948 = vmatmul.mubr.f32.gmra.mxu0 %v19370_v33  ;;  %6327 = vmatmul.mubr.f32.gmra.mxu1 %v19387_v57  ;;  %v19402_v33 = vld [vmem:[#allocation15_spill] sm:$0xff]  ;;  %v19417_v6 = vand.u32 4294901760, %v19416_v15 }
 0x448   : > { %5953 = vmatprep.mubr.f32.mxu0 %v19089_v44  ;;  %6332 = vmatprep.mubr.f32.mxu1 %v19089_v44  ;;  %v19403_v59 = vand.u32 4294901760, %v19402_v33  ;;  %v19419_v57 = vld [vmem:[#allocation63_spill] sm:$0xff] }
 0x449   : > { %6598 = vmatprep.subr.mxu0 %v19388_v0  ;;  %6953 = vmatprep.subr.mxu1 %v19389_v32  ;;  %v19420_v0 = vand.u32 4294901760, %v19282_v45  ;;  %v19421_v32 = vld [vmem:[#allocation107_spill] sm:$0xff]  ;;  %v19429_v45 = vld [vmem:[#allocation41_spill] sm:$0xff] }
 0x44a   : > { %6602 = vmatpush1.msra.mxu0 %v19390_v22  ;;  %6955 = vmatpush1.msra.mxu1 %v19391_v25  ;;  %v19422_v22 = vld [vmem:[#allocation43_spill] sm:$0xff] }
 0x44b   : > { %5956 = vmatmul.mubr.f32.gmra.mxu0 %v19378_v27  ;;  %6336 = vmatmul.mubr.f32.gmra.mxu1 %v19393_v30  ;;  %v19410_v27 = vld [vmem:[#allocation103_spill] sm:$0xff]  ;;  %v19423_v25 = vand.u32 4294901760, %v19422_v22 }
 0x44c   : > { %5961 = vmatprep.mubr.f32.mxu0 %v19089_v44  ;;  %6341 = vmatprep.mubr.f32.mxu1 %v19089_v44  ;;  %v19411_v46 = vand.u32 4294901760, %v19410_v27 }
 0x44d   : > { %6606 = vmatprep.subr.mxu0 %v19395_v39  ;;  %6957 = vmatprep.subr.mxu1 %v19396_v14  ;;  %v19428_v39 = vand.u32 4294901760, %v19427_v56  ;;  %v19430_v14 = vld [vmem:[#allocation8_spill] sm:$0xff] }
 0x44e   : > { %6610 = vmatpush1.msra.mxu0 %v19398_v7  ;;  %6959 = vmatpush1.msra.mxu1 %v19399_v4  ;;  %v19431_v3 = vand.u32 4294901760, %v19430_v14  ;;  %v19432_v7 = vld [vmem:[#allocation110_spill] sm:$0xff] }
 0x44f   : > { %5964 = vmatmul.mubr.f32.gmra.mxu0 %v19386_v51  ;;  %6345 = vmatmul.mubr.f32.gmra.mxu1 %v19401_v28  ;;  %v19418_v51 = vand.u32 4294901760, %v19280_v55  ;;  %v19426_v55 = vld [vmem:[#allocation108_spill] sm:$0xff]  ;;  %v19433_v4 = vand.u32 4294901760, %v19432_v7 }
 0x450   : > { %5969 = vmatprep.mubr.f32.mxu0 %v19089_v44  ;;  %6350 = vmatprep.mubr.f32.mxu1 %v19089_v44  ;;  %v19435_v28 = vld [vmem:[#allocation112_spill] sm:$0xff] }
 0x451   : > { %6614 = vmatprep.subr.mxu0 %v19403_v59  ;;  %6961 = vmatprep.subr.mxu1 %v19404_v8  ;;  %v19436_v33 = vand.u32 4294901760, %v19435_v28  ;;  %v19437_v59 = vld [vmem:[#allocation111_spill] sm:$0xff] }
 0x452   : > { %6618 = vmatpush1.msra.mxu0 %v19406_v63  ;;  %6963 = vmatpush1.msra.mxu1 %v19407_v11  ;;  %v19439_v11 = vld [vmem:[#allocation115_spill] sm:$0xff] }
 0x453   : > { %5972 = vmatmul.mubr.f32.gmra.mxu0 %v19392_v5  ;;  %6354 = vmatmul.mubr.f32.gmra.mxu1 %v19409_v21  ;;  %v19424_v5 = vld [vmem:[#allocation24_spill] sm:$0xff]  ;;  %v19441_v21 = vld [vmem:[#allocation47_spill] sm:$0xff] }
 0x454   : > { %5977 = vmatprep.mubr.f32.mxu0 %v19089_v44  ;;  %6359 = vmatprep.mubr.f32.mxu1 %v19089_v44  ;;  %v19425_v30 = vand.u32 4294901760, %v19424_v5  ;;  %v19442_v27 = vand.u32 4294901760, %v19441_v21  ;;  %v19446_v5 = vand.u32 4294901760, %v15095_v19  ;;  %v19449_v21 = vand.u32 4294901760, %v15160_v26 }
 0x455   : > { %6622 = vmatprep.subr.mxu0 %v19411_v46  ;;  %6965 = vmatprep.subr.mxu1 %v19412_v2  ;;  %v19443_v2 = vld [vmem:[#allocation97_spill] sm:$0xff] }
 0x456   : > { %6626 = vmatpush1.msra.mxu0 %v19414_v47  ;;  %6967 = vmatpush1.msra.mxu1 %v19415_v52  ;;  %v19444_v20 = vand.u32 4294901760, %v19443_v2 }
 0x457   : > { %5980 = vmatmul.mubr.f32.gmra.mxu0 %v19400_v36  ;;  %6363 = vmatmul.mubr.f32.gmra.mxu1 %v19417_v6  ;;  %v19434_v36 = vld [vmem:[#allocation36_spill] sm:$0xff]  ;;  %v19445_v6 = vand.u32 4294901760, %v15078_v13 }
 0x458   : > { %5985 = vmatprep.mubr.f32.mxu0 %v19089_v44  ;;  %6368 = vmatprep.mubr.f32.mxu1 %v19089_v44 }
 0x459   : > { %6630 = vmatprep.subr.mxu0 %v19418_v51  ;;  %6969 = vmatprep.subr.mxu1 %v19419_v57 }
 0x45a   : > { %6634 = vmatpush1.msra.mxu0 %v19420_v0  ;;  %6971 = vmatpush1.msra.mxu1 %v19421_v32 }
 0x45b   : > { %5988 = vmatmul.mubr.f32.gmra.mxu0 %v19408_v1  ;;  %6372 = vmatmul.mubr.f32.gmra.mxu1 %v19423_v25  ;;  %v19440_v1 = vand.u32 4294901760, %v19439_v11 }
 0x45c   : > { %5993 = vmatprep.mubr.f32.mxu0 %v19089_v44  ;;  %6377 = vmatprep.mubr.f32.mxu1 %v19089_v44 }
 0x45d   : > { %6638 = vmatprep.subr.mxu0 %v19425_v30  ;;  %6973 = vmatprep.subr.mxu1 %v19426_v55 }
 0x45e   : > { %6642 = vmatpush1.msra.mxu0 %v19428_v39  ;;  %6975 = vmatpush1.msra.mxu1 %v19429_v45 }
 0x45f   : > { %5996 = vmatmul.mubr.f32.gmra.mxu0 %v19416_v15  ;;  %6381 = vmatmul.mubr.f32.gmra.mxu1 %v19431_v3 }
 0x460   : > { %6001 = vmatprep.mubr.f32.mxu0 %v19089_v44  ;;  %6386 = vmatprep.mubr.f32.mxu1 %v19089_v44 }
 0x461   : > { %6646 = vmatprep.subr.mxu0 %v19433_v4  ;;  %6977 = vmatprep.subr.mxu1 %v19434_v36 }
 0x462   : > { %6650 = vmatpush1.msra.mxu0 %v19436_v33  ;;  %6979 = vmatpush1.msra.mxu1 %v19437_v59  ;;  %v19448_v59 = vand.u32 4294901760, %v15136_v16 }
 0x463   : > { %v5539_v8 = vpop.f32.mrf.mxu1  ;;  %6004 = vmatmul.mubr.f32.gmra.mxu0 %v19422_v22  ;;  %6390 = vmatmul.mubr.f32.gmra.mxu1 %v19438_v34 }
 0x464   : > { %6009 = vmatprep.mubr.f32.mxu0 %v19089_v44  ;;  %6395 = vmatprep.mubr.f32.mxu1 %v19089_v44 }
 0x465   : > { %v5541_v63 = vpop.f32.mrf.mxu1  ;;  %6654 = vmatprep.subr.mxu0 %v19440_v1 }
 0x466   : > { %6658 = vmatpush1.msra.mxu0 %v19442_v27 }
 0x467   : > { %v5546_v46 = vpop.f32.mrf.mxu1  ;;  %6012 = vmatmul.mubr.f32.gmra.mxu0 %v19430_v14  ;;  %6399 = vmatmul.mubr.f32.gmra.mxu1 %v19444_v20  ;;  %v19447_v14 = vand.u32 4294901760, %v15121_v18 }
 0x468   : > { %6017 = vmatprep.mubr.f32.mxu0 %v19089_v44  ;;  %6404 = vmatprep.mubr.f32.mxu1 %v19089_v44 }
 0x469   : > { %v5548_v47 = vpop.f32.mrf.mxu1 }
 0x46b   : > { %v4966_v52 = vpop.f32.mrf.mxu0  ;;  %v5553_v15 = vpop.f32.mrf.mxu1  ;;  %6020 = vmatmul.mubr.f32.gmra.mxu0 %v15032_v23  ;;  %6408 = vmatmul.mubr.f32.gmra.mxu1 %v19445_v6 }
 0x46c   : > { %v15512_v51 = vadd.f32 %v5539_v8, %v4966_v52  ;;  %6025 = vmatprep.mubr.f32.mxu0 %v19089_v44  ;;  %6413 = vmatprep.mubr.f32.mxu1 %v19089_v44  ;;  %v19450_v52 = vand.u32 4294901760, %v15175_v10 }
 0x46d   : > { %v4968_v57 = vpop.f32.mrf.mxu0  ;;  %v5555_v0 = vpop.f32.mrf.mxu1 }
 0x46e   : > { %v15516_v32 = vadd.f32 %v5541_v63, %v4968_v57 }
 0x46f   : > { %v4977_v22 = vpop.f32.mrf.mxu0  ;;  %v5560_v25 = vpop.f32.mrf.mxu1  ;;  %6028 = vmatmul.mubr.f32.gmra.mxu0 %v19443_v2  ;;  %6417 = vmatmul.mubr.f32.gmra.mxu1 %v19446_v5 }
 0x470   : > { %v15521_v23 = vadd.f32 %v5546_v46, %v4977_v22  ;;  %6033 = vmatprep.mubr.f32.mxu0 %v19089_v44  ;;  %6422 = vmatprep.mubr.f32.mxu1 %v19089_v44 }
 0x471   : > { %v4979_v30 = vpop.f32.mrf.mxu0  ;;  %v5562_v55 = vpop.f32.mrf.mxu1 }
 0x472   : > { %v15525_v56 = vadd.f32 %v5548_v47, %v4979_v30 }
 0x473   : > { %v4988_v39 = vpop.f32.mrf.mxu0  ;;  %v5567_v45 = vpop.f32.mrf.mxu1  ;;  %6036 = vmatmul.mubr.f32.gmra.mxu0 %v15078_v13  ;;  %6426 = vmatmul.mubr.f32.gmra.mxu1 %v19447_v14  ;;  %v19452_v14 = vand.u32 4294901760, %v15214_v38 }
 0x474   : > { %v15530_v3 = vadd.f32 %v5553_v15, %v4988_v39  ;;  %6041 = vmatprep.mubr.f32.mxu0 %v19089_v44  ;;  %6431 = vmatprep.mubr.f32.mxu1 %v19089_v44 }
 0x475   : > { %v4990_v7 = vpop.f32.mrf.mxu0  ;;  %v5569_v4 = vpop.f32.mrf.mxu1 }
 0x476   : > { %v15534_v36 = vadd.f32 %v5555_v0, %v4990_v7 }
 0x477   : > { %v4999_v28 = vpop.f32.mrf.mxu0  ;;  %v5574_v33 = vpop.f32.mrf.mxu1  ;;  %6044 = vmatmul.mubr.f32.gmra.mxu0 %v15095_v19  ;;  %6435 = vmatmul.mubr.f32.gmra.mxu1 %v19448_v59 }
 0x478   : > { %v15539_v13 = vadd.f32 %v5560_v25, %v4999_v28  ;;  %6049 = vmatprep.mubr.f32.mxu0 %v19089_v44  ;;  %6440 = vmatprep.mubr.f32.mxu1 %v19089_v44  ;;  %v19451_v25 = vand.u32 4294901760, %v15199_v50 }
 0x479   : > { %v5001_v8 = vpop.f32.mrf.mxu0  ;;  %v5576_v34 = vpop.f32.mrf.mxu1 }
 0x47a   : > { %v15543_v63 = vadd.f32 %v5562_v55, %v5001_v8  ;;  %v19453_v8 = vand.u32 4294901760, %v15236_v37 }
 0x47b   : > { %v5010_v11 = vpop.f32.mrf.mxu0  ;;  %v5581_v1 = vpop.f32.mrf.mxu1  ;;  %6052 = vmatmul.mubr.f32.gmra.mxu0 %v15121_v18  ;;  %6444 = vmatmul.mubr.f32.gmra.mxu1 %v19449_v21 }
 0x47c   : > { %v15548_v19 = vadd.f32 %v5567_v45, %v5010_v11  ;;  %6057 = vmatprep.mubr.f32.mxu0 %v19089_v44  ;;  %6449 = vmatprep.mubr.f32.mxu1 %v19089_v44 }
 0x47d   : > { %v5012_v27 = vpop.f32.mrf.mxu0  ;;  %v5583_v46 = vpop.f32.mrf.mxu1 }
 0x47e   : > { %v15552_v2 = vadd.f32 %v5569_v4, %v5012_v27 }
 0x47f   : > { %v5021_v20 = vpop.f32.mrf.mxu0  ;;  %v5588_v47 = vpop.f32.mrf.mxu1  ;;  %6060 = vmatmul.mubr.f32.gmra.mxu0 %v15136_v16  ;;  %6453 = vmatmul.mubr.f32.gmra.mxu1 %v19450_v52 }
 0x480   : > { %v15557_v18 = vadd.f32 %v5574_v33, %v5021_v20  ;;  %6065 = vmatprep.mubr.f32.mxu0 %v19089_v44  ;;  %6458 = vmatprep.mubr.f32.mxu1 %v19089_v44 }
 0x481   : > { %v5023_v15 = vpop.f32.mrf.mxu0  ;;  %v5590_v6 = vpop.f32.mrf.mxu1 }
 0x482   : > { %v15561_v57 = vadd.f32 %v5576_v34, %v5023_v15 }
 0x483   : > { %v5032_v0 = vpop.f32.mrf.mxu0  ;;  %v5595_v22 = vpop.f32.mrf.mxu1  ;;  %6068 = vmatmul.mubr.f32.gmra.mxu0 %v15160_v26  ;;  %6462 = vmatmul.mubr.f32.gmra.mxu1 %v19451_v25 }
 0x484   : > { %v15566_v16 = vadd.f32 %v5581_v1, %v5032_v0  ;;  %6073 = vmatprep.mubr.f32.mxu0 %v19089_v44  ;;  %6467 = vmatprep.mubr.f32.mxu1 %v19089_v44  ;;  %v19457_v0 = vand.u32 4294901760, %v15271_v42 }
 0x485   : > { %v5034_v5 = vpop.f32.mrf.mxu0  ;;  %v5597_v30 = vpop.f32.mrf.mxu1 }
 0x486   : > { %v15570_v55 = vadd.f32 %v5583_v46, %v5034_v5  ;;  %v19455_v46 = vand.u32 4294901760, %v15250_v62 }
 0x487   : > { %v5043_v39 = vpop.f32.mrf.mxu0  ;;  %v5602_v45 = vpop.f32.mrf.mxu1  ;;  %6076 = vmatmul.mubr.f32.gmra.mxu0 %v15175_v10  ;;  %6471 = vmatmul.mubr.f32.gmra.mxu1 %v19452_v14 }
 0x488   : > { %v15575_v26 = vadd.f32 %v5588_v47, %v5043_v39  ;;  %6081 = vmatprep.mubr.f32.mxu0 %v19089_v44  ;;  %6476 = vmatprep.mubr.f32.mxu1 %v19089_v44 }
 0x489   : > { %v5045_v7 = vpop.f32.mrf.mxu0  ;;  %v5604_v4 = vpop.f32.mrf.mxu1 }
 0x48a   : > { %v15579_v28 = vadd.f32 %v5590_v6, %v5045_v7 }
 0x48b   : > { %v5054_v33 = vpop.f32.mrf.mxu0  ;;  %v5609_v59 = vpop.f32.mrf.mxu1  ;;  %6084 = vmatmul.mubr.f32.gmra.mxu0 %v15199_v50  ;;  %6480 = vmatmul.mubr.f32.gmra.mxu1 %v19453_v8 }
 0x48c   : > { %v15584_v10 = vadd.f32 %v5595_v22, %v5054_v33  ;;  %6089 = vmatprep.mubr.f32.mxu0 %v19089_v44  ;;  %6485 = vmatprep.mubr.f32.mxu1 %v19089_v44 }
 0x48d   : > { %v5056_v34 = vpop.f32.mrf.mxu0  ;;  %v5611_v11 = vpop.f32.mrf.mxu1 }
 0x48e   : > { %v15588_v1 = vadd.f32 %v5597_v30, %v5056_v34 }
 0x48f   : > { %v5065_v21 = vpop.f32.mrf.mxu0  ;;  %v5616_v27 = vpop.f32.mrf.mxu1  ;;  %6092 = vmatmul.mubr.f32.gmra.mxu0 %v15214_v38  ;;  %6489 = vmatmul.mubr.f32.gmra.mxu1 %v19455_v46 }
 0x490   : > { %19454 = vst [vmem:[#allocation14_spill] sm:$0xff] %v15588_v1  ;;  %v15593_v50 = vadd.f32 %v5602_v45, %v5065_v21  ;;  %6097 = vmatprep.mubr.f32.mxu0 %v19089_v44  ;;  %6494 = vmatprep.mubr.f32.mxu1 %v19089_v44  ;;  %v19459_v45 = vand.u32 4294901760, %v15281_v49 }
 0x491   : > { %v5067_v20 = vpop.f32.mrf.mxu0  ;;  %v5618_v47 = vpop.f32.mrf.mxu1 }
 0x492   : > { %v15597_v52 = vadd.f32 %v5604_v4, %v5067_v20 }
 0x493   : > { %v5076_v15 = vpop.f32.mrf.mxu0  ;;  %v5623_v6 = vpop.f32.mrf.mxu1  ;;  %6100 = vmatmul.mubr.f32.gmra.mxu0 %v15236_v37  ;;  %6498 = vmatmul.mubr.f32.gmra.mxu1 %v19457_v0 }
 0x494   : > { %19456 = vst [vmem:[#allocation66_spill] sm:$0xff] %v15597_v52  ;;  %v15602_v38 = vadd.f32 %v5609_v59, %v5076_v15  ;;  %6105 = vmatprep.mubr.f32.mxu0 %v19089_v44  ;;  %6503 = vmatprep.mubr.f32.mxu1 %v19089_v44 }
 0x495   : > { %v5078_v22 = vpop.f32.mrf.mxu0  ;;  %v5625_v25 = vpop.f32.mrf.mxu1 }
 0x496   : > { %v15606_v5 = vadd.f32 %v5611_v11, %v5078_v22 }
 0x497   : > { %v5087_v30 = vpop.f32.mrf.mxu0  ;;  %v5630_v39 = vpop.f32.mrf.mxu1  ;;  %6108 = vmatmul.mubr.f32.gmra.mxu0 %v15250_v62  ;;  %6507 = vmatmul.mubr.f32.gmra.mxu1 %v19459_v45 }
 0x498   : > { %19458 = vst [vmem:[#allocation83_spill] sm:$0xff] %v15606_v5  ;;  %v15611_v37 = vadd.f32 %v5616_v27, %v5087_v30  ;;  %6113 = vmatprep.mubr.f32.mxu0 %v19089_v44  ;;  %6512 = vmatprep.mubr.f32.mxu1 %v19089_v44 }
 0x499   : > { %v5089_v14 = vpop.f32.mrf.mxu0  ;;  %v5632_v7 = vpop.f32.mrf.mxu1 }
 0x49a   : > { %v15615_v4 = vadd.f32 %v5618_v47, %v5089_v14 }
 0x49b   : > { %v5098_v33 = vpop.f32.mrf.mxu0  ;;  %v5637_v59 = vpop.f32.mrf.mxu1  ;;  %6116 = vmatmul.mubr.f32.gmra.mxu0 %v15271_v42  ;;  %6516 = vmatmul.mubr.f32.gmra.mxu1 %v5292_v54 }
 0x49c   : > { %19460 = vst [vmem:[#allocation70_spill] sm:$0xff] %v15615_v4  ;;  %v15620_v62 = vadd.f32 %v5623_v6, %v5098_v33  ;;  %6121 = vmatprep.mubr.f32.mxu0 %v19089_v44  ;;  %6521 = vmatprep.mubr.f32.mxu1 %v19089_v44  ;;  %v19463_v6 = vld [vmem:[#allocation58_spill] sm:$0xff] }
 0x49d   : > { %v5100_v8 = vpop.f32.mrf.mxu0  ;;  %v5639_v34 = vpop.f32.mrf.mxu1 }
 0x49e   : > { %v15624_v11 = vadd.f32 %v5625_v25, %v5100_v8  ;;  %v19467_v8 = vld [vmem:[#allocation3_spill] sm:$0xff] }
 0x49f   : > { %v5109_v21 = vpop.f32.mrf.mxu0  ;;  %v5644_v27 = vpop.f32.mrf.mxu1  ;;  %6124 = vmatmul.mubr.f32.gmra.mxu0 %v15281_v49  ;;  %6525 = vmatmul.mubr.f32.gmra.mxu1 %v5303_v53 }
 0x4a0   : > { %19461 = vst [vmem:[#allocation65_spill] sm:$0xff] %v15624_v11  ;;  %v15629_v42 = vadd.f32 %v5630_v39, %v5109_v21  ;;  %6129 = vmatprep.mubr.f32.mxu0 %v19089_v44  ;;  %7012 = vmatprep.mubr.f32.mxu1 %v19089_v44  ;;  %v19465_v39 = vld [vmem:[#allocation30_spill] sm:$0xff] }
 0x4a1   : > { %v5111_v54 = vpop.f32.mrf.mxu0  ;;  %v5646_v46 = vpop.f32.mrf.mxu1 }
 0x4a2   : > { %v15633_v20 = vadd.f32 %v5632_v7, %v5111_v54 }
 0x4a3   : > { %v5120_v47 = vpop.f32.mrf.mxu0  ;;  %v5651_v15 = vpop.f32.mrf.mxu1  ;;  %6132 = vmatmul.mubr.f32.gmra.mxu0 %v15302_v48  ;;  %7014 = vmatmul.mubr.f32.vlgmr.msra.gmra.mxu1 %v19463_v6 }
 0x4a4   : > { %19462 = vst [vmem:[#allocation80_spill] sm:$0xff] %v15633_v20  ;;  %v15637_v49 = vadd.f32 %v5637_v59, %v5120_v47  ;;  %6137 = vmatprep.mubr.f32.mxu0 %v19089_v44  ;;  %7019 = vmatprep.mubr.f32.mxu1 %v19089_v44 }
 0x4a5   : > { %v5122_v53 = vpop.f32.mrf.mxu0  ;;  %v5653_v0 = vpop.f32.mrf.mxu1 }
 0x4a6   : > { %v15641_v22 = vadd.f32 %v5639_v34, %v5122_v53 }
 0x4a7   : > { %v5131_v25 = vpop.f32.mrf.mxu0  ;;  %v5658_v30 = vpop.f32.mrf.mxu1  ;;  %6140 = vmatmul.mubr.f32.gmra.mxu0 %v15313_v61  ;;  %7021 = vmatmul.mubr.f32.gmra.mxu1 %v19465_v39 }
 0x4a8   : > { %19464 = vst [vmem:[#allocation31_spill] sm:$0xff] %v15641_v22  ;;  %v15645_v45 = vadd.f32 %v5644_v27, %v5131_v25  ;;  %6691 = vmatprep.mubr.f32.mxu0 %v19089_v44  ;;  %7026 = vmatprep.mubr.f32.mxu1 %v19089_v44 }
 0x4a9   : > { %v5133_v48 = vpop.f32.mrf.mxu0  ;;  %v5660_v14 = vpop.f32.mrf.mxu1 }
 0x4aa   : > { %v15649_v7 = vadd.f32 %v5646_v46, %v5133_v48  ;;  %v19470_v46 = vld [vmem:[#allocation13_spill] sm:$0xff] }
 0x4ab   : > { %v5142_v33 = vpop.f32.mrf.mxu0  ;;  %v5665_v59 = vpop.f32.mrf.mxu1  ;;  %6693 = vmatmul.mubr.f32.vlgmr.msra.gmra.mxu0 %v19463_v6  ;;  %7028 = vmatmul.mubr.f32.gmra.mxu1 %v19467_v8 }
 0x4ac   : > { %19466 = vst [vmem:[#allocation50_spill] sm:$0xff] %v15649_v7  ;;  %v15653_v34 = vadd.f32 %v5651_v15, %v5142_v33  ;;  %6698 = vmatprep.mubr.f32.mxu0 %v19089_v44  ;;  %7033 = vmatprep.mubr.f32.mxu1 %v19089_v44 }
 0x4ad   : > { %v5144_v61 = vpop.f32.mrf.mxu0  ;;  %v5667_v21 = vpop.f32.mrf.mxu1 }
 0x4ae   : > { %19468 = vst [vmem:[#allocation29_spill] sm:$0xff] %v15653_v34  ;;  %v15657_v27 = vadd.f32 %v5653_v0, %v5144_v61  ;;  %v19473_v0 = vld [vmem:[#allocation12_spill] sm:$0xff] }
 0x4af   : > { %v5153_v54 = vpop.f32.mrf.mxu0  ;;  %v5672_v47 = vpop.f32.mrf.mxu1  ;;  %6700 = vmatmul.mubr.f32.gmra.mxu0 %v19465_v39  ;;  %7035 = vmatmul.mubr.f32.gmra.mxu1 %v19470_v46 }
 0x4b0   : > { %19469 = vst [vmem:[#allocation68_spill] sm:$0xff] %v15657_v27  ;;  %v15661_v53 = vadd.f32 %v5658_v30, %v5153_v54  ;;  %6705 = vmatprep.mubr.f32.mxu0 %v19089_v44  ;;  %7040 = vmatprep.mubr.f32.mxu1 %v19089_v44 }
 0x4b1   : > { %v5155_v15 = vpop.f32.mrf.mxu0  ;;  %v5674_v6 = vpop.f32.mrf.mxu1 }
 0x4b2   : > { %19471 = vst [vmem:[#allocation23_spill] sm:$0xff] %v15661_v53  ;;  %v15665_v25 = vadd.f32 %v5660_v14, %v5155_v15  ;;  %v19476_v14 = vld [vmem:[#allocation19_spill] sm:$0xff] }
 0x4b3   : > { %v5164_v48 = vpop.f32.mrf.mxu0  ;;  %v5679_v33 = vpop.f32.mrf.mxu1  ;;  %6707 = vmatmul.mubr.f32.gmra.mxu0 %v19467_v8  ;;  %7042 = vmatmul.mubr.f32.gmra.mxu1 %v19473_v0 }
 0x4b4   : > { %19472 = vst [vmem:[#allocation38_spill] sm:$0xff] %v15665_v25  ;;  %v15669_v61 = vadd.f32 %v5665_v59, %v5164_v48  ;;  %6712 = vmatprep.mubr.f32.mxu0 %v19089_v44  ;;  %7047 = vmatprep.mubr.f32.mxu1 %v19089_v44 }
 0x4b5   : > { %v5166_v30 = vpop.f32.mrf.mxu0  ;;  %v5681_v39 = vpop.f32.mrf.mxu1 }
 0x4b6   : > { %19474 = vst [vmem:[#allocation33_spill] sm:$0xff] %v15669_v61  ;;  %v15673_v54 = vadd.f32 %v5667_v21, %v5166_v30  ;;  %v19479_v21 = vld [vmem:[#allocation71_spill] sm:$0xff] }
 0x4b7   : > { %v5175_v31 = vpop.f32.mrf.mxu0  ;;  %v5686_v29 = vpop.f32.mrf.mxu1  ;;  %6714 = vmatmul.mubr.f32.gmra.mxu0 %v19470_v46  ;;  %7049 = vmatmul.mubr.f32.gmra.mxu1 %v19476_v14 }
 0x4b8   : > { %19475 = vst [vmem:[#allocation39_spill] sm:$0xff] %v15673_v54  ;;  %v15677_v15 = vadd.f32 %v5672_v47, %v5175_v31  ;;  %6719 = vmatprep.mubr.f32.mxu0 %v19089_v44  ;;  %7054 = vmatprep.mubr.f32.mxu1 %v19089_v44 }
 0x4b9   : > { %v5177_v59 = vpop.f32.mrf.mxu0  ;;  %v5688_v8 = vpop.f32.mrf.mxu1 }
 0x4ba   : > { %19477 = vst [vmem:[#allocation81_spill] sm:$0xff] %v15677_v15  ;;  %v15681_v48 = vadd.f32 %v5674_v6, %v5177_v59  ;;  %v19482_v6 = vld [vmem:[#allocation37_spill] sm:$0xff]  ;;  %v19535_v15 = vld [vmem:[#allocation74_spill] sm:$0xff] }
 0x4bb   : > { %v5186_v43 = vpop.f32.mrf.mxu0  ;;  %v5693_v25 = vpop.f32.mrf.mxu1  ;;  %6721 = vmatmul.mubr.f32.gmra.mxu0 %v19473_v0  ;;  %7056 = vmatmul.mubr.f32.gmra.mxu1 %v19479_v21 }
 0x4bc   : > { %19478 = vst [vmem:[#allocation40_spill] sm:$0xff] %v15681_v48  ;;  %v15685_v30 = vadd.f32 %v5679_v33, %v5186_v43  ;;  %6726 = vmatprep.mubr.f32.mxu0 %v19089_v44  ;;  %7061 = vmatprep.mubr.f32.mxu1 %v19089_v44 }
 0x4bd   : > { %v5188_v31 = vpop.f32.mrf.mxu0  ;;  %v5695_v47 = vpop.f32.mrf.mxu1 }
 0x4be   : > { %19480 = vst [vmem:[#allocation28_spill] sm:$0xff] %v15685_v30  ;;  %v15689_v46 = vadd.f32 %v5681_v39, %v5188_v31  ;;  %v9575_v39 = vld [vmem:[%s17636_s3 + $0xf8] sm:$0xff] }
 0x4bf   : > { %v5197_v54 = vpop.f32.mrf.mxu0  ;;  %v5700_v27 = vpop.f32.mrf.mxu1  ;;  %6728 = vmatmul.mubr.f32.gmra.mxu0 %v19476_v14  ;;  %7063 = vmatmul.mubr.f32.gmra.mxu1 %v19482_v6  ;;  %v19485_v14 = vld [vmem:[#allocation56_spill] sm:$0xff] }
 0x4c0   : > { %19481 = vst [vmem:[#allocation91_spill] sm:$0xff] %v15689_v46  ;;  %v15693_v59 = vadd.f32 %v5686_v29, %v5197_v54  ;;  %6733 = vmatprep.mubr.f32.mxu0 %v19089_v44  ;;  %7068 = vmatprep.mubr.f32.mxu1 %v19089_v44  ;;  %v15704_v29 = vand.u32 4294901760, %v9575_v39 }
 0x4c1   : > { %v5199_v43 = vpop.f32.mrf.mxu0  ;;  %v5702_v33 = vpop.f32.mrf.mxu1 }
 0x4c2   : > { %19483 = vst [vmem:[#allocation21_spill] sm:$0xff] %v15693_v59  ;;  %v15697_v0 = vadd.f32 %v5688_v8, %v5199_v43  ;;  %10634 = vmatprep.subr.mxu0 %v15704_v29 }
 0x4c3   : > { %v5208_v31 = vpop.f32.mrf.mxu0  ;;  %v5707_v46 = vpop.f32.mrf.mxu1  ;;  %6735 = vmatmul.mubr.f32.gmra.mxu0 %v19479_v21  ;;  %7070 = vmatmul.mubr.f32.gmra.mxu1 %v19485_v14 }
 0x4c4   : > { %19484 = vst [vmem:[#allocation92_spill] sm:$0xff] %v15697_v0  ;;  %v15706_v54 = vadd.f32 %v5693_v25, %v5208_v31  ;;  %6740 = vmatprep.mubr.f32.mxu0 %v19089_v44  ;;  %7075 = vmatprep.mubr.f32.mxu1 %v19089_v44  ;;  %v15712_v0 = vsub.f32 %v9575_v39, %v15704_v29  ;;  %v19489_v25 = vld [vmem:[#allocation61_spill] sm:$0xff] }
 0x4c5   : > { %v5210_v8 = vpop.f32.mrf.mxu0  ;;  %v5709_v43 = vpop.f32.mrf.mxu1  ;;  %10635 = vmatpush3.msra.mxu0 %v15704_v29 }
 0x4c6   : > { %19486 = vst [vmem:[#allocation46_spill] sm:$0xff] %v15706_v54  ;;  %19487 = vst [vmem:[#allocation7_spill] sm:$0xff] %v15712_v0  ;;  %v15714_v48 = vadd.f32 %v5695_v47, %v5210_v8  ;;  %v15720_v31 = vand.u32 4294901760, %v15712_v0 }
 0x4c7   : > { %v5219_v21 = vpop.f32.mrf.mxu0  ;;  %v5714_v7 = vpop.f32.mrf.mxu1  ;;  %6742 = vmatmul.mubr.f32.gmra.mxu0 %v19482_v6  ;;  %7077 = vmatmul.mubr.f32.gmra.mxu1 %v19489_v25  ;;  %v9574_v6 = vld [vmem:[%s17636_s3 + $0xf0] sm:$0xff] }
 0x4c8   : > { %19488 = vst [vmem:[#allocation93_spill] sm:$0xff] %v15714_v48  ;;  %19490 = vst [vmem:[#allocation6_spill] sm:$0xff] %v15720_v31  ;;  %v15722_v22 = vadd.f32 %v5700_v27, %v5219_v21  ;;  %6747 = vmatprep.mubr.f32.mxu0 %v19089_v44  ;;  %7082 = vmatprep.mubr.f32.mxu1 %v19089_v44  ;;  %v7829_v8 = vsub.f32 %v15712_v0, %v15720_v31  ;;  %v19493_v27 = vld [vmem:[#allocation75_spill] sm:$0xff]  ;;  %v15735_v4 = vand.u32 4294901760, %v9574_v6 }
 0x4c9   : > { %v5221_v39 = vpop.f32.mrf.mxu0  ;;  %v5716_v47 = vpop.f32.mrf.mxu1 }
 0x4ca   : > { %19491 = vst [vmem:[#allocation94_spill] sm:$0xff] %v15722_v22  ;;  %v15728_v48 = vadd.f32 %v5702_v33, %v5221_v39  ;;  %v7830_v21 = vand.u32 4294901760, %v7829_v8  ;;  %19494 = vst [vmem:[#allocation52_spill] sm:$0xff] %v15735_v4  ;;  %10636 = vmatprep.subr.mxu0 %v15735_v4  ;;  %v15743_v31 = vsub.f32 %v9574_v6, %v15735_v4  ;;  %v9568_v22 = vld [vmem:[%s17636_s3 + $0xc0] sm:$0xff] }
 0x4cb   : > { %v5230_v20 = vpop.f32.mrf.mxu0  ;;  %v5721_v11 = vpop.f32.mrf.mxu1  ;;  %6749 = vmatmul.mubr.f32.gmra.mxu0 %v19485_v14  ;;  %7084 = vmatmul.mubr.f32.gmra.mxu1 %v19493_v27 }
 0x4cc   : > { %19492 = vst [vmem:[#allocation62_spill] sm:$0xff] %v15728_v48  ;;  %v15737_v5 = vadd.f32 %v5707_v46, %v5230_v20  ;;  %6754 = vmatprep.mubr.f32.mxu0 %v19089_v44  ;;  %7089 = vmatprep.mubr.f32.mxu1 %v19089_v44  ;;  %19496 = vst [vmem:[#allocation95_spill] sm:$0xff] %v15743_v31  ;;  %v19498_v46 = vld [vmem:[#allocation90_spill] sm:$0xff]  ;;  %v15751_v48 = vand.u32 4294901760, %v15743_v31 }
 0x4cd   : > { %v5232_v33 = vpop.f32.mrf.mxu0  ;;  %v5723_v39 = vpop.f32.mrf.mxu1  ;;  %10714 = vmatprep.subr.mxu1 %v7830_v21  ;;  %10637 = vmatpush3.msra.mxu0 %v15735_v4 }
 0x4ce   : > { %19495 = vst [vmem:[#allocation25_spill] sm:$0xff] %v15737_v5  ;;  %v15745_v14 = vadd.f32 %v5709_v43, %v5232_v33  ;;  %10715 = vmatpush3.msra.mxu1 %v7830_v21  ;;  %19499 = vst [vmem:[#allocation51_spill] sm:$0xff] %v15751_v48  ;;  %v7836_v21 = vsub.f32 %v15743_v31, %v15751_v48 }
 0x4cf   : > { %v5241_v8 = vpop.f32.mrf.mxu0  ;;  %v5728_v20 = vpop.f32.mrf.mxu1  ;;  %6756 = vmatmul.mubr.f32.gmra.mxu0 %v19489_v25  ;;  %7091 = vmatmul.mubr.f32.gmra.mxu1 %v19498_v46  ;;  %v9573_v25 = vld [vmem:[%s17636_s3 + $0xe8] sm:$0xff] }
 0x4d0   : > { %19497 = vst [vmem:[#allocation96_spill] sm:$0xff] %v15745_v14  ;;  %v15753_v52 = vadd.f32 %v5714_v7, %v5241_v8  ;;  %6761 = vmatprep.mubr.f32.mxu0 %v19089_v44  ;;  %7096 = vmatprep.mubr.f32.mxu1 %v19089_v44  ;;  %v19502_v7 = vld [vmem:[#allocation101_spill] sm:$0xff]  ;;  %v7837_v8 = vand.u32 4294901760, %v7836_v21  ;;  %v15766_v1 = vand.u32 4294901760, %v9573_v25 }
 0x4d1   : > { %v5243_v43 = vpop.f32.mrf.mxu0  ;;  %v5730_v6 = vpop.f32.mrf.mxu1 }
 0x4d2   : > { %19500 = vst [vmem:[#allocation9_spill] sm:$0xff] %v15753_v52  ;;  %v15759_v33 = vadd.f32 %v5716_v47, %v5243_v43  ;;  %19503 = vst [vmem:[#allocation5_spill] sm:$0xff] %v15766_v1  ;;  %10716 = vmatprep.subr.mxu1 %v7837_v8  ;;  %10638 = vmatprep.subr.mxu0 %v15766_v1  ;;  %v15774_v48 = vsub.f32 %v9573_v25, %v15766_v1 }
 0x4d3   : > { %v5252_v14 = vpop.f32.mrf.mxu0  ;;  %v5735_v4 = vpop.f32.mrf.mxu1  ;;  %6763 = vmatmul.mubr.f32.gmra.mxu0 %v19493_v27  ;;  %7098 = vmatmul.mubr.f32.gmra.mxu1 %v19502_v7 }
 0x4d4   : > { %19501 = vst [vmem:[#allocation98_spill] sm:$0xff] %v15759_v33  ;;  %v15768_v52 = vadd.f32 %v5721_v11, %v5252_v14  ;;  %6768 = vmatprep.mubr.f32.mxu0 %v19089_v44  ;;  %7103 = vmatprep.mubr.f32.mxu1 %v19089_v44  ;;  %19505 = vst [vmem:[#allocation99_spill] sm:$0xff] %v15774_v48  ;;  %v19507_v14 = vld [vmem:[#allocation89_spill] sm:$0xff]  ;;  %v15782_v33 = vand.u32 4294901760, %v15774_v48 }
 0x4d5   : > { %v5254_v47 = vpop.f32.mrf.mxu0  ;;  %v5737_v43 = vpop.f32.mrf.mxu1  ;;  %10717 = vmatpush3.msra.mxu1 %v7837_v8  ;;  %10639 = vmatpush3.msra.mxu0 %v15766_v1 }
 0x4d6   : > { %19504 = vst [vmem:[#allocation11_spill] sm:$0xff] %v15768_v52  ;;  %v15776_v27 = vadd.f32 %v5723_v39, %v5254_v47  ;;  %19508 = vst [vmem:[#allocation100_spill] sm:$0xff] %v15782_v33  ;;  %v7843_v8 = vsub.f32 %v15774_v48, %v15782_v33 }
 0x4d7   : > { %v5263_v21 = vpop.f32.mrf.mxu0  ;;  %v5742_v11 = vpop.f32.mrf.mxu1  ;;  %6770 = vmatmul.mubr.f32.gmra.mxu0 %v19498_v46  ;;  %7105 = vmatmul.mubr.f32.gmra.mxu1 %v19507_v14  ;;  %v9572_v46 = vld [vmem:[%s17636_s3 + $0xe0] sm:$0xff] }
 0x4d8   : > { %19506 = vst [vmem:[#allocation55_spill] sm:$0xff] %v15776_v27  ;;  %v15784_v31 = vadd.f32 %v5728_v20, %v5263_v21  ;;  %6775 = vmatprep.mubr.f32.mxu0 %v19089_v44  ;;  %7110 = vmatprep.mubr.f32.mxu1 %v19089_v44  ;;  %v19511_v20 = vld [vmem:[#allocation49_spill] sm:$0xff]  ;;  %v7844_v21 = vand.u32 4294901760, %v7843_v8 }
 0x4d9   : > { %v5265_v39 = vpop.f32.mrf.mxu0  ;;  %v5744_v25 = vpop.f32.mrf.mxu1 }
 0x4da   : > { %19509 = vst [vmem:[#allocation102_spill] sm:$0xff] %v15784_v31  ;;  %v15790_v47 = vadd.f32 %v5730_v6, %v5265_v39  ;;  %v15797_v31 = vand.u32 4294901760, %v9572_v46  ;;  %v9571_v6 = vld [vmem:[%s17636_s3 + $0xd8] sm:$0xff]  ;;  %10718 = vmatprep.subr.mxu1 %v7844_v21 }
 0x4db   : > { %v5274_v27 = vpop.f32.mrf.mxu0  ;;  %v5749_v1 = vpop.f32.mrf.mxu1  ;;  %6777 = vmatmul.mubr.f32.gmra.mxu0 %v19502_v7  ;;  %7112 = vmatmul.mubr.f32.gmra.mxu1 %v19511_v20  ;;  %v15810_v8 = vand.u32 4294901760, %v9571_v6 }
 0x4dc   : > { %19510 = vst [vmem:[#allocation15_spill] sm:$0xff] %v15790_v47  ;;  %19512 = vst [vmem:[#allocation57_spill] sm:$0xff] %v15797_v31  ;;  %v15799_v52 = vadd.f32 %v5735_v4, %v5274_v27  ;;  %6782 = vmatprep.mubr.f32.mxu0 %v19089_v44  ;;  %7117 = vmatprep.mubr.f32.mxu1 %v19089_v44  ;;  %v15808_v7 = vsub.f32 %v9572_v46, %v15797_v31  ;;  %v9570_v27 = vld [vmem:[%s17636_s3 + $0xd0] sm:$0xff] }
 0x4dd   : > { %v5276_v39 = vpop.f32.mrf.mxu0  ;;  %v5751_v33 = vpop.f32.mrf.mxu1  ;;  %10640 = vmatprep.subr.mxu0 %v15797_v31  ;;  %19515 = vst [vmem:[#allocation77_spill] sm:$0xff] %v15810_v8  ;;  %10719 = vmatpush3.msra.mxu1 %v7844_v21  ;;  %v15824_v5 = vsub.f32 %v9571_v6, %v15810_v8 }
 0x4de   : > { %19513 = vst [vmem:[#allocation34_spill] sm:$0xff] %v15799_v52  ;;  %19514 = vst [vmem:[#allocation16_spill] sm:$0xff] %v15808_v7  ;;  %v15812_v4 = vadd.f32 %v5737_v43, %v5276_v39  ;;  %10641 = vmatpush3.msra.mxu0 %v15797_v31  ;;  %v19517_v52 = vld [vmem:[#allocation69_spill] sm:$0xff]  ;;  %v15821_v46 = vand.u32 4294901760, %v15808_v7  ;;  %v15826_v43 = vand.u32 4294901760, %v9570_v27 }
 0x4df   : > { %v5285_v47 = vpop.f32.mrf.mxu0  ;;  %v5756_v48 = vpop.f32.mrf.mxu1  ;;  %6784 = vmatmul.mubr.f32.gmra.mxu0 %v19507_v14  ;;  %7119 = vmatmul.mubr.f32.gmra.mxu1 %v19517_v52  ;;  %19519 = vst [vmem:[#allocation22_spill] sm:$0xff] %v15824_v5  ;;  %v9569_v14 = vld [vmem:[%s17636_s3 + $0xc8] sm:$0xff]  ;;  %v15839_v6 = vand.u32 4294901760, %v15824_v5 }
 0x4e0   : > { %19516 = vst [vmem:[#allocation103_spill] sm:$0xff] %v15812_v4  ;;  %19518 = vst [vmem:[#allocation104_spill] sm:$0xff] %v15821_v46  ;;  %v15828_v21 = vadd.f32 %v5742_v11, %v5285_v47  ;;  %6789 = vmatprep.mubr.f32.mxu0 %v19089_v44  ;;  %7124 = vmatprep.mubr.f32.mxu1 %v19089_v44  ;;  %v7850_v31 = vsub.f32 %v15808_v7, %v15821_v46  ;;  %v15844_v47 = vand.u32 4294901760, %v9569_v14  ;;  %v19526_v7 = vld [vmem:[#allocation114_spill] sm:$0xff] }
 0x4e1   : > { %19520 = vst [vmem:[#allocation35_spill] sm:$0xff] %v15826_v43  ;;  %v5287_v39 = vpop.f32.mrf.mxu0  ;;  %v5758_v4 = vpop.f32.mrf.mxu1  ;;  %10642 = vmatprep.subr.mxu0 %v15810_v8  ;;  %19522 = vst [vmem:[#allocation63_spill] sm:$0xff] %v15839_v6  ;;  %v15842_v11 = vsub.f32 %v9570_v27, %v15826_v43  ;;  %v7857_v27 = vsub.f32 %v15824_v5, %v15839_v6 }
 0x4e2   : > { %19521 = vst [vmem:[#allocation79_spill] sm:$0xff] %v15828_v21  ;;  %19524 = vst [vmem:[#allocation43_spill] sm:$0xff] %v15844_v47  ;;  %v15846_v21 = vadd.f32 %v5744_v25, %v5287_v39  ;;  %10643 = vmatpush3.msra.mxu0 %v15810_v8  ;;  %v7851_v59 = vand.u32 4294901760, %v7850_v31  ;;  %v15862_v39 = vsub.f32 %v9569_v14, %v15844_v47  ;;  %v15868_v8 = vand.u32 4294901760, %v9568_v22  ;;  %v9567_v31 = vld [vmem:[%s17636_s3 + $0xb8] sm:$0xff] }
 0x4e3   : > { %19523 = vst [vmem:[#allocation107_spill] sm:$0xff] %v15842_v11  ;;  %v5296_v54 = vpop.f32.mrf.mxu0  ;;  %v15852_v46 = vpop.f32.mrf.mxu1  ;;  %6791 = vmatmul.mubr.f32.gmra.mxu0 %v19511_v20  ;;  %7126 = vmatmul.mubr.f32.gmra.mxu1 %v19526_v7  ;;  %v15859_v25 = vand.u32 4294901760, %v15842_v11  ;;  %v7858_v5 = vand.u32 4294901760, %v7857_v27  ;;  %v9566_v27 = vld [vmem:[%s17636_s3 + $0xb0] sm:$0xff] }
 0x4e4   : > { %19525 = vst [vmem:[#allocation24_spill] sm:$0xff] %v15846_v21  ;;  %19528 = vst [vmem:[#allocation109_spill] sm:$0xff] %v15862_v39  ;;  %v15864_v21 = vadd.f32 %v5749_v1, %v5296_v54  ;;  %6796 = vmatprep.mubr.f32.mxu0 %v19089_v44  ;;  %7131 = vmatprep.mubr.f32.mxu1 %v19089_v44  ;;  %v15877_v1 = vand.u32 4294901760, %v15862_v39  ;;  %v15879_v54 = vand.u32 4294901760, %v9567_v31 }
 0x4e5   : > { %19527 = vst [vmem:[#allocation108_spill] sm:$0xff] %v15859_v25  ;;  %19530 = vst [vmem:[#allocation8_spill] sm:$0xff] %v15868_v8  ;;  %v5298_v20 = vpop.f32.mrf.mxu0  ;;  %v6249_v6 = vpop.f32.mrf.mxu1  ;;  %10720 = vmatprep.subr.mxu1 %v7851_v59  ;;  %v7864_v14 = vsub.f32 %v15842_v11, %v15859_v25  ;;  %10644 = vmatprep.subr.mxu0 %v15826_v43  ;;  %v15885_v30 = vsub.f32 %v9568_v22, %v15868_v8 }
 0x4e6   : > { %19529 = vst [vmem:[#allocation41_spill] sm:$0xff] %v15864_v21  ;;  %19531 = vst [vmem:[#allocation110_spill] sm:$0xff] %v15877_v1  ;;  %v15881_v21 = vadd.f32 %v5751_v33, %v5298_v20  ;;  %10721 = vmatpush3.msra.mxu1 %v7851_v59  ;;  %10645 = vmatpush3.msra.mxu0 %v15826_v43  ;;  %v7871_v22 = vsub.f32 %v15862_v39, %v15877_v1  ;;  %v15904_v43 = vand.u32 4294901760, %v9566_v27  ;;  %v19541_v39 = vld [vmem:[#allocation17_spill] sm:$0xff] }
 0x4e7   : > { %19532 = vst [vmem:[#allocation36_spill] sm:$0xff] %v15879_v54  ;;  %19534 = vst [vmem:[#allocation111_spill] sm:$0xff] %v15885_v30  ;;  %v5307_v25 = vpop.f32.mrf.mxu0  ;;  %v6256_v11 = vpop.f32.mrf.mxu1  ;;  %6798 = vmatmul.mubr.f32.gmra.mxu0 %v19517_v52  ;;  %7133 = vmatmul.mubr.f32.gmra.mxu1 %v19535_v15  ;;  %v7865_v20 = vand.u32 4294901760, %v7864_v14  ;;  %v15902_v52 = vsub.f32 %v9567_v31, %v15879_v54 }
 0x4e8   : > { %19533 = vst [vmem:[#allocation112_spill] sm:$0xff] %v15881_v21  ;;  %v15892_v61 = vadd.f32 %v5756_v48, %v5307_v25  ;;  %6803 = vmatprep.mubr.f32.mxu0 %v19089_v44  ;;  %7138 = vmatprep.mubr.f32.mxu1 %v19089_v44  ;;  %v15899_v21 = vand.u32 4294901760, %v15885_v30  ;;  %19539 = vst [vmem:[#allocation58_spill] sm:$0xff] %v15904_v43  ;;  %v9565_v25 = vld [vmem:[%s17636_s3 + $0xa8] sm:$0xff] }
 0x4e9   : > { %v5309_v59 = vpop.f32.mrf.mxu0  ;;  %v6258_v33 = vpop.f32.mrf.mxu1  ;;  %10722 = vmatprep.subr.mxu1 %v7858_v5  ;;  %19538 = vst [vmem:[#allocation97_spill] sm:$0xff] %v15902_v52  ;;  %10646 = vmatprep.subr.mxu0 %v15844_v47 }
 0x4ea   : > { %19536 = vst [vmem:[#allocation115_spill] sm:$0xff] %v15892_v61  ;;  %19537 = vst [vmem:[#allocation47_spill] sm:$0xff] %v15899_v21  ;;  %v15907_v48 = vadd.f32 %v5758_v4, %v5309_v59  ;;  %10723 = vmatpush3.msra.mxu1 %v7858_v5  ;;  %10647 = vmatpush3.msra.mxu0 %v15844_v47  ;;  %v7872_v4 = vand.u32 4294901760, %v7871_v22  ;;  %v15923_v47 = vand.u32 4294901760, %v15902_v52  ;;  %v15928_v61 = vand.u32 4294901760, %v9565_v25 }
 0x4eb   : > { %v5893_v14 = vpop.f32.mrf.mxu0  ;;  %v6265_v1 = vpop.f32.mrf.mxu1  ;;  %6805 = vmatmul.mubr.f32.gmra.mxu0 %v19526_v7  ;;  %7140 = vmatmul.mubr.f32.gmra.mxu1 %v19541_v39  ;;  %v15926_v7 = vsub.f32 %v9566_v27, %v15904_v43  ;;  %v19545_v27 = vld [vmem:[#allocation118_spill] sm:$0xff] }
 0x4ec   : > { %19540 = vst [vmem:[#allocation30_spill] sm:$0xff] %v15907_v48  ;;  %v5894_v31 = vadd.f32 %v5893_v14, %v15512_v51  ;;  %6810 = vmatprep.mubr.f32.mxu0 %v19089_v44  ;;  %7145 = vmatprep.mubr.f32.mxu1 %v19089_v44  ;;  %v7878_v48 = vsub.f32 %v15885_v30, %v15899_v21  ;;  %19542 = vst [vmem:[#allocation3_spill] sm:$0xff] %v15923_v47  ;;  %v9564_v51 = vld [vmem:[%s17636_s3 + $0xa0] sm:$0xff] }
 0x4ed   : > { %v5895_v5 = vpop.f32.mrf.mxu0  ;;  %v15918_v59 = vpop.f32.mrf.mxu1  ;;  %10724 = vmatprep.subr.mxu1 %v7865_v20  ;;  %19543 = vst [vmem:[#allocation13_spill] sm:$0xff] %v15926_v7  ;;  %19544 = vst [vmem:[#allocation12_spill] sm:$0xff] %v15928_v61  ;;  %10648 = vmatprep.subr.mxu0 %v15868_v8 }
 0x4ee   : > { %v5896_v22 = vadd.f32 %v5895_v5, %v15516_v32  ;;  %10725 = vmatpush3.msra.mxu1 %v7865_v20  ;;  %v15936_v14 = vadd.f32 %v15852_v46, %v5894_v31  ;;  %10649 = vmatpush3.msra.mxu0 %v15868_v8  ;;  %v15946_v32 = vand.u32 4294901760, %v9564_v51  ;;  %v7879_v31 = vand.u32 4294901760, %v7878_v48  ;;  %v9563_v48 = vld [vmem:[%s17636_s3 + $0x98] sm:$0xff] }
 0x4ef   : > { %v5901_v21 = vpop.f32.mrf.mxu0  ;;  %v6274_v30 = vpop.f32.mrf.mxu1  ;;  %6812 = vmatmul.mubr.f32.gmra.mxu0 %v19535_v15  ;;  %7147 = vmatmul.mubr.f32.gmra.mxu1 %v19545_v27  ;;  %v7885_v15 = vsub.f32 %v15902_v52, %v15923_v47  ;;  %v15953_v5 = vand.u32 4294901760, %v15926_v7  ;;  %v19549_v52 = vld [vmem:[#allocation73_spill] sm:$0xff] }
 0x4f0   : > { %v5902_v53 = vadd.f32 %v5901_v21, %v15521_v23  ;;  %6817 = vmatprep.mubr.f32.mxu0 %v19089_v44  ;;  %7152 = vmatprep.mubr.f32.mxu1 %v19089_v44  ;;  %v15944_v34 = vadd.f32 %v6249_v6, %v5896_v22  ;;  %19546 = vst [vmem:[#allocation19_spill] sm:$0xff] %v15946_v32 }
 0x4f1   : > { %v5903_v46 = vpop.f32.mrf.mxu0  ;;  %v15948_v20 = vpop.f32.mrf.mxu1  ;;  %10726 = vmatprep.subr.mxu1 %v7872_v4  ;;  %19547 = vst [vmem:[#allocation71_spill] sm:$0xff] %v15953_v5  ;;  %v15956_v23 = vsub.f32 %v9565_v25, %v15928_v61  ;;  %10650 = vmatprep.subr.mxu0 %v15879_v54 }
 0x4f2   : > { %v5904_v21 = vadd.f32 %v5903_v46, %v15525_v56  ;;  %10727 = vmatpush3.msra.mxu1 %v7872_v4  ;;  %v15960_v6 = vadd.f32 %v6256_v11, %v5902_v53  ;;  %10651 = vmatpush3.msra.mxu0 %v15879_v54  ;;  %v15974_v53 = vsub.f32 %v9564_v51, %v15946_v32  ;;  %v7886_v46 = vand.u32 4294901760, %v7885_v15 }
 0x4f3   : > { %19548 = vst [vmem:[#allocation37_spill] sm:$0xff] %v15956_v23  ;;  %v5909_v22 = vpop.f32.mrf.mxu0  ;;  %v6283_v47 = vpop.f32.mrf.mxu1  ;;  %6819 = vmatmul.mubr.f32.gmra.mxu0 %v19541_v39  ;;  %7154 = vmatmul.mubr.f32.gmra.mxu1 %v19549_v52  ;;  %v7892_v39 = vsub.f32 %v15926_v7, %v15953_v5  ;;  %v15981_v54 = vand.u32 4294901760, %v15956_v23  ;;  %v19553_v5 = vld [vmem:[#allocation117_spill] sm:$0xff] }
 0x4f4   : > { %v5910_v25 = vadd.f32 %v5909_v22, %v15530_v3  ;;  %6824 = vmatprep.mubr.f32.mxu0 %v19089_v44  ;;  %7159 = vmatprep.mubr.f32.mxu1 %v19089_v44  ;;  %v15971_v56 = vadd.f32 %v6258_v33, %v5904_v21  ;;  %19550 = vst [vmem:[#allocation56_spill] sm:$0xff] %v15974_v53  ;;  %v15983_v3 = vand.u32 4294901760, %v9563_v48  ;;  %v9562_v21 = vld [vmem:[%s17636_s3 + $0x90] sm:$0xff] }
 0x4f5   : > { %v5911_v11 = vpop.f32.mrf.mxu0  ;;  %v15976_v4 = vpop.f32.mrf.mxu1  ;;  %10728 = vmatprep.subr.mxu1 %v7879_v31  ;;  %19551 = vst [vmem:[#allocation61_spill] sm:$0xff] %v15981_v54  ;;  %10652 = vmatprep.subr.mxu0 %v15904_v43 }
 0x4f6   : > { %19552 = vst [vmem:[#allocation75_spill] sm:$0xff] %v15983_v3  ;;  %v5912_v33 = vadd.f32 %v5911_v11, %v15534_v36  ;;  %10729 = vmatpush3.msra.mxu1 %v7879_v31  ;;  %v15987_v51 = vadd.f32 %v6265_v1, %v5910_v25  ;;  %10653 = vmatpush3.msra.mxu0 %v15904_v43  ;;  %v15999_v36 = vand.u32 4294901760, %v15974_v53  ;;  %v7893_v11 = vand.u32 4294901760, %v7892_v39 }
 0x4f7   : > { %v5917_v15 = vpop.f32.mrf.mxu0  ;;  %v6292_v22 = vpop.f32.mrf.mxu1  ;;  %6826 = vmatmul.mubr.f32.gmra.mxu0 %v19545_v27  ;;  %7161 = vmatmul.mubr.f32.gmra.mxu1 %v19553_v5  ;;  %v7899_v27 = vsub.f32 %v15956_v23, %v15981_v54  ;;  %v16007_v43 = vsub.f32 %v9563_v48, %v15983_v3  ;;  %v19584_v23 = vld [vmem:[#allocation81_spill] sm:$0xff] }
 0x4f8   : > { %v5918_v7 = vadd.f32 %v5917_v15, %v15539_v13  ;;  %6831 = vmatprep.mubr.f32.mxu0 %v19089_v44  ;;  %7166 = vmatprep.mubr.f32.mxu1 %v19089_v44  ;;  %19554 = vst [vmem:[#allocation90_spill] sm:$0xff] %v15999_v36  ;;  %v16002_v1 = vadd.f32 %v15918_v59, %v5912_v33  ;;  %v16009_v13 = vand.u32 4294901760, %v9562_v21  ;;  %v9561_v59 = vld [vmem:[%s17636_s3 + $0x88] sm:$0xff] }
 0x4f9   : > { %v5919_v31 = vpop.f32.mrf.mxu0  ;;  %v6294_v25 = vpop.f32.mrf.mxu1  ;;  %10730 = vmatprep.subr.mxu1 %v7886_v46  ;;  %19555 = vst [vmem:[#allocation101_spill] sm:$0xff] %v16007_v43  ;;  %10654 = vmatprep.subr.mxu0 %v15928_v61 }
 0x4fa   : > { %19556 = vst [vmem:[#allocation89_spill] sm:$0xff] %v16009_v13  ;;  %v5920_v15 = vadd.f32 %v5919_v31, %v15543_v63  ;;  %10731 = vmatpush3.msra.mxu1 %v7886_v46  ;;  %v16013_v8 = vadd.f32 %v6274_v30, %v5918_v7  ;;  %10655 = vmatpush3.msra.mxu0 %v15928_v61  ;;  %v7900_v31 = vand.u32 4294901760, %v7899_v27  ;;  %v19581_v61 = vld [vmem:[#allocation33_spill] sm:$0xff] }
 0x4fb   : > { %v5925_v39 = vpop.f32.mrf.mxu0  ;;  %v6301_v33 = vpop.f32.mrf.mxu1  ;;  %6833 = vmatmul.mubr.f32.gmra.mxu0 %v19549_v52  ;;  %7168 = vmatmul.mubr.f32.gmra.mxu1 %v15140_v40  ;;  %v7906_v63 = vsub.f32 %v15974_v53, %v15999_v36  ;;  %v16030_v52 = vand.u32 4294901760, %v16007_v43  ;;  %v16033_v54 = vsub.f32 %v9562_v21, %v16009_v13 }
 0x4fc   : > { %v5926_v48 = vadd.f32 %v5925_v39, %v15548_v19  ;;  %6838 = vmatprep.mubr.f32.mxu0 %v19089_v44  ;;  %7173 = vmatprep.mubr.f32.mxu1 %v19089_v44  ;;  %v16027_v30 = vadd.f32 %v15948_v20, %v5920_v15  ;;  %v16035_v19 = vand.u32 4294901760, %v9561_v59  ;;  %v9560_v20 = vld [vmem:[%s17636_s3 + $0x80] sm:$0xff] }
 0x4fd   : > { %v5927_v7 = vpop.f32.mrf.mxu0  ;;  %v6303_v46 = vpop.f32.mrf.mxu1  ;;  %10732 = vmatprep.subr.mxu1 %v7893_v11  ;;  %19557 = vst [vmem:[#allocation49_spill] sm:$0xff] %v16030_v52  ;;  %19558 = vst [vmem:[#allocation69_spill] sm:$0xff] %v16033_v54  ;;  %10656 = vmatprep.subr.mxu0 %v15946_v32 }
 0x4fe   : > { %19559 = vst [vmem:[#allocation114_spill] sm:$0xff] %v16035_v19  ;;  %v5928_v39 = vadd.f32 %v5927_v7, %v15552_v2  ;;  %10733 = vmatpush3.msra.mxu1 %v7893_v11  ;;  %v16039_v36 = vadd.f32 %v6283_v47, %v5926_v48  ;;  %10657 = vmatpush3.msra.mxu0 %v15946_v32  ;;  %v7907_v2 = vand.u32 4294901760, %v7906_v63 }
 0x4ff   : > { %v5933_v27 = vpop.f32.mrf.mxu0  ;;  %v6310_v15 = vpop.f32.mrf.mxu1  ;;  %6840 = vmatmul.mubr.f32.gmra.mxu0 %v19553_v5  ;;  %7175 = vmatmul.mubr.f32.gmra.mxu1 %v15150_v58  ;;  %v7913_v7 = vsub.f32 %v16007_v43, %v16030_v52  ;;  %v16056_v5 = vand.u32 4294901760, %v16033_v54  ;;  %v16059_v32 = vsub.f32 %v9561_v59, %v16035_v19  ;;  %v19563_v52 = vld [vmem:[#allocation120_spill] sm:$0xff] }
 0x500   : > { %v5934_v21 = vadd.f32 %v5933_v27, %v15557_v18  ;;  %6845 = vmatprep.mubr.f32.mxu0 %v19089_v44  ;;  %7180 = vmatprep.mubr.f32.mxu1 %v19089_v44  ;;  %v16051_v47 = vadd.f32 %v15976_v4, %v5928_v39  ;;  %v16061_v18 = vand.u32 4294901760, %v9560_v20 }
 0x501   : > { %v5935_v11 = vpop.f32.mrf.mxu0  ;;  %v6312_v48 = vpop.f32.mrf.mxu1  ;;  %10734 = vmatprep.subr.mxu1 %v7900_v31  ;;  %19560 = vst [vmem:[#allocation74_spill] sm:$0xff] %v16056_v5  ;;  %19561 = vst [vmem:[#allocation17_spill] sm:$0xff] %v16059_v32  ;;  %10658 = vmatprep.subr.mxu0 %v15983_v3 }
 0x502   : > { %19562 = vst [vmem:[#allocation118_spill] sm:$0xff] %v16061_v18  ;;  %v5936_v63 = vadd.f32 %v5935_v11, %v15561_v57  ;;  %10735 = vmatpush3.msra.mxu1 %v7900_v31  ;;  %v16065_v4 = vadd.f32 %v6292_v22, %v5934_v21  ;;  %10659 = vmatpush3.msra.mxu0 %v15983_v3  ;;  %v7914_v22 = vand.u32 4294901760, %v7913_v7 }
 0x503   : > { %v5941_v39 = vpop.f32.mrf.mxu0  ;;  %v6319_v27 = vpop.f32.mrf.mxu1  ;;  %6847 = vmatmul.mubr.f32.gmra.mxu0 %v15140_v40  ;;  %7182 = vmatmul.mubr.f32.gmra.mxu1 %v19563_v52  ;;  %v7920_v21 = vsub.f32 %v16033_v54, %v16056_v5  ;;  %v16080_v40 = vand.u32 4294901760, %v16059_v32  ;;  %v16083_v11 = vsub.f32 %v9560_v20, %v16061_v18  ;;  %v19578_v54 = vld [vmem:[#allocation23_spill] sm:$0xff] }
 0x504   : > { %v5942_v59 = vadd.f32 %v5941_v39, %v15566_v16  ;;  %6852 = vmatprep.mubr.f32.mxu0 %v19089_v44  ;;  %7187 = vmatprep.mubr.f32.mxu1 %v19089_v44  ;;  %v16073_v43 = vadd.f32 %v6294_v25, %v5936_v63 }
 0x505   : > { %v5943_v57 = vpop.f32.mrf.mxu0  ;;  %v16075_v31 = vpop.f32.mrf.mxu1  ;;  %10736 = vmatprep.subr.mxu1 %v7907_v2  ;;  %19564 = vst [vmem:[#allocation73_spill] sm:$0xff] %v16080_v40  ;;  %19565 = vst [vmem:[#allocation117_spill] sm:$0xff] %v16083_v11  ;;  %10660 = vmatprep.subr.mxu0 %v16009_v13 }
 0x506   : > { %v5944_v16 = vadd.f32 %v5943_v57, %v15570_v55  ;;  %10737 = vmatpush3.msra.mxu1 %v7907_v2  ;;  %10661 = vmatpush3.msra.mxu0 %v16009_v13  ;;  %v16088_v25 = vadd.f32 %v6301_v33, %v5942_v59  ;;  %v7921_v33 = vand.u32 4294901760, %v7920_v21  ;;  %v7927_v59 = vsub.f32 %v16059_v32, %v16080_v40 }
 0x507   : > { %v5949_v63 = vpop.f32.mrf.mxu0  ;;  %v6328_v7 = vpop.f32.mrf.mxu1  ;;  %6854 = vmatmul.mubr.f32.gmra.mxu0 %v15150_v58  ;;  %7189 = vmatmul.mubr.f32.gmra.mxu1 %v15189_v35  ;;  %v16102_v58 = vand.u32 4294901760, %v16083_v11 }
 0x508   : > { %v5950_v39 = vadd.f32 %v5949_v63, %v15575_v26  ;;  %6859 = vmatprep.mubr.f32.mxu0 %v19089_v44  ;;  %7194 = vmatprep.mubr.f32.mxu1 %v19089_v44  ;;  %v16095_v20 = vadd.f32 %v6303_v46, %v5944_v16 }
 0x509   : > { %v5951_v55 = vpop.f32.mrf.mxu0  ;;  %v16097_v2 = vpop.f32.mrf.mxu1  ;;  %10738 = vmatprep.subr.mxu1 %v7914_v22  ;;  %19566 = vst [vmem:[#allocation120_spill] sm:$0xff] %v16102_v58  ;;  %10662 = vmatprep.subr.mxu0 %v16035_v19 }
 0x50a   : > { %v5952_v26 = vadd.f32 %v5951_v55, %v15579_v28  ;;  %10739 = vmatpush3.msra.mxu1 %v7914_v22  ;;  %10663 = vmatpush3.msra.mxu0 %v16035_v19  ;;  %v16107_v46 = vadd.f32 %v6310_v15, %v5950_v39  ;;  %v7928_v15 = vand.u32 4294901760, %v7927_v59  ;;  %v7934_v39 = vsub.f32 %v16083_v11, %v16102_v58 }
 0x50b   : > { %v5957_v57 = vpop.f32.mrf.mxu0  ;;  %v6337_v16 = vpop.f32.mrf.mxu1  ;;  %6861 = vmatmul.mubr.f32.gmra.mxu0 %v19563_v52  ;;  %7196 = vmatmul.mubr.f32.gmra.mxu1 %v15218_v9 }
 0x50c   : > { %v5958_v21 = vadd.f32 %v5957_v57, %v15584_v10  ;;  %6866 = vmatprep.mubr.f32.mxu0 %v19089_v44  ;;  %7201 = vmatprep.mubr.f32.mxu1 %v19089_v44  ;;  %v16114_v63 = vadd.f32 %v6312_v48, %v5952_v26 }
 0x50d   : > { %v16116_v28 = vpop.f32.mrf.mxu0  ;;  %v16118_v22 = vpop.f32.mrf.mxu1  ;;  %10740 = vmatprep.subr.mxu1 %v7921_v33  ;;  %10664 = vmatprep.subr.mxu0 %v16061_v18 }
 0x50e   : > { %19567 = vst [vmem:[#allocation122_spill] sm:$0xff] %v16114_v63  ;;  %10741 = vmatpush3.msra.mxu1 %v7921_v33  ;;  %10665 = vmatpush3.msra.mxu0 %v16061_v18  ;;  %v16124_v10 = vadd.f32 %v6319_v27, %v5958_v21  ;;  %v7935_v33 = vand.u32 4294901760, %v7934_v39 }
 0x50f   : > { %v5965_v52 = vpop.f32.mrf.mxu0  ;;  %v6346_v55 = vpop.f32.mrf.mxu1  ;;  %6868 = vmatmul.mubr.f32.gmra.mxu0 %v15189_v35  ;;  %7203 = vmatmul.mubr.f32.gmra.mxu1 %v15226_v41 }
 0x510   : > { %19568 = vst [vmem:[#allocation123_spill] sm:$0xff] %v16124_v10  ;;  %v5966_v48 = vadd.f32 %v5965_v52, %v15593_v50  ;;  %6873 = vmatprep.mubr.f32.mxu0 %v19089_v44  ;;  %7208 = vmatprep.mubr.f32.mxu1 %v19089_v44 }
 0x511   : > { %v16131_v59 = vpop.f32.mrf.mxu0  ;;  %v16133_v26 = vpop.f32.mrf.mxu1  ;;  %10742 = vmatprep.subr.mxu1 %v7928_v15  ;;  %10794 = vmatprep.subr.mxu0 %v15712_v0 }
 0x512   : > { %10743 = vmatpush3.msra.mxu1 %v7928_v15  ;;  %v16136_v27 = vadd.f32 %v6328_v7, %v5966_v48 }
 0x513   : > { %v5973_v35 = vpop.f32.mrf.mxu0  ;;  %v6355_v57 = vpop.f32.mrf.mxu1  ;;  %6875 = vmatmul.mubr.f32.gmra.mxu0 %v15218_v9  ;;  %7210 = vmatmul.mubr.f32.gmra.mxu1 %v15254_v24 }
 0x514   : > { %19569 = vst [vmem:[#allocation124_spill] sm:$0xff] %v16136_v27  ;;  %v5974_v50 = vadd.f32 %v5973_v35, %v15602_v38  ;;  %6880 = vmatprep.mubr.f32.mxu0 %v19089_v44  ;;  %7215 = vmatprep.mubr.f32.mxu1 %v19089_v44 }
 0x515   : > { %v16143_v21 = vpop.f32.mrf.mxu0  ;;  %v16145_v39 = vpop.f32.mrf.mxu1  ;;  %10744 = vmatprep.subr.mxu1 %v7935_v33 }
 0x516   : > { %10745 = vmatpush3.msra.mxu1 %v7935_v33  ;;  %v16147_v7 = vadd.f32 %v6337_v16, %v5974_v50 }
 0x517   : > { %v5981_v15 = vpop.f32.mrf.mxu0  ;;  %v6364_v52 = vpop.f32.mrf.mxu1  ;;  %6882 = vmatmul.mubr.f32.gmra.mxu0 %v15226_v41  ;;  %7217 = vmatmul.mubr.f32.gmra.mxu1 %v15260_v60 }
 0x518   : > { %19570 = vst [vmem:[#allocation125_spill] sm:$0xff] %v16147_v7  ;;  %v5982_v9 = vadd.f32 %v5981_v15, %v15611_v37  ;;  %6887 = vmatprep.mubr.f32.mxu0 %v19089_v44  ;;  %7222 = vmatprep.mubr.f32.mxu1 %v19089_v44 }
 0x519   : > { %v16154_v38 = vpop.f32.mrf.mxu0  ;;  %v16156_v48 = vpop.f32.mrf.mxu1  ;;  %10874 = vmatprep.subr.mxu1 %v15704_v29 }
 0x51a   : > { %v16159_v16 = vadd.f32 %v6346_v55, %v5982_v9 }
 0x51b   : > { %v5989_v33 = vpop.f32.mrf.mxu0  ;;  %v6373_v35 = vpop.f32.mrf.mxu1  ;;  %6889 = vmatmul.mubr.f32.gmra.mxu0 %v15254_v24  ;;  %7224 = vmatmul.mubr.f32.gmra.mxu1 %v15288_v17 }
 0x51c   : > { %19571 = vst [vmem:[#allocation126_spill] sm:$0xff] %v16159_v16  ;;  %v5990_v41 = vadd.f32 %v5989_v33, %v15620_v62  ;;  %6894 = vmatprep.mubr.f32.mxu0 %v19089_v44  ;;  %7229 = vmatprep.mubr.f32.mxu1 %v19089_v44  ;;  %v19591_v16 = vld [vmem:[#allocation21_spill] sm:$0xff] }
 0x51d   : > { %v16166_v37 = vpop.f32.mrf.mxu0  ;;  %v16168_v50 = vpop.f32.mrf.mxu1 }
 0x51e   : > { %v16170_v15 = vadd.f32 %v6355_v57, %v5990_v41 }
 0x51f   : > { %v5997_v55 = vpop.f32.mrf.mxu0  ;;  %v6382_v9 = vpop.f32.mrf.mxu1  ;;  %6896 = vmatmul.mubr.f32.gmra.mxu0 %v15260_v60  ;;  %7231 = vmatmul.mubr.f32.gmra.mxu1 %v15298_v12 }
 0x520   : > { %19572 = vst [vmem:[#allocation127_spill] sm:$0xff] %v16170_v15  ;;  %v5998_v24 = vadd.f32 %v5997_v55, %v15629_v42  ;;  %6901 = vmatprep.mubr.f32.mxu0 %v19089_v44 }
 0x521   : > { %v16176_v62 = vpop.f32.mrf.mxu0  ;;  %v16178_v33 = vpop.f32.mrf.mxu1 }
 0x522   : > { %v16180_v58 = vadd.f32 %v6364_v52, %v5998_v24 }
 0x523   : > { %v6005_v40 = vpop.f32.mrf.mxu0  ;;  %v6391_v5 = vpop.f32.mrf.mxu1  ;;  %6903 = vmatmul.mubr.f32.gmra.mxu0 %v15288_v17 }
 0x524   : > { %19573 = vst [vmem:[#allocation128_spill] sm:$0xff] %v16180_v58  ;;  %v6006_v57 = vadd.f32 %v6005_v40, %v15637_v49  ;;  %6908 = vmatprep.mubr.f32.mxu0 %v19089_v44  ;;  %v19576_v40 = vld [vmem:[#allocation29_spill] sm:$0xff]  ;;  %v19587_v58 = vld [vmem:[#allocation28_spill] sm:$0xff] }
 0x525   : > { %v16185_v60 = vpop.f32.mrf.mxu0  ;;  %v16187_v41 = vpop.f32.mrf.mxu1 }
 0x526   : > { %v16189_v42 = vadd.f32 %v6373_v35, %v6006_v57 }
 0x527   : > { %v6013_v55 = vpop.f32.mrf.mxu0  ;;  %v6400_v11 = vpop.f32.mrf.mxu1  ;;  %6910 = vmatmul.mubr.f32.gmra.mxu0 %v15298_v12 }
 0x528   : > { %19574 = vst [vmem:[#allocation129_spill] sm:$0xff] %v16189_v42  ;;  %v6014_v52 = vadd.f32 %v6013_v55, %v15645_v45 }
 0x529   : > { %v16193_v24 = vpop.f32.mrf.mxu0  ;;  %v16195_v32 = vpop.f32.mrf.mxu1 }
 0x52a   : > { %v16197_v17 = vadd.f32 %v6382_v9, %v6014_v52 }
 0x52b   : > { %v6021_v49 = vpop.f32.mrf.mxu0  ;;  %v6409_v44 = vpop.f32.mrf.mxu1 }
 0x52c   : > { %19575 = vst [vmem:[#allocation130_spill] sm:$0xff] %v16197_v17  ;;  %v6022_v18 = vadd.f32 %v6021_v49, %v19576_v40 }
 0x52d   : > { %v16200_v19 = vpop.f32.mrf.mxu0  ;;  %v16202_v35 = vpop.f32.mrf.mxu1 }
 0x52e   : > { %v16204_v57 = vadd.f32 %v6391_v5, %v6022_v18 }
 0x52f   : > { %v6029_v13 = vpop.f32.mrf.mxu0  ;;  %v6418_v12 = vpop.f32.mrf.mxu1 }
 0x530   : > { %19577 = vst [vmem:[#allocation29_spill] sm:$0xff] %v16204_v57  ;;  %v6030_v45 = vadd.f32 %v6029_v13, %v19578_v54 }
 0x531   : > { %v16207_v55 = vpop.f32.mrf.mxu0  ;;  %v16209_v3 = vpop.f32.mrf.mxu1 }
 0x532   : > { %19579 = vst [vmem:[#allocation23_spill] sm:$0xff] %v16209_v3  ;;  %v16211_v9 = vadd.f32 %v6400_v11, %v6030_v45  ;;  %v19637_v3 = vld [vmem:[#allocation66_spill] sm:$0xff] }
 0x533   : > { %v6037_v52 = vpop.f32.mrf.mxu0  ;;  %v6427_v53 = vpop.f32.mrf.mxu1 }
 0x534   : > { %19580 = vst [vmem:[#allocation131_spill] sm:$0xff] %v16211_v9  ;;  %v6038_v49 = vadd.f32 %v6037_v52, %v19581_v61 }
 0x535   : > { %v16214_v40 = vpop.f32.mrf.mxu0  ;;  %v16216_v17 = vpop.f32.mrf.mxu1 }
 0x536   : > { %19582 = vst [vmem:[#allocation33_spill] sm:$0xff] %v16216_v17  ;;  %v16218_v5 = vadd.f32 %v6409_v44, %v6038_v49 }
 0x537   : > { %v6045_v18 = vpop.f32.mrf.mxu0  ;;  %v6436_v57 = vpop.f32.mrf.mxu1 }
 0x538   : > { %19583 = vst [vmem:[#allocation132_spill] sm:$0xff] %v16218_v5  ;;  %v6046_v54 = vadd.f32 %v6045_v18, %v19584_v23 }
 0x539   : > { %v16221_v13 = vpop.f32.mrf.mxu0  ;;  %v16223_v42 = vpop.f32.mrf.mxu1 }
 0x53a   : > { %19585 = vst [vmem:[#allocation81_spill] sm:$0xff] %v16223_v42  ;;  %v16225_v11 = vadd.f32 %v6418_v12, %v6046_v54  ;;  %v19595_v42 = vld [vmem:[#allocation46_spill] sm:$0xff] }
 0x53b   : > { %v6053_v45 = vpop.f32.mrf.mxu0  ;;  %v6445_v9 = vpop.f32.mrf.mxu1 }
 0x53c   : > { %19586 = vst [vmem:[#allocation133_spill] sm:$0xff] %v16225_v11  ;;  %v6054_v61 = vadd.f32 %v6053_v45, %v19587_v58 }
 0x53d   : > { %v16228_v52 = vpop.f32.mrf.mxu0  ;;  %v16230_v15 = vpop.f32.mrf.mxu1 }
 0x53e   : > { %19588 = vst [vmem:[#allocation28_spill] sm:$0xff] %v16228_v52  ;;  %19589 = vst [vmem:[#allocation134_spill] sm:$0xff] %v16230_v15  ;;  %v16232_v44 = vadd.f32 %v6427_v53, %v6054_v61  ;;  %v19599_v15 = vld [vmem:[#allocation94_spill] sm:$0xff] }
 0x53f   : > { %v6061_v49 = vpop.f32.mrf.mxu0  ;;  %v6454_v5 = vpop.f32.mrf.mxu1 }
 0x540   : > { %19590 = vst [vmem:[#allocation135_spill] sm:$0xff] %v16232_v44  ;;  %v6062_v23 = vadd.f32 %v6061_v49, %v19591_v16 }
 0x541   : > { %v16235_v18 = vpop.f32.mrf.mxu0  ;;  %v16237_v17 = vpop.f32.mrf.mxu1 }
 0x542   : > { %19592 = vst [vmem:[#allocation21_spill] sm:$0xff] %v16235_v18  ;;  %19593 = vst [vmem:[#allocation136_spill] sm:$0xff] %v16237_v17  ;;  %v16239_v12 = vadd.f32 %v6436_v57, %v6062_v23  ;;  %v19603_v17 = vld [vmem:[#allocation25_spill] sm:$0xff] }
 0x543   : > { %v6069_v54 = vpop.f32.mrf.mxu0  ;;  %v6463_v11 = vpop.f32.mrf.mxu1 }
 0x544   : > { %19594 = vst [vmem:[#allocation137_spill] sm:$0xff] %v16239_v12  ;;  %v6070_v58 = vadd.f32 %v6069_v54, %v19595_v42 }
 0x545   : > { %v16242_v45 = vpop.f32.mrf.mxu0  ;;  %v16244_v7 = vpop.f32.mrf.mxu1 }
 0x546   : > { %19596 = vst [vmem:[#allocation46_spill] sm:$0xff] %v16242_v45  ;;  %19597 = vst [vmem:[#allocation138_spill] sm:$0xff] %v16244_v7  ;;  %v16246_v53 = vadd.f32 %v6445_v9, %v6070_v58  ;;  %v19607_v7 = vld [vmem:[#allocation9_spill] sm:$0xff] }
 0x547   : > { %v6077_v61 = vpop.f32.mrf.mxu0  ;;  %v6472_v44 = vpop.f32.mrf.mxu1 }
 0x548   : > { %19598 = vst [vmem:[#allocation139_spill] sm:$0xff] %v16246_v53  ;;  %v6078_v16 = vadd.f32 %v6077_v61, %v19599_v15 }
 0x549   : > { %v16249_v49 = vpop.f32.mrf.mxu0  ;;  %v16251_v18 = vpop.f32.mrf.mxu1 }
 0x54a   : > { %19600 = vst [vmem:[#allocation94_spill] sm:$0xff] %v16249_v49  ;;  %19601 = vst [vmem:[#allocation140_spill] sm:$0xff] %v16251_v18  ;;  %v16253_v57 = vadd.f32 %v6454_v5, %v6078_v16  ;;  %v19611_v18 = vld [vmem:[#allocation11_spill] sm:$0xff] }
 0x54b   : > { %v6085_v23 = vpop.f32.mrf.mxu0  ;;  %v6481_v12 = vpop.f32.mrf.mxu1 }
 0x54c   : > { %19602 = vst [vmem:[#allocation141_spill] sm:$0xff] %v16253_v57  ;;  %v6086_v42 = vadd.f32 %v6085_v23, %v19603_v17 }
 0x54d   : > { %v16256_v54 = vpop.f32.mrf.mxu0  ;;  %v16258_v45 = vpop.f32.mrf.mxu1 }
 0x54e   : > { %19604 = vst [vmem:[#allocation25_spill] sm:$0xff] %v16256_v54  ;;  %19605 = vst [vmem:[#allocation142_spill] sm:$0xff] %v16258_v45  ;;  %v16260_v9 = vadd.f32 %v6463_v11, %v6086_v42  ;;  %v19615_v45 = vld [vmem:[#allocation102_spill] sm:$0xff] }
 0x54f   : > { %v6093_v58 = vpop.f32.mrf.mxu0  ;;  %v6490_v53 = vpop.f32.mrf.mxu1 }
 0x550   : > { %19606 = vst [vmem:[#allocation143_spill] sm:$0xff] %v16260_v9  ;;  %v6094_v15 = vadd.f32 %v6093_v58, %v19607_v7 }
 0x551   : > { %v16263_v61 = vpop.f32.mrf.mxu0  ;;  %v16265_v49 = vpop.f32.mrf.mxu1 }
 0x552   : > { %19608 = vst [vmem:[#allocation9_spill] sm:$0xff] %v16263_v61  ;;  %19609 = vst [vmem:[#allocation144_spill] sm:$0xff] %v16265_v49  ;;  %v16267_v5 = vadd.f32 %v6472_v44, %v6094_v15 }
 0x553   : > { %v6101_v16 = vpop.f32.mrf.mxu0  ;;  %v6499_v57 = vpop.f32.mrf.mxu1 }
 0x554   : > { %19610 = vst [vmem:[#allocation145_spill] sm:$0xff] %v16267_v5  ;;  %v6102_v17 = vadd.f32 %v6101_v16, %v19611_v18  ;;  %v19619_v5 = vld [vmem:[#allocation34_spill] sm:$0xff] }
 0x555   : > { %v16270_v23 = vpop.f32.mrf.mxu0  ;;  %v16272_v54 = vpop.f32.mrf.mxu1 }
 0x556   : > { %19612 = vst [vmem:[#allocation11_spill] sm:$0xff] %v16270_v23  ;;  %19613 = vst [vmem:[#allocation146_spill] sm:$0xff] %v16272_v54  ;;  %v16274_v11 = vadd.f32 %v6481_v12, %v6102_v17  ;;  %v19623_v54 = vld [vmem:[#allocation79_spill] sm:$0xff] }
 0x557   : > { %v6109_v42 = vpop.f32.mrf.mxu0  ;;  %v6508_v9 = vpop.f32.mrf.mxu1 }
 0x558   : > { %19614 = vst [vmem:[#allocation147_spill] sm:$0xff] %v16274_v11  ;;  %v6110_v7 = vadd.f32 %v6109_v42, %v19615_v45 }
 0x559   : > { %v16277_v58 = vpop.f32.mrf.mxu0  ;;  %v16279_v61 = vpop.f32.mrf.mxu1 }
 0x55a   : > { %19616 = vst [vmem:[#allocation102_spill] sm:$0xff] %v16277_v58  ;;  %19617 = vst [vmem:[#allocation148_spill] sm:$0xff] %v16279_v61  ;;  %v16281_v44 = vadd.f32 %v6490_v53, %v6110_v7 }
 0x55b   : > { %v6117_v15 = vpop.f32.mrf.mxu0  ;;  %v6517_v49 = vpop.f32.mrf.mxu1 }
 0x55c   : > { %19618 = vst [vmem:[#allocation149_spill] sm:$0xff] %v16281_v44  ;;  %v6118_v18 = vadd.f32 %v6117_v15, %v19619_v5  ;;  %v19627_v44 = vld [vmem:[#allocation41_spill] sm:$0xff] }
 0x55d   : > { %v16284_v16 = vpop.f32.mrf.mxu0  ;;  %v16286_v23 = vpop.f32.mrf.mxu1 }
 0x55e   : > { %19620 = vst [vmem:[#allocation34_spill] sm:$0xff] %v16284_v16  ;;  %19621 = vst [vmem:[#allocation150_spill] sm:$0xff] %v16286_v23  ;;  %v16288_v12 = vadd.f32 %v6499_v57, %v6118_v18 }
 0x55f   : > { %v6125_v17 = vpop.f32.mrf.mxu0  ;;  %v6526_v11 = vpop.f32.mrf.mxu1 }
 0x560   : > { %19622 = vst [vmem:[#allocation151_spill] sm:$0xff] %v16288_v12  ;;  %v6126_v45 = vadd.f32 %v6125_v17, %v19623_v54  ;;  %v19630_v12 = vld [vmem:[#allocation115_spill] sm:$0xff] }
 0x561   : > { %v16291_v42 = vpop.f32.mrf.mxu0  ;;  %v16293_v58 = vpop.f32.mrf.mxu1 }
 0x562   : > { %19624 = vst [vmem:[#allocation79_spill] sm:$0xff] %v16291_v42  ;;  %19625 = vst [vmem:[#allocation152_spill] sm:$0xff] %v16293_v58  ;;  %v16295_v53 = vadd.f32 %v6508_v9, %v6126_v45 }
 0x563   : > { %v6133_v7 = vpop.f32.mrf.mxu0  ;;  %v7015_v61 = vpop.f32.mrf.mxu1 }
 0x564   : > { %19626 = vst [vmem:[#allocation153_spill] sm:$0xff] %v16295_v53  ;;  %v6134_v5 = vadd.f32 %v6133_v7, %v19627_v44  ;;  %v9559_v44 = vld [vmem:[%s17635_s2 + $0x2] sm:$0x3] }
 0x565   : > { %v16298_v15 = vpop.f32.mrf.mxu0  ;;  %v7017_v16 = vpop.f32.mrf.mxu1 }
 0x566   : > { %19628 = vst [vmem:[#allocation41_spill] sm:$0xff] %v16298_v15  ;;  %v16300_v23 = vadd.f32 %v6517_v49, %v6134_v5  ;;  %v19636_v15 = vld [vmem:[#allocation14_spill] sm:$0xff] }
 0x567   : > { %v6141_v57 = vpop.f32.mrf.mxu0  ;;  %v7022_v18 = vpop.f32.mrf.mxu1  ;;  %v5960_v27 = vadd.f32 %v16116_v28, %v19636_v15 }
 0x568   : > { %19629 = vst [vmem:[#allocation154_spill] sm:$0xff] %v16300_v23  ;;  %v6142_v52 = vadd.f32 %v6141_v57, %v19630_v12  ;;  %v19633_v23 = vld [vmem:[#allocation119_spill] sm:$0xff] }
 0x569   : > { %v16303_v54 = vpop.f32.mrf.mxu0  ;;  %v7024_v17 = vpop.f32.mrf.mxu1  ;;  %v19634_v53 = vsub.s32 0, %v19633_v23 }
 0x56a   : > { %19631 = vst [vmem:[#allocation115_spill] sm:$0xff] %v16303_v54  ;;  %v16305_v42 = vadd.f32 %v6526_v11, %v6142_v52 }
 0x56b   : > { %v6694_v9 = vpop.f32.mrf.mxu0  ;;  %v7029_v45 = vpop.f32.mrf.mxu1  ;;  %v16314_v12 = vrot.slane %v9559_v44, %v19634_v53 }
 0x56c   : > { %19632 = vst [vmem:[#allocation155_spill] sm:$0xff] %v16305_v42  ;;  %v6695_v58 = vadd.f32 %v6694_v9, %v15936_v14  ;;  %v19635_v42 = vsub.s32 1, %v19633_v23  ;;  %v19639_v23 = vld [vmem:[#allocation70_spill] sm:$0xff] }
 0x56d   : > { %v6696_v7 = vpop.f32.mrf.mxu0  ;;  %v7031_v49 = vpop.f32.mrf.mxu1 }
 0x56e   : > { %v6697_v5 = vadd.f32 %v6696_v7, %v15944_v34  ;;  %v7016_v52 = vadd.f32 %v7015_v61, %v6695_v58  ;;  %v16320_v14 = vrot.slane %v9559_v44, %v19635_v42  ;;  %v5968_v34 = vadd.f32 %v16131_v59, %v19637_v3  ;;  %v19638_v7 = vld [vmem:[#allocation83_spill] sm:$0xff]  ;;  %v19640_v42 = vld [vmem:[#allocation65_spill] sm:$0xff] }
 0x56f   : > { %v6701_v57 = vpop.f32.mrf.mxu0  ;;  %v16316_v54 = vpop.f32.mrf.mxu1  ;;  %v5976_v53 = vadd.f32 %v16143_v21, %v19638_v7  ;;  %v19643_v7 = vld [vmem:[#allocation50_spill] sm:$0xff] }
 0x570   : > { %v7018_v11 = vadd.f32 %v7017_v16, %v6697_v5  ;;  %v6702_v9 = vadd.f32 %v6701_v57, %v15960_v6  ;;  %v5984_v16 = vadd.f32 %v16154_v38, %v19639_v23  ;;  %v5992_v6 = vadd.f32 %v16166_v37, %v19640_v42  ;;  %v19641_v57 = vld [vmem:[#allocation80_spill] sm:$0xff] }
 0x571   : > { %v6703_v10 = vpop.f32.mrf.mxu0  ;;  %v7038_v63 = vpop.f32.mrf.mxu1  ;;  %v16342_v38 = vadd.f32 %v16075_v31, %v5960_v27  ;;  %v16345_v37 = vadd.f32 %v16097_v2, %v5968_v34 }
 0x572   : > { %v7239_v0 = vmin.f32 %v7016_v52, %v7018_v11  ;;  %v7307_v61 = vadd.f32 %v7018_v11, %v7016_v52  ;;  %v6704_v58 = vadd.f32 %v6703_v10, %v15971_v56  ;;  %v7023_v44 = vadd.f32 %v7022_v18, %v6702_v9 }
 0x573   : > { %v6708_v28 = vpop.f32.mrf.mxu0  ;;  %v16334_v15 = vpop.f32.mrf.mxu1  ;;  %v6000_v56 = vadd.f32 %v16176_v62, %v19641_v57  ;;  %v16348_v18 = vadd.f32 %v16118_v22, %v5976_v53  ;;  %v6016_v62 = vadd.f32 %v16193_v24, %v19643_v7  ;;  %v16358_v2 = vadd.f32 %v16133_v26, %v5984_v16 }
 0x574   : > { %v7275_v3 = vmul.f32 %v16314_v12, %v7239_v0  ;;  %v7343_v59 = vmul.f32 %v16320_v14, %v7307_v61  ;;  %v7025_v21 = vadd.f32 %v7024_v17, %v6704_v58  ;;  %v6709_v5 = vadd.f32 %v6708_v28, %v15987_v51  ;;  %v19642_v0 = vld [vmem:[#allocation31_spill] sm:$0xff] }
 0x575   : > { %v6710_v10 = vpop.f32.mrf.mxu0  ;;  %v7045_v52 = vpop.f32.mrf.mxu1  ;;  %v6008_v11 = vadd.f32 %v16185_v60, %v19642_v0  ;;  %v16361_v22 = vadd.f32 %v16145_v39, %v5992_v6  ;;  %v16373_v26 = vadd.f32 %v16156_v48, %v6000_v56  ;;  %v16388_v48 = vadd.f32 %v16178_v33, %v6016_v62  ;;  %v19648_v33 = vld [vmem:[#allocation39_spill] sm:$0xff] }
 0x576   : > { %v7240_v17 = vmin.f32 %v7023_v44, %v7025_v21  ;;  %v7308_v9 = vadd.f32 %v7025_v21, %v7023_v44  ;;  %v6711_v51 = vadd.f32 %v6710_v10, %v16002_v1  ;;  %v7375_v31 = vadd.f32 %v7343_v59, %v7275_v3  ;;  %v19644_v1 = vld [vmem:[#allocation68_spill] sm:$0xff] }
 0x577   : > { %v6715_v61 = vpop.f32.mrf.mxu0  ;;  %v16355_v58 = vpop.f32.mrf.mxu1  ;;  %v7030_v34 = vadd.f32 %v7029_v45, %v6709_v5  ;;  %v6024_v23 = vadd.f32 %v16200_v19, %v19644_v1  ;;  %v16376_v3 = vadd.f32 %v16168_v50, %v6008_v11  ;;  %v19646_v45 = vld [vmem:[#allocation38_spill] sm:$0xff] }
 0x578   : > { %v7276_v27 = vmul.f32 %v16314_v12, %v7240_v17  ;;  %v7344_v60 = vmul.f32 %v16320_v14, %v7308_v9  ;;  %v7032_v53 = vadd.f32 %v7031_v49, %v6711_v51  ;;  %v6716_v24 = vadd.f32 %v6715_v61, %v16013_v8 }
 0x579   : > { %v6717_v42 = vpop.f32.mrf.mxu0  ;;  %v16368_v44 = vpop.f32.mrf.mxu1  ;;  %v16370_v28 = vand.u32 4294901760, %v7375_v31  ;;  %v6032_v49 = vadd.f32 %v16207_v55, %v19646_v45  ;;  %v16400_v17 = vadd.f32 %v16187_v41, %v6024_v23  ;;  %v6040_v9 = vadd.f32 %v16214_v40, %v19648_v33 }
 0x57a   : > { %v7376_v39 = vadd.f32 %v7344_v60, %v7276_v27  ;;  %v7241_v16 = vmin.f32 %v7030_v34, %v7032_v53  ;;  %v7309_v6 = vadd.f32 %v7032_v53, %v7030_v34  ;;  %v6718_v19 = vadd.f32 %v6717_v42, %v16027_v30  ;;  %v19650_v34 = vld [vmem:[#allocation52_spill] sm:$0xff] }
 0x57b   : > { %19645 = vst [vmem:[#allocation119_spill] sm:$0xff] %v16370_v28  ;;  %10746 = vmatprep.mubr.f32.mxu1 %v16370_v28  ;;  %v6722_v8 = vpop.f32.mrf.mxu0  ;;  %v16382_v59 = vpop.f32.mrf.mxu1  ;;  %v16385_v21 = vsub.f32 %v7375_v31, %v16370_v28  ;;  %v7037_v30 = vadd.f32 %v16316_v54, %v6716_v24  ;;  %v16415_v31 = vadd.f32 %v16195_v32, %v6032_v49 }
 0x57c   : > { %v16390_v5 = vand.u32 4294901760, %v7376_v39  ;;  %v7277_v50 = vmul.f32 %v16314_v12, %v7241_v16  ;;  %v7345_v57 = vmul.f32 %v16320_v14, %v7309_v6  ;;  %v6723_v55 = vadd.f32 %v6722_v8, %v16039_v36  ;;  %v19651_v8 = vld [vmem:[#allocation5_spill] sm:$0xff] }
 0x57d   : > { %v7039_v56 = vadd.f32 %v7038_v63, %v6718_v19  ;;  %v6724_v10 = vpop.f32.mrf.mxu0  ;;  %v16396_v0 = vpop.f32.mrf.mxu1  ;;  %v18370_v11 = vand.u32 4294901760, %v16385_v21  ;;  %v16434_v16 = vadd.f32 %v16202_v35, %v6040_v9 }
 0x57e   : > { %19647 = vst [vmem:[#allocation14_spill] sm:$0xff] %v16390_v5  ;;  %v16405_v51 = vsub.f32 %v7376_v39, %v16390_v5  ;;  %v6725_v7 = vadd.f32 %v6724_v10, %v16051_v47  ;;  %10747 = vmatmul.mubr.f32.vlgmr.msra.gmra.mxu1 %v16390_v5  ;;  %v7377_v36 = vadd.f32 %v7345_v57, %v7277_v50 }
 0x57f   : > { %v7242_v63 = vmin.f32 %v7037_v30, %v7039_v56  ;;  %v7310_v54 = vadd.f32 %v7039_v56, %v7037_v30  ;;  %v6729_v62 = vpop.f32.mrf.mxu0  ;;  %v16409_v61 = vpop.f32.mrf.mxu1  ;;  %v7508_v41 = vsub.f32 %v16385_v21, %v18370_v11  ;;  %10875 = vmatpush3.msra.mxu1 %v15704_v29  ;;  %v7044_v47 = vadd.f32 %v16334_v15, %v6723_v55 }
 0x580   : > { %v18369_v40 = vand.u32 4294901760, %v16405_v51  ;;  %v7046_v27 = vadd.f32 %v7045_v52, %v6725_v7  ;;  %v16420_v60 = vand.u32 4294901760, %v7377_v36  ;;  %10876 = vmatprep.subr.mxu1 %v19650_v34  ;;  %v6730_v23 = vadd.f32 %v6729_v62, %v16065_v4  ;;  %v19653_v7 = vld [vmem:[#allocation57_spill] sm:$0xff] }
 0x581   : > { %v7278_v53 = vmul.f32 %v16314_v12, %v7242_v63  ;;  %v7346_v1 = vmul.f32 %v16320_v14, %v7310_v54  ;;  %v6731_v24 = vpop.f32.mrf.mxu0  ;;  %v16426_v32 = vpop.f32.mrf.mxu1  ;;  %v7509_v42 = vand.u32 4294901760, %v7508_v41  ;;  %10877 = vmatpush3.msra.mxu1 %v19650_v34 }
 0x582   : > { %19649 = vst [vmem:[#allocation66_spill] sm:$0xff] %v16420_v60  ;;  %v7518_v15 = vsub.f32 %v16405_v51, %v18369_v40  ;;  %v7243_v52 = vmin.f32 %v7044_v47, %v7046_v27  ;;  %v7311_v39 = vadd.f32 %v7046_v27, %v7044_v47  ;;  %10749 = vmatprep.mubr.f32.mxu1 %v16420_v60 }
 0x583   : > { %v6732_v6 = vadd.f32 %v6731_v24, %v16073_v43  ;;  %10666 = vmatprep.mubr.f32.mxu0 %v7509_v42  ;;  %v6736_v4 = vpop.f32.mrf.mxu0  ;;  %v16437_v45 = vpop.f32.mrf.mxu1  ;;  %v7378_v49 = vadd.f32 %v7346_v1, %v7278_v53  ;;  %v16440_v19 = vsub.f32 %v7377_v36, %v16420_v60  ;;  %10878 = vmatprep.subr.mxu1 %v19651_v8  ;;  %v19654_v36 = vld [vmem:[#allocation40_spill] sm:$0xff]  ;;  %v19657_v24 = vld [vmem:[#allocation77_spill] sm:$0xff] }
 0x584   : > { %v7519_v50 = vand.u32 4294901760, %v7518_v15  ;;  %v7279_v57 = vmul.f32 %v16314_v12, %v7243_v52  ;;  %v7347_v55 = vmul.f32 %v16320_v14, %v7311_v39  ;;  %v6737_v35 = vadd.f32 %v6736_v4, %v16088_v25  ;;  %10879 = vmatpush3.msra.mxu1 %v19651_v8  ;;  %v19658_v4 = vld [vmem:[#allocation95_spill] sm:$0xff] }
 0x585   : > { %v7051_v43 = vadd.f32 %v16355_v58, %v6730_v23  ;;  %v7053_v30 = vadd.f32 %v16368_v44, %v6732_v6  ;;  %v6738_v56 = vpop.f32.mrf.mxu0  ;;  %v16449_v10 = vpop.f32.mrf.mxu1  ;;  %v16451_v33 = vand.u32 4294901760, %v7378_v49  ;;  %v18368_v9 = vand.u32 4294901760, %v16440_v19  ;;  %10880 = vmatprep.subr.mxu1 %v19653_v7  ;;  %v19656_v23 = vld [vmem:[#allocation7_spill] sm:$0xff] }
 0x586   : > { %v6048_v63 = vadd.f32 %v16221_v13, %v19654_v36  ;;  %v6739_v25 = vadd.f32 %v6738_v56, %v16095_v20  ;;  %10667 = vmatmul.mubr.f32.vlgmr.msra.gmra.mxu0 %v7519_v50  ;;  %v7379_v54 = vadd.f32 %v7347_v55, %v7279_v57  ;;  %10881 = vmatpush3.msra.mxu1 %v19653_v7  ;;  %v19659_v50 = vld [vmem:[#allocation122_spill] sm:$0xff] }
 0x587   : > { %19652 = vst [vmem:[#allocation83_spill] sm:$0xff] %v16451_v33  ;;  %v7244_v58 = vmin.f32 %v7051_v43, %v7053_v30  ;;  %v7312_v44 = vadd.f32 %v7053_v30, %v7051_v43  ;;  %v16460_v62 = vsub.f32 %v7378_v49, %v16451_v33  ;;  %10750 = vmatmul.mubr.f32.gmra.mxu1 %v16451_v33  ;;  %v6743_v41 = vpop.f32.mrf.mxu0  ;;  %v16463_v47 = vpop.f32.mrf.mxu1 }
 0x588   : > { %v7528_v13 = vsub.f32 %v16440_v19, %v18368_v9  ;;  %v7058_v20 = vadd.f32 %v16382_v59, %v6737_v35  ;;  %v7060_v27 = vadd.f32 %v16396_v0, %v6739_v25  ;;  %v6744_v53 = vadd.f32 %v6743_v41, %v16107_v46  ;;  %10795 = vmatpush3.msra.mxu0 %v19656_v23  ;;  %v19661_v41 = vld [vmem:[#allocation99_spill] sm:$0xff] }
 0x589   : > { %v16471_v1 = vand.u32 4294901760, %v7379_v54  ;;  %10882 = vmatprep.subr.mxu1 %v19657_v24  ;;  %v7280_v42 = vmul.f32 %v16314_v12, %v7244_v58  ;;  %v7348_v15 = vmul.f32 %v16320_v14, %v7312_v44  ;;  %v6745_v52 = vpop.f32.mrf.mxu0  ;;  %v16477_v39 = vpop.f32.mrf.mxu1  ;;  %v18367_v59 = vand.u32 4294901760, %v16460_v62  ;;  %10796 = vmatprep.subr.mxu0 %v19658_v4  ;;  %v19660_v58 = vld [vmem:[#allocation123_spill] sm:$0xff] }
 0x58a   : > { %v7529_v6 = vand.u32 4294901760, %v7528_v13  ;;  %10883 = vmatpush3.msra.mxu1 %v19657_v24  ;;  %v7245_v46 = vmin.f32 %v7058_v20, %v7060_v27  ;;  %v7313_v0 = vadd.f32 %v7060_v27, %v7058_v20  ;;  %v7065_v49 = vadd.f32 %v16409_v61, %v6744_v53  ;;  %10797 = vmatpush3.msra.mxu0 %v19658_v4  ;;  %v19663_v23 = vld [vmem:[#allocation23_spill] sm:$0xff] }
 0x58b   : > { %19655 = vst [vmem:[#allocation70_spill] sm:$0xff] %v16471_v1  ;;  %v6746_v57 = vadd.f32 %v6745_v52, %v19659_v50  ;;  %10752 = vmatprep.mubr.f32.mxu1 %v16471_v1  ;;  %v6750_v55 = vpop.f32.mrf.mxu0  ;;  %v16485_v35 = vpop.f32.mrf.mxu1  ;;  %v7538_v43 = vsub.f32 %v16460_v62, %v18367_v59  ;;  %v7380_v30 = vadd.f32 %v7348_v15, %v7280_v42  ;;  %v19664_v15 = vld [vmem:[#allocation35_spill] sm:$0xff] }
 0x58c   : > { %10669 = vmatprep.mubr.f32.mxu0 %v7529_v6  ;;  %v16491_v56 = vsub.f32 %v7379_v54, %v16471_v1  ;;  %v7281_v61 = vmul.f32 %v16314_v12, %v7245_v46  ;;  %v7349_v36 = vmul.f32 %v16320_v14, %v7313_v0  ;;  %v6751_v44 = vadd.f32 %v6750_v55, %v19660_v58  ;;  %v19665_v46 = vld [vmem:[#allocation16_spill] sm:$0xff] }
 0x58d   : > { %v7067_v25 = vadd.f32 %v16426_v32, %v6746_v57  ;;  %10798 = vmatprep.subr.mxu0 %v19661_v41  ;;  %v6752_v13 = vpop.f32.mrf.mxu0  ;;  %v16499_v20 = vpop.f32.mrf.mxu1  ;;  %v7539_v27 = vand.u32 4294901760, %v7538_v43  ;;  %v16501_v53 = vand.u32 4294901760, %v7380_v30  ;;  %v16505_v42 = vadd.f32 %v19663_v23, %v6048_v63  ;;  %10884 = vmatprep.subr.mxu1 %v19664_v15  ;;  %v19666_v43 = vld [vmem:[#allocation124_spill] sm:$0xff] }
 0x58e   : > { %v18365_v54 = vand.u32 4294901760, %v16491_v56  ;;  %10799 = vmatpush3.msra.mxu0 %v19661_v41  ;;  %v7072_v6 = vadd.f32 %v16437_v45, %v6751_v44  ;;  %v6753_v4 = vadd.f32 %v6752_v13, %v16342_v38  ;;  %v19668_v58 = vld [vmem:[#allocation28_spill] sm:$0xff]  ;;  %10885 = vmatpush3.msra.mxu1 %v19664_v15 }
 0x58f   : > { %19662 = vst [vmem:[#allocation65_spill] sm:$0xff] %v16501_v53  ;;  %v7246_v32 = vmin.f32 %v7065_v49, %v7067_v25  ;;  %v7314_v52 = vadd.f32 %v7067_v25, %v7065_v49  ;;  %10800 = vmatprep.subr.mxu0 %v19665_v46  ;;  %10670 = vmatmul.mubr.f32.gmra.mxu0 %v7539_v27  ;;  %v6757_v63 = vpop.f32.mrf.mxu0  ;;  %v16516_v50 = vpop.f32.mrf.mxu1 }
 0x590   : > { %v16513_v0 = vsub.f32 %v7380_v30, %v16501_v53  ;;  %10753 = vmatmul.mubr.f32.gmra.mxu1 %v16501_v53  ;;  %v7548_v57 = vsub.f32 %v16491_v56, %v18365_v54  ;;  %v7381_v49 = vadd.f32 %v7349_v36, %v7281_v61  ;;  %v7074_v55 = vadd.f32 %v16449_v10, %v6753_v4  ;;  %v19667_v30 = vld [vmem:[#allocation91_spill] sm:$0xff]  ;;  %v19670_v36 = vld [vmem:[#allocation22_spill] sm:$0xff] }
 0x591   : > { %v7282_v45 = vmul.f32 %v16314_v12, %v7246_v32  ;;  %v7350_v38 = vmul.f32 %v16320_v14, %v7314_v52  ;;  %v6758_v25 = vadd.f32 %v6757_v63, %v19666_v43  ;;  %10801 = vmatpush3.msra.mxu0 %v19665_v46  ;;  %v6056_v44 = vadd.f32 %v19668_v58, %v19667_v30  ;;  %v6759_v41 = vpop.f32.mrf.mxu0  ;;  %v16528_v13 = vpop.f32.mrf.mxu1  ;;  %v19672_v58 = vld [vmem:[#allocation107_spill] sm:$0xff] }
 0x592   : > { %v7549_v27 = vand.u32 4294901760, %v7548_v57  ;;  %v16530_v23 = vand.u32 4294901760, %v7381_v49  ;;  %v18366_v61 = vand.u32 4294901760, %v16513_v0  ;;  %10802 = vmatprep.subr.mxu0 %v19670_v36  ;;  %v7247_v10 = vmin.f32 %v7072_v6, %v7074_v55 }
 0x593   : > { %v7315_v32 = vadd.f32 %v7074_v55, %v7072_v6  ;;  %v7079_v52 = vadd.f32 %v16463_v47, %v6758_v25  ;;  %v6760_v4 = vadd.f32 %v6759_v41, %v16345_v37  ;;  %10803 = vmatpush3.msra.mxu0 %v19670_v36  ;;  %v6764_v46 = vpop.f32.mrf.mxu0  ;;  %v16539_v63 = vpop.f32.mrf.mxu1  ;;  %v7382_v43 = vadd.f32 %v7350_v38, %v7282_v45  ;;  %v19671_v55 = vld [vmem:[#allocation125_spill] sm:$0xff] }
 0x594   : > { %19669 = vst [vmem:[#allocation80_spill] sm:$0xff] %v16530_v23  ;;  %10672 = vmatprep.mubr.f32.mxu0 %v7549_v27  ;;  %10755 = vmatprep.mubr.f32.mxu1 %v16530_v23  ;;  %v7558_v57 = vsub.f32 %v16513_v0, %v18366_v61  ;;  %v16545_v30 = vsub.f32 %v7381_v49, %v16530_v23  ;;  %v19674_v49 = vld [vmem:[#allocation33_spill] sm:$0xff] }
 0x595   : > { %v7283_v47 = vmul.f32 %v16314_v12, %v7247_v10  ;;  %v7351_v37 = vmul.f32 %v16320_v14, %v7315_v32  ;;  %v7081_v6 = vadd.f32 %v16477_v39, %v6760_v4  ;;  %v6765_v25 = vadd.f32 %v6764_v46, %v19671_v55  ;;  %10804 = vmatprep.subr.mxu0 %v19672_v58  ;;  %v6766_v41 = vpop.f32.mrf.mxu0  ;;  %v16552_v27 = vpop.f32.mrf.mxu1  ;;  %v19675_v10 = vld [vmem:[#allocation43_spill] sm:$0xff]  ;;  %v19676_v55 = vld [vmem:[#allocation109_spill] sm:$0xff] }
 0x596   : > { %v7559_v36 = vand.u32 4294901760, %v7558_v57  ;;  %v16554_v54 = vand.u32 4294901760, %v7382_v43  ;;  %v18371_v45 = vand.u32 4294901760, %v16545_v30  ;;  %v16558_v38 = vadd.f32 %v19674_v49, %v6056_v44  ;;  %10805 = vmatpush3.msra.mxu0 %v19672_v58  ;;  %10886 = vmatprep.subr.mxu1 %v19675_v10 }
 0x597   : > { %v7248_v39 = vmin.f32 %v7079_v52, %v7081_v6  ;;  %v7316_v32 = vadd.f32 %v7081_v6, %v7079_v52  ;;  %v7086_v4 = vadd.f32 %v16485_v35, %v6765_v25  ;;  %v6767_v46 = vadd.f32 %v6766_v41, %v16348_v18  ;;  %10806 = vmatprep.subr.mxu0 %v19676_v55  ;;  %v6771_v44 = vpop.f32.mrf.mxu0  ;;  %v16569_v49 = vpop.f32.mrf.mxu1  ;;  %v19677_v25 = vld [vmem:[#allocation126_spill] sm:$0xff] }
 0x598   : > { %19673 = vst [vmem:[#allocation31_spill] sm:$0xff] %v16554_v54  ;;  %10673 = vmatmul.mubr.f32.gmra.mxu0 %v7559_v36  ;;  %v16566_v57 = vsub.f32 %v7382_v43, %v16554_v54  ;;  %10756 = vmatmul.mubr.f32.gmra.mxu1 %v16554_v54  ;;  %v7568_v58 = vsub.f32 %v16545_v30, %v18371_v45  ;;  %v19678_v43 = vld [vmem:[#allocation92_spill] sm:$0xff]  ;;  %v19679_v36 = vld [vmem:[#allocation21_spill] sm:$0xff] }
 0x599   : > { %v7383_v52 = vadd.f32 %v7351_v37, %v7283_v47  ;;  %v7284_v35 = vmul.f32 %v16314_v12, %v7248_v39  ;;  %v7352_v18 = vmul.f32 %v16320_v14, %v7316_v32  ;;  %v7088_v6 = vadd.f32 %v16499_v20, %v6767_v46  ;;  %10807 = vmatpush3.msra.mxu0 %v19676_v55  ;;  %v6773_v59 = vpop.f32.mrf.mxu0  ;;  %v16581_v9 = vpop.f32.mrf.mxu1  ;;  %v19681_v37 = vld [vmem:[#allocation111_spill] sm:$0xff] }
 0x59a   : > { %v6772_v41 = vadd.f32 %v6771_v44, %v19677_v25  ;;  %v6064_v61 = vadd.f32 %v19679_v36, %v19678_v43  ;;  %v7569_v40 = vand.u32 4294901760, %v7568_v58  ;;  %v18372_v47 = vand.u32 4294901760, %v16566_v57  ;;  %10887 = vmatpush3.msra.mxu1 %v19675_v10  ;;  %10808 = vmatprep.subr.mxu0 %v19681_v37 }
 0x59b   : > { %v16583_v11 = vand.u32 4294901760, %v7383_v52  ;;  %v7249_v20 = vmin.f32 %v7086_v4, %v7088_v6  ;;  %v7317_v39 = vadd.f32 %v7088_v6, %v7086_v4  ;;  %v6774_v46 = vadd.f32 %v6773_v59, %v16358_v2  ;;  %10809 = vmatpush3.msra.mxu0 %v19681_v37  ;;  %v6778_v55 = vpop.f32.mrf.mxu0  ;;  %v16592_v44 = vpop.f32.mrf.mxu1  ;;  %v19683_v6 = vld [vmem:[#allocation8_spill] sm:$0xff] }
 0x59c   : > { %v7093_v32 = vadd.f32 %v16516_v50, %v6772_v41  ;;  %10675 = vmatprep.mubr.f32.mxu0 %v7569_v40  ;;  %v7578_v58 = vsub.f32 %v16566_v57, %v18372_v47  ;;  %v7384_v25 = vadd.f32 %v7352_v18, %v7284_v35  ;;  %v19682_v40 = vld [vmem:[#allocation127_spill] sm:$0xff]  ;;  %10888 = vmatprep.subr.mxu1 %v19683_v6 }
 0x59d   : > { %19680 = vst [vmem:[#allocation50_spill] sm:$0xff] %v16583_v11  ;;  %10758 = vmatprep.mubr.f32.mxu1 %v16583_v11  ;;  %v16598_v43 = vsub.f32 %v7383_v52, %v16583_v11  ;;  %v7285_v50 = vmul.f32 %v16314_v12, %v7249_v20  ;;  %v7353_v2 = vmul.f32 %v16320_v14, %v7317_v39  ;;  %v6780_v41 = vpop.f32.mrf.mxu0  ;;  %v16605_v36 = vpop.f32.mrf.mxu1  ;;  %v19685_v52 = vld [vmem:[#allocation81_spill] sm:$0xff] }
 0x59e   : > { %v7095_v59 = vadd.f32 %v16528_v13, %v6774_v46  ;;  %v6779_v4 = vadd.f32 %v6778_v55, %v19682_v40  ;;  %v7579_v37 = vand.u32 4294901760, %v7578_v58  ;;  %v16607_v45 = vand.u32 4294901760, %v7384_v25  ;;  %10889 = vmatpush3.msra.mxu1 %v19683_v6  ;;  %v19686_v20 = vld [vmem:[#allocation97_spill] sm:$0xff] }
 0x59f   : > { %v18381_v35 = vand.u32 4294901760, %v16598_v43  ;;  %v16611_v18 = vadd.f32 %v19685_v52, %v6064_v61  ;;  %10810 = vmatprep.subr.mxu0 %v19686_v20  ;;  %v6781_v55 = vadd.f32 %v6780_v41, %v16361_v22  ;;  %v6785_v61 = vpop.f32.mrf.mxu0  ;;  %v16622_v40 = vpop.f32.mrf.mxu1 }
 0x5a0   : > { %19684 = vst [vmem:[#allocation68_spill] sm:$0xff] %v16607_v45  ;;  %v7250_v13 = vmin.f32 %v7093_v32, %v7095_v59  ;;  %v7318_v39 = vadd.f32 %v7095_v59, %v7093_v32  ;;  %v7100_v46 = vadd.f32 %v16539_v63, %v6779_v4  ;;  %10811 = vmatpush3.msra.mxu0 %v19686_v20  ;;  %v19687_v4 = vld [vmem:[#allocation128_spill] sm:$0xff]  ;;  %v19690_v20 = vld [vmem:[#allocation46_spill] sm:$0xff] }
 0x5a1   : > { %10676 = vmatmul.mubr.f32.gmra.mxu0 %v7579_v37  ;;  %v16619_v58 = vsub.f32 %v7384_v25, %v16607_v45  ;;  %10759 = vmatmul.mubr.f32.gmra.mxu1 %v16607_v45  ;;  %v7588_v52 = vsub.f32 %v16598_v43, %v18381_v35  ;;  %v7385_v32 = vadd.f32 %v7353_v2, %v7285_v50  ;;  %v19688_v25 = vld [vmem:[#allocation36_spill] sm:$0xff]  ;;  %v19689_v37 = vld [vmem:[#allocation93_spill] sm:$0xff]  ;;  %v6787_v45 = vpop.f32.mrf.mxu0  ;;  %v16634_v11 = vpop.f32.mrf.mxu1 }
 0x5a2   : > { %v7286_v63 = vmul.f32 %v16314_v12, %v7250_v13  ;;  %v7354_v22 = vmul.f32 %v16320_v14, %v7318_v39  ;;  %v7102_v59 = vadd.f32 %v16552_v27, %v6781_v55  ;;  %v6786_v41 = vadd.f32 %v6785_v61, %v19687_v4  ;;  %10890 = vmatprep.subr.mxu1 %v19688_v25  ;;  %v19692_v2 = vld [vmem:[#allocation13_spill] sm:$0xff] }
 0x5a3   : > { %v6072_v47 = vadd.f32 %v19690_v20, %v19689_v37  ;;  %v7589_v54 = vand.u32 4294901760, %v7588_v52  ;;  %v16636_v23 = vand.u32 4294901760, %v7385_v32  ;;  %v18384_v50 = vand.u32 4294901760, %v16619_v58  ;;  %10891 = vmatpush3.msra.mxu1 %v19688_v25  ;;  %10812 = vmatprep.subr.mxu0 %v19692_v2  ;;  %v6792_v61 = vpop.f32.mrf.mxu0  ;;  %v16645_v52 = vpop.f32.mrf.mxu1 }
 0x5a4   : > { %v7251_v27 = vmin.f32 %v7100_v46, %v7102_v59  ;;  %v7319_v13 = vadd.f32 %v7102_v59, %v7100_v46  ;;  %v7107_v39 = vadd.f32 %v16569_v49, %v6786_v41  ;;  %v6788_v55 = vadd.f32 %v6787_v45, %v16373_v26  ;;  %10813 = vmatpush3.msra.mxu0 %v19692_v2  ;;  %v19694_v59 = vld [vmem:[#allocation58_spill] sm:$0xff] }
 0x5a5   : > { %19691 = vst [vmem:[#allocation38_spill] sm:$0xff] %v16636_v23  ;;  %10678 = vmatprep.mubr.f32.mxu0 %v7589_v54  ;;  %10761 = vmatprep.mubr.f32.mxu1 %v16636_v23  ;;  %v7598_v4 = vsub.f32 %v16619_v58, %v18384_v50  ;;  %v7386_v37 = vadd.f32 %v7354_v22, %v7286_v63  ;;  %v19693_v54 = vld [vmem:[#allocation129_spill] sm:$0xff]  ;;  %v6794_v41 = vpop.f32.mrf.mxu0  ;;  %v16658_v2 = vpop.f32.mrf.mxu1 }
 0x5a6   : > { %v16651_v20 = vsub.f32 %v7385_v32, %v16636_v23  ;;  %v7287_v49 = vmul.f32 %v16314_v12, %v7251_v27  ;;  %v7355_v26 = vmul.f32 %v16320_v14, %v7319_v13  ;;  %v7109_v45 = vadd.f32 %v16581_v9, %v6788_v55  ;;  %10892 = vmatprep.subr.mxu1 %v19694_v59  ;;  %v19696_v32 = vld [vmem:[#allocation134_spill] sm:$0xff]  ;;  %v19697_v27 = vld [vmem:[#allocation37_spill] sm:$0xff] }
 0x5a7   : > { %v6793_v46 = vadd.f32 %v6792_v61, %v19693_v54  ;;  %v7599_v35 = vand.u32 4294901760, %v7598_v4  ;;  %v16660_v53 = vand.u32 4294901760, %v7386_v37  ;;  %v16664_v22 = vadd.f32 %v19696_v32, %v6072_v47  ;;  %10893 = vmatpush3.msra.mxu1 %v19694_v59  ;;  %10814 = vmatprep.subr.mxu0 %v19697_v27  ;;  %v6799_v47 = vpop.f32.mrf.mxu0  ;;  %v16675_v54 = vpop.f32.mrf.mxu1 }
 0x5a8   : > { %v18393_v63 = vand.u32 4294901760, %v16651_v20  ;;  %v7252_v9 = vmin.f32 %v7107_v39, %v7109_v45  ;;  %v7320_v13 = vadd.f32 %v7109_v45, %v7107_v39  ;;  %v6795_v61 = vadd.f32 %v6794_v41, %v16376_v3  ;;  %10815 = vmatpush3.msra.mxu0 %v19697_v27  ;;  %v19700_v41 = vld [vmem:[#allocation62_spill] sm:$0xff] }
 0x5a9   : > { %19695 = vst [vmem:[#allocation39_spill] sm:$0xff] %v16660_v53  ;;  %v7114_v55 = vadd.f32 %v16592_v44, %v6793_v46  ;;  %10679 = vmatmul.mubr.f32.gmra.mxu0 %v7599_v35  ;;  %v16672_v4 = vsub.f32 %v7386_v37, %v16660_v53  ;;  %10762 = vmatmul.mubr.f32.gmra.mxu1 %v16660_v53  ;;  %v19698_v35 = vld [vmem:[#allocation130_spill] sm:$0xff]  ;;  %v19699_v37 = vld [vmem:[#allocation12_spill] sm:$0xff]  ;;  %v6801_v53 = vpop.f32.mrf.mxu0  ;;  %v16687_v23 = vpop.f32.mrf.mxu1 }
 0x5aa   : > { %v7608_v32 = vsub.f32 %v16651_v20, %v18393_v63  ;;  %v7387_v39 = vadd.f32 %v7355_v26, %v7287_v49  ;;  %v7288_v44 = vmul.f32 %v16314_v12, %v7252_v9  ;;  %v7356_v3 = vmul.f32 %v16320_v14, %v7320_v13  ;;  %10894 = vmatprep.subr.mxu1 %v19699_v37  ;;  %v19701_v27 = vld [vmem:[#allocation94_spill] sm:$0xff]  ;;  %v19703_v26 = vld [vmem:[#allocation56_spill] sm:$0xff] }
 0x5ab   : > { %v7116_v45 = vadd.f32 %v16605_v36, %v6795_v61  ;;  %v6800_v46 = vadd.f32 %v6799_v47, %v19698_v35  ;;  %v6080_v50 = vadd.f32 %v19701_v27, %v19700_v41  ;;  %v18396_v49 = vand.u32 4294901760, %v16672_v4  ;;  %10895 = vmatpush3.msra.mxu1 %v19699_v37  ;;  %10816 = vmatprep.subr.mxu0 %v19703_v26  ;;  %v6806_v47 = vpop.f32.mrf.mxu0 }
 0x5ac   : > { %v7609_v1 = vand.u32 4294901760, %v7608_v32  ;;  %v16689_v33 = vand.u32 4294901760, %v7387_v39  ;;  %v6802_v61 = vadd.f32 %v6801_v53, %v16388_v48  ;;  %10817 = vmatpush3.msra.mxu0 %v19703_v26  ;;  %v16698_v32 = vpop.f32.mrf.mxu1  ;;  %v7388_v41 = vadd.f32 %v7356_v3, %v7288_v44 }
 0x5ad   : > { %v7253_v36 = vmin.f32 %v7114_v55, %v7116_v45  ;;  %v7321_v9 = vadd.f32 %v7116_v45, %v7114_v55  ;;  %v7121_v13 = vadd.f32 %v16622_v40, %v6800_v46  ;;  %v7618_v35 = vsub.f32 %v16672_v4, %v18396_v49  ;;  %v19705_v45 = vld [vmem:[#allocation19_spill] sm:$0xff]  ;;  %v6808_v46 = vpop.f32.mrf.mxu0 }
 0x5ae   : > { %19702 = vst [vmem:[#allocation52_spill] sm:$0xff] %v16689_v33  ;;  %10681 = vmatprep.mubr.f32.mxu0 %v7609_v1  ;;  %10764 = vmatprep.mubr.f32.mxu1 %v16689_v33  ;;  %v16704_v27 = vsub.f32 %v7387_v39, %v16689_v33  ;;  %v7123_v53 = vadd.f32 %v16634_v11, %v6802_v61  ;;  %v19704_v1 = vld [vmem:[#allocation29_spill] sm:$0xff]  ;;  %v16711_v26 = vpop.f32.mrf.mxu1  ;;  %v16713_v60 = vand.u32 4294901760, %v7388_v41  ;;  %v19707_v39 = vld [vmem:[#allocation136_spill] sm:$0xff] }
 0x5af   : > { %v7289_v40 = vmul.f32 %v16314_v12, %v7253_v36  ;;  %v7357_v48 = vmul.f32 %v16320_v14, %v7321_v9  ;;  %v6807_v55 = vadd.f32 %v6806_v47, %v19704_v1  ;;  %10896 = vmatprep.subr.mxu1 %v19705_v45  ;;  %v7619_v63 = vand.u32 4294901760, %v7618_v35  ;;  %v19708_v36 = vld [vmem:[#allocation101_spill] sm:$0xff]  ;;  %v19709_v1 = vld [vmem:[#allocation75_spill] sm:$0xff] }
 0x5b0   : > { %19706 = vst [vmem:[#allocation5_spill] sm:$0xff] %v16713_v60  ;;  %v18406_v44 = vand.u32 4294901760, %v16704_v27  ;;  %v16717_v3 = vadd.f32 %v19707_v39, %v6080_v50  ;;  %10897 = vmatpush3.msra.mxu1 %v19705_v45  ;;  %10818 = vmatprep.subr.mxu0 %v19708_v36  ;;  %v7254_v11 = vmin.f32 %v7121_v13, %v7123_v53  ;;  %v6813_v50 = vpop.f32.mrf.mxu0  ;;  %v16728_v39 = vpop.f32.mrf.mxu1 }
 0x5b1   : > { %v7322_v9 = vadd.f32 %v7123_v53, %v7121_v13  ;;  %v7128_v61 = vadd.f32 %v16645_v52, %v6807_v55  ;;  %v6809_v47 = vadd.f32 %v6808_v46, %v16400_v17  ;;  %10898 = vmatprep.subr.mxu1 %v19709_v1  ;;  %10682 = vmatmul.mubr.f32.gmra.mxu0 %v7619_v63  ;;  %v19710_v63 = vld [vmem:[#allocation131_spill] sm:$0xff]  ;;  %v19712_v46 = vld [vmem:[#allocation25_spill] sm:$0xff] }
 0x5b2   : > { %v16725_v35 = vsub.f32 %v7388_v41, %v16713_v60  ;;  %10765 = vmatmul.mubr.f32.gmra.mxu1 %v16713_v60  ;;  %v7628_v49 = vsub.f32 %v16704_v27, %v18406_v44  ;;  %v7389_v13 = vadd.f32 %v7357_v48, %v7289_v40  ;;  %v7290_v52 = vmul.f32 %v16314_v12, %v7254_v11  ;;  %v19711_v41 = vld [vmem:[#allocation96_spill] sm:$0xff]  ;;  %v6815_v33 = vpop.f32.mrf.mxu0  ;;  %v16740_v5 = vpop.f32.mrf.mxu1  ;;  %v19714_v48 = vld [vmem:[#allocation69_spill] sm:$0xff] }
 0x5b3   : > { %v7358_v17 = vmul.f32 %v16320_v14, %v7322_v9  ;;  %v7130_v53 = vadd.f32 %v16658_v2, %v6809_v47  ;;  %v6814_v55 = vadd.f32 %v6813_v50, %v19710_v63  ;;  %10819 = vmatpush3.msra.mxu0 %v19708_v36  ;;  %v6088_v60 = vadd.f32 %v19712_v46, %v19711_v41  ;;  %v19715_v47 = vld [vmem:[#allocation89_spill] sm:$0xff] }
 0x5b4   : > { %v7629_v28 = vand.u32 4294901760, %v7628_v49  ;;  %v16742_v45 = vand.u32 4294901760, %v7389_v13  ;;  %v18408_v40 = vand.u32 4294901760, %v16725_v35  ;;  %10899 = vmatpush3.msra.mxu1 %v19709_v1  ;;  %10820 = vmatprep.subr.mxu0 %v19714_v48  ;;  %v6816_v36 = vadd.f32 %v6815_v33, %v16415_v31  ;;  %v6820_v49 = vpop.f32.mrf.mxu0  ;;  %v16751_v50 = vpop.f32.mrf.mxu1 }
 0x5b5   : > { %v7255_v2 = vmin.f32 %v7128_v61, %v7130_v53  ;;  %v7323_v11 = vadd.f32 %v7130_v53, %v7128_v61  ;;  %v7135_v9 = vadd.f32 %v16675_v54, %v6814_v55  ;;  %10900 = vmatprep.subr.mxu1 %v19715_v47  ;;  %v7390_v41 = vadd.f32 %v7358_v17, %v7290_v52 }
 0x5b6   : > { %19713 = vst [vmem:[#allocation57_spill] sm:$0xff] %v16742_v45  ;;  %10684 = vmatprep.mubr.f32.mxu0 %v7629_v28  ;;  %10767 = vmatprep.mubr.f32.mxu1 %v16742_v45  ;;  %v7638_v63 = vsub.f32 %v16725_v35, %v18408_v40  ;;  %v16757_v46 = vsub.f32 %v7389_v13, %v16742_v45  ;;  %v19716_v28 = vld [vmem:[#allocation132_spill] sm:$0xff]  ;;  %v6822_v53 = vpop.f32.mrf.mxu0  ;;  %v16764_v55 = vpop.f32.mrf.mxu1  ;;  %v19718_v13 = vld [vmem:[#allocation138_spill] sm:$0xff] }
 0x5b7   : > { %v7291_v54 = vmul.f32 %v16314_v12, %v7255_v2  ;;  %v7359_v31 = vmul.f32 %v16320_v14, %v7323_v11  ;;  %v7137_v33 = vadd.f32 %v16687_v23, %v6816_v36  ;;  %v6821_v61 = vadd.f32 %v6820_v49, %v19716_v28  ;;  %10901 = vmatpush3.msra.mxu1 %v19715_v47  ;;  %v19719_v2 = vld [vmem:[#allocation114_spill] sm:$0xff] }
 0x5b8   : > { %v7639_v44 = vand.u32 4294901760, %v7638_v63  ;;  %v16766_v1 = vand.u32 4294901760, %v7390_v41  ;;  %v18415_v52 = vand.u32 4294901760, %v16757_v46  ;;  %v16770_v17 = vadd.f32 %v19718_v13, %v6088_v60  ;;  %10902 = vmatprep.subr.mxu1 %v19719_v2  ;;  %10821 = vmatpush3.msra.mxu0 %v19714_v48  ;;  %v6827_v60 = vpop.f32.mrf.mxu0  ;;  %v16781_v28 = vpop.f32.mrf.mxu1  ;;  %v19723_v13 = vld [vmem:[#allocation9_spill] sm:$0xff] }
 0x5b9   : > { %v7256_v23 = vmin.f32 %v7135_v9, %v7137_v33  ;;  %v7324_v11 = vadd.f32 %v7137_v33, %v7135_v9  ;;  %v7142_v36 = vadd.f32 %v16698_v32, %v6821_v61  ;;  %v6823_v49 = vadd.f32 %v6822_v53, %v16434_v16  ;;  %10903 = vmatpush3.msra.mxu1 %v19719_v2  ;;  %v19722_v53 = vld [vmem:[#allocation98_spill] sm:$0xff] }
 0x5ba   : > { %19717 = vst [vmem:[#allocation40_spill] sm:$0xff] %v16766_v1  ;;  %10685 = vmatmul.mubr.f32.gmra.mxu0 %v7639_v44  ;;  %v16778_v63 = vsub.f32 %v7390_v41, %v16766_v1  ;;  %10768 = vmatmul.mubr.f32.gmra.mxu1 %v16766_v1  ;;  %v7648_v48 = vsub.f32 %v16757_v46, %v18415_v52  ;;  %v19720_v44 = vld [vmem:[#allocation133_spill] sm:$0xff]  ;;  %v19721_v41 = vld [vmem:[#allocation118_spill] sm:$0xff]  ;;  %v6829_v1 = vpop.f32.mrf.mxu0  ;;  %v16793_v45 = vpop.f32.mrf.mxu1 }
 0x5bb   : > { %v7391_v9 = vadd.f32 %v7359_v31, %v7291_v54  ;;  %v7292_v32 = vmul.f32 %v16314_v12, %v7256_v23  ;;  %v7360_v16 = vmul.f32 %v16320_v14, %v7324_v11  ;;  %v7144_v33 = vadd.f32 %v16711_v26, %v6823_v49  ;;  %10904 = vmatprep.subr.mxu1 %v19721_v41  ;;  %v19725_v31 = vld [vmem:[#allocation17_spill] sm:$0xff] }
 0x5bc   : > { %v6828_v61 = vadd.f32 %v6827_v60, %v19720_v44  ;;  %v6096_v40 = vadd.f32 %v19723_v13, %v19722_v53  ;;  %v7649_v2 = vand.u32 4294901760, %v7648_v48  ;;  %v18417_v54 = vand.u32 4294901760, %v16778_v63  ;;  %10905 = vmatpush3.msra.mxu1 %v19721_v41  ;;  %10822 = vmatprep.subr.mxu0 %v19725_v31  ;;  %v6834_v60 = vpop.f32.mrf.mxu0  ;;  %v7169_v48 = vpop.f32.mrf.mxu1 }
 0x5bd   : > { %v16795_v47 = vand.u32 4294901760, %v7391_v9  ;;  %v7257_v26 = vmin.f32 %v7142_v36, %v7144_v33  ;;  %v7325_v23 = vadd.f32 %v7144_v33, %v7142_v36  ;;  %v6830_v49 = vadd.f32 %v6829_v1, %v16505_v42  ;;  %10823 = vmatpush3.msra.mxu0 %v19725_v31  ;;  %v19726_v1 = vld [vmem:[#allocation135_spill] sm:$0xff]  ;;  %v19727_v33 = vld [vmem:[#allocation117_spill] sm:$0xff]  ;;  %11034 = vmatprep.subr.mxu1 %v15704_v29 }
 0x5be   : > { %v7149_v11 = vadd.f32 %v16728_v39, %v6828_v61  ;;  %10687 = vmatprep.mubr.f32.mxu0 %v7649_v2  ;;  %v7658_v44 = vsub.f32 %v16778_v63, %v18417_v54  ;;  %v7392_v53 = vadd.f32 %v7360_v16, %v7292_v32  ;;  %v6835_v2 = vadd.f32 %v6834_v60, %v19726_v1  ;;  %v6836_v61 = vpop.f32.mrf.mxu0  ;;  %v16815_v31 = vpop.f32.mrf.mxu1  ;;  %v19730_v60 = vld [vmem:[#allocation6_spill] sm:$0xff] }
 0x5bf   : > { %19724 = vst [vmem:[#allocation7_spill] sm:$0xff] %v16795_v47  ;;  %10770 = vmatprep.mubr.f32.mxu1 %v16795_v47  ;;  %v16808_v13 = vsub.f32 %v7391_v9, %v16795_v47  ;;  %v7293_v36 = vmul.f32 %v16314_v12, %v7257_v26  ;;  %v7361_v39 = vmul.f32 %v16320_v14, %v7325_v23  ;;  %v19729_v9 = vld [vmem:[#allocation140_spill] sm:$0xff] }
 0x5c0   : > { %v7151_v42 = vadd.f32 %v16740_v5, %v6830_v49  ;;  %10824 = vmatprep.subr.mxu0 %v19727_v33  ;;  %v7659_v52 = vand.u32 4294901760, %v7658_v44  ;;  %v16817_v41 = vand.u32 4294901760, %v7392_v53  ;;  %v16821_v16 = vadd.f32 %v19729_v9, %v6096_v40  ;;  %v6841_v40 = vpop.f32.mrf.mxu0  ;;  %v7176_v1 = vpop.f32.mrf.mxu1 }
 0x5c1   : > { %v18424_v32 = vand.u32 4294901760, %v16808_v13  ;;  %10825 = vmatpush3.msra.mxu0 %v19727_v33  ;;  %v7156_v23 = vadd.f32 %v16751_v50, %v6835_v2  ;;  %v6837_v49 = vadd.f32 %v6836_v61, %v16558_v38  ;;  %v7393_v9 = vadd.f32 %v7361_v39, %v7293_v36  ;;  %v19733_v2 = vld [vmem:[#allocation55_spill] sm:$0xff] }
 0x5c2   : > { %19728 = vst [vmem:[#allocation77_spill] sm:$0xff] %v16817_v41  ;;  %v7258_v5 = vmin.f32 %v7149_v11, %v7151_v42  ;;  %v7326_v26 = vadd.f32 %v7151_v42, %v7149_v11  ;;  %10954 = vmatprep.subr.mxu0 %v19730_v60  ;;  %10688 = vmatmul.mubr.f32.gmra.mxu0 %v7659_v52  ;;  %v19732_v42 = vld [vmem:[#allocation137_spill] sm:$0xff]  ;;  %v6843_v54 = vpop.f32.mrf.mxu0 }
 0x5c3   : > { %v16829_v44 = vsub.f32 %v7392_v53, %v16817_v41  ;;  %10771 = vmatmul.mubr.f32.gmra.mxu1 %v16817_v41  ;;  %v7668_v33 = vsub.f32 %v16808_v13, %v18424_v32  ;;  %v7158_v38 = vadd.f32 %v16764_v55, %v6837_v49  ;;  %v6842_v52 = vadd.f32 %v6841_v40, %v19732_v42  ;;  %v19734_v53 = vld [vmem:[#allocation11_spill] sm:$0xff]  ;;  %v7178_v41 = vpop.f32.mrf.mxu1 }
 0x5c4   : > { %v7294_v11 = vmul.f32 %v16314_v12, %v7258_v5  ;;  %v7362_v50 = vmul.f32 %v16320_v14, %v7326_v26  ;;  %v6104_v61 = vadd.f32 %v19734_v53, %v19733_v2  ;;  %v16841_v37 = vand.u32 4294901760, %v7393_v9  ;;  %v6848_v55 = vpop.f32.mrf.mxu0 }
 0x5c5   : > { %19731 = vst [vmem:[#allocation95_spill] sm:$0xff] %v16829_v44  ;;  %v7669_v47 = vand.u32 4294901760, %v7668_v33  ;;  %v18425_v59 = vand.u32 4294901760, %v16829_v44  ;;  %v7259_v32 = vmin.f32 %v7156_v23, %v7158_v38  ;;  %v7327_v36 = vadd.f32 %v7158_v38, %v7156_v23  ;;  %v7183_v26 = vpop.f32.mrf.mxu1 }
 0x5c6   : > { %19735 = vst [vmem:[#allocation122_spill] sm:$0xff] %v16841_v37  ;;  %v7163_v39 = vadd.f32 %v16781_v28, %v6842_v52  ;;  %v6844_v5 = vadd.f32 %v6843_v54, %v16611_v18  ;;  %10773 = vmatprep.mubr.f32.mxu1 %v16841_v37  ;;  %v7394_v40 = vadd.f32 %v7362_v50, %v7294_v11  ;;  %v19737_v18 = vld [vmem:[#allocation139_spill] sm:$0xff]  ;;  %v6850_v54 = vpop.f32.mrf.mxu0 }
 0x5c7   : > { %10690 = vmatprep.mubr.f32.mxu0 %v7669_v47  ;;  %v7678_v49 = vsub.f32 %v16829_v44, %v18425_v59  ;;  %v16851_v33 = vsub.f32 %v7393_v9, %v16841_v37  ;;  %v7295_v42 = vmul.f32 %v16314_v12, %v7259_v32  ;;  %v7363_v23 = vmul.f32 %v16320_v14, %v7327_v36  ;;  %v7185_v38 = vpop.f32.mrf.mxu1  ;;  %v19739_v59 = vld [vmem:[#allocation142_spill] sm:$0xff] }
 0x5c8   : > { %v7165_v28 = vadd.f32 %v16793_v45, %v6844_v5  ;;  %v6849_v47 = vadd.f32 %v6848_v55, %v19737_v18  ;;  %v16857_v2 = vand.u32 4294901760, %v7394_v40  ;;  %v16861_v11 = vadd.f32 %v19739_v59, %v6104_v61  ;;  %v6855_v36 = vpop.f32.mrf.mxu0 }
 0x5c9   : > { %19736 = vst [vmem:[#allocation123_spill] sm:$0xff] %v16851_v33  ;;  %v7679_v52 = vand.u32 4294901760, %v7678_v49  ;;  %v18432_v53 = vand.u32 4294901760, %v16851_v33  ;;  %v6851_v32 = vadd.f32 %v6850_v54, %v16664_v22  ;;  %v16868_v5 = vpop.f32.mrf.mxu1  ;;  %v7395_v59 = vadd.f32 %v7363_v23, %v7295_v42 }
 0x5ca   : > { %19738 = vst [vmem:[#allocation99_spill] sm:$0xff] %v16857_v2  ;;  %v7260_v9 = vmin.f32 %v7163_v39, %v7165_v28  ;;  %v7328_v50 = vadd.f32 %v7165_v28, %v7163_v39  ;;  %v7170_v37 = vadd.f32 %v7169_v48, %v6849_v47  ;;  %v16865_v45 = vsub.f32 %v7394_v40, %v16857_v2  ;;  %v19741_v39 = vld [vmem:[#allocation141_spill] sm:$0xff]  ;;  %v19742_v40 = vld [vmem:[#allocation15_spill] sm:$0xff]  ;;  %v19743_v28 = vld [vmem:[#allocation102_spill] sm:$0xff]  ;;  %v6857_v47 = vpop.f32.mrf.mxu0 }
 0x5cb   : > { %10691 = vmatmul.mubr.f32.gmra.mxu0 %v7679_v52  ;;  %10774 = vmatmul.mubr.f32.gmra.mxu1 %v16857_v2  ;;  %v7688_v55 = vsub.f32 %v16851_v33, %v18432_v53  ;;  %v7172_v22 = vadd.f32 %v16815_v31, %v6851_v32  ;;  %v6856_v49 = vadd.f32 %v6855_v36, %v19741_v39  ;;  %v7192_v54 = vpop.f32.mrf.mxu1  ;;  %v16879_v2 = vand.u32 4294901760, %v7395_v59 }
 0x5cc   : > { %19740 = vst [vmem:[#allocation23_spill] sm:$0xff] %v16865_v45  ;;  %v7296_v61 = vmul.f32 %v16314_v12, %v7260_v9  ;;  %v7364_v48 = vmul.f32 %v16320_v14, %v7328_v50  ;;  %v6112_v18 = vadd.f32 %v19743_v28, %v19742_v40  ;;  %v18436_v44 = vand.u32 4294901760, %v16865_v45  ;;  %v6862_v31 = vpop.f32.mrf.mxu0  ;;  %v19747_v40 = vld [vmem:[#allocation34_spill] sm:$0xff] }
 0x5cd   : > { %v7689_v52 = vand.u32 4294901760, %v7688_v55  ;;  %19744 = vst [vmem:[#allocation35_spill] sm:$0xff] %v16879_v2  ;;  %v7261_v53 = vmin.f32 %v7170_v37, %v7172_v22  ;;  %v7329_v42 = vadd.f32 %v7172_v22, %v7170_v37  ;;  %v7177_v23 = vadd.f32 %v7176_v1, %v6856_v49  ;;  %10776 = vmatprep.mubr.f32.mxu1 %v16879_v2  ;;  %v16884_v50 = vpop.f32.mrf.mxu1  ;;  %v19746_v49 = vld [vmem:[#allocation103_spill] sm:$0xff] }
 0x5ce   : > { %v6858_v9 = vadd.f32 %v6857_v47, %v16717_v3  ;;  %v7698_v32 = vsub.f32 %v16865_v45, %v18436_v44  ;;  %v7396_v36 = vadd.f32 %v7364_v48, %v7296_v61  ;;  %v16890_v55 = vsub.f32 %v7395_v59, %v16879_v2  ;;  %v19745_v3 = vld [vmem:[#allocation143_spill] sm:$0xff]  ;;  %v6864_v47 = vpop.f32.mrf.mxu0 }
 0x5cf   : > { %10693 = vmatprep.mubr.f32.mxu0 %v7689_v52  ;;  %v7297_v39 = vmul.f32 %v16314_v12, %v7261_v53  ;;  %v7365_v37 = vmul.f32 %v16320_v14, %v7329_v42  ;;  %v6863_v22 = vadd.f32 %v6862_v31, %v19745_v3  ;;  %v6120_v28 = vadd.f32 %v19747_v40, %v19746_v49  ;;  %v7199_v52 = vpop.f32.mrf.mxu1 }
 0x5d0   : > { %v7179_v1 = vadd.f32 %v7178_v41, %v6858_v9  ;;  %v7699_v33 = vand.u32 4294901760, %v7698_v32  ;;  %v16897_v25 = vand.u32 4294901760, %v7396_v36  ;;  %v18444_v61 = vand.u32 4294901760, %v16890_v55  ;;  %v6869_v42 = vpop.f32.mrf.mxu0 }
 0x5d1   : > { %v7184_v44 = vadd.f32 %v7183_v26, %v6863_v22  ;;  %v6865_v53 = vadd.f32 %v6864_v47, %v16770_v17  ;;  %v7204_v9 = vpop.f32.mrf.mxu1  ;;  %v7397_v32 = vadd.f32 %v7365_v37, %v7297_v39  ;;  %v19751_v47 = vld [vmem:[#allocation144_spill] sm:$0xff]  ;;  %v19752_v37 = vld [vmem:[#allocation146_spill] sm:$0xff] }
 0x5d2   : > { %19748 = vst [vmem:[#allocation16_spill] sm:$0xff] %v16897_v25  ;;  %v7262_v48 = vmin.f32 %v7177_v23, %v7179_v1  ;;  %v7330_v59 = vadd.f32 %v7179_v1, %v7177_v23  ;;  %10694 = vmatmul.mubr.f32.gmra.mxu0 %v7699_v33  ;;  %v16902_v41 = vsub.f32 %v7396_v36, %v16897_v25  ;;  %v19749_v1 = vld [vmem:[#allocation145_spill] sm:$0xff]  ;;  %v6871_v33 = vpop.f32.mrf.mxu0 }
 0x5d3   : > { %10777 = vmatmul.mubr.f32.gmra.mxu1 %v16897_v25  ;;  %v7708_v31 = vsub.f32 %v16890_v55, %v18444_v61  ;;  %v7186_v26 = vadd.f32 %v7185_v38, %v6865_v53  ;;  %v6870_v17 = vadd.f32 %v6869_v42, %v19749_v1  ;;  %v7206_v22 = vpop.f32.mrf.mxu1  ;;  %v16911_v49 = vand.u32 4294901760, %v7397_v32 }
 0x5d4   : > { %v7298_v3 = vmul.f32 %v16314_v12, %v7262_v48  ;;  %v7366_v23 = vmul.f32 %v16320_v14, %v7330_v59  ;;  %v18443_v40 = vand.u32 4294901760, %v16902_v41  ;;  %v6493_v25 = vadd.f32 %v19751_v47, %v6112_v18  ;;  %v6876_v38 = vpop.f32.mrf.mxu0 }
 0x5d5   : > { %v7709_v36 = vand.u32 4294901760, %v7708_v31  ;;  %19750 = vst [vmem:[#allocation124_spill] sm:$0xff] %v16911_v49  ;;  %v7263_v2 = vmin.f32 %v7184_v44, %v7186_v26  ;;  %v7331_v45 = vadd.f32 %v7186_v26, %v7184_v44  ;;  %v6872_v39 = vadd.f32 %v6871_v33, %v16821_v16  ;;  %10779 = vmatprep.mubr.f32.mxu1 %v16911_v49  ;;  %v16918_v59 = vpop.f32.mrf.mxu1  ;;  %v19754_v26 = vld [vmem:[#allocation147_spill] sm:$0xff] }
 0x5d6   : > { %v6502_v48 = vadd.f32 %v19752_v37, %v6120_v28  ;;  %v7718_v53 = vsub.f32 %v16902_v41, %v18443_v40  ;;  %v7398_v42 = vadd.f32 %v7366_v23, %v7298_v3  ;;  %v16924_v31 = vsub.f32 %v7397_v32, %v16911_v49  ;;  %v6878_v33 = vpop.f32.mrf.mxu0  ;;  %v19756_v3 = vld [vmem:[#allocation24_spill] sm:$0xff]  ;;  %v19757_v23 = vld [vmem:[#allocation79_spill] sm:$0xff] }
 0x5d7   : > { %10696 = vmatprep.mubr.f32.mxu0 %v7709_v36  ;;  %v7299_v44 = vmul.f32 %v16314_v12, %v7263_v2  ;;  %v7367_v16 = vmul.f32 %v16320_v14, %v7331_v45  ;;  %v7191_v18 = vadd.f32 %v16868_v5, %v6870_v17  ;;  %v7193_v28 = vadd.f32 %v7192_v54, %v6872_v39  ;;  %v7213_v36 = vpop.f32.mrf.mxu1 }
 0x5d8   : > { %19753 = vst [vmem:[#allocation91_spill] sm:$0xff] %v16924_v31  ;;  %v6877_v1 = vadd.f32 %v6876_v38, %v19754_v26  ;;  %v7719_v47 = vand.u32 4294901760, %v7718_v53  ;;  %v16930_v37 = vand.u32 4294901760, %v7398_v42  ;;  %v18449_v40 = vand.u32 4294901760, %v16924_v31  ;;  %v6883_v54 = vpop.f32.mrf.mxu0 }
 0x5d9   : > { %v6128_v32 = vadd.f32 %v19757_v23, %v19756_v3  ;;  %v7399_v61 = vadd.f32 %v7367_v16, %v7299_v44  ;;  %v7264_v49 = vmin.f32 %v7191_v18, %v7193_v28  ;;  %v7332_v2 = vadd.f32 %v7193_v28, %v7191_v18  ;;  %v16940_v17 = vpop.f32.mrf.mxu1  ;;  %v19758_v44 = vld [vmem:[#allocation149_spill] sm:$0xff] }
 0x5da   : > { %19755 = vst [vmem:[#allocation28_spill] sm:$0xff] %v16930_v37  ;;  %v6879_v45 = vadd.f32 %v6878_v33, %v16861_v11  ;;  %10697 = vmatmul.mubr.f32.gmra.mxu0 %v7719_v47  ;;  %v16937_v5 = vsub.f32 %v7398_v42, %v16930_v37  ;;  %10780 = vmatmul.mubr.f32.gmra.mxu1 %v16930_v37  ;;  %v6885_v28 = vpop.f32.mrf.mxu0  ;;  %v19760_v47 = vld [vmem:[#allocation112_spill] sm:$0xff]  ;;  %v19761_v3 = vld [vmem:[#allocation41_spill] sm:$0xff] }
 0x5db   : > { %v7728_v39 = vsub.f32 %v16924_v31, %v18449_v40  ;;  %v7300_v38 = vmul.f32 %v16314_v12, %v7264_v49  ;;  %v7368_v53 = vmul.f32 %v16320_v14, %v7332_v2  ;;  %v6884_v16 = vadd.f32 %v6883_v54, %v19758_v44  ;;  %v7220_v31 = vpop.f32.mrf.mxu1 }
 0x5dc   : > { %v16948_v11 = vand.u32 4294901760, %v7399_v61  ;;  %v7198_v42 = vadd.f32 %v16884_v50, %v6877_v1  ;;  %v7200_v18 = vadd.f32 %v7199_v52, %v6879_v45  ;;  %v18453_v33 = vand.u32 4294901760, %v16937_v5  ;;  %v6890_v50 = vpop.f32.mrf.mxu0  ;;  %v19762_v45 = vld [vmem:[#allocation151_spill] sm:$0xff] }
 0x5dd   : > { %v7729_v26 = vand.u32 4294901760, %v7728_v39  ;;  %v6136_v23 = vadd.f32 %v19761_v3, %v19760_v47  ;;  %v7400_v37 = vadd.f32 %v7368_v53, %v7300_v38  ;;  %v6886_v40 = vadd.f32 %v6885_v28, %v6493_v25 }
 0x5de   : > { %19759 = vst [vmem:[#allocation22_spill] sm:$0xff] %v16948_v11  ;;  %10782 = vmatprep.mubr.f32.mxu1 %v16948_v11  ;;  %v16956_v49 = vsub.f32 %v7399_v61, %v16948_v11  ;;  %v7265_v2 = vmin.f32 %v7198_v42, %v7200_v18  ;;  %v7333_v54 = vadd.f32 %v7200_v18, %v7198_v42  ;;  %v6892_v42 = vpop.f32.mrf.mxu0 }
 0x5df   : > { %v7205_v44 = vadd.f32 %v7204_v9, %v6884_v16  ;;  %10699 = vmatprep.mubr.f32.mxu0 %v7729_v26  ;;  %v7738_v52 = vsub.f32 %v16937_v5, %v18453_v33  ;;  %v7207_v1 = vadd.f32 %v7206_v22, %v6886_v40  ;;  %v6891_v39 = vadd.f32 %v6890_v50, %v19762_v45  ;;  %v19764_v26 = vld [vmem:[#allocation148_spill] sm:$0xff]  ;;  %v7225_v40 = vpop.f32.mrf.mxu1 }
 0x5e0   : > { %v16962_v38 = vand.u32 4294901760, %v7400_v37  ;;  %v18452_v25 = vand.u32 4294901760, %v16956_v49  ;;  %v7301_v61 = vmul.f32 %v16314_v12, %v7265_v2  ;;  %v7369_v53 = vmul.f32 %v16320_v14, %v7333_v54  ;;  %v6897_v3 = vpop.f32.mrf.mxu0  ;;  %v19765_v2 = vld [vmem:[#allocation150_spill] sm:$0xff] }
 0x5e1   : > { %v7739_v9 = vand.u32 4294901760, %v7738_v52  ;;  %v7266_v16 = vmin.f32 %v7205_v44, %v7207_v1  ;;  %v7334_v18 = vadd.f32 %v7207_v1, %v7205_v44  ;;  %v6893_v28 = vadd.f32 %v6892_v42, %v6502_v48  ;;  %v19766_v1 = vld [vmem:[#allocation153_spill] sm:$0xff] }
 0x5e2   : > { %19763 = vst [vmem:[#allocation125_spill] sm:$0xff] %v16962_v38  ;;  %10783 = vmatmul.mubr.f32.gmra.mxu1 %v16962_v38  ;;  %v6511_v47 = vadd.f32 %v19764_v26, %v6128_v32  ;;  %v7401_v22 = vadd.f32 %v7369_v53, %v7301_v61  ;;  %v7748_v50 = vsub.f32 %v16956_v49, %v18452_v25  ;;  %v6899_v53 = vpop.f32.mrf.mxu0  ;;  %v19767_v25 = vld [vmem:[#allocation30_spill] sm:$0xff] }
 0x5e3   : > { %10700 = vmatmul.mubr.f32.gmra.mxu0 %v7739_v9  ;;  %v6520_v45 = vadd.f32 %v19765_v2, %v6136_v23  ;;  %v16974_v54 = vsub.f32 %v7400_v37, %v16962_v38  ;;  %v7302_v44 = vmul.f32 %v16314_v12, %v7266_v16  ;;  %v7370_v48 = vmul.f32 %v16320_v14, %v7334_v18  ;;  %v19768_v23 = vld [vmem:[#allocation115_spill] sm:$0xff]  ;;  %v7227_v16 = vpop.f32.mrf.mxu1 }
 0x5e4   : > { %v7212_v52 = vadd.f32 %v16918_v59, %v6891_v39  ;;  %v7214_v32 = vadd.f32 %v7213_v36, %v6893_v28  ;;  %v6898_v61 = vadd.f32 %v6897_v3, %v19766_v1  ;;  %v7749_v42 = vand.u32 4294901760, %v7748_v50  ;;  %v6904_v59 = vpop.f32.mrf.mxu0  ;;  %v19769_v28 = vld [vmem:[#allocation154_spill] sm:$0xff] }
 0x5e5   : > { %v16980_v9 = vand.u32 4294901760, %v7401_v22  ;;  %v7757_v26 = vand.u32 4294901760, %v16974_v54  ;;  %v6144_v2 = vadd.f32 %v19768_v23, %v19767_v25  ;;  %v7402_v37 = vadd.f32 %v7370_v48, %v7302_v44 }
 0x5e6   : > { %v7267_v33 = vmin.f32 %v7212_v52, %v7214_v32  ;;  %v7335_v38 = vadd.f32 %v7214_v32, %v7212_v52  ;;  %v6900_v11 = vadd.f32 %v6899_v53, %v6511_v47  ;;  %10702 = vmatprep.mubr.f32.mxu0 %v7749_v42  ;;  %v6905_v3 = vadd.f32 %v6904_v59, %v19769_v28  ;;  %v6906_v48 = vpop.f32.mrf.mxu0 }
 0x5e7   : > { %10785 = vmatprep.mubr.f32.mxu1 %v16980_v9  ;;  %v7758_v36 = vsub.f32 %v16974_v54, %v7757_v26  ;;  %v16990_v39 = vsub.f32 %v7401_v22, %v16980_v9  ;;  %v16995_v50 = vand.u32 4294901760, %v7402_v37  ;;  %v7219_v47 = vadd.f32 %v16940_v17, %v6898_v61  ;;  %v19770_v22 = vld [vmem:[#allocation152_spill] sm:$0xff]  ;;  %v19771_v61 = vld [vmem:[#allocation155_spill] sm:$0xff] }
 0x5e8   : > { %v7303_v18 = vmul.f32 %v16314_v12, %v7267_v33  ;;  %v7371_v25 = vmul.f32 %v16320_v14, %v7335_v38  ;;  %v7221_v44 = vadd.f32 %v7220_v31, %v6900_v11  ;;  %v6907_v53 = vadd.f32 %v6906_v48, %v6520_v45  ;;  %v7232_v38 = vpop.f32.mrf.mxu1  ;;  %v6911_v17 = vpop.f32.mrf.mxu0 }
 0x5e9   : > { %v7759_v52 = vand.u32 4294901760, %v7758_v36  ;;  %v7767_v32 = vand.u32 4294901760, %v16990_v39  ;;  %10786 = vmatmul.mubr.f32.gmra.mxu1 %v16995_v50  ;;  %v6529_v42 = vadd.f32 %v19770_v22, %v6144_v2  ;;  %v17002_v33 = vsub.f32 %v7402_v37, %v16995_v50 }
 0x5ea   : > { %v7403_v1 = vadd.f32 %v7371_v25, %v7303_v18  ;;  %v7268_v23 = vmin.f32 %v7219_v47, %v7221_v44  ;;  %v7336_v59 = vadd.f32 %v7221_v44, %v7219_v47  ;;  %v7226_v28 = vadd.f32 %v7225_v40, %v6905_v3  ;;  %v6913_v25 = vpop.f32.mrf.mxu0 }
 0x5eb   : > { %10703 = vmatmul.mubr.f32.gmra.mxu0 %v7759_v52  ;;  %v7768_v31 = vsub.f32 %v16990_v39, %v7767_v32  ;;  %v7228_v11 = vadd.f32 %v7227_v16, %v6907_v53  ;;  %v6912_v45 = vadd.f32 %v6911_v17, %v19771_v61  ;;  %v7777_v2 = vand.u32 4294901760, %v17002_v33  ;;  %v7234_v52 = vpop.f32.mrf.mxu1 }
 0x5ec   : > { %v17008_v36 = vand.u32 4294901760, %v7403_v1  ;;  %v7304_v37 = vmul.f32 %v16314_v12, %v7268_v23  ;;  %v7372_v18 = vmul.f32 %v16320_v14, %v7336_v59  ;;  %v6914_v44 = vadd.f32 %v6913_v25, %v6529_v42 }
 0x5ed   : > { %v7769_v47 = vand.u32 4294901760, %v7768_v31  ;;  %v7269_v40 = vmin.f32 %v7226_v28, %v7228_v11  ;;  %v7337_v3 = vadd.f32 %v7228_v11, %v7226_v28  ;;  %v7778_v16 = vsub.f32 %v17002_v33, %v7777_v2 }
 0x5ee   : > { %10788 = vmatprep.mubr.f32.mxu1 %v17008_v36  ;;  %v7404_v48 = vadd.f32 %v7372_v18, %v7304_v37  ;;  %v17018_v53 = vsub.f32 %v7403_v1, %v17008_v36  ;;  %v7233_v59 = vadd.f32 %v7232_v38, %v6912_v45  ;;  %v7235_v17 = vadd.f32 %v7234_v52, %v6914_v44 }
 0x5ef   : > { %10705 = vmatprep.mubr.f32.mxu0 %v7769_v47  ;;  %v7305_v22 = vmul.f32 %v16314_v12, %v7269_v40  ;;  %v7373_v23 = vmul.f32 %v16320_v14, %v7337_v3  ;;  %v7779_v28 = vand.u32 4294901760, %v7778_v16 }
 0x5f0   : > { %v17022_v42 = vand.u32 4294901760, %v7404_v48  ;;  %v7787_v31 = vand.u32 4294901760, %v17018_v53  ;;  %v7270_v61 = vmin.f32 %v7233_v59, %v7235_v17  ;;  %v7338_v37 = vadd.f32 %v7235_v17, %v7233_v59 }
 0x5f1   : > { %v7405_v11 = vadd.f32 %v7373_v23, %v7305_v22  ;;  %10706 = vmatmul.mubr.f32.gmra.mxu0 %v7779_v28  ;;  %v19772_v23 = vand.u32 4294901760, %v16385_v21  ;;  %v19773_v28 = vand.u32 4294901760, %v16405_v51 }
 0x5f2   : > { %10789 = vmatmul.mubr.f32.gmra.mxu1 %v17022_v42  ;;  %v7788_v1 = vsub.f32 %v17018_v53, %v7787_v31  ;;  %v17030_v18 = vsub.f32 %v7404_v48, %v17022_v42  ;;  %v7306_v38 = vmul.f32 %v16314_v12, %v7270_v61  ;;  %v7374_v45 = vmul.f32 %v16320_v14, %v7338_v37 }
 0x5f3   : > { %v17034_v25 = vand.u32 4294901760, %v7405_v11  ;;  %v19774_v61 = vand.u32 4294901760, %v16440_v19 }
 0x5f4   : > { %v7789_v47 = vand.u32 4294901760, %v7788_v1  ;;  %v7797_v40 = vand.u32 4294901760, %v17030_v18  ;;  %v7406_v3 = vadd.f32 %v7374_v45, %v7306_v38  ;;  %v19775_v1 = vand.u32 4294901760, %v16460_v62  ;;  %v19798_v45 = vld [vmem:[#allocation123_spill] sm:$0xff] }
 0x5f5   : > { %10791 = vmatprep.mubr.f32.mxu1 %v17034_v25  ;;  %v17039_v44 = vsub.f32 %v7405_v11, %v17034_v25  ;;  %v19776_v38 = vand.u32 4294901760, %v16491_v56 }
 0x5f6   : > { %10708 = vmatprep.mubr.f32.mxu0 %v7789_v47  ;;  %v7798_v48 = vsub.f32 %v17030_v18, %v7797_v40  ;;  %v17044_v52 = vand.u32 4294901760, %v7406_v3  ;;  %v19800_v47 = vld [vmem:[#allocation58_spill] sm:$0xff] }
 0x5f7   : > { %v7807_v12 = vand.u32 4294901760, %v17039_v44 }
 0x5f8   : > { %v7799_v14 = vand.u32 4294901760, %v7798_v48  ;;  %10792 = vmatmul.mubr.f32.gmra.mxu1 %v17044_v52  ;;  %v17052_v22 = vsub.f32 %v7406_v3, %v17044_v52  ;;  %v19801_v3 = vld [vmem:[#allocation47_spill] sm:$0xff] }
 0x5f9   : > { %v7808_v16 = vsub.f32 %v17039_v44, %v7807_v12  ;;  %10906 = vmatprep.mubr.f32.mxu1 %v19772_v23  ;;  %v19802_v48 = vld [vmem:[#allocation23_spill] sm:$0xff] }
 0x5fa   : > { %10709 = vmatmul.mubr.f32.gmra.mxu0 %v7799_v14  ;;  %v7817_v17 = vand.u32 4294901760, %v17052_v22  ;;  %v19805_v14 = vld [vmem:[#allocation12_spill] sm:$0xff]  ;;  %v19808_v23 = vld [vmem:[#allocation91_spill] sm:$0xff] }
 0x5fb   : > { %v7809_v59 = vand.u32 4294901760, %v7808_v16  ;;  %v19806_v16 = vld [vmem:[#allocation3_spill] sm:$0xff] }
 0x5fc   : > { %10907 = vmatmul.mubr.f32.vlgmr.msra.gmra.mxu1 %v19773_v28  ;;  %v7818_v11 = vsub.f32 %v17052_v22, %v7817_v17  ;;  %v19811_v28 = vld [vmem:[#allocation71_spill] sm:$0xff] }
 0x5fd   : > { %10711 = vmatprep.mubr.f32.mxu0 %v7809_v59  ;;  %10909 = vmatprep.mubr.f32.mxu1 %v19774_v61  ;;  %v19810_v59 = vld [vmem:[#allocation19_spill] sm:$0xff]  ;;  %v19813_v61 = vand.u32 4294901760, %v16956_v49 }
 0x5fe   : > { %11035 = vmatpush3.msra.mxu1 %v15704_v29  ;;  %v7819_v37 = vand.u32 4294901760, %v7818_v11  ;;  %v19777_v29 = vand.u32 4294901760, %v16513_v0  ;;  %v19812_v11 = vand.u32 4294901760, %v16937_v5 }
 0x5ff   : > { %11036 = vmatprep.subr.mxu1 %v19650_v34 }
 0x600   : > { %11037 = vmatpush3.msra.mxu1 %v19650_v34  ;;  %10712 = vmatmul.mubr.f32.gmra.mxu0 %v7819_v37  ;;  %v19778_v34 = vand.u32 4294901760, %v16545_v30  ;;  %v19814_v37 = vld [vmem:[#allocation75_spill] sm:$0xff] }
 0x601   : > { %10910 = vmatmul.mubr.f32.gmra.mxu1 %v19775_v1  ;;  %10826 = vmatprep.mubr.f32.mxu0 %v16385_v21  ;;  %v19779_v21 = vld [vmem:[#allocation51_spill] sm:$0xff]  ;;  %v19815_v1 = vld [vmem:[#allocation61_spill] sm:$0xff] }
 0x602   : > { %10912 = vmatprep.mubr.f32.mxu1 %v19776_v38  ;;  %11038 = vmatprep.subr.mxu1 %v19651_v8  ;;  %v19817_v38 = vld [vmem:[#allocation90_spill] sm:$0xff] }
 0x603   : > { %11039 = vmatpush3.msra.mxu1 %v19651_v8  ;;  %v19782_v8 = vld [vmem:[#allocation100_spill] sm:$0xff] }
 0x604   : > { %10827 = vmatmul.mubr.f32.vlgmr.msra.gmra.mxu0 %v16405_v51  ;;  %11040 = vmatprep.subr.mxu1 %v19653_v7  ;;  %v19780_v51 = vand.u32 4294901760, %v16566_v57 }
 0x605   : > { %10913 = vmatmul.mubr.f32.gmra.mxu1 %v19777_v29  ;;  %10829 = vmatprep.mubr.f32.mxu0 %v16440_v19  ;;  %v19781_v19 = vand.u32 4294901760, %v16598_v43  ;;  %v19832_v29 = vld [vmem:[#allocation50_spill] sm:$0xff] }
 0x606   : > { %10915 = vmatprep.mubr.f32.mxu1 %v19778_v34  ;;  %10955 = vmatpush3.msra.mxu0 %v19730_v60  ;;  %v19795_v60 = vld [vmem:[#allocation110_spill] sm:$0xff] }
 0x607   : > { %10956 = vmatprep.subr.mxu0 %v19779_v21  ;;  %11041 = vmatpush3.msra.mxu1 %v19653_v7  ;;  %v19783_v7 = vand.u32 4294901760, %v16619_v58 }
 0x608   : > { %10830 = vmatmul.mubr.f32.gmra.mxu0 %v16460_v62  ;;  %11042 = vmatprep.subr.mxu1 %v19657_v24  ;;  %v19784_v62 = vand.u32 4294901760, %v16651_v20 }
 0x609   : > { %10916 = vmatmul.mubr.f32.gmra.mxu1 %v19780_v51  ;;  %10832 = vmatprep.mubr.f32.mxu0 %v16491_v56  ;;  %v19785_v56 = vld [vmem:[#allocation104_spill] sm:$0xff] }
 0x60a   : > { %10918 = vmatprep.mubr.f32.mxu1 %v19781_v19  ;;  %10957 = vmatpush3.msra.mxu0 %v19779_v21  ;;  %v19833_v19 = vld [vmem:[#allocation68_spill] sm:$0xff] }
 0x60b   : > { %10958 = vmatprep.subr.mxu0 %v19782_v8  ;;  %11043 = vmatpush3.msra.mxu1 %v19657_v24  ;;  %v19786_v24 = vand.u32 4294901760, %v16672_v4 }
 0x60c   : > { %10833 = vmatmul.mubr.f32.gmra.mxu0 %v16513_v0  ;;  %11044 = vmatprep.subr.mxu1 %v19664_v15  ;;  %v19787_v0 = vand.u32 4294901760, %v16704_v27 }
 0x60d   : > { %10919 = vmatmul.mubr.f32.gmra.mxu1 %v19783_v7  ;;  %10835 = vmatprep.mubr.f32.mxu0 %v16545_v30  ;;  %v19788_v30 = vld [vmem:[#allocation63_spill] sm:$0xff] }
 0x60e   : > { %10921 = vmatprep.mubr.f32.mxu1 %v19784_v62  ;;  %10959 = vmatpush3.msra.mxu0 %v19782_v8  ;;  %v19834_v8 = vld [vmem:[#allocation38_spill] sm:$0xff]  ;;  %v19835_v62 = vld [vmem:[#allocation39_spill] sm:$0xff] }
 0x60f   : > { %10960 = vmatprep.subr.mxu0 %v19785_v56  ;;  %11045 = vmatpush3.msra.mxu1 %v19664_v15  ;;  %v19789_v15 = vand.u32 4294901760, %v16725_v35 }
 0x610   : > { %10836 = vmatmul.mubr.f32.gmra.mxu0 %v16566_v57  ;;  %11046 = vmatprep.subr.mxu1 %v19675_v10  ;;  %v19790_v57 = vand.u32 4294901760, %v16757_v46 }
 0x611   : > { %10922 = vmatmul.mubr.f32.gmra.mxu1 %v19786_v24  ;;  %10838 = vmatprep.mubr.f32.mxu0 %v16598_v43  ;;  %v19791_v43 = vld [vmem:[#allocation108_spill] sm:$0xff] }
 0x612   : > { %10924 = vmatprep.mubr.f32.mxu1 %v19787_v0  ;;  %10961 = vmatpush3.msra.mxu0 %v19785_v56  ;;  %v19836_v24 = vld [vmem:[#allocation52_spill] sm:$0xff] }
 0x613   : > { %10962 = vmatprep.subr.mxu0 %v19788_v30  ;;  %11047 = vmatpush3.msra.mxu1 %v19675_v10  ;;  %v19792_v10 = vand.u32 4294901760, %v16778_v63 }
 0x614   : > { %10839 = vmatmul.mubr.f32.gmra.mxu0 %v16619_v58  ;;  %11048 = vmatprep.subr.mxu1 %v19683_v6  ;;  %v19793_v58 = vand.u32 4294901760, %v16808_v13 }
 0x615   : > { %10925 = vmatmul.mubr.f32.gmra.mxu1 %v19789_v15  ;;  %10841 = vmatprep.mubr.f32.mxu0 %v16651_v20  ;;  %v19794_v20 = vld [vmem:[#allocation36_spill] sm:$0xff] }
 0x616   : > { %10927 = vmatprep.mubr.f32.mxu1 %v19790_v57  ;;  %10963 = vmatpush3.msra.mxu0 %v19788_v30 }
 0x617   : > { %10964 = vmatprep.subr.mxu0 %v19791_v43  ;;  %11049 = vmatpush3.msra.mxu1 %v19683_v6  ;;  %v19796_v6 = vld [vmem:[#allocation95_spill] sm:$0xff] }
 0x618   : > { %10842 = vmatmul.mubr.f32.gmra.mxu0 %v16672_v4  ;;  %11050 = vmatprep.subr.mxu1 %v19794_v20  ;;  %v19797_v4 = vand.u32 4294901760, %v19796_v6 }
 0x619   : > { %10928 = vmatmul.mubr.f32.gmra.mxu1 %v19792_v10  ;;  %10844 = vmatprep.mubr.f32.mxu0 %v16704_v27  ;;  %v19799_v27 = vand.u32 4294901760, %v19798_v45  ;;  %v19838_v10 = vld [vmem:[#allocation57_spill] sm:$0xff] }
 0x61a   : > { %10930 = vmatprep.mubr.f32.mxu1 %v19793_v58  ;;  %10965 = vmatpush3.msra.mxu0 %v19791_v43  ;;  %v19837_v43 = vld [vmem:[#allocation5_spill] sm:$0xff] }
 0x61b   : > { %10966 = vmatprep.subr.mxu0 %v19795_v60  ;;  %11051 = vmatpush3.msra.mxu1 %v19794_v20  ;;  %v19839_v20 = vld [vmem:[#allocation40_spill] sm:$0xff] }
 0x61c   : > { %10845 = vmatmul.mubr.f32.gmra.mxu0 %v16725_v35  ;;  %11052 = vmatprep.subr.mxu1 %v19800_v47  ;;  %v19803_v35 = vand.u32 4294901760, %v19802_v48 }
 0x61d   : > { %10931 = vmatmul.mubr.f32.gmra.mxu1 %v19797_v4  ;;  %10847 = vmatprep.mubr.f32.mxu0 %v16757_v46  ;;  %v19804_v46 = vand.u32 4294901760, %v16890_v55 }
 0x61e   : > { %10933 = vmatprep.mubr.f32.mxu1 %v19799_v27  ;;  %10967 = vmatpush3.msra.mxu0 %v19795_v60 }
 0x61f   : > { %10968 = vmatprep.subr.mxu0 %v19801_v3  ;;  %11053 = vmatpush3.msra.mxu1 %v19800_v47 }
 0x620   : > { %10848 = vmatmul.mubr.f32.gmra.mxu0 %v16778_v63  ;;  %11054 = vmatprep.subr.mxu1 %v19805_v14  ;;  %v19807_v63 = vand.u32 4294901760, %v16902_v41 }
 0x621   : > { %10934 = vmatmul.mubr.f32.gmra.mxu1 %v19803_v35  ;;  %10850 = vmatprep.mubr.f32.mxu0 %v16808_v13  ;;  %v19809_v13 = vand.u32 4294901760, %v19808_v23 }
 0x622   : > { %10936 = vmatprep.mubr.f32.mxu1 %v19804_v46  ;;  %10969 = vmatpush3.msra.mxu0 %v19801_v3  ;;  %v19841_v3 = vld [vmem:[#allocation77_spill] sm:$0xff]  ;;  %v19843_v46 = vld [vmem:[#allocation99_spill] sm:$0xff] }
 0x623   : > { %10970 = vmatprep.subr.mxu0 %v19806_v16  ;;  %11055 = vmatpush3.msra.mxu1 %v19805_v14 }
 0x624   : > { %10851 = vmatmul.mubr.f32.gmra.mxu0 %v19796_v6  ;;  %11056 = vmatprep.subr.mxu1 %v19810_v59  ;;  %v19840_v6 = vld [vmem:[#allocation7_spill] sm:$0xff] }
 0x625   : > { %10937 = vmatmul.mubr.f32.gmra.mxu1 %v19807_v63  ;;  %10853 = vmatprep.mubr.f32.mxu0 %v19798_v45 }
 0x626   : > { %10939 = vmatprep.mubr.f32.mxu1 %v19809_v13  ;;  %10971 = vmatpush3.msra.mxu0 %v19806_v16  ;;  %v19844_v16 = vld [vmem:[#allocation35_spill] sm:$0xff] }
 0x627   : > { %10972 = vmatprep.subr.mxu0 %v19811_v28  ;;  %11057 = vmatpush3.msra.mxu1 %v19810_v59 }
 0x628   : > { %10854 = vmatmul.mubr.f32.gmra.mxu0 %v19802_v48  ;;  %11058 = vmatprep.subr.mxu1 %v19814_v37  ;;  %v19842_v48 = vld [vmem:[#allocation122_spill] sm:$0xff] }
 0x629   : > { %10940 = vmatmul.mubr.f32.gmra.mxu1 %v19812_v11  ;;  %10856 = vmatprep.mubr.f32.mxu0 %v16890_v55  ;;  %v19816_v55 = vld [vmem:[#allocation89_spill] sm:$0xff]  ;;  %v19846_v11 = vld [vmem:[#allocation124_spill] sm:$0xff] }
 0x62a   : > { %10942 = vmatprep.mubr.f32.mxu1 %v19813_v61  ;;  %10973 = vmatpush3.msra.mxu0 %v19811_v28  ;;  %v19845_v28 = vld [vmem:[#allocation16_spill] sm:$0xff] }
 0x62b   : > { %10974 = vmatprep.subr.mxu0 %v19815_v1  ;;  %11059 = vmatpush3.msra.mxu1 %v19814_v37  ;;  %v19847_v37 = vld [vmem:[#allocation28_spill] sm:$0xff] }
 0x62c   : > { %10857 = vmatmul.mubr.f32.gmra.mxu0 %v16902_v41  ;;  %11060 = vmatprep.subr.mxu1 %v19816_v55  ;;  %v19818_v41 = vld [vmem:[#allocation114_spill] sm:$0xff] }
 0x62d   : > { %10943 = vmatmul.mubr.f32.gmra.mxu1 %v7757_v26  ;;  %10859 = vmatprep.mubr.f32.mxu0 %v19808_v23  ;;  %v19819_v26 = vld [vmem:[#allocation49_spill] sm:$0xff] }
 0x62e   : > { %10945 = vmatprep.mubr.f32.mxu1 %v7767_v32  ;;  %10975 = vmatpush3.msra.mxu0 %v19815_v1  ;;  %v19824_v32 = vld [vmem:[#allocation14_spill] sm:$0xff] }
 0x62f   : > { %10976 = vmatprep.subr.mxu0 %v19817_v38  ;;  %11061 = vmatpush3.msra.mxu1 %v19816_v55  ;;  %v19848_v55 = vld [vmem:[#allocation22_spill] sm:$0xff] }
 0x630   : > { %10860 = vmatmul.mubr.f32.gmra.mxu0 %v16937_v5  ;;  %11062 = vmatprep.subr.mxu1 %v19818_v41  ;;  %v19820_v5 = vld [vmem:[#allocation118_spill] sm:$0xff] }
 0x631   : > { %10946 = vmatmul.mubr.f32.gmra.mxu1 %v7777_v2  ;;  %10862 = vmatprep.mubr.f32.mxu0 %v16956_v49  ;;  %v19821_v49 = vld [vmem:[#allocation74_spill] sm:$0xff]  ;;  %v19826_v2 = vld [vmem:[#allocation120_spill] sm:$0xff] }
 0x632   : > { %10948 = vmatprep.mubr.f32.mxu1 %v7787_v31  ;;  %10977 = vmatpush3.msra.mxu0 %v19817_v38  ;;  %v19828_v31 = vld [vmem:[#allocation70_spill] sm:$0xff] }
 0x633   : > { %10978 = vmatprep.subr.mxu0 %v19819_v26  ;;  %11063 = vmatpush3.msra.mxu1 %v19818_v41 }
 0x634   : > { %10863 = vmatmul.mubr.f32.gmra.mxu0 %v16974_v54  ;;  %11064 = vmatprep.subr.mxu1 %v19820_v5  ;;  %v19822_v54 = vld [vmem:[#allocation119_spill] sm:$0xff] }
 0x635   : > { %10949 = vmatmul.mubr.f32.gmra.mxu1 %v7797_v40  ;;  %10865 = vmatprep.mubr.f32.mxu0 %v16990_v39  ;;  %v19823_v39 = vld [vmem:[#allocation73_spill] sm:$0xff]  ;;  %v19830_v40 = vld [vmem:[#allocation80_spill] sm:$0xff] }
 0x636   : > { %10951 = vmatprep.mubr.f32.mxu1 %v7807_v12  ;;  %10979 = vmatpush3.msra.mxu0 %v19819_v26 }
 0x637   : > { %10980 = vmatprep.subr.mxu0 %v19821_v49  ;;  %11065 = vmatpush3.msra.mxu1 %v19820_v5 }
 0x638   : > { %10866 = vmatmul.mubr.f32.gmra.mxu0 %v17002_v33  ;;  %v19825_v33 = vld [vmem:[#allocation66_spill] sm:$0xff] }
 0x639   : > { %10952 = vmatmul.mubr.f32.gmra.mxu1 %v7817_v17  ;;  %10868 = vmatprep.mubr.f32.mxu0 %v17018_v53  ;;  %v19827_v53 = vld [vmem:[#allocation83_spill] sm:$0xff] }
 0x63a   : > { %10981 = vmatpush3.msra.mxu0 %v19821_v49  ;;  %11066 = vmatprep.mubr.f32.mxu1 %v19822_v54  ;;  %v19831_v17 = vld [vmem:[#allocation31_spill] sm:$0xff]  ;;  %v19849_v49 = vld [vmem:[#allocation125_spill] sm:$0xff] }
 0x63b   : > { %10982 = vmatprep.subr.mxu0 %v19823_v39 }
 0x63c   : > { %10983 = vmatpush3.msra.mxu0 %v19823_v39 }
 0x63d   : > { %10869 = vmatmul.mubr.f32.gmra.mxu0 %v17030_v18  ;;  %11067 = vmatmul.mubr.f32.vlgmr.msra.gmra.mxu1 %v19824_v32  ;;  %v19829_v18 = vld [vmem:[#allocation65_spill] sm:$0xff] }
 0x63e   : > { %10871 = vmatprep.mubr.f32.mxu0 %v17039_v44  ;;  %11069 = vmatprep.mubr.f32.mxu1 %v19825_v33  ;;  %v10748_v44 = vpop.f32.mrf.mxu1 }
 0x63f   : > { %10984 = vmatprep.subr.mxu0 %v19826_v2 }
 0x640   : > { %10985 = vmatpush3.msra.mxu0 %v19826_v2  ;;  %v7972_v34 = vpop.f32.mrf.mxu1 }
 0x641   : > { %10872 = vmatmul.mubr.f32.gmra.mxu0 %v17052_v22  ;;  %11070 = vmatmul.mubr.f32.gmra.mxu1 %v19827_v53 }
 0x642   : > { %10986 = vmatprep.mubr.f32.mxu0 %v19822_v54  ;;  %11072 = vmatprep.mubr.f32.mxu1 %v19828_v31 }
 0x645   : > { %10987 = vmatmul.mubr.f32.vlgmr.msra.gmra.mxu0 %v19824_v32  ;;  %11073 = vmatmul.mubr.f32.gmra.mxu1 %v19829_v18 }
 0x646   : > { %10989 = vmatprep.mubr.f32.mxu0 %v19825_v33  ;;  %11075 = vmatprep.mubr.f32.mxu1 %v19830_v40  ;;  %v10668_v12 = vpop.f32.mrf.mxu0 }
 0x647   : > { %v17228_v22 = vadd.f32 %v10748_v44, %v10668_v12  ;;  %v10751_v7 = vpop.f32.mrf.mxu1 }
 0x648   : > { %v7511_v21 = vpop.f32.mrf.mxu0 }
 0x649   : > { %10990 = vmatmul.mubr.f32.gmra.mxu0 %v19827_v53  ;;  %11076 = vmatmul.mubr.f32.gmra.mxu1 %v19831_v17  ;;  %v17232_v51 = vadd.f32 %v7972_v34, %v7511_v21  ;;  %v7984_v30 = vpop.f32.mrf.mxu1 }
 0x64a   : > { %10992 = vmatprep.mubr.f32.mxu0 %v19828_v31  ;;  %11078 = vmatprep.mubr.f32.mxu1 %v19832_v29 }
 0x64d   : > { %10993 = vmatmul.mubr.f32.gmra.mxu0 %v19829_v18  ;;  %11079 = vmatmul.mubr.f32.gmra.mxu1 %v19833_v19 }
 0x64e   : > { %10995 = vmatprep.mubr.f32.mxu0 %v19830_v40  ;;  %11081 = vmatprep.mubr.f32.mxu1 %v19834_v8 }
 0x64f   : > { %v10671_v56 = vpop.f32.mrf.mxu0 }
 0x650   : > { %v17242_v0 = vadd.f32 %v10751_v7, %v10671_v56  ;;  %v10754_v58 = vpop.f32.mrf.mxu1 }
 0x651   : > { %10996 = vmatmul.mubr.f32.gmra.mxu0 %v19831_v17  ;;  %11082 = vmatmul.mubr.f32.gmra.mxu1 %v19835_v62  ;;  %v7531_v15 = vpop.f32.mrf.mxu0 }
 0x652   : > { %10998 = vmatprep.mubr.f32.mxu0 %v19832_v29  ;;  %11084 = vmatprep.mubr.f32.mxu1 %v19836_v24  ;;  %v17244_v57 = vadd.f32 %v7984_v30, %v7531_v15  ;;  %v7996_v45 = vpop.f32.mrf.mxu1 }
 0x655   : > { %10999 = vmatmul.mubr.f32.gmra.mxu0 %v19833_v19  ;;  %11085 = vmatmul.mubr.f32.gmra.mxu1 %v19837_v43 }
 0x656   : > { %11001 = vmatprep.mubr.f32.mxu0 %v19834_v8  ;;  %11087 = vmatprep.mubr.f32.mxu1 %v19838_v10 }
 0x658   : > { %v10674_v60 = vpop.f32.mrf.mxu0  ;;  %v10757_v35 = vpop.f32.mrf.mxu1 }
 0x659   : > { %11002 = vmatmul.mubr.f32.gmra.mxu0 %v19835_v62  ;;  %11088 = vmatmul.mubr.f32.gmra.mxu1 %v19839_v20  ;;  %v17254_v4 = vadd.f32 %v10754_v58, %v10674_v60 }
 0x65a   : > { %11004 = vmatprep.mubr.f32.mxu0 %v19836_v24  ;;  %11090 = vmatprep.mubr.f32.mxu1 %v19840_v6  ;;  %v7551_v27 = vpop.f32.mrf.mxu0  ;;  %v8008_v23 = vpop.f32.mrf.mxu1 }
 0x65b   : > { %v17256_v47 = vadd.f32 %v7996_v45, %v7551_v27 }
 0x65d   : > { %11005 = vmatmul.mubr.f32.gmra.mxu0 %v19837_v43  ;;  %11091 = vmatmul.mubr.f32.gmra.mxu1 %v19841_v3 }
 0x65e   : > { %11007 = vmatprep.mubr.f32.mxu0 %v19838_v10  ;;  %11093 = vmatprep.mubr.f32.mxu1 %v19842_v48 }
 0x661   : > { %11008 = vmatmul.mubr.f32.gmra.mxu0 %v19839_v20  ;;  %11094 = vmatmul.mubr.f32.gmra.mxu1 %v19843_v46  ;;  %v10677_v14 = vpop.f32.mrf.mxu0  ;;  %v10760_v61 = vpop.f32.mrf.mxu1 }
 0x662   : > { %11010 = vmatprep.mubr.f32.mxu0 %v19840_v6  ;;  %11096 = vmatprep.mubr.f32.mxu1 %v19844_v16  ;;  %v17266_v63 = vadd.f32 %v10757_v35, %v10677_v14 }
 0x663   : > { %v7571_v13 = vpop.f32.mrf.mxu0  ;;  %v8020_v41 = vpop.f32.mrf.mxu1 }
 0x664   : > { %v17268_v59 = vadd.f32 %v8008_v23, %v7571_v13 }
 0x665   : > { %11011 = vmatmul.mubr.f32.gmra.mxu0 %v19841_v3  ;;  %11097 = vmatmul.mubr.f32.gmra.mxu1 %v19845_v28 }
 0x666   : > { %11013 = vmatprep.mubr.f32.mxu0 %v19842_v48  ;;  %11099 = vmatprep.mubr.f32.mxu1 %v19846_v11 }
 0x669   : > { %11014 = vmatmul.mubr.f32.gmra.mxu0 %v19843_v46  ;;  %11100 = vmatmul.mubr.f32.gmra.mxu1 %v19847_v37  ;;  %v10680_v1 = vpop.f32.mrf.mxu0  ;;  %v10763_v54 = vpop.f32.mrf.mxu1 }
 0x66a   : > { %11016 = vmatprep.mubr.f32.mxu0 %v19844_v16  ;;  %11102 = vmatprep.mubr.f32.mxu1 %v19848_v55  ;;  %v17278_v38 = vadd.f32 %v10760_v61, %v10680_v1 }
 0x66b   : > { %v7591_v26 = vpop.f32.mrf.mxu0  ;;  %v8032_v33 = vpop.f32.mrf.mxu1 }
 0x66c   : > { %v17280_v5 = vadd.f32 %v8020_v41, %v7591_v26 }
 0x66d   : > { %11017 = vmatmul.mubr.f32.gmra.mxu0 %v19845_v28  ;;  %11103 = vmatmul.mubr.f32.gmra.mxu1 %v19849_v49 }
 0x66e   : > { %11019 = vmatprep.mubr.f32.mxu0 %v19846_v11  ;;  %11105 = vmatprep.mubr.f32.mxu1 %v16980_v9 }
 0x671   : > { %11020 = vmatmul.mubr.f32.gmra.mxu0 %v19847_v37  ;;  %11106 = vmatmul.mubr.f32.gmra.mxu1 %v16995_v50  ;;  %v10683_v39 = vpop.f32.mrf.mxu0 }
 0x672   : > { %11022 = vmatprep.mubr.f32.mxu0 %v19848_v55  ;;  %11108 = vmatprep.mubr.f32.mxu1 %v17008_v36  ;;  %v17290_v32 = vadd.f32 %v10763_v54, %v10683_v39  ;;  %v10766_v31 = vpop.f32.mrf.mxu1 }
 0x673   : > { %v7611_v2 = vpop.f32.mrf.mxu0 }
 0x674   : > { %v17292_v53 = vadd.f32 %v8032_v33, %v7611_v2  ;;  %v8044_v44 = vpop.f32.mrf.mxu1 }
 0x675   : > { %11023 = vmatmul.mubr.f32.gmra.mxu0 %v19849_v49  ;;  %11109 = vmatmul.mubr.f32.gmra.mxu1 %v17022_v42 }
 0x676   : > { %11025 = vmatprep.mubr.f32.mxu0 %v16980_v9  ;;  %11111 = vmatprep.mubr.f32.mxu1 %v17034_v25 }
 0x679   : > { %11026 = vmatmul.mubr.f32.gmra.mxu0 %v16995_v50  ;;  %11112 = vmatmul.mubr.f32.gmra.mxu1 %v17044_v52 }
 0x67a   : > { %v10686_v18 = vpop.f32.mrf.mxu0  ;;  %11028 = vmatprep.mubr.f32.mxu0 %v17008_v36  ;;  %v10769_v9 = vpop.f32.mrf.mxu1 }
 0x67b   : > { %v17301_v40 = vadd.f32 %v10766_v31, %v10686_v18 }
 0x67c   : > { %v7631_v12 = vpop.f32.mrf.mxu0  ;;  %v8056_v34 = vpop.f32.mrf.mxu1 }
 0x67d   : > { %v17303_v17 = vadd.f32 %v8044_v44, %v7631_v12  ;;  %11029 = vmatmul.mubr.f32.gmra.mxu0 %v17022_v42 }
 0x67e   : > { %11031 = vmatprep.mubr.f32.mxu0 %v17034_v25 }
 0x681   : > { %11032 = vmatmul.mubr.f32.gmra.mxu0 %v17044_v52 }
 0x682   : > { %v10689_v29 = vpop.f32.mrf.mxu0 }
 0x683   : > { %v17308_v50 = vadd.f32 %v10769_v9, %v10689_v29  ;;  %v10772_v36 = vpop.f32.mrf.mxu1 }
 0x684   : > { %v7651_v21 = vpop.f32.mrf.mxu0 }
 0x685   : > { %v17310_v19 = vadd.f32 %v8056_v34, %v7651_v21  ;;  %v8068_v62 = vpop.f32.mrf.mxu1 }
 0x68b   : > { %v10692_v8 = vpop.f32.mrf.mxu0  ;;  %v10775_v42 = vpop.f32.mrf.mxu1 }
 0x68c   : > { %v17312_v7 = vadd.f32 %v10772_v36, %v10692_v8 }
 0x68d   : > { %v7671_v56 = vpop.f32.mrf.mxu0  ;;  %v8080_v52 = vpop.f32.mrf.mxu1 }
 0x68e   : > { %v17314_v24 = vadd.f32 %v8068_v62, %v7671_v56 }
 0x690   : > { %19850 = vst [vmem:[#allocation107_spill] sm:$0xff] %v17314_v24 }
 0x692   : > { %v10695_v25 = vpop.f32.mrf.mxu0 }
 0x693   : > { %v17316_v30 = vadd.f32 %v10775_v42, %v10695_v25  ;;  %v10778_v10 = vpop.f32.mrf.mxu1 }
 0x694   : > { %v7691_v15 = vpop.f32.mrf.mxu0 }
 0x695   : > { %19851 = vst [vmem:[#allocation33_spill] sm:$0xff] %v17316_v30  ;;  %v17318_v43 = vadd.f32 %v8080_v52, %v7691_v15  ;;  %v8092_v60 = vpop.f32.mrf.mxu1 }
 0x697   : > { %19852 = vst [vmem:[#allocation43_spill] sm:$0xff] %v17318_v43 }
 0x69a   : > { %v10698_v58 = vpop.f32.mrf.mxu0  ;;  %v10781_v27 = vpop.f32.mrf.mxu1 }
 0x69b   : > { %v17320_v20 = vadd.f32 %v10778_v10, %v10698_v58 }
 0x69c   : > { %v7711_v6 = vpop.f32.mrf.mxu0  ;;  %v8104_v35 = vpop.f32.mrf.mxu1 }
 0x69d   : > { %19853 = vst [vmem:[#allocation109_spill] sm:$0xff] %v17320_v20  ;;  %v17322_v45 = vadd.f32 %v8092_v60, %v7711_v6 }
 0x69f   : > { %19854 = vst [vmem:[#allocation126_spill] sm:$0xff] %v17322_v45 }
 0x6a2   : > { %v10784_v16 = vpop.f32.mrf.mxu1 }
 0x6a3   : > { %v10701_v3 = vpop.f32.mrf.mxu0 }
 0x6a4   : > { %v17324_v48 = vadd.f32 %v10781_v27, %v10701_v3  ;;  %v8116_v13 = vpop.f32.mrf.mxu1 }
 0x6a5   : > { %v7731_v46 = vpop.f32.mrf.mxu0 }
 0x6a6   : > { %19855 = vst [vmem:[#allocation92_spill] sm:$0xff] %v17324_v48  ;;  %v17326_v14 = vadd.f32 %v8104_v35, %v7731_v46 }
 0x6a8   : > { %19856 = vst [vmem:[#allocation21_spill] sm:$0xff] %v17326_v14 }
 0x6a9   : > { %v10787_v61 = vpop.f32.mrf.mxu1 }
 0x6ab   : > { %v10704_v23 = vpop.f32.mrf.mxu0  ;;  %v8128_v1 = vpop.f32.mrf.mxu1 }
 0x6ac   : > { %v17328_v28 = vadd.f32 %v10784_v16, %v10704_v23 }
 0x6ad   : > { %v7751_v11 = vpop.f32.mrf.mxu0 }
 0x6ae   : > { %19857 = vst [vmem:[#allocation111_spill] sm:$0xff] %v17328_v28  ;;  %v17330_v37 = vadd.f32 %v8116_v13, %v7751_v11 }
 0x6b0   : > { %19858 = vst [vmem:[#allocation127_spill] sm:$0xff] %v17330_v37 }
 0x6b1   : > { %v10707_v55 = vpop.f32.mrf.mxu0 }
 0x6b2   : > { %v17332_v41 = vadd.f32 %v10787_v61, %v10707_v55  ;;  %v10790_v26 = vpop.f32.mrf.mxu1 }
 0x6b3   : > { %v7771_v49 = vpop.f32.mrf.mxu0 }
 0x6b4   : > { %19859 = vst [vmem:[#allocation8_spill] sm:$0xff] %v17332_v41  ;;  %v17334_v54 = vadd.f32 %v8128_v1, %v7771_v49  ;;  %v8140_v39 = vpop.f32.mrf.mxu1 }
 0x6b6   : > { %19860 = vst [vmem:[#allocation81_spill] sm:$0xff] %v17334_v54 }
 0x6b8   : > { %v10793_v33 = vpop.f32.mrf.mxu1 }
 0x6ba   : > { %v10710_v2 = vpop.f32.mrf.mxu0  ;;  %v8152_v18 = vpop.f32.mrf.mxu1 }
 0x6bb   : > { %v17336_v31 = vadd.f32 %v10790_v26, %v10710_v2 }
 0x6bc   : > { %v7791_v44 = vpop.f32.mrf.mxu0  ;;  %v17340_v9 = vpop.f32.mrf.mxu1 }
 0x6bd   : > { %19861 = vst [vmem:[#allocation97_spill] sm:$0xff] %v17336_v31  ;;  %v17338_v12 = vadd.f32 %v8140_v39, %v7791_v44 }
 0x6be   : > { %v17342_v29 = vpop.f32.mrf.mxu1 }
 0x6bf   : > { %19862 = vst [vmem:[#allocation128_spill] sm:$0xff] %v17338_v12 }
 0x6c0   : > { %v10713_v34 = vpop.f32.mrf.mxu0 }
 0x6c1   : > { %v17344_v21 = vpop.f32.mrf.mxu1  ;;  %v17346_v36 = vadd.f32 %v10793_v33, %v10713_v34 }
 0x6c2   : > { %v7811_v8 = vpop.f32.mrf.mxu0 }
 0x6c3   : > { %19863 = vst [vmem:[#allocation93_spill] sm:$0xff] %v17346_v36  ;;  %v17348_v62 = vpop.f32.mrf.mxu1  ;;  %v17350_v56 = vadd.f32 %v8152_v18, %v7811_v8 }
 0x6c4   : > { %v10828_v42 = vpop.f32.mrf.mxu0 }
 0x6c5   : > { %19864 = vst [vmem:[#allocation46_spill] sm:$0xff] %v17350_v56  ;;  %v17352_v25 = vpop.f32.mrf.mxu1 }
 0x6c6   : > { %v8262_v52 = vpop.f32.mrf.mxu0 }
 0x6c7   : > { %v17354_v15 = vpop.f32.mrf.mxu1 }
 0x6c8   : > { %v10831_v10 = vpop.f32.mrf.mxu0 }
 0x6c9   : > { %v17356_v58 = vpop.f32.mrf.mxu1 }
 0x6ca   : > { %v17358_v60 = vpop.f32.mrf.mxu0 }
 0x6cb   : > { %v17360_v6 = vpop.f32.mrf.mxu1 }
 0x6cc   : > { %v17362_v27 = vpop.f32.mrf.mxu0 }
 0x6cd   : > { %v17364_v3 = vpop.f32.mrf.mxu1 }
 0x6ce   : > { %v17366_v35 = vpop.f32.mrf.mxu0 }
 0x6cf   : > { %v17368_v46 = vpop.f32.mrf.mxu1 }
 0x6d0   : > { %v17370_v16 = vpop.f32.mrf.mxu0 }
 0x6d1   : > { %v17372_v23 = vpop.f32.mrf.mxu1 }
 0x6d2   : > { %v17374_v13 = vpop.f32.mrf.mxu0 }
 0x6d3   : > { %v17376_v11 = vpop.f32.mrf.mxu1 }
 0x6d4   : > { %v17378_v61 = vpop.f32.mrf.mxu0 }
 0x6d5   : > { %v17380_v1 = vpop.f32.mrf.mxu1 }
 0x6d6   : > { %v17382_v55 = vpop.f32.mrf.mxu0 }
 0x6d7   : > { %v17384_v26 = vpop.f32.mrf.mxu1 }
 0x6d8   : > { %v17386_v49 = vpop.f32.mrf.mxu0 }
 0x6d9   : > { %v17388_v39 = vpop.f32.mrf.mxu1 }
 0x6da   : > { %v17390_v33 = vpop.f32.mrf.mxu0 }
 0x6db   : > { %v17392_v2 = vpop.f32.mrf.mxu1 }
 0x6dc   : > { %19865 = vst [vmem:[#allocation13_spill] sm:$0xff] %v17392_v2  ;;  %v17394_v18 = vpop.f32.mrf.mxu0 }
 0x6dd   : > { %v17396_v44 = vpop.f32.mrf.mxu1 }
 0x6de   : > { %19866 = vst [vmem:[#allocation129_spill] sm:$0xff] %v17396_v44  ;;  %v17398_v34 = vpop.f32.mrf.mxu0 }
 0x6df   : > { %v17400_v8 = vpop.f32.mrf.mxu1 }
 0x6e0   : > { %19867 = vst [vmem:[#allocation134_spill] sm:$0xff] %v17400_v8  ;;  %v17402_v56 = vpop.f32.mrf.mxu0 }
 0x6e1   : > { %v17404_v36 = vpop.f32.mrf.mxu1 }
 0x6e2   : > { %19868 = vst [vmem:[#allocation37_spill] sm:$0xff] %v17404_v36  ;;  %v17406_v12 = vpop.f32.mrf.mxu0 }
 0x6e3   : > { %v17408_v31 = vpop.f32.mrf.mxu1 }
 0x6e4   : > { %19869 = vst [vmem:[#allocation130_spill] sm:$0xff] %v17408_v31  ;;  %v17410_v54 = vpop.f32.mrf.mxu0 }
 0x6e5   : > { %v17412_v41 = vpop.f32.mrf.mxu1 }
 0x6e6   : > { %19870 = vst [vmem:[#allocation62_spill] sm:$0xff] %v17412_v41  ;;  %v17414_v37 = vpop.f32.mrf.mxu0 }
 0x6e7   : > { %19871 = vst [vmem:[#allocation94_spill] sm:$0xff] %v17414_v37  ;;  %v17416_v28 = vpop.f32.mrf.mxu1 }
 0x6e8   : > { %19872 = vst [vmem:[#allocation56_spill] sm:$0xff] %v17416_v28  ;;  %v17418_v14 = vpop.f32.mrf.mxu0 }
 0x6e9   : > { %19873 = vst [vmem:[#allocation29_spill] sm:$0xff] %v17418_v14  ;;  %v17420_v48 = vpop.f32.mrf.mxu1 }
 0x6ea   : > { %19874 = vst [vmem:[#allocation136_spill] sm:$0xff] %v17420_v48  ;;  %v17422_v45 = vpop.f32.mrf.mxu0 }
 0x6eb   : > { %19875 = vst [vmem:[#allocation101_spill] sm:$0xff] %v17422_v45  ;;  %v17424_v20 = vpop.f32.mrf.mxu1 }
 0x6ec   : > { %19876 = vst [vmem:[#allocation131_spill] sm:$0xff] %v17424_v20  ;;  %v17426_v36 = vpop.f32.mrf.mxu0 }
 0x6ed   : > { %19877 = vst [vmem:[#allocation96_spill] sm:$0xff] %v17426_v36  ;;  %v17428_v43 = vpop.f32.mrf.mxu1 }
 0x6ee   : > { %19878 = vst [vmem:[#allocation25_spill] sm:$0xff] %v17428_v43  ;;  %v17430_v31 = vpop.f32.mrf.mxu0 }
 0x6ef   : > { %19879 = vst [vmem:[#allocation69_spill] sm:$0xff] %v17430_v31  ;;  %v17432_v8 = vpop.f32.mrf.mxu1 }
 0x6f0   : > { %19880 = vst [vmem:[#allocation132_spill] sm:$0xff] %v17432_v8  ;;  %v17434_v41 = vpop.f32.mrf.mxu0 }
 0x6f1   : > { %19881 = vst [vmem:[#allocation138_spill] sm:$0xff] %v17434_v41  ;;  %v17436_v30 = vpop.f32.mrf.mxu1 }
 0x6f2   : > { %19882 = vst [vmem:[#allocation133_spill] sm:$0xff] %v17436_v30  ;;  %v17438_v28 = vpop.f32.mrf.mxu0 }
 0x6f3   : > { %19883 = vst [vmem:[#allocation98_spill] sm:$0xff] %v17438_v28  ;;  %v17440_v14 = vpop.f32.mrf.mxu1 }
 0x6f4   : > { %19884 = vst [vmem:[#allocation9_spill] sm:$0xff] %v17440_v14  ;;  %v17442_v48 = vpop.f32.mrf.mxu0 }
 0x6f5   : > { %19885 = vst [vmem:[#allocation17_spill] sm:$0xff] %v17442_v48  ;;  %v17444_v45 = vpop.f32.mrf.mxu1 }
 0x6f6   : > { %19886 = vst [vmem:[#allocation135_spill] sm:$0xff] %v17444_v45  ;;  %v17446_v20 = vpop.f32.mrf.mxu0  ;;  %v8270_v45 = vadd.f32 %v10828_v42, %v17228_v22  ;;  %v8298_v42 = vadd.f32 %v17362_v27, %v17254_v4 }
 0x6f7   : > { %19887 = vst [vmem:[#allocation117_spill] sm:$0xff] %v17446_v20  ;;  %v17448_v36 = vpop.f32.mrf.mxu1 }
 0x6f8   : > { %19888 = vst [vmem:[#allocation140_spill] sm:$0xff] %v17448_v36  ;;  %v17450_v43 = vpop.f32.mrf.mxu0  ;;  %v8263_v36 = vadd.f32 %v8262_v52, %v17232_v51 }
 0x6f9   : > { %19889 = vst [vmem:[#allocation6_spill] sm:$0xff] %v17450_v43  ;;  %v17452_v31 = vpop.f32.mrf.mxu1 }
 0x6fa   : > { %19890 = vst [vmem:[#allocation137_spill] sm:$0xff] %v17452_v31  ;;  %v17454_v8 = vpop.f32.mrf.mxu0  ;;  %v8569_v22 = vadd.f32 %v17342_v29, %v8263_v36  ;;  %v19898_v36 = vld [vmem:[#allocation44_spill] sm:$0xff] }
 0x6fb   : > { %19891 = vst [vmem:[#allocation55_spill] sm:$0xff] %v17454_v8  ;;  %v17456_v41 = vpop.f32.mrf.mxu1  ;;  %v8284_v8 = vadd.f32 %v10831_v10, %v17242_v0  ;;  %v8291_v0 = vadd.f32 %v17366_v35, %v17256_v47  ;;  %v8609_v47 = vadd.f32 %v17352_v25, %v8298_v42 }
 0x6fc   : > { %19892 = vst [vmem:[#allocation11_spill] sm:$0xff] %v17456_v41  ;;  %v8577_v41 = vadd.f32 %v17340_v9, %v8270_v45  ;;  %v19897_v45 = vld [vmem:[#allocation42_spill] sm:$0xff] }
 0x6fd   : > { %v17458_v30 = vpop.f32.mrf.mxu0  ;;  %v11068_v28 = vpop.f32.mrf.mxu1  ;;  %v8593_v24 = vadd.f32 %v17344_v21, %v8284_v8  ;;  %v8312_v21 = vadd.f32 %v17370_v16, %v17266_v63  ;;  %v8326_v63 = vadd.f32 %v17378_v61, %v17278_v38 }
 0x6fe   : > { %19893 = vst [vmem:[#allocation139_spill] sm:$0xff] %v17458_v30 }
 0x6ff   : > { %v17460_v14 = vpop.f32.mrf.mxu0  ;;  %v9208_v48 = vpop.f32.mrf.mxu1 }
 0x700   : > { %19894 = vst [vmem:[#allocation142_spill] sm:$0xff] %v17460_v14  ;;  %v8277_v14 = vadd.f32 %v17358_v60, %v17244_v57 }
 0x701   : > { %v17463_v44 = vpop.f32.mrf.mxu0  ;;  %v11071_v20 = vpop.f32.mrf.mxu1 }
 0x702   : > { %19895 = vst [vmem:[#allocation141_spill] sm:$0xff] %v17463_v44 }
 0x703   : > { %v17466_v43 = vpop.f32.mrf.mxu0  ;;  %v9220_v31 = vpop.f32.mrf.mxu1 }
 0x704   : > { %19896 = vst [vmem:[#allocation15_spill] sm:$0xff] %v17466_v43 }
 0x705   : > { %v10988_v30 = vpop.f32.mrf.mxu0  ;;  %v11074_v2 = vpop.f32.mrf.mxu1 }
 0x706   : > { %v8942_v37 = vadd.f32 %v10988_v30, %v8577_v41 }
 0x707   : > { %v8935_v51 = vpop.f32.mrf.mxu0  ;;  %v9232_v52 = vpop.f32.mrf.mxu1 }
 0x708   : > { %v9215_v43 = vadd.f32 %v11068_v28, %v8942_v37  ;;  %v8936_v44 = vadd.f32 %v8935_v51, %v8569_v22  ;;  %v8585_v37 = vadd.f32 %v17348_v62, %v8277_v14  ;;  %v19899_v14 = vld [vmem:[#allocation45_spill] sm:$0xff]  ;;  %v8625_v51 = vadd.f32 %v17356_v58, %v8312_v21  ;;  %v19903_v21 = vld [vmem:[#allocation2_spill] sm:$0xff] }
 0x709   : > { %v10991_v57 = vpop.f32.mrf.mxu0  ;;  %v11077_v30 = vpop.f32.mrf.mxu1  ;;  %v8340_v58 = vadd.f32 %v17386_v49, %v17290_v32  ;;  %v8354_v32 = vadd.f32 %v17394_v18, %v17301_v40 }
 0x70a   : > { %v9399_v4 = vadd.f32 %v9215_v43, %v19897_v45  ;;  %v9209_v41 = vadd.f32 %v9208_v48, %v8936_v44  ;;  %v8954_v28 = vadd.f32 %v10991_v57, %v8593_v24  ;;  %v8601_v48 = vadd.f32 %v17354_v15, %v8291_v0 }
 0x70b   : > { %v8947_v9 = vpop.f32.mrf.mxu0  ;;  %v9244_v29 = vpop.f32.mrf.mxu1  ;;  %v8305_v24 = vadd.f32 %v17374_v13, %v17268_v59  ;;  %v8319_v59 = vadd.f32 %v17382_v55, %v17280_v5  ;;  %v19902_v5 = vld [vmem:[#allocation18_spill] sm:$0xff] }
 0x70c   : > { %9431 = vst [vmem:[%s17483_s11 + $0x8] sm:$0xff] %v9399_v4  ;;  %v9398_v10 = vadd.f32 %v9209_v41, %v19898_v36  ;;  %v9227_v60 = vadd.f32 %v11071_v20, %v8954_v28  ;;  %v8948_v27 = vadd.f32 %v8947_v9, %v8585_v37  ;;  %v19900_v20 = vld [vmem:[#allocation60_spill] sm:$0xff] }
 0x70d   : > { %v10994_v35 = vpop.f32.mrf.mxu0  ;;  %v11080_v43 = vpop.f32.mrf.mxu1  ;;  %v8617_v45 = vadd.f32 %v17360_v6, %v8305_v24  ;;  %v8333_v6 = vadd.f32 %v17390_v33, %v17292_v53  ;;  %v8347_v53 = vadd.f32 %v17398_v34, %v17303_v17  ;;  %v19906_v17 = vld [vmem:[#allocation32_spill] sm:$0xff] }
 0x70e   : > { %9430 = vst [vmem:[%s17483_s11] sm:$0xff] %v9398_v10  ;;  %v9401_v62 = vadd.f32 %v9227_v60, %v19899_v14  ;;  %v9221_v25 = vadd.f32 %v9220_v31, %v8948_v27  ;;  %v8966_v44 = vadd.f32 %v10994_v35, %v8609_v47  ;;  %v19901_v31 = vld [vmem:[#allocation27_spill] sm:$0xff] }
 0x70f   : > { %v8959_v16 = vpop.f32.mrf.mxu0  ;;  %v9256_v8 = vpop.f32.mrf.mxu1 }
 0x710   : > { %9433 = vst [vmem:[%s17483_s11 + $0x18] sm:$0xff] %v9401_v62  ;;  %v9400_v22 = vadd.f32 %v9221_v25, %v19900_v20  ;;  %v9239_v42 = vadd.f32 %v11074_v2, %v8966_v44  ;;  %v8960_v15 = vadd.f32 %v8959_v16, %v8601_v48  ;;  %v8641_v2 = vadd.f32 %v17364_v3, %v8326_v63 }
 0x711   : > { %v10997_v13 = vpop.f32.mrf.mxu0  ;;  %v11083_v0 = vpop.f32.mrf.mxu1  ;;  %v8657_v48 = vadd.f32 %v17372_v23, %v8340_v58  ;;  %v8649_v62 = vadd.f32 %v17376_v11, %v8333_v6  ;;  %v8368_v23 = vadd.f32 %v17402_v56, %v17308_v50  ;;  %v8361_v11 = vadd.f32 %v17406_v12, %v17310_v19  ;;  %v19909_v19 = vld [vmem:[#allocation107_spill] sm:$0xff]  ;;  %v19910_v12 = vld [vmem:[#allocation94_spill] sm:$0xff] }
 0x712   : > { %9432 = vst [vmem:[%s17483_s11 + $0x10] sm:$0xff] %v9400_v22  ;;  %v9403_v57 = vadd.f32 %v9239_v42, %v19901_v31  ;;  %v9233_v38 = vadd.f32 %v9232_v52, %v8960_v15  ;;  %v8978_v61 = vadd.f32 %v10997_v13, %v8625_v51  ;;  %v8633_v52 = vadd.f32 %v17368_v46, %v8319_v59  ;;  %v19907_v42 = vld [vmem:[#allocation88_spill] sm:$0xff]  ;;  %v19908_v13 = vld [vmem:[#allocation85_spill] sm:$0xff] }
 0x713   : > { %v8971_v4 = vpop.f32.mrf.mxu0  ;;  %v9268_v41 = vpop.f32.mrf.mxu1  ;;  %v8382_v50 = vadd.f32 %v17410_v54, %v17312_v7 }
 0x714   : > { %9435 = vst [vmem:[%s17483_s11 + $0x28] sm:$0xff] %v9403_v57  ;;  %v9402_v55 = vadd.f32 %v9233_v38, %v19902_v5  ;;  %v9251_v28 = vadd.f32 %v11077_v30, %v8978_v61  ;;  %v8972_v37 = vadd.f32 %v8971_v4, %v8617_v45  ;;  %v19904_v30 = vld [vmem:[#allocation67_spill] sm:$0xff]  ;;  %v8689_v57 = vadd.f32 %v17388_v39, %v8368_v23  ;;  %v19911_v4 = vld [vmem:[#allocation86_spill] sm:$0xff]  ;;  %v19924_v23 = vld [vmem:[#allocation37_spill] sm:$0xff] }
 0x715   : > { %v11000_v9 = vpop.f32.mrf.mxu0  ;;  %v11086_v47 = vpop.f32.mrf.mxu1  ;;  %v8375_v38 = vadd.f32 %v19910_v12, %v19909_v19 }
 0x716   : > { %9434 = vst [vmem:[%s17483_s11 + $0x20] sm:$0xff] %v9402_v55  ;;  %v9405_v3 = vadd.f32 %v9251_v28, %v19903_v21  ;;  %v9245_v36 = vadd.f32 %v9244_v29, %v8972_v37  ;;  %v8990_v10 = vadd.f32 %v11000_v9, %v8641_v2  ;;  %v19905_v29 = vld [vmem:[#allocation48_spill] sm:$0xff]  ;;  %v19912_v2 = vld [vmem:[#allocation13_spill] sm:$0xff] }
 0x717   : > { %v8983_v49 = vpop.f32.mrf.mxu0  ;;  %v9280_v60 = vpop.f32.mrf.mxu1  ;;  %v8681_v58 = vadd.f32 %v19912_v2, %v8361_v11  ;;  %v19913_v28 = vld [vmem:[#allocation129_spill] sm:$0xff] }
 0x718   : > { %9437 = vst [vmem:[%s17483_s11 + $0x38] sm:$0xff] %v9405_v3  ;;  %v9404_v27 = vadd.f32 %v9245_v36, %v19904_v30  ;;  %v9263_v35 = vadd.f32 %v11080_v43, %v8990_v10  ;;  %v8984_v46 = vadd.f32 %v8983_v49, %v8633_v52  ;;  %v8673_v43 = vadd.f32 %v17380_v1, %v8354_v32  ;;  %v19914_v9 = vld [vmem:[#allocation33_spill] sm:$0xff]  ;;  %v19917_v32 = vld [vmem:[#allocation134_spill] sm:$0xff] }
 0x719   : > { %v11003_v33 = vpop.f32.mrf.mxu0  ;;  %v11089_v24 = vpop.f32.mrf.mxu1  ;;  %v8705_v37 = vadd.f32 %v19913_v28, %v8382_v50  ;;  %v19916_v52 = vld [vmem:[#allocation53_spill] sm:$0xff]  ;;  %v8697_v49 = vadd.f32 %v19917_v32, %v8375_v38  ;;  %v19940_v32 = vld [vmem:[#allocation136_spill] sm:$0xff] }
 0x71a   : > { %9436 = vst [vmem:[%s17483_s11 + $0x30] sm:$0xff] %v9404_v27  ;;  %v9407_v14 = vadd.f32 %v9263_v35, %v19905_v29  ;;  %v9257_v40 = vadd.f32 %v9256_v8, %v8984_v46  ;;  %v9002_v18 = vadd.f32 %v11003_v33, %v8657_v48  ;;  %v8665_v8 = vadd.f32 %v17384_v26, %v8347_v53  ;;  %v19919_v30 = vld [vmem:[#allocation101_spill] sm:$0xff]  ;;  %v19920_v35 = vld [vmem:[#allocation10_spill] sm:$0xff]  ;;  %v19922_v29 = vld [vmem:[#allocation96_spill] sm:$0xff] }
 0x71b   : > { %v8995_v25 = vpop.f32.mrf.mxu0  ;;  %v9292_v44 = vpop.f32.mrf.mxu1  ;;  %v19921_v33 = vld [vmem:[#allocation109_spill] sm:$0xff] }
 0x71c   : > { %9439 = vst [vmem:[%s17483_s11 + $0x48] sm:$0xff] %v9407_v14  ;;  %v9406_v34 = vadd.f32 %v9257_v40, %v19906_v17  ;;  %v9275_v63 = vadd.f32 %v11083_v0, %v9002_v18  ;;  %v8996_v16 = vadd.f32 %v8995_v25, %v8649_v62  ;;  %v8410_v14 = vadd.f32 %v19922_v29, %v19921_v33  ;;  %v19944_v29 = vld [vmem:[#allocation131_spill] sm:$0xff] }
 0x71d   : > { %v11006_v20 = vpop.f32.mrf.mxu0  ;;  %v11092_v22 = vpop.f32.mrf.mxu1 }
 0x71e   : > { %9438 = vst [vmem:[%s17483_s11 + $0x40] sm:$0xff] %v9406_v34  ;;  %v9409_v1 = vadd.f32 %v9275_v63, %v19907_v42  ;;  %v9269_v15 = vadd.f32 %v9268_v41, %v8996_v16  ;;  %v9014_v51 = vadd.f32 %v11006_v20, %v8673_v43  ;;  %v19925_v34 = vld [vmem:[#allocation126_spill] sm:$0xff]  ;;  %v19926_v63 = vld [vmem:[#allocation69_spill] sm:$0xff] }
 0x71f   : > { %v9007_v56 = vpop.f32.mrf.mxu0  ;;  %v9304_v59 = vpop.f32.mrf.mxu1  ;;  %v8403_v16 = vadd.f32 %v19926_v63, %v19925_v34 }
 0x720   : > { %9441 = vst [vmem:[%s17483_s11 + $0x58] sm:$0xff] %v9409_v1  ;;  %v9408_v0 = vadd.f32 %v9269_v15, %v19908_v13  ;;  %v9287_v31 = vadd.f32 %v11086_v47, %v9014_v51  ;;  %v9008_v26 = vadd.f32 %v9007_v56, %v8665_v8  ;;  %v19915_v47 = vld [vmem:[#allocation29_spill] sm:$0xff]  ;;  %v19928_v15 = vld [vmem:[#allocation130_spill] sm:$0xff] }
 0x721   : > { %v11009_v61 = vpop.f32.mrf.mxu0  ;;  %v11095_v45 = vpop.f32.mrf.mxu1  ;;  %v8396_v39 = vadd.f32 %v19915_v47, %v19914_v9  ;;  %v19929_v13 = vld [vmem:[#allocation62_spill] sm:$0xff]  ;;  %v19937_v9 = vld [vmem:[#allocation111_spill] sm:$0xff]  ;;  %v19938_v47 = vld [vmem:[#allocation17_spill] sm:$0xff] }
 0x722   : > { %9440 = vst [vmem:[%s17483_s11 + $0x50] sm:$0xff] %v9408_v0  ;;  %v9411_v41 = vadd.f32 %v9287_v31, %v19911_v4  ;;  %v9281_v7 = vadd.f32 %v9280_v60, %v9008_v26  ;;  %v9026_v54 = vadd.f32 %v11009_v61, %v8689_v57  ;;  %v19918_v60 = vld [vmem:[#allocation43_spill] sm:$0xff]  ;;  %v19930_v0 = vld [vmem:[#allocation92_spill] sm:$0xff]  ;;  %v19931_v31 = vld [vmem:[#allocation138_spill] sm:$0xff] }
 0x723   : > { %v9019_v5 = vpop.f32.mrf.mxu0  ;;  %v9316_v55 = vpop.f32.mrf.mxu1  ;;  %v8389_v27 = vadd.f32 %v19919_v30, %v19918_v60  ;;  %v8721_v17 = vadd.f32 %v19924_v23, %v8396_v39  ;;  %v8424_v26 = vadd.f32 %v19931_v31, %v19930_v0  ;;  %v19932_v57 = vld [vmem:[#allocation72_spill] sm:$0xff]  ;;  %v8438_v39 = vadd.f32 %v19938_v47, %v19937_v9  ;;  %v19941_v60 = vld [vmem:[#allocation127_spill] sm:$0xff]  ;;  %v19942_v30 = vld [vmem:[#allocation117_spill] sm:$0xff] }
 0x724   : > { %9443 = vst [vmem:[%s17483_s11 + $0x68] sm:$0xff] %v9411_v41  ;;  %v9410_v6 = vadd.f32 %v9281_v7, %v19916_v52  ;;  %v9299_v21 = vadd.f32 %v11089_v24, %v9026_v54  ;;  %v9020_v3 = vadd.f32 %v9019_v5, %v8681_v58  ;;  %v19923_v24 = vld [vmem:[#allocation84_spill] sm:$0xff]  ;;  %v19934_v7 = vld [vmem:[#allocation21_spill] sm:$0xff]  ;;  %v19935_v54 = vld [vmem:[#allocation98_spill] sm:$0xff] }
 0x725   : > { %v11012_v36 = vpop.f32.mrf.mxu0  ;;  %v11098_v10 = vpop.f32.mrf.mxu1  ;;  %v8713_v51 = vadd.f32 %v19928_v15, %v8389_v27  ;;  %v19933_v41 = vld [vmem:[#allocation56_spill] sm:$0xff]  ;;  %v8417_v2 = vadd.f32 %v19935_v54, %v19934_v7  ;;  %v19936_v58 = vld [vmem:[#allocation54_spill] sm:$0xff]  ;;  %v8431_v27 = vadd.f32 %v19942_v30, %v19941_v60  ;;  %v19954_v0 = vld [vmem:[#allocation139_spill] sm:$0xff] }
 0x726   : > { %9442 = vst [vmem:[%s17483_s11 + $0x60] sm:$0xff] %v9410_v6  ;;  %v9413_v46 = vadd.f32 %v9299_v21, %v19920_v35  ;;  %v9293_v48 = vadd.f32 %v9292_v44, %v9020_v3  ;;  %v9038_v53 = vadd.f32 %v11012_v36, %v8705_v37  ;;  %v19927_v44 = vld [vmem:[#allocation82_spill] sm:$0xff]  ;;  %v19948_v23 = vld [vmem:[#allocation4_spill] sm:$0xff] }
 0x727   : > { %v9031_v40 = vpop.f32.mrf.mxu0  ;;  %v9328_v18 = vpop.f32.mrf.mxu1  ;;  %v19952_v15 = vld [vmem:[#allocation20_spill] sm:$0xff] }
 0x728   : > { %9445 = vst [vmem:[%s17483_s11 + $0x78] sm:$0xff] %v9413_v46  ;;  %v9412_v62 = vadd.f32 %v9293_v48, %v19923_v24  ;;  %v9311_v25 = vadd.f32 %v11092_v22, %v9038_v53  ;;  %v9032_v43 = vadd.f32 %v9031_v40, %v8697_v49  ;;  %v8737_v22 = vadd.f32 %v19929_v13, %v8410_v14  ;;  %v19945_v24 = vld [vmem:[#allocation25_spill] sm:$0xff] }
 0x729   : > { %v11015_v20 = vpop.f32.mrf.mxu0  ;;  %v11101_v8 = vpop.f32.mrf.mxu1  ;;  %v8753_v49 = vadd.f32 %v19940_v32, %v8424_v26  ;;  %v8745_v14 = vadd.f32 %v19944_v29, %v8417_v2 }
 0x72a   : > { %9444 = vst [vmem:[%s17483_s11 + $0x70] sm:$0xff] %v9412_v62  ;;  %v9415_v11 = vadd.f32 %v9311_v25, %v19927_v44  ;;  %v9305_v42 = vadd.f32 %v9304_v59, %v9032_v43  ;;  %v9050_v1 = vadd.f32 %v11015_v20, %v8721_v17  ;;  %v8729_v59 = vadd.f32 %v19933_v41, %v8403_v16  ;;  %v19947_v25 = vld [vmem:[#allocation6_spill] sm:$0xff]  ;;  %v19949_v44 = vld [vmem:[#allocation132_spill] sm:$0xff] }
 0x72b   : > { %v9043_v50 = vpop.f32.mrf.mxu0  ;;  %v9340_v56 = vpop.f32.mrf.mxu1  ;;  %v8769_v62 = vadd.f32 %v19945_v24, %v8438_v39  ;;  %v19957_v41 = vld [vmem:[#allocation128_spill] sm:$0xff]  ;;  %v19961_v39 = vld [vmem:[#allocation135_spill] sm:$0xff]  ;;  %v19969_v24 = vld [vmem:[#allocation121_spill] sm:$0xff] }
 0x72c   : > { %9447 = vst [vmem:[%s17483_s11 + $0x88] sm:$0xff] %v9415_v11  ;;  %v9414_v19 = vadd.f32 %v9305_v42, %v19932_v57  ;;  %v9323_v12 = vadd.f32 %v11095_v45, %v9050_v1  ;;  %v9044_v38 = vadd.f32 %v9043_v50, %v8713_v51  ;;  %v19939_v45 = vld [vmem:[#allocation113_spill] sm:$0xff]  ;;  %v8761_v11 = vadd.f32 %v19949_v44, %v8431_v27  ;;  %v19951_v42 = vld [vmem:[#allocation55_spill] sm:$0xff]  ;;  %v19965_v27 = vld [vmem:[#allocation140_spill] sm:$0xff] }
 0x72d   : > { %v11018_v61 = vpop.f32.mrf.mxu0  ;;  %v11104_v4 = vpop.f32.mrf.mxu1  ;;  %v19972_v44 = vld [vmem:[#allocation11_spill] sm:$0xff] }
 0x72e   : > { %9446 = vst [vmem:[%s17483_s11 + $0x80] sm:$0xff] %v9414_v19  ;;  %v9417_v5 = vadd.f32 %v9323_v12, %v19936_v58  ;;  %v9317_v28 = vadd.f32 %v9316_v55, %v9044_v38  ;;  %v9062_v37 = vadd.f32 %v11018_v61, %v8737_v22  ;;  %v19943_v55 = vld [vmem:[#allocation64_spill] sm:$0xff]  ;;  %v19953_v22 = vld [vmem:[#allocation97_spill] sm:$0xff] }
 0x72f   : > { %v9055_v52 = vpop.f32.mrf.mxu0  ;;  %v9352_v6 = vpop.f32.mrf.mxu1  ;;  %v8466_v31 = vadd.f32 %v19954_v0, %v19953_v22  ;;  %v19956_v38 = vld [vmem:[#allocation133_spill] sm:$0xff] }
 0x730   : > { %9449 = vst [vmem:[%s17483_s11 + $0x98] sm:$0xff] %v9417_v5  ;;  %v9416_v21 = vadd.f32 %v9317_v28, %v19939_v45  ;;  %v9335_v3 = vadd.f32 %v11098_v10, %v9062_v37  ;;  %v9056_v36 = vadd.f32 %v9055_v52, %v8729_v59  ;;  %v19946_v10 = vld [vmem:[#allocation8_spill] sm:$0xff]  ;;  %v19958_v59 = vld [vmem:[#allocation142_spill] sm:$0xff]  ;;  %v19960_v37 = vld [vmem:[#allocation9_spill] sm:$0xff] }
 0x731   : > { %v11021_v35 = vpop.f32.mrf.mxu0  ;;  %v11107_v46 = vpop.f32.mrf.mxu1  ;;  %v8452_v43 = vadd.f32 %v19947_v25, %v19946_v10  ;;  %v8459_v7 = vadd.f32 %v19958_v59, %v19957_v41  ;;  %v19962_v52 = vld [vmem:[#allocation93_spill] sm:$0xff] }
 0x732   : > { %9448 = vst [vmem:[%s17483_s11 + $0x90] sm:$0xff] %v9416_v21  ;;  %v9419_v48 = vadd.f32 %v9335_v3, %v19943_v55  ;;  %v9329_v53 = vadd.f32 %v9328_v18, %v9056_v36  ;;  %v9074_v33 = vadd.f32 %v11021_v35, %v8753_v49  ;;  %v19950_v18 = vld [vmem:[#allocation81_spill] sm:$0xff]  ;;  %v19966_v35 = vld [vmem:[#allocation46_spill] sm:$0xff]  ;;  %v19967_v55 = vld [vmem:[#allocation15_spill] sm:$0xff] }
 0x733   : > { %v9067_v40 = vpop.f32.mrf.mxu0  ;;  %v9364_v16 = vpop.f32.mrf.mxu1  ;;  %v8445_v1 = vadd.f32 %v19951_v42, %v19950_v18  ;;  %v8785_v61 = vadd.f32 %v19956_v38, %v8452_v43  ;;  %v19963_v45 = vld [vmem:[#allocation141_spill] sm:$0xff]  ;;  %v19973_v42 = vld [vmem:[#allocation26_spill] sm:$0xff] }
 0x734   : > { %9451 = vst [vmem:[%s17483_s11 + $0xa8] sm:$0xff] %v9419_v48  ;;  %v9418_v17 = vadd.f32 %v9329_v53, %v19948_v23  ;;  %v9347_v34 = vadd.f32 %v11101_v8, %v9074_v33  ;;  %v9068_v63 = vadd.f32 %v9067_v40, %v8745_v14  ;;  %v19955_v8 = vld [vmem:[#allocation116_spill] sm:$0xff]  ;;  %v8480_v21 = vadd.f32 %v19963_v45, %v19962_v52  ;;  %v19964_v3 = vld [vmem:[#allocation105_spill] sm:$0xff] }
 0x735   : > { %v11024_v20 = vpop.f32.mrf.mxu0  ;;  %v11110_v54 = vpop.f32.mrf.mxu1  ;;  %v8777_v9 = vadd.f32 %v19960_v37, %v8445_v1  ;;  %v8473_v48 = vadd.f32 %v19967_v55, %v19966_v35  ;;  %v19968_v53 = vld [vmem:[#allocation76_spill] sm:$0xff]  ;;  %v19970_v25 = vld [vmem:[#allocation137_spill] sm:$0xff] }
 0x736   : > { %9450 = vst [vmem:[%s17483_s11 + $0xa0] sm:$0xff] %v9418_v17  ;;  %v9421_v51 = vadd.f32 %v9347_v34, %v19952_v15  ;;  %v9341_v50 = vadd.f32 %v9340_v56, %v9068_v63  ;;  %v9086_v13 = vadd.f32 %v11024_v20, %v8769_v62  ;;  %v19959_v56 = vld [vmem:[#allocation106_spill] sm:$0xff]  ;;  %v8817_v43 = vadd.f32 %v19970_v25, %v8480_v21  ;;  %v19971_v34 = vld [vmem:[#allocation87_spill] sm:$0xff] }
 0x737   : > { %v9079_v26 = vpop.f32.mrf.mxu0  ;;  %v9376_v60 = vpop.f32.mrf.mxu1 }
 0x738   : > { %9453 = vst [vmem:[%s17483_s11 + $0xb8] sm:$0xff] %v9421_v51  ;;  %v9420_v57 = vadd.f32 %v9341_v50, %v19955_v8  ;;  %v9359_v19 = vadd.f32 %v11104_v4, %v9086_v13  ;;  %v9080_v12 = vadd.f32 %v9079_v26, %v8761_v11  ;;  %v8801_v4 = vadd.f32 %v19961_v39, %v8466_v31  ;;  %v19974_v13 = vld [vmem:[#allocation59_spill] sm:$0xff]  ;;  %v19975_v31 = vld [vmem:[#allocation78_spill] sm:$0xff] }
 0x739   : > { %v11027_v2 = vpop.f32.mrf.mxu0  ;;  %v11113_v23 = vpop.f32.mrf.mxu1  ;;  %v8809_v11 = vadd.f32 %v19972_v44, %v8473_v48 }
 0x73a   : > { %9452 = vst [vmem:[%s17483_s11 + $0xb0] sm:$0xff] %v9420_v57  ;;  %v9423_v58 = vadd.f32 %v9359_v19, %v19959_v56  ;;  %v9353_v5 = vadd.f32 %v9352_v6, %v9080_v12  ;;  %v9098_v28 = vadd.f32 %v11027_v2, %v8785_v61  ;;  %v8793_v6 = vadd.f32 %v19965_v27, %v8459_v7 }
 0x73b   : > { %v9091_v47 = vpop.f32.mrf.mxu0  ;;  %v9388_v50 = vpop.f32.mrf.mxu1 }
 0x73c   : > { %9455 = vst [vmem:[%s17483_s11 + $0xc8] sm:$0xff] %v9423_v58  ;;  %v9422_v36 = vadd.f32 %v9353_v5, %v19964_v3  ;;  %v9371_v32 = vadd.f32 %v11107_v46, %v9098_v28  ;;  %v9092_v49 = vadd.f32 %v9091_v47, %v8777_v9 }
 0x73d   : > { %v11030_v30 = vpop.f32.mrf.mxu0 }
 0x73e   : > { %9454 = vst [vmem:[%s17483_s11 + $0xc0] sm:$0xff] %v9422_v36  ;;  %v9425_v33 = vadd.f32 %v9371_v32, %v19968_v53  ;;  %v9365_v29 = vadd.f32 %v9364_v16, %v9092_v49  ;;  %v9110_v14 = vadd.f32 %v11030_v30, %v8801_v4 }
 0x73f   : > { %v9103_v40 = vpop.f32.mrf.mxu0 }
 0x740   : > { %9457 = vst [vmem:[%s17483_s11 + $0xd8] sm:$0xff] %v9425_v33  ;;  %v9424_v62 = vadd.f32 %v9365_v29, %v19969_v24  ;;  %v9383_v46 = vadd.f32 %v11110_v54, %v9110_v14  ;;  %v9104_v10 = vadd.f32 %v9103_v40, %v8793_v6 }
 0x741   : > { %v11033_v17 = vpop.f32.mrf.mxu0 }
 0x742   : > { %9456 = vst [vmem:[%s17483_s11 + $0xd0] sm:$0xff] %v9424_v62  ;;  %v9427_v63 = vadd.f32 %v9383_v46, %v19971_v34  ;;  %v9377_v20 = vadd.f32 %v9376_v60, %v9104_v10  ;;  %v9122_v16 = vadd.f32 %v11033_v17, %v8817_v43 }
 0x743   : > { %v9115_v18 = vpop.f32.mrf.mxu0 }
 0x744   : > { %9459 = vst [vmem:[%s17483_s11 + $0xe8] sm:$0xff] %v9427_v63  ;;  %v9426_v1 = vadd.f32 %v9377_v20, %v19973_v42  ;;  %v9395_v15 = vadd.f32 %v11113_v23, %v9122_v16  ;;  %v9116_v51 = vadd.f32 %v9115_v18, %v8809_v11 }
 0x746   : > { %9458 = vst [vmem:[%s17483_s11 + $0xe0] sm:$0xff] %v9426_v1  ;;  %v9429_v22 = vadd.f32 %v9395_v15, %v19974_v13  ;;  %v9389_v0 = vadd.f32 %v9388_v50, %v9116_v51 }
 0x748   : > { %9461 = vst [vmem:[%s17483_s11 + $0xf8] sm:$0xff] %v9429_v22  ;;  %v9428_v26 = vadd.f32 %v9389_v0, %v19975_v31 }
 0x74a   : > { %9460 = vst [vmem:[%s17483_s11 + $0xf0] sm:$0xff] %v9428_v26 }
 0x74b PF: > { %s14_s15 = sadd.s32 1, %s11161_s15  }
 0x74c   : > { %p11_p4 = scmp.ge.s32.totalorder %s14_s15, 4  }
 0x74e   :  { %13 = sbr.rel (!%p11_p4) target bundleno = 1 (0x1), region = 69 }

</bundles_post_ra>
